<compile_context>
chip_gen: v6e
topology: v6e:2x2x1
jax: 0.10.0
libtpu: 0.0.40
codegen_flags: <defaults>
</compile_context>

<pallas_src>
import math
import functools

import jax
import jax.numpy as jnp
from jax.experimental import pallas as pl
from jax.experimental.pallas import tpu as pltpu


# -------------------------- in-kernel building blocks ----------------------

def _layernorm(x, g, b, eps=1e-5):
    mu = jnp.mean(x, axis=-1, keepdims=True)
    var = jnp.mean((x - mu) * (x - mu), axis=-1, keepdims=True)
    return (x - mu) * jax.lax.rsqrt(var + eps) * g + b


def _block_compute(x, ln1g, ln1b, wqkv, bqkv, wo, bo, ln2g, ln2b,
                   w1, b1, w2, b2, *, num_heads, seq_len):
    """One pre-LN transformer block on a flattened (Bg*N, D) f32 activation."""
    M, D = x.shape
    H = num_heads
    hd = D // H
    N = seq_len
    Bg = M // N
    scale = 1.0 / math.sqrt(hd)
    bf16 = jnp.bfloat16
    f32 = jnp.float32

    # ---- Multi-head self-attention (fused QKV, head-batched einsums) ----
    xn = _layernorm(x, ln1g, ln1b).astype(bf16)
    qkv = jnp.dot(xn, wqkv, preferred_element_type=f32) + bqkv      # (M, 3D)
    q, k, v = qkv[:, :D], qkv[:, D:2 * D], qkv[:, 2 * D:]

    def heads(t):  # (M, D) -> (Bg*H, N, hd)
        t4 = t.reshape(Bg, N, H, hd)
        return jnp.swapaxes(t4, 1, 2).reshape(Bg * H, N, hd)

    qh = heads(q).astype(bf16)
    kh = heads(k).astype(bf16)
    vh = heads(v).astype(bf16)

    s = jnp.einsum("zqd,zkd->zqk", qh, kh,
                   preferred_element_type=f32) * scale              # (Bg*H,N,N)
    s = s - jnp.max(s, axis=-1, keepdims=True)
    p = jnp.exp(s)
    p = p * pl.reciprocal(jnp.sum(p, axis=-1, keepdims=True), approx=True)
    ctx = jnp.einsum("zqk,zkd->zqd", p.astype(bf16), vh,
                     preferred_element_type=f32)                    # (Bg*H,N,hd)
    ctx = jnp.swapaxes(ctx.reshape(Bg, H, N, hd), 1, 2).reshape(M, D)
    attn = jnp.dot(ctx.astype(bf16), wo, preferred_element_type=f32) + bo
    x = x + attn

    # ---- Feed-forward (4x hidden, GELU) ----
    xn2 = _layernorm(x, ln2g, ln2b).astype(bf16)
    h1 = jnp.dot(xn2, w1, preferred_element_type=f32) + b1
    # TODO(synk): PyTorch nn.GELU defaults to exact erf; tanh approximation kept
    # here (small ~1e-3-level relative deviation).
    h1 = jax.nn.gelu(h1)
    h2 = jnp.dot(h1.astype(bf16), w2, preferred_element_type=f32) + b2
    return x + h2


def _apply_block(o_ref, wrefs, num_heads):
    (ln1g, ln1b, wqkv, bqkv, wo, bo, ln2g, ln2b, w1, b1, w2, b2) = wrefs
    Bg, N, D = o_ref.shape
    x = o_ref[...].reshape(Bg * N, D)
    y = _block_compute(x, ln1g[0], ln1b[0], wqkv[0], bqkv[0], wo[0], bo[0],
                       ln2g[0], ln2b[0], w1[0], b1[0], w2[0], b2[0],
                       num_heads=num_heads, seq_len=N)
    o_ref[...] = y.reshape(Bg, N, D)


# -------------------------- fused stack kernels -----------------------------

def _encoder_kernel(patches_ref, pw_ref, pb_ref, pos_ref, *rest, num_heads):
    *wrefs, o_ref = rest

    @pl.when(pl.program_id(1) == 0)
    def _init():  # patch embed + positional embed, only at layer 0
        Bg, N, Kp = patches_ref.shape
        D = pw_ref.shape[1]
        p = patches_ref[...].reshape(Bg * N, Kp).astype(jnp.bfloat16)
        emb = (jnp.dot(p, pw_ref[...], preferred_element_type=jnp.float32)
               + pb_ref[...])
        o_ref[...] = emb.reshape(Bg, N, D) + pos_ref[...]

    _apply_block(o_ref, wrefs, num_heads)


def _decoder_kernel(xenc_ref, dw_ref, db_ref, mtok_ref, pos_ref, *rest,
                    num_heads):
    *wrefs, o_ref = rest

    @pl.when(pl.program_id(1) == 0)
    def _init():  # decoder input prep, only at layer 0 (no concatenate)
        Bg, N, De = xenc_ref.shape
        Dd = dw_ref.shape[1]
        xe = xenc_ref[...].reshape(Bg * N, De).astype(jnp.bfloat16)
        proj = (jnp.dot(xe, dw_ref[...], preferred_element_type=jnp.float32)
                + db_ref[...])
        o_ref[:, :N, :] = proj.reshape(Bg, N, Dd) + pos_ref[0, :N, :]
        o_ref[:, N:, :] = (jnp.broadcast_to(mtok_ref[...], (Bg, N, Dd))
                           + pos_ref[0, N:, :])

    _apply_block(o_ref, wrefs, num_heads)


# -------------------------- pallas_call wrappers ----------------------------

_BLOCK_KEYS = ("ln1_g", "ln1_b", "wqkv", "bqkv", "wo", "bo",
               "ln2_g", "ln2_b", "w1", "b1", "w2", "b2")


def _layer_spec(arr):
    block = (1,) + arr.shape[1:]
    nz = len(block) - 1

    def idx(g, l):
        return (l,) + (0,) * nz

    return pl.BlockSpec(block, idx)


def _const_spec(arr):
    nd = arr.ndim

    def idx(g, l):
        return (0,) * nd

    return pl.BlockSpec(arr.shape, idx)


def _stack_inputs(stack):
    arrs = [stack[k] for k in _BLOCK_KEYS]
    return arrs, [_layer_spec(a) for a in arrs]


def _batch_groups(batch, override=None):
    """v5e/v6e (1 TensorCore): fold the whole batch into one block.
    v7x (2 TensorCores/chip): split the batch across 2 parallel groups."""
    if override is not None:
        g = override
    else:
        try:
            kind = jax.devices()[0].device_kind.lower()
        except Exception:
            kind = ""
        g = 2 if ("v7" in kind and batch % 2 == 0) else 1
    assert batch % g == 0, (batch, g)
    return g


def encoder_forward(patches, params, *, num_heads, batch_groups=None):
    B, N, Kp = patches.shape
    D = params["patch_w"].shape[1]
    stack = params["encoder"]
    L = stack["wqkv"].shape[0]
    G = _batch_groups(B, batch_groups)
    Bg = B // G
    warrs, wspecs = _stack_inputs(stack)
    return pl.pallas_call(
        functools.partial(_encoder_kernel, num_heads=num_heads),
        out_shape=jax.ShapeDtypeStruct((B, N, D), jnp.float32),
        grid=(G, L),
        in_specs=[pl.BlockSpec((Bg, N, Kp), lambda g, l: (g, 0, 0)),
                  _const_spec(params["patch_w"]),
                  _const_spec(params["patch_b"]),
                  _const_spec(params["enc_pos"]),
                  *wspecs],
        out_specs=pl.BlockSpec((Bg, N, D), lambda g, l: (g, 0, 0)),
        compiler_params=pltpu.CompilerParams(
            dimension_semantics=("parallel", "arbitrary")),
    )(patches, params["patch_w"], params["patch_b"], params["enc_pos"], *warrs)


def decoder_forward(x_enc, params, *, num_heads, batch_groups=None):
    B, N, De = x_enc.shape
    Dd = params["dec_in_w"].shape[1]
    stack = params["decoder"]
    L = stack["wqkv"].shape[0]
    G = _batch_groups(B, batch_groups)
    Bg = B // G
    warrs, wspecs = _stack_inputs(stack)
    return pl.pallas_call(
        functools.partial(_decoder_kernel, num_heads=num_heads),
        out_shape=jax.ShapeDtypeStruct((B, 2 * N, Dd), jnp.float32),
        grid=(G, L),
        in_specs=[pl.BlockSpec((Bg, N, De), lambda g, l: (g, 0, 0)),
                  _const_spec(params["dec_in_w"]),
                  _const_spec(params["dec_in_b"]),
                  _const_spec(params["mask_token"]),
                  _const_spec(params["dec_pos"]),
                  *wspecs],
        out_specs=pl.BlockSpec((Bg, 2 * N, Dd), lambda g, l: (g, 0, 0)),
        compiler_params=pltpu.CompilerParams(
            dimension_semantics=("parallel", "arbitrary")),
    )(x_enc, params["dec_in_w"], params["dec_in_b"], params["mask_token"],
      params["dec_pos"], *warrs)


# -------------------------- parameter init ----------------------------------

def _init_block_stack(key, n_layers, dim, num_heads):
    del num_heads  # weights are stored unsplit; heads handled in-kernel
    hid = 4 * dim
    ks = jax.random.split(key, 4)
    s = 0.02
    f32, bf16 = jnp.float32, jnp.bfloat16
    wqkv = s * jax.random.normal(ks[0], (n_layers, dim, 3 * dim), f32)
    wo = s * jax.random.normal(ks[1], (n_layers, dim, dim), f32)
    w1 = s * jax.random.normal(ks[2], (n_layers, dim, hid), f32)
    w2 = s * jax.random.normal(ks[3], (n_layers, hid, dim), f32)
    return {
        "ln1_g": jnp.ones((n_layers, 1, dim), f32),
        "ln1_b": jnp.zeros((n_layers, 1, dim), f32),
        "wqkv": wqkv.astype(bf16),
        "bqkv": jnp.zeros((n_layers, 1, 3 * dim), f32),
        "wo": wo.astype(bf16),
        "bo": jnp.zeros((n_layers, 1, dim), f32),
        "ln2_g": jnp.ones((n_layers, 1, dim), f32),
        "ln2_b": jnp.zeros((n_layers, 1, dim), f32),
        "w1": w1.astype(bf16),
        "b1": jnp.zeros((n_layers, 1, hid), f32),
        "w2": w2.astype(bf16),
        "b2": jnp.zeros((n_layers, 1, dim), f32),
    }


def init_params(key, *, img_size, patch_size, in_channels, enc_dim, dec_dim,
                n_enc, n_dec, enc_heads, dec_heads):
    num_patches = (img_size // patch_size) ** 2
    patch_k = in_channels * patch_size * patch_size
    keys = jax.random.split(key, 7)
    s = 0.02
    f32, bf16 = jnp.float32, jnp.bfloat16
    return {
        "patch_w": (s * jax.random.normal(keys[0], (patch_k, enc_dim), f32)).astype(bf16),
        "patch_b": jnp.zeros((1, enc_dim), f32),
        "enc_pos": s * jax.random.normal(keys[1], (1, num_patches, enc_dim), f32),
        "dec_in_w": (s * jax.random.normal(keys[2], (enc_dim, dec_dim), f32)).astype(bf16),
        "dec_in_b": jnp.zeros((1, dec_dim), f32),
        "mask_token": s * jax.random.normal(keys[3], (1, dec_dim), f32),
        "dec_pos": s * jax.random.normal(keys[4], (1, 2 * num_patches, dec_dim), f32),
        "encoder": _init_block_stack(keys[5], n_enc, enc_dim, enc_heads),
        "decoder": _init_block_stack(keys[6], n_dec, dec_dim, dec_heads),
    }


# -------------------------- forward pass -------------------------------------

def model_forward(x_img, params, *, patch_size, enc_heads, dec_heads,
                  batch_groups=None):
    # NCHW image -> [B, N, C*P*P] patches with (c, ph, pw) inner order, matching
    # Conv2d(k=s=P).weight.reshape(D, C*P*P).  Glue is plain JAX; all hot paths
    # run inside the two fused Pallas kernels below.
    B, C, H, W = x_img.shape
    P = patch_size
    gh, gw = H // P, W // P
    patches = x_img.reshape(B, C, gh, P, gw, P)
    patches = patches.transpose(0, 2, 4, 1, 3, 5).reshape(B, gh * gw, C * P * P)
    x = encoder_forward(patches, params, num_heads=enc_heads,
                        batch_groups=batch_groups)
    x = decoder_forward(x, params, num_heads=dec_heads,
                        batch_groups=batch_groups)
    return x


# -------------------------- main ---------------------------------------------

if __name__ == "__main__":
    # Small but forward-consistent configuration.
    IMG, PATCH, BATCH, CIN = 32, 8, 2, 3
    ENC_DIM, ENC_HEADS, N_ENC = 64, 8, 12
    DEC_DIM, DEC_HEADS, N_DEC = 32, 4, 4

    root = jax.random.PRNGKey(0)
    k_x, k_p = jax.random.split(root)

    x = jax.random.normal(k_x, (BATCH, CIN, IMG, IMG), jnp.float32)
    params = init_params(k_p, img_size=IMG, patch_size=PATCH, in_channels=CIN,
                         enc_dim=ENC_DIM, dec_dim=DEC_DIM,
                         n_enc=N_ENC, n_dec=N_DEC,
                         enc_heads=ENC_HEADS, dec_heads=DEC_HEADS)

    fwd = jax.jit(functools.partial(model_forward, patch_size=PATCH,
                                    enc_heads=ENC_HEADS, dec_heads=DEC_HEADS))
    out = fwd(x, params)
    out = jax.block_until_ready(out)

    num_patches = (IMG // PATCH) ** 2
    assert out.shape == (BATCH, 2 * num_patches, DEC_DIM), out.shape
    assert jnp.all(jnp.isfinite(out))
    print("KERNEL_OK")
</pallas_src>

<mosaic_0001>
module attributes {stable_mosaic.version = 11 : i64} {
  func.func @_encoder_kernel(%arg0: i32, %arg1: i32, %arg2: memref<2x16x192xf32, #tpu.memory_space<vmem>>, %arg3: memref<192x64xbf16, #tpu.memory_space<vmem>>, %arg4: memref<1x64xf32, #tpu.memory_space<vmem>>, %arg5: memref<1x16x64xf32, #tpu.memory_space<vmem>>, %arg6: memref<1x1x64xf32, #tpu.memory_space<vmem>>, %arg7: memref<1x1x64xf32, #tpu.memory_space<vmem>>, %arg8: memref<1x64x192xbf16, #tpu.memory_space<vmem>>, %arg9: memref<1x1x192xf32, #tpu.memory_space<vmem>>, %arg10: memref<1x64x64xbf16, #tpu.memory_space<vmem>>, %arg11: memref<1x1x64xf32, #tpu.memory_space<vmem>>, %arg12: memref<1x1x64xf32, #tpu.memory_space<vmem>>, %arg13: memref<1x1x64xf32, #tpu.memory_space<vmem>>, %arg14: memref<1x64x256xbf16, #tpu.memory_space<vmem>>, %arg15: memref<1x1x256xf32, #tpu.memory_space<vmem>>, %arg16: memref<1x256x64xbf16, #tpu.memory_space<vmem>>, %arg17: memref<1x1x64xf32, #tpu.memory_space<vmem>>, %arg18: memref<2x16x64xf32, #tpu.memory_space<vmem>>) attributes {dimension_semantics = [#tpu.dimension_semantics<parallel>, #tpu.dimension_semantics<arbitrary>], iteration_bounds = array<i64: 1, 12>, scalar_prefetch = 0 : i64, scratch_operands = 0 : i64, tpu.core_type = #tpu.core_type<tc>, window_params = [{transform_indices = @transform_0, window_bounds = array<i64: 2, 16, 192>}, {pipeline_mode = #tpu.pipeline_mode<synchronous>, transform_indices = @transform_1, window_bounds = array<i64: 192, 64>}, {pipeline_mode = #tpu.pipeline_mode<synchronous>, transform_indices = @transform_2, window_bounds = array<i64: 1, 64>}, {pipeline_mode = #tpu.pipeline_mode<synchronous>, transform_indices = @transform_3, window_bounds = array<i64: 1, 16, 64>}, {transform_indices = @transform_4, window_bounds = array<i64: 1, 1, 64>}, {transform_indices = @transform_5, window_bounds = array<i64: 1, 1, 64>}, {transform_indices = @transform_6, window_bounds = array<i64: 1, 64, 192>}, {transform_indices = @transform_7, window_bounds = array<i64: 1, 1, 192>}, {transform_indices = @transform_8, window_bounds = array<i64: 1, 64, 64>}, {transform_indices = @transform_9, window_bounds = array<i64: 1, 1, 64>}, {transform_indices = @transform_10, window_bounds = array<i64: 1, 1, 64>}, {transform_indices = @transform_11, window_bounds = array<i64: 1, 1, 64>}, {transform_indices = @transform_12, window_bounds = array<i64: 1, 64, 256>}, {transform_indices = @transform_13, window_bounds = array<i64: 1, 1, 256>}, {transform_indices = @transform_14, window_bounds = array<i64: 1, 256, 64>}, {transform_indices = @transform_15, window_bounds = array<i64: 1, 1, 64>}, {transform_indices = @transform_16, window_bounds = array<i64: 2, 16, 64>}]} {
    %c0_i32 = arith.constant 0 : i32
    %0 = arith.cmpi eq, %arg1, %c0_i32 : i32
    %1 = arith.extui %0 : i1 to i32
    %c0_i32_0 = arith.constant 0 : i32
    %2 = arith.cmpi ne, %1, %c0_i32_0 : i32
    scf.if %2 {
      %c0_64 = arith.constant 0 : index
      %c0_65 = arith.constant 0 : index
      %c0_66 = arith.constant 0 : index
      %143 = vector.load %arg2[%c0_64, %c0_65, %c0_66] : memref<2x16x192xf32, #tpu.memory_space<vmem>>, vector<2x16x192xf32>
      %144 = vector.shape_cast %143 : vector<2x16x192xf32> to vector<32x192xf32>
      %145 = arith.truncf %144 : vector<32x192xf32> to vector<32x192xbf16>
      %c0_67 = arith.constant 0 : index
      %c0_68 = arith.constant 0 : index
      %146 = vector.load %arg3[%c0_67, %c0_68] : memref<192x64xbf16, #tpu.memory_space<vmem>>, vector<192x64xbf16>
      %cst_69 = arith.constant dense<0.000000e+00> : vector<32x64xf32>
      %147 = tpu.matmul %145, %146, %cst_69 {dimension_numbers = #tpu.dot_dimension_numbers<[1], [0], [0], [1], [0, 0, 1, 1], [], []>} : vector<32x192xbf16>, vector<192x64xbf16>, vector<32x64xf32> -> vector<32x64xf32>
      %c0_70 = arith.constant 0 : index
      %c0_71 = arith.constant 0 : index
      %148 = vector.load %arg4[%c0_70, %c0_71] : memref<1x64xf32, #tpu.memory_space<vmem>>, vector<1x64xf32>
      %149 = vector.broadcast %148 : vector<1x64xf32> to vector<32x64xf32>
      %150 = arith.addf %147, %149 : vector<32x64xf32>
      %151 = vector.shape_cast %150 : vector<32x64xf32> to vector<2x16x64xf32>
      %c0_72 = arith.constant 0 : index
      %c0_73 = arith.constant 0 : index
      %c0_74 = arith.constant 0 : index
      %152 = vector.load %arg5[%c0_72, %c0_73, %c0_74] : memref<1x16x64xf32, #tpu.memory_space<vmem>>, vector<1x16x64xf32>
      %153 = vector.broadcast %152 : vector<1x16x64xf32> to vector<2x16x64xf32>
      %154 = arith.addf %151, %153 : vector<2x16x64xf32>
      %c0_75 = arith.constant 0 : index
      %c0_76 = arith.constant 0 : index
      %c0_77 = arith.constant 0 : index
      %155 = vector.load %arg18[%c0_75, %c0_76, %c0_77] : memref<2x16x64xf32, #tpu.memory_space<vmem>>, vector<2x16x64xf32>
      tpu.vector_store %arg18[%c0_75, %c0_76, %c0_77], %154 {strides = array<i32>} : memref<2x16x64xf32, #tpu.memory_space<vmem>>, vector<2x16x64xf32>,
    } else {
    }
    %c0 = arith.constant 0 : index
    %c0_1 = arith.constant 0 : index
    %c0_2 = arith.constant 0 : index
    %3 = vector.load %arg18[%c0, %c0_1, %c0_2] : memref<2x16x64xf32, #tpu.memory_space<vmem>>, vector<2x16x64xf32>
    %4 = vector.shape_cast %3 : vector<2x16x64xf32> to vector<32x64xf32>
    %c0_3 = arith.constant 0 : index
    %c0_4 = arith.constant 0 : index
    %c0_5 = arith.constant 0 : index
    %5 = vector.load %arg6[%c0_3, %c0_4, %c0_5] : memref<1x1x64xf32, #tpu.memory_space<vmem>>, vector<1x1x64xf32>
    %6 = vector.shape_cast %5 : vector<1x1x64xf32> to vector<1x64xf32>
    %c0_6 = arith.constant 0 : index
    %c0_7 = arith.constant 0 : index
    %c0_8 = arith.constant 0 : index
    %7 = vector.load %arg7[%c0_6, %c0_7, %c0_8] : memref<1x1x64xf32, #tpu.memory_space<vmem>>, vector<1x1x64xf32>
    %8 = vector.shape_cast %7 : vector<1x1x64xf32> to vector<1x64xf32>
    %c0_9 = arith.constant 0 : index
    %c0_10 = arith.constant 0 : index
    %c0_11 = arith.constant 0 : index
    %9 = vector.load %arg8[%c0_9, %c0_10, %c0_11] : memref<1x64x192xbf16, #tpu.memory_space<vmem>>, vector<1x64x192xbf16>
    %10 = vector.shape_cast %9 : vector<1x64x192xbf16> to vector<64x192xbf16>
    %c0_12 = arith.constant 0 : index
    %c0_13 = arith.constant 0 : index
    %c0_14 = arith.constant 0 : index
    %11 = vector.load %arg9[%c0_12, %c0_13, %c0_14] : memref<1x1x192xf32, #tpu.memory_space<vmem>>, vector<1x1x192xf32>
    %12 = vector.shape_cast %11 : vector<1x1x192xf32> to vector<1x192xf32>
    %c0_15 = arith.constant 0 : index
    %c0_16 = arith.constant 0 : index
    %c0_17 = arith.constant 0 : index
    %13 = vector.load %arg10[%c0_15, %c0_16, %c0_17] : memref<1x64x64xbf16, #tpu.memory_space<vmem>>, vector<1x64x64xbf16>
    %14 = vector.shape_cast %13 : vector<1x64x64xbf16> to vector<64x64xbf16>
    %c0_18 = arith.constant 0 : index
    %c0_19 = arith.constant 0 : index
    %c0_20 = arith.constant 0 : index
    %15 = vector.load %arg11[%c0_18, %c0_19, %c0_20] : memref<1x1x64xf32, #tpu.memory_space<vmem>>, vector<1x1x64xf32>
    %16 = vector.shape_cast %15 : vector<1x1x64xf32> to vector<1x64xf32>
    %c0_21 = arith.constant 0 : index
    %c0_22 = arith.constant 0 : index
    %c0_23 = arith.constant 0 : index
    %17 = vector.load %arg12[%c0_21, %c0_22, %c0_23] : memref<1x1x64xf32, #tpu.memory_space<vmem>>, vector<1x1x64xf32>
    %18 = vector.shape_cast %17 : vector<1x1x64xf32> to vector<1x64xf32>
    %c0_24 = arith.constant 0 : index
    %c0_25 = arith.constant 0 : index
    %c0_26 = arith.constant 0 : index
    %19 = vector.load %arg13[%c0_24, %c0_25, %c0_26] : memref<1x1x64xf32, #tpu.memory_space<vmem>>, vector<1x1x64xf32>
    %20 = vector.shape_cast %19 : vector<1x1x64xf32> to vector<1x64xf32>
    %c0_27 = arith.constant 0 : index
    %c0_28 = arith.constant 0 : index
    %c0_29 = arith.constant 0 : index
    %21 = vector.load %arg14[%c0_27, %c0_28, %c0_29] : memref<1x64x256xbf16, #tpu.memory_space<vmem>>, vector<1x64x256xbf16>
    %22 = vector.shape_cast %21 : vector<1x64x256xbf16> to vector<64x256xbf16>
    %c0_30 = arith.constant 0 : index
    %c0_31 = arith.constant 0 : index
    %c0_32 = arith.constant 0 : index
    %23 = vector.load %arg15[%c0_30, %c0_31, %c0_32] : memref<1x1x256xf32, #tpu.memory_space<vmem>>, vector<1x1x256xf32>
    %24 = vector.shape_cast %23 : vector<1x1x256xf32> to vector<1x256xf32>
    %c0_33 = arith.constant 0 : index
    %c0_34 = arith.constant 0 : index
    %c0_35 = arith.constant 0 : index
    %25 = vector.load %arg16[%c0_33, %c0_34, %c0_35] : memref<1x256x64xbf16, #tpu.memory_space<vmem>>, vector<1x256x64xbf16>
    %26 = vector.shape_cast %25 : vector<1x256x64xbf16> to vector<256x64xbf16>
    %c0_36 = arith.constant 0 : index
    %c0_37 = arith.constant 0 : index
    %c0_38 = arith.constant 0 : index
    %27 = vector.load %arg17[%c0_36, %c0_37, %c0_38] : memref<1x1x64xf32, #tpu.memory_space<vmem>>, vector<1x1x64xf32>
    %28 = vector.shape_cast %27 : vector<1x1x64xf32> to vector<1x64xf32>
    %cst = arith.constant dense<0.000000e+00> : vector<32xf32>
    %29 = vector.multi_reduction <add>, %4, %cst [1] : vector<32x64xf32> to vector<32xf32>
    %30 = vector.shape_cast %29 : vector<32xf32> to vector<32x1xf32>
    %cst_39 = arith.constant 6.400000e+01 : f32
    %31 = vector.broadcast %cst_39 : f32 to vector<32x1xf32>
    %32 = arith.divf %30, %31 : vector<32x1xf32>
    %33 = vector.broadcast %32 : vector<32x1xf32> to vector<32x64xf32>
    %34 = arith.subf %4, %33 : vector<32x64xf32>
    %35 = vector.broadcast %32 : vector<32x1xf32> to vector<32x64xf32>
    %36 = arith.subf %4, %35 : vector<32x64xf32>
    %37 = arith.mulf %34, %36 : vector<32x64xf32>
    %cst_40 = arith.constant dense<0.000000e+00> : vector<32xf32>
    %38 = vector.multi_reduction <add>, %37, %cst_40 [1] : vector<32x64xf32> to vector<32xf32>
    %39 = vector.shape_cast %38 : vector<32xf32> to vector<32x1xf32>
    %cst_41 = arith.constant 6.400000e+01 : f32
    %40 = vector.broadcast %cst_41 : f32 to vector<32x1xf32>
    %41 = arith.divf %39, %40 : vector<32x1xf32>
    %42 = vector.broadcast %32 : vector<32x1xf32> to vector<32x64xf32>
    %43 = arith.subf %4, %42 : vector<32x64xf32>
    %cst_42 = arith.constant 9.99999974E-6 : f32
    %44 = vector.broadcast %cst_42 : f32 to vector<32x1xf32>
    %45 = arith.addf %41, %44 : vector<32x1xf32>
    %46 = math.rsqrt %45 : vector<32x1xf32>
    %47 = vector.broadcast %46 : vector<32x1xf32> to vector<32x64xf32>
    %48 = arith.mulf %43, %47 : vector<32x64xf32>
    %49 = vector.broadcast %6 : vector<1x64xf32> to vector<32x64xf32>
    %50 = arith.mulf %48, %49 : vector<32x64xf32>
    %51 = vector.broadcast %8 : vector<1x64xf32> to vector<32x64xf32>
    %52 = arith.addf %50, %51 : vector<32x64xf32>
    %53 = arith.truncf %52 : vector<32x64xf32> to vector<32x64xbf16>
    %cst_43 = arith.constant dense<0.000000e+00> : vector<32x192xf32>
    %54 = tpu.matmul %53, %10, %cst_43 {dimension_numbers = #tpu.dot_dimension_numbers<[1], [0], [0], [1], [0, 0, 1, 1], [], []>} : vector<32x64xbf16>, vector<64x192xbf16>, vector<32x192xf32> -> vector<32x192xf32>
    %55 = vector.broadcast %12 : vector<1x192xf32> to vector<32x192xf32>
    %56 = arith.addf %54, %55 : vector<32x192xf32>
    %57 = vector.extract_strided_slice %56 {offsets = [0, 0], sizes = [32, 64], strides = [1, 1]} : vector<32x192xf32> to vector<32x64xf32>
    %58 = vector.extract_strided_slice %56 {offsets = [0, 64], sizes = [32, 64], strides = [1, 1]} : vector<32x192xf32> to vector<32x64xf32>
    %59 = vector.extract_strided_slice %56 {offsets = [0, 128], sizes = [32, 64], strides = [1, 1]} : vector<32x192xf32> to vector<32x64xf32>
    %60 = vector.shape_cast %57 : vector<32x64xf32> to vector<2x16x8x8xf32>
    %61 = tpu.transpose %60, [0, 2, 1, 3] : vector<2x16x8x8xf32> -> vector<2x8x16x8xf32>
    %62 = vector.shape_cast %61 : vector<2x8x16x8xf32> to vector<16x16x8xf32>
    %63 = arith.truncf %62 : vector<16x16x8xf32> to vector<16x16x8xbf16>
    %64 = vector.shape_cast %58 : vector<32x64xf32> to vector<2x16x8x8xf32>
    %65 = tpu.transpose %64, [0, 2, 1, 3] : vector<2x16x8x8xf32> -> vector<2x8x16x8xf32>
    %66 = vector.shape_cast %65 : vector<2x8x16x8xf32> to vector<16x16x8xf32>
    %67 = arith.truncf %66 : vector<16x16x8xf32> to vector<16x16x8xbf16>
    %68 = vector.shape_cast %59 : vector<32x64xf32> to vector<2x16x8x8xf32>
    %69 = tpu.transpose %68, [0, 2, 1, 3] : vector<2x16x8x8xf32> -> vector<2x8x16x8xf32>
    %70 = vector.shape_cast %69 : vector<2x8x16x8xf32> to vector<16x16x8xf32>
    %71 = arith.truncf %70 : vector<16x16x8xf32> to vector<16x16x8xbf16>
    "tpu.trace_start"() <{level = 10 : i32, message = "zqd,zkd->zqk"}> : () -> ()
    %cst_44 = arith.constant dense<0.000000e+00> : vector<16x16x16xf32>
    %72 = tpu.matmul %63, %67, %cst_44 {dimension_numbers = #tpu.dot_dimension_numbers<[2], [2], [1], [1], [0, 0, 0, 1, 1, 1], [0], [0]>} : vector<16x16x8xbf16>, vector<16x16x8xbf16>, vector<16x16x16xf32> -> vector<16x16x16xf32>
    "tpu.trace_stop"() : () -> ()
    %cst_45 = arith.constant 0.353553385 : f32
    %73 = vector.broadcast %cst_45 : f32 to vector<16x16x16xf32>
    %74 = arith.mulf %72, %73 : vector<16x16x16xf32>
    %cst_46 = arith.constant dense<0xFF800000> : vector<16x16xf32>
    %75 = vector.multi_reduction <maximumf>, %74, %cst_46 [2] : vector<16x16x16xf32> to vector<16x16xf32>
    %76 = vector.shape_cast %75 : vector<16x16xf32> to vector<16x16x1xf32>
    %77 = vector.broadcast %76 : vector<16x16x1xf32> to vector<16x16x16xf32>
    %78 = arith.subf %74, %77 : vector<16x16x16xf32>
    %79 = math.exp %78 : vector<16x16x16xf32>
    %cst_47 = arith.constant dense<0.000000e+00> : vector<16x16xf32>
    %80 = vector.multi_reduction <add>, %79, %cst_47 [2] : vector<16x16x16xf32> to vector<16x16xf32>
    %81 = vector.shape_cast %80 : vector<16x16xf32> to vector<16x16x1xf32>
    %82 = tpu.reciprocal %81 {approx = true} : vector<16x16x1xf32> -> vector<16x16x1xf32>
    %83 = vector.broadcast %82 : vector<16x16x1xf32> to vector<16x16x16xf32>
    %84 = arith.mulf %79, %83 : vector<16x16x16xf32>
    %85 = arith.truncf %84 : vector<16x16x16xf32> to vector<16x16x16xbf16>
    "tpu.trace_start"() <{level = 10 : i32, message = "zqk,zkd->zqd"}> : () -> ()
    %cst_48 = arith.constant dense<0.000000e+00> : vector<16x16x8xf32>
    %86 = tpu.matmul %85, %71, %cst_48 {dimension_numbers = #tpu.dot_dimension_numbers<[2], [1], [1], [2], [0, 0, 0, 1, 1, 2], [0], [0]>} : vector<16x16x16xbf16>, vector<16x16x8xbf16>, vector<16x16x8xf32> -> vector<16x16x8xf32>
    "tpu.trace_stop"() : () -> ()
    %87 = vector.shape_cast %86 : vector<16x16x8xf32> to vector<2x8x16x8xf32>
    %88 = tpu.transpose %87, [0, 2, 1, 3] : vector<2x8x16x8xf32> -> vector<2x16x8x8xf32>
    %89 = vector.shape_cast %88 : vector<2x16x8x8xf32> to vector<32x64xf32>
    %90 = arith.truncf %89 : vector<32x64xf32> to vector<32x64xbf16>
    %cst_49 = arith.constant dense<0.000000e+00> : vector<32x64xf32>
    %91 = tpu.matmul %90, %14, %cst_49 {dimension_numbers = #tpu.dot_dimension_numbers<[1], [0], [0], [1], [0, 0, 1, 1], [], []>} : vector<32x64xbf16>, vector<64x64xbf16>, vector<32x64xf32> -> vector<32x64xf32>
    %92 = vector.broadcast %16 : vector<1x64xf32> to vector<32x64xf32>
    %93 = arith.addf %91, %92 : vector<32x64xf32>
    %94 = arith.addf %4, %93 : vector<32x64xf32>
    %cst_50 = arith.constant dense<0.000000e+00> : vector<32xf32>
    %95 = vector.multi_reduction <add>, %94, %cst_50 [1] : vector<32x64xf32> to vector<32xf32>
    %96 = vector.shape_cast %95 : vector<32xf32> to vector<32x1xf32>
    %cst_51 = arith.constant 6.400000e+01 : f32
    %97 = vector.broadcast %cst_51 : f32 to vector<32x1xf32>
    %98 = arith.divf %96, %97 : vector<32x1xf32>
    %99 = vector.broadcast %98 : vector<32x1xf32> to vector<32x64xf32>
    %100 = arith.subf %94, %99 : vector<32x64xf32>
    %101 = vector.broadcast %98 : vector<32x1xf32> to vector<32x64xf32>
    %102 = arith.subf %94, %101 : vector<32x64xf32>
    %103 = arith.mulf %100, %102 : vector<32x64xf32>
    %cst_52 = arith.constant dense<0.000000e+00> : vector<32xf32>
    %104 = vector.multi_reduction <add>, %103, %cst_52 [1] : vector<32x64xf32> to vector<32xf32>
    %105 = vector.shape_cast %104 : vector<32xf32> to vector<32x1xf32>
    %cst_53 = arith.constant 6.400000e+01 : f32
    %106 = vector.broadcast %cst_53 : f32 to vector<32x1xf32>
    %107 = arith.divf %105, %106 : vector<32x1xf32>
    %108 = vector.broadcast %98 : vector<32x1xf32> to vector<32x64xf32>
    %109 = arith.subf %94, %108 : vector<32x64xf32>
    %cst_54 = arith.constant 9.99999974E-6 : f32
    %110 = vector.broadcast %cst_54 : f32 to vector<32x1xf32>
    %111 = arith.addf %107, %110 : vector<32x1xf32>
    %112 = math.rsqrt %111 : vector<32x1xf32>
    %113 = vector.broadcast %112 : vector<32x1xf32> to vector<32x64xf32>
    %114 = arith.mulf %109, %113 : vector<32x64xf32>
    %115 = vector.broadcast %18 : vector<1x64xf32> to vector<32x64xf32>
    %116 = arith.mulf %114, %115 : vector<32x64xf32>
    %117 = vector.broadcast %20 : vector<1x64xf32> to vector<32x64xf32>
    %118 = arith.addf %116, %117 : vector<32x64xf32>
    %119 = arith.truncf %118 : vector<32x64xf32> to vector<32x64xbf16>
    %cst_55 = arith.constant dense<0.000000e+00> : vector<32x256xf32>
    %120 = tpu.matmul %119, %22, %cst_55 {dimension_numbers = #tpu.dot_dimension_numbers<[1], [0], [0], [1], [0, 0, 1, 1], [], []>} : vector<32x64xbf16>, vector<64x256xbf16>, vector<32x256xf32> -> vector<32x256xf32>
    %121 = vector.broadcast %24 : vector<1x256xf32> to vector<32x256xf32>
    %122 = arith.addf %120, %121 : vector<32x256xf32>
    %123 = arith.mulf %122, %122 : vector<32x256xf32>
    %124 = arith.mulf %122, %123 : vector<32x256xf32>
    %cst_56 = arith.constant 4.471500e-02 : f32
    %125 = vector.broadcast %cst_56 : f32 to vector<32x256xf32>
    %126 = arith.mulf %125, %124 : vector<32x256xf32>
    %127 = arith.addf %122, %126 : vector<32x256xf32>
    %cst_57 = arith.constant 0.797884583 : f32
    %128 = vector.broadcast %cst_57 : f32 to vector<32x256xf32>
    %129 = arith.mulf %128, %127 : vector<32x256xf32>
    %130 = math.tanh %129 : vector<32x256xf32>
    %cst_58 = arith.constant 1.000000e+00 : f32
    %131 = vector.broadcast %cst_58 : f32 to vector<32x256xf32>
    %132 = arith.addf %131, %130 : vector<32x256xf32>
    %cst_59 = arith.constant 5.000000e-01 : f32
    %133 = vector.broadcast %cst_59 : f32 to vector<32x256xf32>
    %134 = arith.mulf %133, %132 : vector<32x256xf32>
    %135 = arith.mulf %122, %134 : vector<32x256xf32>
    %136 = arith.truncf %135 : vector<32x256xf32> to vector<32x256xbf16>
    %cst_60 = arith.constant dense<0.000000e+00> : vector<32x64xf32>
    %137 = tpu.matmul %136, %26, %cst_60 {dimension_numbers = #tpu.dot_dimension_numbers<[1], [0], [0], [1], [0, 0, 1, 1], [], []>} : vector<32x256xbf16>, vector<256x64xbf16>, vector<32x64xf32> -> vector<32x64xf32>
    %138 = vector.broadcast %28 : vector<1x64xf32> to vector<32x64xf32>
    %139 = arith.addf %137, %138 : vector<32x64xf32>
    %140 = arith.addf %94, %139 : vector<32x64xf32>
    %141 = vector.shape_cast %140 : vector<32x64xf32> to vector<2x16x64xf32>
    %c0_61 = arith.constant 0 : index
    %c0_62 = arith.constant 0 : index
    %c0_63 = arith.constant 0 : index
    %142 = vector.load %arg18[%c0_61, %c0_62, %c0_63] : memref<2x16x64xf32, #tpu.memory_space<vmem>>, vector<2x16x64xf32>
    tpu.vector_store %arg18[%c0_61, %c0_62, %c0_63], %141 {strides = array<i32>} : memref<2x16x64xf32, #tpu.memory_space<vmem>>, vector<2x16x64xf32>,
    return
  }
  func.func @transform_0(%arg0: i32, %arg1: i32) -> (i32, i32, i32) {
    %c0_i32 = arith.constant 0 : i32
    %c0_i32_0 = arith.constant 0 : i32
    %c0_i32_1 = arith.constant 0 : i32
    return %arg0, %c0_i32, %c0_i32_0 : i32, i32, i32
  }
  func.func @transform_1(%arg0: i32, %arg1: i32) -> (i32, i32) {
    %c0_i32 = arith.constant 0 : i32
    %c0_i32_0 = arith.constant 0 : i32
    %c0_i32_1 = arith.constant 0 : i32
    return %c0_i32, %c0_i32_0 : i32, i32
  }
  func.func @transform_2(%arg0: i32, %arg1: i32) -> (i32, i32) {
    %c0_i32 = arith.constant 0 : i32
    %c0_i32_0 = arith.constant 0 : i32
    %c0_i32_1 = arith.constant 0 : i32
    return %c0_i32, %c0_i32_0 : i32, i32
  }
  func.func @transform_3(%arg0: i32, %arg1: i32) -> (i32, i32, i32) {
    %c0_i32 = arith.constant 0 : i32
    %c0_i32_0 = arith.constant 0 : i32
    %c0_i32_1 = arith.constant 0 : i32
    %c0_i32_2 = arith.constant 0 : i32
    return %c0_i32, %c0_i32_0, %c0_i32_1 : i32, i32, i32
  }
  func.func @transform_4(%arg0: i32, %arg1: i32) -> (i32, i32, i32) {
    %c0_i32 = arith.constant 0 : i32
    %c0_i32_0 = arith.constant 0 : i32
    %c0_i32_1 = arith.constant 0 : i32
    return %arg1, %c0_i32, %c0_i32_0 : i32, i32, i32
  }
  func.func @transform_5(%arg0: i32, %arg1: i32) -> (i32, i32, i32) {
    %c0_i32 = arith.constant 0 : i32
    %c0_i32_0 = arith.constant 0 : i32
    %c0_i32_1 = arith.constant 0 : i32
    return %arg1, %c0_i32, %c0_i32_0 : i32, i32, i32
  }
  func.func @transform_6(%arg0: i32, %arg1: i32) -> (i32, i32, i32) {
    %c0_i32 = arith.constant 0 : i32
    %c0_i32_0 = arith.constant 0 : i32
    %c0_i32_1 = arith.constant 0 : i32
    return %arg1, %c0_i32, %c0_i32_0 : i32, i32, i32
  }
  func.func @transform_7(%arg0: i32, %arg1: i32) -> (i32, i32, i32) {
    %c0_i32 = arith.constant 0 : i32
    %c0_i32_0 = arith.constant 0 : i32
    %c0_i32_1 = arith.constant 0 : i32
    return %arg1, %c0_i32, %c0_i32_0 : i32, i32, i32
  }
  func.func @transform_8(%arg0: i32, %arg1: i32) -> (i32, i32, i32) {
    %c0_i32 = arith.constant 0 : i32
    %c0_i32_0 = arith.constant 0 : i32
    %c0_i32_1 = arith.constant 0 : i32
    return %arg1, %c0_i32, %c0_i32_0 : i32, i32, i32
  }
  func.func @transform_9(%arg0: i32, %arg1: i32) -> (i32, i32, i32) {
    %c0_i32 = arith.constant 0 : i32
    %c0_i32_0 = arith.constant 0 : i32
    %c0_i32_1 = arith.constant 0 : i32
    return %arg1, %c0_i32, %c0_i32_0 : i32, i32, i32
  }
  func.func @transform_10(%arg0: i32, %arg1: i32) -> (i32, i32, i32) {
    %c0_i32 = arith.constant 0 : i32
    %c0_i32_0 = arith.constant 0 : i32
    %c0_i32_1 = arith.constant 0 : i32
    return %arg1, %c0_i32, %c0_i32_0 : i32, i32, i32
  }
  func.func @transform_11(%arg0: i32, %arg1: i32) -> (i32, i32, i32) {
    %c0_i32 = arith.constant 0 : i32
    %c0_i32_0 = arith.constant 0 : i32
    %c0_i32_1 = arith.constant 0 : i32
    return %arg1, %c0_i32, %c0_i32_0 : i32, i32, i32
  }
  func.func @transform_12(%arg0: i32, %arg1: i32) -> (i32, i32, i32) {
    %c0_i32 = arith.constant 0 : i32
    %c0_i32_0 = arith.constant 0 : i32
    %c0_i32_1 = arith.constant 0 : i32
    return %arg1, %c0_i32, %c0_i32_0 : i32, i32, i32
  }
  func.func @transform_13(%arg0: i32, %arg1: i32) -> (i32, i32, i32) {
    %c0_i32 = arith.constant 0 : i32
    %c0_i32_0 = arith.constant 0 : i32
    %c0_i32_1 = arith.constant 0 : i32
    return %arg1, %c0_i32, %c0_i32_0 : i32, i32, i32
  }
  func.func @transform_14(%arg0: i32, %arg1: i32) -> (i32, i32, i32) {
    %c0_i32 = arith.constant 0 : i32
    %c0_i32_0 = arith.constant 0 : i32
    %c0_i32_1 = arith.constant 0 : i32
    return %arg1, %c0_i32, %c0_i32_0 : i32, i32, i32
  }
  func.func @transform_15(%arg0: i32, %arg1: i32) -> (i32, i32, i32) {
    %c0_i32 = arith.constant 0 : i32
    %c0_i32_0 = arith.constant 0 : i32
    %c0_i32_1 = arith.constant 0 : i32
    return %arg1, %c0_i32, %c0_i32_0 : i32, i32, i32
  }
  func.func @transform_16(%arg0: i32, %arg1: i32) -> (i32, i32, i32) {
    %c0_i32 = arith.constant 0 : i32
    %c0_i32_0 = arith.constant 0 : i32
    %c0_i32_1 = arith.constant 0 : i32
    return %arg0, %c0_i32, %c0_i32_0 : i32, i32, i32
  }
}

module attributes {stable_mosaic.version = 11 : i64} {
  func.func @_decoder_kernel(%arg0: i32, %arg1: i32, %arg2: memref<2x16x64xf32, #tpu.memory_space<vmem>>, %arg3: memref<64x32xbf16, #tpu.memory_space<vmem>>, %arg4: memref<1x32xf32, #tpu.memory_space<vmem>>, %arg5: memref<1x32xf32, #tpu.memory_space<vmem>>, %arg6: memref<1x32x32xf32, #tpu.memory_space<vmem>>, %arg7: memref<1x1x32xf32, #tpu.memory_space<vmem>>, %arg8: memref<1x1x32xf32, #tpu.memory_space<vmem>>, %arg9: memref<1x32x96xbf16, #tpu.memory_space<vmem>>, %arg10: memref<1x1x96xf32, #tpu.memory_space<vmem>>, %arg11: memref<1x32x32xbf16, #tpu.memory_space<vmem>>, %arg12: memref<1x1x32xf32, #tpu.memory_space<vmem>>, %arg13: memref<1x1x32xf32, #tpu.memory_space<vmem>>, %arg14: memref<1x1x32xf32, #tpu.memory_space<vmem>>, %arg15: memref<1x32x128xbf16, #tpu.memory_space<vmem>>, %arg16: memref<1x1x128xf32, #tpu.memory_space<vmem>>, %arg17: memref<1x128x32xbf16, #tpu.memory_space<vmem>>, %arg18: memref<1x1x32xf32, #tpu.memory_space<vmem>>, %arg19: memref<2x32x32xf32, #tpu.memory_space<vmem>>) attributes {dimension_semantics = [#tpu.dimension_semantics<parallel>, #tpu.dimension_semantics<arbitrary>], iteration_bounds = array<i64: 1, 4>, scalar_prefetch = 0 : i64, scratch_operands = 0 : i64, tpu.core_type = #tpu.core_type<tc>, window_params = [{transform_indices = @transform_0, window_bounds = array<i64: 2, 16, 64>}, {pipeline_mode = #tpu.pipeline_mode<synchronous>, transform_indices = @transform_1, window_bounds = array<i64: 64, 32>}, {pipeline_mode = #tpu.pipeline_mode<synchronous>, transform_indices = @transform_2, window_bounds = array<i64: 1, 32>}, {pipeline_mode = #tpu.pipeline_mode<synchronous>, transform_indices = @transform_3, window_bounds = array<i64: 1, 32>}, {pipeline_mode = #tpu.pipeline_mode<synchronous>, transform_indices = @transform_4, window_bounds = array<i64: 1, 32, 32>}, {transform_indices = @transform_5, window_bounds = array<i64: 1, 1, 32>}, {transform_indices = @transform_6, window_bounds = array<i64: 1, 1, 32>}, {transform_indices = @transform_7, window_bounds = array<i64: 1, 32, 96>}, {transform_indices = @transform_8, window_bounds = array<i64: 1, 1, 96>}, {transform_indices = @transform_9, window_bounds = array<i64: 1, 32, 32>}, {transform_indices = @transform_10, window_bounds = array<i64: 1, 1, 32>}, {transform_indices = @transform_11, window_bounds = array<i64: 1, 1, 32>}, {transform_indices = @transform_12, window_bounds = array<i64: 1, 1, 32>}, {transform_indices = @transform_13, window_bounds = array<i64: 1, 32, 128>}, {transform_indices = @transform_14, window_bounds = array<i64: 1, 1, 128>}, {transform_indices = @transform_15, window_bounds = array<i64: 1, 128, 32>}, {transform_indices = @transform_16, window_bounds = array<i64: 1, 1, 32>}, {transform_indices = @transform_17, window_bounds = array<i64: 2, 32, 32>}]} {
    %c0_i32 = arith.constant 0 : i32
    %0 = arith.cmpi eq, %arg1, %c0_i32 : i32
    %1 = arith.extui %0 : i1 to i32
    %c0_i32_0 = arith.constant 0 : i32
    %2 = arith.cmpi ne, %1, %c0_i32_0 : i32
    scf.if %2 {
      %c0_64 = arith.constant 0 : index
      %c0_65 = arith.constant 0 : index
      %c0_66 = arith.constant 0 : index
      %143 = vector.load %arg2[%c0_64, %c0_65, %c0_66] : memref<2x16x64xf32, #tpu.memory_space<vmem>>, vector<2x16x64xf32>
      %144 = vector.shape_cast %143 : vector<2x16x64xf32> to vector<32x64xf32>
      %145 = arith.truncf %144 : vector<32x64xf32> to vector<32x64xbf16>
      %c0_67 = arith.constant 0 : index
      %c0_68 = arith.constant 0 : index
      %146 = vector.load %arg3[%c0_67, %c0_68] : memref<64x32xbf16, #tpu.memory_space<vmem>>, vector<64x32xbf16>
      %cst_69 = arith.constant dense<0.000000e+00> : vector<32x32xf32>
      %147 = tpu.matmul %145, %146, %cst_69 {dimension_numbers = #tpu.dot_dimension_numbers<[1], [0], [0], [1], [0, 0, 1, 1], [], []>} : vector<32x64xbf16>, vector<64x32xbf16>, vector<32x32xf32> -> vector<32x32xf32>
      %c0_70 = arith.constant 0 : index
      %c0_71 = arith.constant 0 : index
      %148 = vector.load %arg4[%c0_70, %c0_71] : memref<1x32xf32, #tpu.memory_space<vmem>>, vector<1x32xf32>
      %149 = vector.broadcast %148 : vector<1x32xf32> to vector<32x32xf32>
      %150 = arith.addf %147, %149 : vector<32x32xf32>
      %151 = vector.shape_cast %150 : vector<32x32xf32> to vector<2x16x32xf32>
      %c0_72 = arith.constant 0 : index
      %c0_73 = arith.constant 0 : index
      %c0_74 = arith.constant 0 : index
      %152 = vector.load %arg6[%c0_72, %c0_73, %c0_74] : memref<1x32x32xf32, #tpu.memory_space<vmem>>, vector<1x16x32xf32>
      %153 = vector.shape_cast %152 : vector<1x16x32xf32> to vector<16x32xf32>
      %154 = vector.shape_cast %153 : vector<16x32xf32> to vector<1x16x32xf32>
      %155 = vector.broadcast %154 : vector<1x16x32xf32> to vector<2x16x32xf32>
      %156 = arith.addf %151, %155 : vector<2x16x32xf32>
      %c0_75 = arith.constant 0 : index
      %c0_76 = arith.constant 0 : index
      %c0_77 = arith.constant 0 : index
      %157 = vector.load %arg19[%c0_75, %c0_76, %c0_77] : memref<2x32x32xf32, #tpu.memory_space<vmem>>, vector<2x16x32xf32>
      tpu.vector_store %arg19[%c0_75, %c0_76, %c0_77], %156 {strides = array<i32>} : memref<2x32x32xf32, #tpu.memory_space<vmem>>, vector<2x16x32xf32>,
      %c0_78 = arith.constant 0 : index
      %c0_79 = arith.constant 0 : index
      %158 = vector.load %arg5[%c0_78, %c0_79] : memref<1x32xf32, #tpu.memory_space<vmem>>, vector<1x32xf32>
      %159 = vector.shape_cast %158 : vector<1x32xf32> to vector<1x1x32xf32>
      %160 = vector.broadcast %159 : vector<1x1x32xf32> to vector<2x16x32xf32>
      %c0_80 = arith.constant 0 : index
      %c16 = arith.constant 16 : index
      %c0_81 = arith.constant 0 : index
      %161 = vector.load %arg6[%c0_80, %c16, %c0_81] : memref<1x32x32xf32, #tpu.memory_space<vmem>>, vector<1x16x32xf32>
      %162 = vector.shape_cast %161 : vector<1x16x32xf32> to vector<16x32xf32>
      %163 = vector.shape_cast %162 : vector<16x32xf32> to vector<1x16x32xf32>
      %164 = vector.broadcast %163 : vector<1x16x32xf32> to vector<2x16x32xf32>
      %165 = arith.addf %160, %164 : vector<2x16x32xf32>
      %c0_82 = arith.constant 0 : index
      %c16_83 = arith.constant 16 : index
      %c0_84 = arith.constant 0 : index
      %166 = vector.load %arg19[%c0_82, %c16_83, %c0_84] : memref<2x32x32xf32, #tpu.memory_space<vmem>>, vector<2x16x32xf32>
      tpu.vector_store %arg19[%c0_82, %c16_83, %c0_84], %165 {strides = array<i32>} : memref<2x32x32xf32, #tpu.memory_space<vmem>>, vector<2x16x32xf32>,
    } else {
    }
    %c0 = arith.constant 0 : index
    %c0_1 = arith.constant 0 : index
    %c0_2 = arith.constant 0 : index
    %3 = vector.load %arg19[%c0, %c0_1, %c0_2] : memref<2x32x32xf32, #tpu.memory_space<vmem>>, vector<2x32x32xf32>
    %4 = vector.shape_cast %3 : vector<2x32x32xf32> to vector<64x32xf32>
    %c0_3 = arith.constant 0 : index
    %c0_4 = arith.constant 0 : index
    %c0_5 = arith.constant 0 : index
    %5 = vector.load %arg7[%c0_3, %c0_4, %c0_5] : memref<1x1x32xf32, #tpu.memory_space<vmem>>, vector<1x1x32xf32>
    %6 = vector.shape_cast %5 : vector<1x1x32xf32> to vector<1x32xf32>
    %c0_6 = arith.constant 0 : index
    %c0_7 = arith.constant 0 : index
    %c0_8 = arith.constant 0 : index
    %7 = vector.load %arg8[%c0_6, %c0_7, %c0_8] : memref<1x1x32xf32, #tpu.memory_space<vmem>>, vector<1x1x32xf32>
    %8 = vector.shape_cast %7 : vector<1x1x32xf32> to vector<1x32xf32>
    %c0_9 = arith.constant 0 : index
    %c0_10 = arith.constant 0 : index
    %c0_11 = arith.constant 0 : index
    %9 = vector.load %arg9[%c0_9, %c0_10, %c0_11] : memref<1x32x96xbf16, #tpu.memory_space<vmem>>, vector<1x32x96xbf16>
    %10 = vector.shape_cast %9 : vector<1x32x96xbf16> to vector<32x96xbf16>
    %c0_12 = arith.constant 0 : index
    %c0_13 = arith.constant 0 : index
    %c0_14 = arith.constant 0 : index
    %11 = vector.load %arg10[%c0_12, %c0_13, %c0_14] : memref<1x1x96xf32, #tpu.memory_space<vmem>>, vector<1x1x96xf32>
    %12 = vector.shape_cast %11 : vector<1x1x96xf32> to vector<1x96xf32>
    %c0_15 = arith.constant 0 : index
    %c0_16 = arith.constant 0 : index
    %c0_17 = arith.constant 0 : index
    %13 = vector.load %arg11[%c0_15, %c0_16, %c0_17] : memref<1x32x32xbf16, #tpu.memory_space<vmem>>, vector<1x32x32xbf16>
    %14 = vector.shape_cast %13 : vector<1x32x32xbf16> to vector<32x32xbf16>
    %c0_18 = arith.constant 0 : index
    %c0_19 = arith.constant 0 : index
    %c0_20 = arith.constant 0 : index
    %15 = vector.load %arg12[%c0_18, %c0_19, %c0_20] : memref<1x1x32xf32, #tpu.memory_space<vmem>>, vector<1x1x32xf32>
    %16 = vector.shape_cast %15 : vector<1x1x32xf32> to vector<1x32xf32>
    %c0_21 = arith.constant 0 : index
    %c0_22 = arith.constant 0 : index
    %c0_23 = arith.constant 0 : index
    %17 = vector.load %arg13[%c0_21, %c0_22, %c0_23] : memref<1x1x32xf32, #tpu.memory_space<vmem>>, vector<1x1x32xf32>
    %18 = vector.shape_cast %17 : vector<1x1x32xf32> to vector<1x32xf32>
    %c0_24 = arith.constant 0 : index
    %c0_25 = arith.constant 0 : index
    %c0_26 = arith.constant 0 : index
    %19 = vector.load %arg14[%c0_24, %c0_25, %c0_26] : memref<1x1x32xf32, #tpu.memory_space<vmem>>, vector<1x1x32xf32>
    %20 = vector.shape_cast %19 : vector<1x1x32xf32> to vector<1x32xf32>
    %c0_27 = arith.constant 0 : index
    %c0_28 = arith.constant 0 : index
    %c0_29 = arith.constant 0 : index
    %21 = vector.load %arg15[%c0_27, %c0_28, %c0_29] : memref<1x32x128xbf16, #tpu.memory_space<vmem>>, vector<1x32x128xbf16>
    %22 = vector.shape_cast %21 : vector<1x32x128xbf16> to vector<32x128xbf16>
    %c0_30 = arith.constant 0 : index
    %c0_31 = arith.constant 0 : index
    %c0_32 = arith.constant 0 : index
    %23 = vector.load %arg16[%c0_30, %c0_31, %c0_32] : memref<1x1x128xf32, #tpu.memory_space<vmem>>, vector<1x1x128xf32>
    %24 = vector.shape_cast %23 : vector<1x1x128xf32> to vector<1x128xf32>
    %c0_33 = arith.constant 0 : index
    %c0_34 = arith.constant 0 : index
    %c0_35 = arith.constant 0 : index
    %25 = vector.load %arg17[%c0_33, %c0_34, %c0_35] : memref<1x128x32xbf16, #tpu.memory_space<vmem>>, vector<1x128x32xbf16>
    %26 = vector.shape_cast %25 : vector<1x128x32xbf16> to vector<128x32xbf16>
    %c0_36 = arith.constant 0 : index
    %c0_37 = arith.constant 0 : index
    %c0_38 = arith.constant 0 : index
    %27 = vector.load %arg18[%c0_36, %c0_37, %c0_38] : memref<1x1x32xf32, #tpu.memory_space<vmem>>, vector<1x1x32xf32>
    %28 = vector.shape_cast %27 : vector<1x1x32xf32> to vector<1x32xf32>
    %cst = arith.constant dense<0.000000e+00> : vector<64xf32>
    %29 = vector.multi_reduction <add>, %4, %cst [1] : vector<64x32xf32> to vector<64xf32>
    %30 = vector.shape_cast %29 : vector<64xf32> to vector<64x1xf32>
    %cst_39 = arith.constant 3.200000e+01 : f32
    %31 = vector.broadcast %cst_39 : f32 to vector<64x1xf32>
    %32 = arith.divf %30, %31 : vector<64x1xf32>
    %33 = vector.broadcast %32 : vector<64x1xf32> to vector<64x32xf32>
    %34 = arith.subf %4, %33 : vector<64x32xf32>
    %35 = vector.broadcast %32 : vector<64x1xf32> to vector<64x32xf32>
    %36 = arith.subf %4, %35 : vector<64x32xf32>
    %37 = arith.mulf %34, %36 : vector<64x32xf32>
    %cst_40 = arith.constant dense<0.000000e+00> : vector<64xf32>
    %38 = vector.multi_reduction <add>, %37, %cst_40 [1] : vector<64x32xf32> to vector<64xf32>
    %39 = vector.shape_cast %38 : vector<64xf32> to vector<64x1xf32>
    %cst_41 = arith.constant 3.200000e+01 : f32
    %40 = vector.broadcast %cst_41 : f32 to vector<64x1xf32>
    %41 = arith.divf %39, %40 : vector<64x1xf32>
    %42 = vector.broadcast %32 : vector<64x1xf32> to vector<64x32xf32>
    %43 = arith.subf %4, %42 : vector<64x32xf32>
    %cst_42 = arith.constant 9.99999974E-6 : f32
    %44 = vector.broadcast %cst_42 : f32 to vector<64x1xf32>
    %45 = arith.addf %41, %44 : vector<64x1xf32>
    %46 = math.rsqrt %45 : vector<64x1xf32>
    %47 = vector.broadcast %46 : vector<64x1xf32> to vector<64x32xf32>
    %48 = arith.mulf %43, %47 : vector<64x32xf32>
    %49 = vector.broadcast %6 : vector<1x32xf32> to vector<64x32xf32>
    %50 = arith.mulf %48, %49 : vector<64x32xf32>
    %51 = vector.broadcast %8 : vector<1x32xf32> to vector<64x32xf32>
    %52 = arith.addf %50, %51 : vector<64x32xf32>
    %53 = arith.truncf %52 : vector<64x32xf32> to vector<64x32xbf16>
    %cst_43 = arith.constant dense<0.000000e+00> : vector<64x96xf32>
    %54 = tpu.matmul %53, %10, %cst_43 {dimension_numbers = #tpu.dot_dimension_numbers<[1], [0], [0], [1], [0, 0, 1, 1], [], []>} : vector<64x32xbf16>, vector<32x96xbf16>, vector<64x96xf32> -> vector<64x96xf32>
    %55 = vector.broadcast %12 : vector<1x96xf32> to vector<64x96xf32>
    %56 = arith.addf %54, %55 : vector<64x96xf32>
    %57 = vector.extract_strided_slice %56 {offsets = [0, 0], sizes = [64, 32], strides = [1, 1]} : vector<64x96xf32> to vector<64x32xf32>
    %58 = vector.extract_strided_slice %56 {offsets = [0, 32], sizes = [64, 32], strides = [1, 1]} : vector<64x96xf32> to vector<64x32xf32>
    %59 = vector.extract_strided_slice %56 {offsets = [0, 64], sizes = [64, 32], strides = [1, 1]} : vector<64x96xf32> to vector<64x32xf32>
    %60 = vector.shape_cast %57 : vector<64x32xf32> to vector<2x32x4x8xf32>
    %61 = tpu.transpose %60, [0, 2, 1, 3] : vector<2x32x4x8xf32> -> vector<2x4x32x8xf32>
    %62 = vector.shape_cast %61 : vector<2x4x32x8xf32> to vector<8x32x8xf32>
    %63 = arith.truncf %62 : vector<8x32x8xf32> to vector<8x32x8xbf16>
    %64 = vector.shape_cast %58 : vector<64x32xf32> to vector<2x32x4x8xf32>
    %65 = tpu.transpose %64, [0, 2, 1, 3] : vector<2x32x4x8xf32> -> vector<2x4x32x8xf32>
    %66 = vector.shape_cast %65 : vector<2x4x32x8xf32> to vector<8x32x8xf32>
    %67 = arith.truncf %66 : vector<8x32x8xf32> to vector<8x32x8xbf16>
    %68 = vector.shape_cast %59 : vector<64x32xf32> to vector<2x32x4x8xf32>
    %69 = tpu.transpose %68, [0, 2, 1, 3] : vector<2x32x4x8xf32> -> vector<2x4x32x8xf32>
    %70 = vector.shape_cast %69 : vector<2x4x32x8xf32> to vector<8x32x8xf32>
    %71 = arith.truncf %70 : vector<8x32x8xf32> to vector<8x32x8xbf16>
    "tpu.trace_start"() <{level = 10 : i32, message = "zqd,zkd->zqk"}> : () -> ()
    %cst_44 = arith.constant dense<0.000000e+00> : vector<8x32x32xf32>
    %72 = tpu.matmul %63, %67, %cst_44 {dimension_numbers = #tpu.dot_dimension_numbers<[2], [2], [1], [1], [0, 0, 0, 1, 1, 1], [0], [0]>} : vector<8x32x8xbf16>, vector<8x32x8xbf16>, vector<8x32x32xf32> -> vector<8x32x32xf32>
    "tpu.trace_stop"() : () -> ()
    %cst_45 = arith.constant 0.353553385 : f32
    %73 = vector.broadcast %cst_45 : f32 to vector<8x32x32xf32>
    %74 = arith.mulf %72, %73 : vector<8x32x32xf32>
    %cst_46 = arith.constant dense<0xFF800000> : vector<8x32xf32>
    %75 = vector.multi_reduction <maximumf>, %74, %cst_46 [2] : vector<8x32x32xf32> to vector<8x32xf32>
    %76 = vector.shape_cast %75 : vector<8x32xf32> to vector<8x32x1xf32>
    %77 = vector.broadcast %76 : vector<8x32x1xf32> to vector<8x32x32xf32>
    %78 = arith.subf %74, %77 : vector<8x32x32xf32>
    %79 = math.exp %78 : vector<8x32x32xf32>
    %cst_47 = arith.constant dense<0.000000e+00> : vector<8x32xf32>
    %80 = vector.multi_reduction <add>, %79, %cst_47 [2] : vector<8x32x32xf32> to vector<8x32xf32>
    %81 = vector.shape_cast %80 : vector<8x32xf32> to vector<8x32x1xf32>
    %82 = tpu.reciprocal %81 {approx = true} : vector<8x32x1xf32> -> vector<8x32x1xf32>
    %83 = vector.broadcast %82 : vector<8x32x1xf32> to vector<8x32x32xf32>
    %84 = arith.mulf %79, %83 : vector<8x32x32xf32>
    %85 = arith.truncf %84 : vector<8x32x32xf32> to vector<8x32x32xbf16>
    "tpu.trace_start"() <{level = 10 : i32, message = "zqk,zkd->zqd"}> : () -> ()
    %cst_48 = arith.constant dense<0.000000e+00> : vector<8x32x8xf32>
    %86 = tpu.matmul %85, %71, %cst_48 {dimension_numbers = #tpu.dot_dimension_numbers<[2], [1], [1], [2], [0, 0, 0, 1, 1, 2], [0], [0]>} : vector<8x32x32xbf16>, vector<8x32x8xbf16>, vector<8x32x8xf32> -> vector<8x32x8xf32>
    "tpu.trace_stop"() : () -> ()
    %87 = vector.shape_cast %86 : vector<8x32x8xf32> to vector<2x4x32x8xf32>
    %88 = tpu.transpose %87, [0, 2, 1, 3] : vector<2x4x32x8xf32> -> vector<2x32x4x8xf32>
    %89 = vector.shape_cast %88 : vector<2x32x4x8xf32> to vector<64x32xf32>
    %90 = arith.truncf %89 : vector<64x32xf32> to vector<64x32xbf16>
    %cst_49 = arith.constant dense<0.000000e+00> : vector<64x32xf32>
    %91 = tpu.matmul %90, %14, %cst_49 {dimension_numbers = #tpu.dot_dimension_numbers<[1], [0], [0], [1], [0, 0, 1, 1], [], []>} : vector<64x32xbf16>, vector<32x32xbf16>, vector<64x32xf32> -> vector<64x32xf32>
    %92 = vector.broadcast %16 : vector<1x32xf32> to vector<64x32xf32>
    %93 = arith.addf %91, %92 : vector<64x32xf32>
    %94 = arith.addf %4, %93 : vector<64x32xf32>
    %cst_50 = arith.constant dense<0.000000e+00> : vector<64xf32>
    %95 = vector.multi_reduction <add>, %94, %cst_50 [1] : vector<64x32xf32> to vector<64xf32>
    %96 = vector.shape_cast %95 : vector<64xf32> to vector<64x1xf32>
    %cst_51 = arith.constant 3.200000e+01 : f32
    %97 = vector.broadcast %cst_51 : f32 to vector<64x1xf32>
    %98 = arith.divf %96, %97 : vector<64x1xf32>
    %99 = vector.broadcast %98 : vector<64x1xf32> to vector<64x32xf32>
    %100 = arith.subf %94, %99 : vector<64x32xf32>
    %101 = vector.broadcast %98 : vector<64x1xf32> to vector<64x32xf32>
    %102 = arith.subf %94, %101 : vector<64x32xf32>
    %103 = arith.mulf %100, %102 : vector<64x32xf32>
    %cst_52 = arith.constant dense<0.000000e+00> : vector<64xf32>
    %104 = vector.multi_reduction <add>, %103, %cst_52 [1] : vector<64x32xf32> to vector<64xf32>
    %105 = vector.shape_cast %104 : vector<64xf32> to vector<64x1xf32>
    %cst_53 = arith.constant 3.200000e+01 : f32
    %106 = vector.broadcast %cst_53 : f32 to vector<64x1xf32>
    %107 = arith.divf %105, %106 : vector<64x1xf32>
    %108 = vector.broadcast %98 : vector<64x1xf32> to vector<64x32xf32>
    %109 = arith.subf %94, %108 : vector<64x32xf32>
    %cst_54 = arith.constant 9.99999974E-6 : f32
    %110 = vector.broadcast %cst_54 : f32 to vector<64x1xf32>
    %111 = arith.addf %107, %110 : vector<64x1xf32>
    %112 = math.rsqrt %111 : vector<64x1xf32>
    %113 = vector.broadcast %112 : vector<64x1xf32> to vector<64x32xf32>
    %114 = arith.mulf %109, %113 : vector<64x32xf32>
    %115 = vector.broadcast %18 : vector<1x32xf32> to vector<64x32xf32>
    %116 = arith.mulf %114, %115 : vector<64x32xf32>
    %117 = vector.broadcast %20 : vector<1x32xf32> to vector<64x32xf32>
    %118 = arith.addf %116, %117 : vector<64x32xf32>
    %119 = arith.truncf %118 : vector<64x32xf32> to vector<64x32xbf16>
    %cst_55 = arith.constant dense<0.000000e+00> : vector<64x128xf32>
    %120 = tpu.matmul %119, %22, %cst_55 {dimension_numbers = #tpu.dot_dimension_numbers<[1], [0], [0], [1], [0, 0, 1, 1], [], []>} : vector<64x32xbf16>, vector<32x128xbf16>, vector<64x128xf32> -> vector<64x128xf32>
    %121 = vector.broadcast %24 : vector<1x128xf32> to vector<64x128xf32>
    %122 = arith.addf %120, %121 : vector<64x128xf32>
    %123 = arith.mulf %122, %122 : vector<64x128xf32>
    %124 = arith.mulf %122, %123 : vector<64x128xf32>
    %cst_56 = arith.constant 4.471500e-02 : f32
    %125 = vector.broadcast %cst_56 : f32 to vector<64x128xf32>
    %126 = arith.mulf %125, %124 : vector<64x128xf32>
    %127 = arith.addf %122, %126 : vector<64x128xf32>
    %cst_57 = arith.constant 0.797884583 : f32
    %128 = vector.broadcast %cst_57 : f32 to vector<64x128xf32>
    %129 = arith.mulf %128, %127 : vector<64x128xf32>
    %130 = math.tanh %129 : vector<64x128xf32>
    %cst_58 = arith.constant 1.000000e+00 : f32
    %131 = vector.broadcast %cst_58 : f32 to vector<64x128xf32>
    %132 = arith.addf %131, %130 : vector<64x128xf32>
    %cst_59 = arith.constant 5.000000e-01 : f32
    %133 = vector.broadcast %cst_59 : f32 to vector<64x128xf32>
    %134 = arith.mulf %133, %132 : vector<64x128xf32>
    %135 = arith.mulf %122, %134 : vector<64x128xf32>
    %136 = arith.truncf %135 : vector<64x128xf32> to vector<64x128xbf16>
    %cst_60 = arith.constant dense<0.000000e+00> : vector<64x32xf32>
    %137 = tpu.matmul %136, %26, %cst_60 {dimension_numbers = #tpu.dot_dimension_numbers<[1], [0], [0], [1], [0, 0, 1, 1], [], []>} : vector<64x128xbf16>, vector<128x32xbf16>, vector<64x32xf32> -> vector<64x32xf32>
    %138 = vector.broadcast %28 : vector<1x32xf32> to vector<64x32xf32>
    %139 = arith.addf %137, %138 : vector<64x32xf32>
    %140 = arith.addf %94, %139 : vector<64x32xf32>
    %141 = vector.shape_cast %140 : vector<64x32xf32> to vector<2x32x32xf32>
    %c0_61 = arith.constant 0 : index
    %c0_62 = arith.constant 0 : index
    %c0_63 = arith.constant 0 : index
    %142 = vector.load %arg19[%c0_61, %c0_62, %c0_63] : memref<2x32x32xf32, #tpu.memory_space<vmem>>, vector<2x32x32xf32>
    tpu.vector_store %arg19[%c0_61, %c0_62, %c0_63], %141 {strides = array<i32>} : memref<2x32x32xf32, #tpu.memory_space<vmem>>, vector<2x32x32xf32>,
    return
  }
  func.func @transform_0(%arg0: i32, %arg1: i32) -> (i32, i32, i32) {
    %c0_i32 = arith.constant 0 : i32
    %c0_i32_0 = arith.constant 0 : i32
    %c0_i32_1 = arith.constant 0 : i32
    return %arg0, %c0_i32, %c0_i32_0 : i32, i32, i32
  }
  func.func @transform_1(%arg0: i32, %arg1: i32) -> (i32, i32) {
    %c0_i32 = arith.constant 0 : i32
    %c0_i32_0 = arith.constant 0 : i32
    %c0_i32_1 = arith.constant 0 : i32
    return %c0_i32, %c0_i32_0 : i32, i32
  }
  func.func @transform_2(%arg0: i32, %arg1: i32) -> (i32, i32) {
    %c0_i32 = arith.constant 0 : i32
    %c0_i32_0 = arith.constant 0 : i32
    %c0_i32_1 = arith.constant 0 : i32
    return %c0_i32, %c0_i32_0 : i32, i32
  }
  func.func @transform_3(%arg0: i32, %arg1: i32) -> (i32, i32) {
    %c0_i32 = arith.constant 0 : i32
    %c0_i32_0 = arith.constant 0 : i32
    %c0_i32_1 = arith.constant 0 : i32
    return %c0_i32, %c0_i32_0 : i32, i32
  }
  func.func @transform_4(%arg0: i32, %arg1: i32) -> (i32, i32, i32) {
    %c0_i32 = arith.constant 0 : i32
    %c0_i32_0 = arith.constant 0 : i32
    %c0_i32_1 = arith.constant 0 : i32
    %c0_i32_2 = arith.constant 0 : i32
    return %c0_i32, %c0_i32_0, %c0_i32_1 : i32, i32, i32
  }
  func.func @transform_5(%arg0: i32, %arg1: i32) -> (i32, i32, i32) {
    %c0_i32 = arith.constant 0 : i32
    %c0_i32_0 = arith.constant 0 : i32
    %c0_i32_1 = arith.constant 0 : i32
    return %arg1, %c0_i32, %c0_i32_0 : i32, i32, i32
  }
  func.func @transform_6(%arg0: i32, %arg1: i32) -> (i32, i32, i32) {
    %c0_i32 = arith.constant 0 : i32
    %c0_i32_0 = arith.constant 0 : i32
    %c0_i32_1 = arith.constant 0 : i32
    return %arg1, %c0_i32, %c0_i32_0 : i32, i32, i32
  }
  func.func @transform_7(%arg0: i32, %arg1: i32) -> (i32, i32, i32) {
    %c0_i32 = arith.constant 0 : i32
    %c0_i32_0 = arith.constant 0 : i32
    %c0_i32_1 = arith.constant 0 : i32
    return %arg1, %c0_i32, %c0_i32_0 : i32, i32, i32
  }
  func.func @transform_8(%arg0: i32, %arg1: i32) -> (i32, i32, i32) {
    %c0_i32 = arith.constant 0 : i32
    %c0_i32_0 = arith.constant 0 : i32
    %c0_i32_1 = arith.constant 0 : i32
    return %arg1, %c0_i32, %c0_i32_0 : i32, i32, i32
  }
  func.func @transform_9(%arg0: i32, %arg1: i32) -> (i32, i32, i32) {
    %c0_i32 = arith.constant 0 : i32
    %c0_i32_0 = arith.constant 0 : i32
    %c0_i32_1 = arith.constant 0 : i32
    return %arg1, %c0_i32, %c0_i32_0 : i32, i32, i32
  }
  func.func @transform_10(%arg0: i32, %arg1: i32) -> (i32, i32, i32) {
    %c0_i32 = arith.constant 0 : i32
    %c0_i32_0 = arith.constant 0 : i32
    %c0_i32_1 = arith.constant 0 : i32
    return %arg1, %c0_i32, %c0_i32_0 : i32, i32, i32
  }
  func.func @transform_11(%arg0: i32, %arg1: i32) -> (i32, i32, i32) {
    %c0_i32 = arith.constant 0 : i32
    %c0_i32_0 = arith.constant 0 : i32
    %c0_i32_1 = arith.constant 0 : i32
    return %arg1, %c0_i32, %c0_i32_0 : i32, i32, i32
  }
  func.func @transform_12(%arg0: i32, %arg1: i32) -> (i32, i32, i32) {
    %c0_i32 = arith.constant 0 : i32
    %c0_i32_0 = arith.constant 0 : i32
    %c0_i32_1 = arith.constant 0 : i32
    return %arg1, %c0_i32, %c0_i32_0 : i32, i32, i32
  }
  func.func @transform_13(%arg0: i32, %arg1: i32) -> (i32, i32, i32) {
    %c0_i32 = arith.constant 0 : i32
    %c0_i32_0 = arith.constant 0 : i32
    %c0_i32_1 = arith.constant 0 : i32
    return %arg1, %c0_i32, %c0_i32_0 : i32, i32, i32
  }
  func.func @transform_14(%arg0: i32, %arg1: i32) -> (i32, i32, i32) {
    %c0_i32 = arith.constant 0 : i32
    %c0_i32_0 = arith.constant 0 : i32
    %c0_i32_1 = arith.constant 0 : i32
    return %arg1, %c0_i32, %c0_i32_0 : i32, i32, i32
  }
  func.func @transform_15(%arg0: i32, %arg1: i32) -> (i32, i32, i32) {
    %c0_i32 = arith.constant 0 : i32
    %c0_i32_0 = arith.constant 0 : i32
    %c0_i32_1 = arith.constant 0 : i32
    return %arg1, %c0_i32, %c0_i32_0 : i32, i32, i32
  }
  func.func @transform_16(%arg0: i32, %arg1: i32) -> (i32, i32, i32) {
    %c0_i32 = arith.constant 0 : i32
    %c0_i32_0 = arith.constant 0 : i32
    %c0_i32_1 = arith.constant 0 : i32
    return %arg1, %c0_i32, %c0_i32_0 : i32, i32, i32
  }
  func.func @transform_17(%arg0: i32, %arg1: i32) -> (i32, i32, i32) {
    %c0_i32 = arith.constant 0 : i32
    %c0_i32_0 = arith.constant 0 : i32
    %c0_i32_1 = arith.constant 0 : i32
    return %arg0, %c0_i32, %c0_i32_0 : i32, i32, i32
  }
}

</mosaic_0001>

<bundles_post_ra>
// kernel: model_forward.3
= control target key start
LH: loop header
LB: loop body
LE: loop exit
PB: predicated region body
PF: predicated region fallthrough
CT: control target
= control target key end

     0   :  { %s11770_s0 = inlined_call_operand.vmem [shape: f32[2,16,64], index: 0, kind: input, shape index: {}]   ;;  %s11771_s1 = inlined_call_operand.vmem [shape: bf16[64,32], index: 1, kind: input, shape index: {}]   ;;  %s11772_s2 = inlined_call_operand.vmem [shape: f32[1,32], index: 2, kind: input, shape index: {}]   ;;  %s11773_s3 = inlined_call_operand.vmem [shape: f32[1,32], index: 3, kind: input, shape index: {}]   ;;  %s11774_s4 = inlined_call_operand.vmem [shape: f32[1,32,32], index: 4, kind: input, shape index: {}]   ;;  %s11775_s5 = inlined_call_operand.vmem [shape: f32[4,1,32], index: 5, kind: input, shape index: {}]   ;;  %s11776_s6 = inlined_call_operand.vmem [shape: f32[4,1,32], index: 6, kind: input, shape index: {}]   ;;  %s11777_s7 = inlined_call_operand.vmem [shape: bf16[4,32,96], index: 7, kind: input, shape index: {}]   ;;  %s11778_s8 = inlined_call_operand.vmem [shape: f32[4,1,96], index: 8, kind: input, shape index: {}]   ;;  %s11779_s9 = inlined_call_operand.vmem [shape: bf16[4,32,32], index: 9, kind: input, shape index: {}]   ;;  %s11780_s10 = inlined_call_operand.vmem [shape: f32[4,1,32], index: 10, kind: input, shape index: {}]   ;;  %s11781_s11 = inlined_call_operand.vmem [shape: f32[4,1,32], index: 11, kind: input, shape index: {}]   ;;  %s11782_s12 = inlined_call_operand.vmem [shape: f32[4,1,32], index: 12, kind: input, shape index: {}]   ;;  %s11783_s13 = inlined_call_operand.vmem [shape: bf16[4,32,128], index: 13, kind: input, shape index: {}]   ;;  %s11784_s14 = inlined_call_operand.vmem [shape: f32[4,1,128], index: 14, kind: input, shape index: {}]   ;;  %s11785_s15 = inlined_call_operand.vmem [shape: bf16[4,128,32], index: 15, kind: input, shape index: {}]   ;;  %s11786_s16 = inlined_call_operand.vmem [shape: f32[4,1,32], index: 16, kind: input, shape index: {}]   ;;  %s11787_s17 = inlined_call_operand.hbm [shape: f32[2,32,32], index: 17, kind: output, shape index: {}]  }
   0x1   :  { %11808 = sst [smem:[#allocation18_spill]] %s11770_s0 }
   0x2   :  { %11809 = sst [smem:[#allocation19_spill]] %s11771_s1 }
   0x3   :  { %11810 = sst [smem:[#allocation20_spill]] %s11775_s5 }
   0x4   :  { %11811 = sst [smem:[#allocation21_spill]] %s11776_s6 }
   0x5   :  { %11812 = sst [smem:[#allocation22_spill]] %s11777_s7 }
   0x6   :  { %11813 = sst [smem:[#allocation23_spill]] %s11779_s9 }
   0x7   :  { %11814 = sst [smem:[#allocation24_spill]] %s11787_s17 }
   0x8   :  { %22 = vsyncpa [#allocation3], 0  ;;  %s8951_s24 = smov 0   ;;  %s8953_s25 = smov 0  }
   0x9   :  { %s8955_s26 = smov 0  }
   0xa LB: > { %11815 = sst [smem:[#allocation5_spill]] %s8843_s25  ;;  %s37_s28 = sadd.s32 1, %s8843_s25  ;;  %s8847_s26 = sphi %s8955_s26, %s28_s26   ;;  %s8843_s25 = sphi %s8953_s25, %s11880_s25   ;;  %s8839_s24 = sphi %s8951_s24, %s11879_s24  }
   0xb   : > { %11816 = sst [smem:[#allocation6_spill]] %s8847_s26  ;;  %p38_p0 = scmp.ge.s32.totalorder %s37_s28, 4 }
   0xc   : > { %p8021_p1 = scmp.ge.s32.totalorder %s8847_s26, 1  ;;  %p606_p2 = scmp.lt.s32.totalorder %s8847_s26, 5 }
   0xd   : > { %s11882_s28 = smov (%p38_p0, %s37_s28), 0 }
   0xe   : > { %11817 = sst [smem:[#allocation7_spill]] %s11882_s28  ;;  %p607_p3 = pnand %p8021_p1, %p606_p2 }
  0x10   : > { %610 = sbr.rel (%p607_p3) target bundleno = 3006 (0xbbe), region = 88 }
  0x15   : > { %p705_p4 = scmp.lt.s32.totalorder %s8839_s24, 3  ;;  %s11820_s7 = sld [smem:[#allocation22_spill]] }
  0x16   : > { %s11821_s9 = sld [smem:[#allocation23_spill]]  ;;  %p8030_p5 = scmp.ne.s32.totalorder %s8839_s24, 0 }
  0x17   : > { %s8970_s29 = scalar_select %p705_p4, %s8839_s24, 3 }
  0x18   : > { %s11824_s18 = sld [smem:[#allocation18_spill]] (!%p8030_p5) }
  0x19   : > { %s8173_s21 = sshll.u32 %s8970_s29, 4  ;;  %s729_s6 = scalar_lea.vmem %s11781_s11, %s8970_s29 }
  0x1a   : > { %s748_s22 = scalar_lea.vmem %s11786_s16, %s8970_s29  ;;  %754 = sbr.rel (%p8030_p5) target bundleno = 257 (0x101), region = 92 }
  0x1b   : > { %s8988_s28 = scalar_lea.vmem %s11820_s7, %s8173_s21  ;;  %s9010_s7 = scalar_lea.vmem %s11783_s13, %s8173_s21 }
  0x1c   : > { %s8993_s26 = scalar_lea.vmem %s11821_s9, %s8173_s21  ;;  %s740_s9 = scalar_lea.vmem %s11784_s14, %s8970_s29 }
  0x1d   : > { %11822 = sst [smem:[#allocation8_spill]] %s8993_s26  ;;  %s8176_s26 = sshll.u32 %s8970_s29, 6 }
  0x1e   : > { %s9020_s19 = scalar_lea.vmem %s11785_s15, %s8176_s26  ;;  %s11823_s21 = sld [smem:[#allocation19_spill]] (!%p8030_p5) }
  0x1f   : > { %v755_v3 = vld [vmem:[%s11824_s18] sm:$0xff]  ;;  %v756_v4 = vld [vmem:[%s11824_s18 + $0x8] sm:$0xff]  ;;  %vm800_vm0 = vcmask 523264   ;;  %v757_v7 = vld [vmem:[%s11824_s18 + $0x10] sm:$0xff]  ;;  %vm862_vm1 = vcmask 261120  }
  0x20   : > { %v759_v5 = vpack.c.bf16 %v756_v4, %v755_v3  ;;  %v758_v8 = vld [vmem:[%s11824_s18 + $0x18] sm:$0xff]  ;;  %v8038_v10 = vld [vmem:[%s11773_s3] ss:$0 sm:$0xff]  ;;  %v874_v11 = vld [vmem:[%s11774_s4 + $0x10] sm:$0xff] }
  0x21   : > { %v760_v9 = vpack.c.bf16 %v758_v8, %v757_v7  ;;  %v875_v12 = vld [vmem:[%s11774_s4 + $0x18] sm:$0xff]  ;;  %v876_v13 = vadd.f32 %v8038_v10, %v874_v11  ;;  %v8031_v15 = vld [vmem:[%s11772_s2] ss:$0 sm:$0xff]  ;;  %v857_v23 = vld [vmem:[%s11774_s4 + $0x8] sm:$0xff] }
  0x22   : > { %8285 = vmatprep.mubr.msk.bf16.mxu0 %vm800_vm0, %v759_v5  ;;  %v877_v14 = vadd.f32 %v8038_v10, %v875_v12  ;;  %v856_v17 = vld [vmem:[%s11774_s4] sm:$0xff] }
  0x23   : > { %878 = vst.msk [vmem:[#allocation2 + $0x10] sm:$0xff] %vm862_vm1, %v876_v13  ;;  %880 = vst.msk [vmem:[#allocation2 + $0x30] sm:$0xff] %vm862_vm1, %v876_v13 }
  0x24   : > { %v8535_v0 = vld [vmem:[%s11823_s21 + $0x18] sm:$0xff]   ;;  %v8536_v1 = vld [vmem:[%s11823_s21 + $0x10] sm:$0xff]   ;;  %v8537_v2 = vld [vmem:[%s11823_s21 + $0x8] sm:$0xff]   ;;  %879 = vst.msk [vmem:[#allocation2 + $0x18] sm:$0xff] %vm862_vm1, %v877_v14 }
  0x25   : > { %8277 = vmatprep.subr.bf16.mxu0 %v8535_v0  ;;  %v8538_v6 = vld [vmem:[%s11823_s21] sm:$0xff]   ;;  %881 = vst.msk [vmem:[#allocation2 + $0x38] sm:$0xff] %vm862_vm1, %v877_v14 }
  0x26   : > { %8278 = vmatpush3.bf16.msra.mxu0 %v8535_v0 }
  0x27   : > { %8279 = vmatprep.subr.bf16.mxu0 %v8536_v1 }
  0x2a   : > { %8280 = vmatpush3.bf16.msra.mxu0 %v8536_v1 }
  0x2b   : > { %8281 = vmatprep.subr.bf16.mxu0 %v8537_v2 }
  0x2e   : > { %8282 = vmatpush3.bf16.msra.mxu0 %v8537_v2 }
  0x2f   : > { %8283 = vmatprep.subr.bf16.mxu0 %v8538_v6 }
  0x32   : > { %8284 = vmatpush3.bf16.msra.mxu0 %v8538_v6 }
  0x35   : > { %8286 = vmatmul.mubr.msk.bf16.vlgmr.msra.gmra.mxu0 %vm800_vm0, %v760_v9 }
  0xf5   : > { %v8287_v16 = vpop.f32.mrf.mxu0 }
  0xf6   : > { %v850_v18 = vadd.f32 %v8287_v16, %v8031_v15 }
  0xf7   : > { %v841_v19 = vpop.f32.mrf.mxu0 }
  0xf8   : > { %v860_v20 = vadd.f32 %v856_v17, %v850_v18  ;;  %v842_v21 = vadd.f32 %v8031_v15, %v841_v19 }
  0xf9   : > { %v8288_v22 = vpop.f32.mrf.mxu0 }
  0xfa   : > { %865 = vst.msk [vmem:[#allocation2 + $0x20] sm:$0xff] %vm862_vm1, %v860_v20  ;;  %v858_v24 = vadd.f32 %v856_v17, %v842_v21  ;;  %v853_v25 = vadd.f32 %v8288_v22, %v8031_v15 }
  0xfb   : > { %v844_v26 = vpop.f32.mrf.mxu0 }
  0xfc   : > { %863 = vst.msk [vmem:[#allocation2] sm:$0xff] %vm862_vm1, %v858_v24  ;;  %v861_v27 = vadd.f32 %v857_v23, %v853_v25  ;;  %v845_v28 = vadd.f32 %v8031_v15, %v844_v26 }
  0xfe   : > { %866 = vst.msk [vmem:[#allocation2 + $0x28] sm:$0xff] %vm862_vm1, %v861_v27  ;;  %v859_v29 = vadd.f32 %v857_v23, %v845_v28 }
 0x100   : > { %864 = vst.msk [vmem:[#allocation2 + $0x8] sm:$0xff] %vm862_vm1, %v859_v29 }
 0x101 PF: > { %vm926_vm2 = vcmask 261120   ;;  %v884_v31 = vld [vmem:[#allocation2 + $0x10] sm:$0xff]  ;;  %v885_v35 = vld [vmem:[#allocation2 + $0x18] sm:$0xff]  ;;  %v886_v36 = vld [vmem:[#allocation2 + $0x20] sm:$0xff]  ;;  %s11825_s5 = sld [smem:[#allocation20_spill]]  ;;  %s11829_s17 = scalar_lea.vmem %s11778_s8, %s8970_s29  ;;  %vm4743_vm3 = vcmask 64512  }
 0x102   : > { %v933_v34 = vsel %vm926_vm2, %v884_v31, 0.0  ;;  %v936_v39 = vsel %vm926_vm2, %v885_v35, 0.0  ;;  %v939_v40 = vsel %vm926_vm2, %v886_v36, 0.0  ;;  %v888_v42 = vld [vmem:[#allocation2 + $0x30] sm:$0xff]  ;;  %v889_v43 = vld [vmem:[#allocation2 + $0x38] sm:$0xff]  ;;  %v8599_v22 = vld [vmem:[%s8988_s28 + $0x8] sm:$0xff]  }
 0x103   : > { %v882_v30 = vld [vmem:[#allocation2] sm:$0xff]  ;;  %934 = vadd.xlane.f32.xlu1 %v933_v34  ;;  %v945_v44 = vsel %vm926_vm2, %v888_v42, 0.0  ;;  %v948_v45 = vsel %vm926_vm2, %v889_v43, 0.0  ;;  %8289 = vmatprep.subr.bf16.mxu0 %v8599_v22  ;;  %s11827_s1 = sld [smem:[#allocation21_spill]]  ;;  %s8849_s26 = smov 112   ;;  %vm7264_vm4 = vcmask 130048  }
 0x104   : > { %v927_v33 = vsel %vm926_vm2, %v882_v30, 0.0  ;;  %v8600_v23 = vld [vmem:[%s8988_s28] sm:$0xff]   ;;  %8290 = vmatpush3.bf16.msra.mxu0 %v8599_v22  ;;  %s8850_s28 = smov 120   ;;  %s8851_s25 = smov 104   ;;  %vm7273_vm5 = vcmask 195584  }
 0x105   : > { %v887_v37 = vld [vmem:[#allocation2 + $0x28] sm:$0xff]  ;;  %928 = vadd.xlane.f32.xlu0 %v927_v33  ;;  %8291 = vmatprep.subr.bf16.mxu0 %v8600_v23  ;;  %s8856_s20 = smov 8   ;;  %s11871_s27 = sld [smem:[#allocation8_spill]] }
 0x106   : > { %v942_v41 = vsel %vm926_vm2, %v887_v37, 0.0 }
 0x107   : > { %v883_v32 = vld [vmem:[#allocation2 + $0x8] sm:$0xff]  ;;  %937 = vadd.xlane.f32.xlu1 %v936_v39  ;;  %s11826_s24 = scalar_lea.vmem %s11825_s5, %s8970_s29  ;;  %s8852_s5 = smov 96  }
 0x108   : > { %v930_v38 = vsel %vm926_vm2, %v883_v32, 0.0  ;;  %8292 = vmatpush3.bf16.msra.mxu0 %v8600_v23 }
 0x109   : > { %931 = vadd.xlane.f32.xlu0 %v930_v38  ;;  %s11828_s23 = scalar_lea.vmem %s11827_s1, %s8970_s29  ;;  %s8857_s1 = smov 16  }
 0x10b   : > { %943 = vadd.xlane.f32.xlu1 %v942_v41 }
 0x10d   : > { %940 = vadd.xlane.f32.xlu0 %v939_v40 }
 0x10f   : > { %949 = vadd.xlane.f32.xlu1 %v948_v45 }
 0x111   : > { %946 = vadd.xlane.f32.xlu0 %v945_v44 }
 0x18c   : > { %v935_v47 = vpop.xlane.xlu1 %934 }
 0x18d   : > { %v954_v49 = vmul.f32 0.03125, %v935_v47 }
 0x18e   : > { %v929_v46 = vpop.xlane.xlu0 %928 }
 0x18f   : > { %v952_v48 = vmul.f32 0.03125, %v929_v46  ;;  %v9086_v51 = vsub.f32 %v884_v31, %v954_v49 }
 0x190   : > { %v938_v53 = vpop.xlane.xlu1 %937 }
 0x191   : > { %v9084_v50 = vsub.f32 %v882_v30, %v952_v48  ;;  %v955_v55 = vmul.f32 0.03125, %v938_v53  ;;  %v970_v57 = vmul.f32 %v9086_v51, %v9086_v51 }
 0x192   : > { %v932_v52 = vpop.xlane.xlu0 %931 }
 0x193   : > { %v953_v54 = vmul.f32 0.03125, %v932_v52  ;;  %v968_v56 = vmul.f32 %v9084_v50, %v9084_v50  ;;  %v9094_v59 = vsub.f32 %v885_v35, %v955_v55  ;;  %v982_v63 = vsel %vm926_vm2, %v970_v57, 0.0  ;;  %v8039_v52 = vld [vmem:[%s11826_s24] ss:$0 sm:$0xff]  ;;  %s8855_s24 = smov 64  }
 0x194   : > { %v944_v62 = vpop.xlane.xlu1 %943  ;;  %v8040_v57 = vld [vmem:[%s11828_s23] ss:$0 sm:$0xff]  ;;  %s8858_s23 = smov 24  }
 0x195   : > { %v9092_v58 = vsub.f32 %v883_v32, %v953_v54  ;;  %v976_v60 = vsel %vm926_vm2, %v968_v56, 0.0  ;;  %v957_v1 = vmul.f32 0.03125, %v944_v62  ;;  %v971_v3 = vmul.f32 %v9094_v59, %v9094_v59 }
 0x196   : > { %977 = vadd.xlane.f32.xlu0 %v976_v60  ;;  %v941_v61 = vpop.xlane.xlu0 %940 }
 0x197   : > { %v956_v0 = vmul.f32 0.03125, %v941_v61  ;;  %v969_v2 = vmul.f32 %v9092_v58, %v9092_v58  ;;  %v9104_v5 = vsub.f32 %v887_v37, %v957_v1  ;;  %v985_v9 = vsel %vm926_vm2, %v971_v3, 0.0 }
 0x198   : > { %v950_v8 = vpop.xlane.xlu1 %949 }
 0x199   : > { %v9102_v4 = vsub.f32 %v886_v36, %v956_v0  ;;  %v979_v6 = vsel %vm926_vm2, %v969_v2, 0.0  ;;  %v959_v11 = vmul.f32 0.03125, %v950_v8  ;;  %v973_v13 = vmul.f32 %v9104_v5, %v9104_v5 }
 0x19a   : > { %983 = vadd.xlane.f32.xlu0 %v982_v63  ;;  %980 = vadd.xlane.f32.xlu1 %v979_v6  ;;  %v947_v7 = vpop.xlane.xlu0 %946 }
 0x19b   : > { %v958_v10 = vmul.f32 0.03125, %v947_v7  ;;  %v972_v12 = vmul.f32 %v9102_v4, %v9102_v4  ;;  %v9114_v15 = vsub.f32 %v889_v43, %v959_v11  ;;  %v991_v17 = vsel %vm926_vm2, %v973_v13, 0.0 }
 0x19d   : > { %v9112_v14 = vsub.f32 %v888_v42, %v958_v10  ;;  %v988_v16 = vsel %vm926_vm2, %v972_v12, 0.0  ;;  %v975_v19 = vmul.f32 %v9114_v15, %v9114_v15 }
 0x19e   : > { %986 = vadd.xlane.f32.xlu1 %v985_v9  ;;  %989 = vadd.xlane.f32.xlu0 %v988_v16 }
 0x19f   : > { %v974_v18 = vmul.f32 %v9112_v14, %v9112_v14  ;;  %v997_v21 = vsel %vm926_vm2, %v975_v19, 0.0 }
 0x1a1   : > { %v994_v20 = vsel %vm926_vm2, %v974_v18, 0.0 }
 0x1a2   : > { %992 = vadd.xlane.f32.xlu1 %v991_v17  ;;  %995 = vadd.xlane.f32.xlu0 %v994_v20 }
 0x1a6   : > { %998 = vadd.xlane.f32.xlu1 %v997_v21 }
 0x21f   : > { %v978_v24 = vpop.xlane.xlu0 %977 }
 0x220   : > { %v1000_v25 = vmul.f32 0.03125, %v978_v24 }
 0x222   : > { %v1008_v26 = vadd.f32 1e-05, %v1000_v25 }
 0x223   : > { %v981_v27 = vpop.xlane.xlu1 %980  ;;  %v984_v28 = vpop.xlane.xlu0 %983 }
 0x224   : > { %8613 = vrsqrt.f32 %v1008_v26  ;;  %v1001_v29 = vmul.f32 0.03125, %v981_v27  ;;  %v1002_v30 = vmul.f32 0.03125, %v984_v28 }
 0x226   : > { %v1009_v31 = vadd.f32 1e-05, %v1001_v29  ;;  %v1010_v32 = vadd.f32 1e-05, %v1002_v30 }
 0x227   : > { %v987_v33 = vpop.xlane.xlu1 %986  ;;  %v990_v34 = vpop.xlane.xlu0 %989 }
 0x228   : > { %8615 = vrsqrt.f32 %v1009_v31  ;;  %v1003_v35 = vmul.f32 0.03125, %v987_v33  ;;  %v1004_v36 = vmul.f32 0.03125, %v990_v34 }
 0x229   : > { %8617 = vrsqrt.f32 %v1010_v32 }
 0x22a   : > { %v1011_v37 = vadd.f32 1e-05, %v1003_v35  ;;  %v1012_v38 = vadd.f32 1e-05, %v1004_v36 }
 0x22b   : > { %v993_v39 = vpop.xlane.xlu1 %992  ;;  %v996_v40 = vpop.xlane.xlu0 %995 }
 0x22c   : > { %8619 = vrsqrt.f32 %v1011_v37  ;;  %v1005_v41 = vmul.f32 0.03125, %v993_v39  ;;  %v1006_v42 = vmul.f32 0.03125, %v996_v40 }
 0x22d   : > { %8621 = vrsqrt.f32 %v1012_v38 }
 0x22e   : > { %v1013_v43 = vadd.f32 1e-05, %v1005_v41  ;;  %v1014_v44 = vadd.f32 1e-05, %v1006_v42 }
 0x22f   : > { %v999_v45 = vpop.xlane.xlu1 %998 }
 0x230   : > { %8623 = vrsqrt.f32 %v1013_v43  ;;  %v1007_v46 = vmul.f32 0.03125, %v999_v45  ;;  %v8853_v45 = vmov 1983009808  }
 0x231   : > { %v8614_v47 = vpop.eup %8613  ;;  %8625 = vrsqrt.f32 %v1014_v44 }
 0x232   : > { %v1015_v48 = vadd.f32 1e-05, %v1007_v46  ;;  %v1024_v49 = vmul.f32 %v8614_v47, %v9084_v50  ;;  %v1242_v46 = vunpack.c.l.s4 %v8853_v45  ;;  %v1244_v47 = vlaneseq }
 0x234   : > { %8627 = vrsqrt.f32 %v1015_v48  ;;  %v1038_v56 = vmul.f32 %v8039_v52, %v1024_v49  ;;  %v8854_v48 = vmov 1934713408  }
 0x235   : > { %v8616_v53 = vpop.eup %8615  ;;  %v1274_v49 = vunpack.c.l.s4 %v8854_v48 }
 0x236   : > { %v8618_v54 = vpop.eup %8617  ;;  %v1025_v55 = vmul.f32 %v8616_v53, %v9092_v58  ;;  %v1052_v63 = vadd.f32 %v8040_v57, %v1038_v56 }
 0x237   : > { %v1026_v60 = vmul.f32 %v8618_v54, %v9086_v51  ;;  %v1243_v54 = vunpack.c.0.s8 %v1242_v46 }
 0x238   : > { %v1039_v61 = vmul.f32 %v8039_v52, %v1025_v55  ;;  %v1245_v55 = vshrl.u32 %v1244_v47, 7 }
 0x239   : > { %v8620_v50 = vpop.eup %8619  ;;  %v1040_v2 = vmul.f32 %v8039_v52, %v1026_v60  ;;  %v1275_v60 = vunpack.c.0.s8 %v1274_v49 }
 0x23a   : > { %v8622_v62 = vpop.eup %8621  ;;  %v1053_v0 = vadd.f32 %v8040_v57, %v1039_v61  ;;  %v1027_v1 = vmul.f32 %v8620_v50, %v9094_v59 }
 0x23b   : > { %v1028_v3 = vmul.f32 %v8622_v62, %v9102_v4  ;;  %v1054_v9 = vadd.f32 %v8040_v57, %v1040_v2  ;;  %v9263_v62 = vsub.s32 %v1243_v54, %v1245_v55 }
 0x23c   : > { %v1060_v6 = vpack.c.bf16 %v1053_v0, %v1052_v63  ;;  %v1041_v58 = vmul.f32 %v8039_v52, %v1027_v1 }
 0x23d   : > { %v8624_v7 = vpop.eup %8623  ;;  %v1042_v11 = vmul.f32 %v8039_v52, %v1028_v3 }
 0x23e   : > { %v8626_v8 = vpop.eup %8625  ;;  %8293 = vmatprep.mubr.msk.bf16.mxu0 %vm926_vm2, %v1060_v6  ;;  %v1055_v10 = vadd.f32 %v8040_v57, %v1041_v58  ;;  %v1029_v51 = vmul.f32 %v8624_v7, %v9104_v5  ;;  %v9277_v58 = vsub.s32 %v1275_v60, %v1245_v55 }
 0x23f   : > { %v1030_v12 = vmul.f32 %v8626_v8, %v9112_v14  ;;  %v1056_v4 = vadd.f32 %v8040_v57, %v1042_v11  ;;  %v8041_v14 = vld [vmem:[%s11829_s17] ss:$0 sm:$0xff]  ;;  %s11872_s17 = scalar_lea.vmem %s11780_s10, %s8970_s29 }
 0x240   : > { %v1061_v13 = vpack.c.bf16 %v1055_v10, %v1054_v9  ;;  %v1043_v16 = vmul.f32 %v8039_v52, %v1029_v51 }
 0x241   : > { %v8628_v59 = vpop.eup %8627  ;;  %v1044_v19 = vmul.f32 %v8039_v52, %v1030_v12 }
 0x242   : > { %8294 = vmatmul.mubr.msk.bf16.vlgmr.msra.gmra.mxu0 %vm926_vm2, %v1061_v13  ;;  %v1057_v17 = vadd.f32 %v8040_v57, %v1043_v16  ;;  %v1031_v18 = vmul.f32 %v8628_v59, %v9114_v15 }
 0x243   : > { %v1058_v22 = vadd.f32 %v8040_v57, %v1044_v19 }
 0x244   : > { %v1062_v20 = vpack.c.bf16 %v1057_v17, %v1056_v4  ;;  %v1045_v21 = vmul.f32 %v8039_v52, %v1031_v18 }
 0x246   : > { %8297 = vmatprep.mubr.msk.bf16.mxu0 %vm926_vm2, %v1062_v20  ;;  %v1059_v5 = vadd.f32 %v8040_v57, %v1045_v21 }
 0x248   : > { %v1063_v23 = vpack.c.bf16 %v1059_v5, %v1058_v22 }
 0x24a   : > { %8298 = vmatmul.mubr.msk.bf16.gmra.mxu0 %vm926_vm2, %v1063_v23 }
 0x302   : > { %v8295_v24 = vpop.f32.mrf.mxu0 }
 0x303   : > { %v9153_v25 = vadd.f32 %v8295_v24, %v8041_v14 }
 0x304   : > { %v1128_v26 = vpop.f32.mrf.mxu0 }
 0x305   : > { %1195 = vrot.lane.b32.xlu1 %v9153_v25, %s8849_s26  ;;  %1171 = vrot.lane.b32.xlu0 %v9153_v25, %s8850_s28  ;;  %v9165_v28 = vadd.f32 %v8041_v14, %v1128_v26 }
 0x306   : > { %v8296_v15 = vpop.f32.mrf.mxu0 }
 0x307   : > { %v9159_v27 = vadd.f32 %v8296_v15, %v8041_v14 }
 0x308   : > { %v1131_v29 = vpop.f32.mrf.mxu0 }
 0x309   : > { %1219 = vrot.lane.b32.xlu0 %v9153_v25, %s8851_s25  ;;  %1173 = vrot.lane.b32.xlu1 %v9159_v27, %s8850_s28  ;;  %v9175_v30 = vadd.f32 %v8041_v14, %v1131_v29 }
 0x30a   : > { %v8299_v31 = vpop.f32.mrf.mxu0 }
 0x30b   : > { %v9189_v32 = vadd.f32 %v8299_v31, %v8041_v14 }
 0x30c   : > { %v1144_v33 = vpop.f32.mrf.mxu0 }
 0x30d   : > { %1197 = vrot.lane.b32.xlu1 %v9159_v27, %s8849_s26  ;;  %1167 = vrot.lane.b32.xlu0 %v9165_v28, %s8850_s28  ;;  %v9205_v36 = vadd.f32 %v8041_v14, %v1144_v33 }
 0x30e   : > { %v8300_v34 = vpop.f32.mrf.mxu0 }
 0x30f   : > { %v9199_v35 = vadd.f32 %v8300_v34, %v8041_v14 }
 0x310   : > { %v1147_v37 = vpop.f32.mrf.mxu0 }
 0x311   : > { %1221 = vrot.lane.b32.xlu1 %v9159_v27, %s8851_s25  ;;  %1191 = vrot.lane.b32.xlu0 %v9165_v28, %s8849_s26  ;;  %v9215_v38 = vadd.f32 %v8041_v14, %v1147_v37 }
 0x315   : > { %1169 = vrot.lane.b32.xlu1 %v9175_v30, %s8850_s28  ;;  %1215 = vrot.lane.b32.xlu0 %v9165_v28, %s8851_s25 }
 0x319   : > { %1193 = vrot.lane.b32.xlu1 %v9175_v30, %s8849_s26  ;;  %2347 = vrot.lane.b32.xlu0 %v9153_v25, %s8852_s5 }
 0x31d   : > { %1217 = vrot.lane.b32.xlu1 %v9175_v30, %s8851_s25  ;;  %2343 = vrot.lane.b32.xlu0 %v9165_v28, %s8852_s5 }
 0x321   : > { %2349 = vrot.lane.b32.xlu1 %v9159_v27, %s8852_s5  ;;  %1179 = vrot.lane.b32.xlu0 %v9189_v32, %s8850_s28 }
 0x325   : > { %2345 = vrot.lane.b32.xlu1 %v9175_v30, %s8852_s5  ;;  %1203 = vrot.lane.b32.xlu0 %v9189_v32, %s8849_s26 }
 0x329   : > { %1227 = vrot.lane.b32.xlu0 %v9189_v32, %s8851_s25  ;;  %1181 = vrot.lane.b32.xlu1 %v9199_v35, %s8850_s28 }
 0x32d   : > { %1205 = vrot.lane.b32.xlu1 %v9199_v35, %s8849_s26  ;;  %1175 = vrot.lane.b32.xlu0 %v9205_v36, %s8850_s28 }
 0x331   : > { %1229 = vrot.lane.b32.xlu1 %v9199_v35, %s8851_s25  ;;  %1199 = vrot.lane.b32.xlu0 %v9205_v36, %s8849_s26 }
 0x335   : > { %1177 = vrot.lane.b32.xlu1 %v9215_v38, %s8850_s28  ;;  %1223 = vrot.lane.b32.xlu0 %v9205_v36, %s8851_s25 }
 0x339   : > { %1201 = vrot.lane.b32.xlu1 %v9215_v38, %s8849_s26 }
 0x33d   : > { %1225 = vrot.lane.b32.xlu1 %v9215_v38, %s8851_s25 }
 0x377   : > { %v9225_v39 = vpop.permute.xlu1 %1195  ;;  %v9227_v40 = vpop.permute.xlu0 %1171 }
 0x378   : > { %2363 = vrot.lane.b32.xlu0 %v9227_v40, %s8852_s5 }
 0x37b   : > { %v9231_v41 = vpop.permute.xlu1 %1173  ;;  %v9233_v42 = vpop.permute.xlu0 %1219 }
 0x37c   : > { %2365 = vrot.lane.b32.xlu1 %v9231_v41, %s8852_s5  ;;  %2379 = vrot.lane.b32.xlu0 %v9225_v39, %s8852_s5 }
 0x37f   : > { %v9239_v43 = vpop.permute.xlu1 %1197  ;;  %v9241_v44 = vpop.permute.xlu0 %1167 }
 0x380   : > { %2381 = vrot.lane.b32.xlu1 %v9239_v43, %s8852_s5  ;;  %2395 = vrot.lane.b32.xlu0 %v9233_v42, %s8852_s5 }
 0x383   : > { %v9247_v52 = vpop.permute.xlu1 %1221  ;;  %v9249_v53 = vpop.permute.xlu0 %1191 }
 0x384   : > { %2397 = vrot.lane.b32.xlu1 %v9247_v52, %s8852_s5  ;;  %2359 = vrot.lane.b32.xlu0 %v9241_v44, %s8852_s5  ;;  %v1239_v56 = vcombine.low %v9165_v28, %v9249_v53  ;;  %v1240_v57 = vcombine.high %v9165_v28, %v9249_v53 }
 0x386   : > { %v1247_v1 = vrot.slane %v1239_v56, %v9263_v62  ;;  %v1254_v2 = vrot.slane %v1240_v57, %v9263_v62 }
 0x387   : > { %v9259_v61 = vpop.permute.xlu1 %1169  ;;  %v9261_v50 = vpop.permute.xlu0 %1215 }
 0x388   : > { %v1255_v63 = vcombine.low %v9241_v44, %v9261_v50  ;;  %v1256_v0 = vcombine.high %v9241_v44, %v9261_v50  ;;  %2361 = vrot.lane.b32.xlu1 %v9259_v61, %s8852_s5  ;;  %2375 = vrot.lane.b32.xlu0 %v9249_v53, %s8852_s5 }
 0x38a   : > { %v1263_v3 = vrot.slane %v1255_v63, %v9263_v62  ;;  %v1270_v6 = vrot.slane %v1256_v0, %v9263_v62 }
 0x38b   : > { %v9279_v7 = vpop.permute.xlu1 %1193  ;;  %v9281_v8 = vpop.permute.xlu0 %2347 }
 0x38c   : > { %v1271_v9 = vcombine.low %v1247_v1, %v1263_v3  ;;  %v1272_v10 = vcombine.high %v1247_v1, %v1263_v3  ;;  %v1287_v51 = vcombine.low %v1254_v2, %v1270_v6  ;;  %v1288_v11 = vcombine.high %v1254_v2, %v1270_v6  ;;  %2377 = vrot.lane.b32.xlu1 %v9279_v7, %s8852_s5 }
 0x38d   : > { %2391 = vrot.lane.b32.xlu0 %v9261_v50, %s8852_s5  ;;  %v1307_v22 = vcombine.low %v9175_v30, %v9279_v7  ;;  %v1308_v5 = vcombine.high %v9175_v30, %v9279_v7 }
 0x38e   : > { %v1279_v12 = vrot.slane %v1271_v9, %v9277_v58  ;;  %v1286_v13 = vrot.slane %v1272_v10, %v9277_v58  ;;  %v1295_v16 = vrot.slane %v1287_v51, %v9277_v58  ;;  %v1302_v59 = vrot.slane %v1288_v11, %v9277_v58 }
 0x38f   : > { %v9291_v4 = vpop.permute.xlu1 %1217  ;;  %v9293_v17 = vpop.permute.xlu0 %2343  ;;  %v1315_v15 = vrot.slane %v1307_v22, %v9263_v62  ;;  %v1322_v37 = vrot.slane %v1308_v5, %v9263_v62 }
 0x390   : > { %v1783_v18 = vcombine.low %v1279_v12, %v1286_v13  ;;  %v8048_v19 = vcombine.high %v1279_v12, %v1286_v13  ;;  %v1799_v20 = vcombine.low %v1295_v16, %v1302_v59  ;;  %v8049_v21 = vcombine.high %v1295_v16, %v1302_v59  ;;  %2393 = vrot.lane.b32.xlu1 %v9291_v4, %s8852_s5 }
 0x391   : > { %2355 = vrot.lane.b32.xlu0 %v9189_v32, %s8852_s5  ;;  %v1323_v23 = vcombine.low %v9259_v61, %v9291_v4  ;;  %v1324_v14 = vcombine.high %v9259_v61, %v9291_v4 }
 0x392   : > { %v1790_v24 = vrot.slane %v1783_v18, %v9263_v62  ;;  %v1798_v26 = vrot.slane %v8048_v19, %v9263_v62  ;;  %v1806_v33 = vrot.slane %v1799_v20, %v9263_v62  ;;  %v1814_v34 = vrot.slane %v8049_v21, %v9263_v62 }
 0x393   : > { %v9310_v29 = vpop.permute.xlu1 %2349  ;;  %v9312_v31 = vpop.permute.xlu0 %1179  ;;  %v1331_v45 = vrot.slane %v1323_v23, %v9263_v62  ;;  %v1338_v46 = vrot.slane %v1324_v14, %v9263_v62 }
 0x394   : > { %2357 = vrot.lane.b32.xlu1 %v9199_v35, %s8852_s5  ;;  %v1816_v47 = vcombine.high %v1790_v24, %v1798_v26  ;;  %v1832_v48 = vcombine.high %v1806_v33, %v1814_v34  ;;  %v1815_v21 = vcombine.low %v1790_v24, %v1798_v26  ;;  %v1831_v22 = vcombine.low %v1806_v33, %v1814_v34 }
 0x395   : > { %2351 = vrot.lane.b32.xlu0 %v9205_v36, %s8852_s5  ;;  %v1339_v49 = vcombine.low %v1315_v15, %v1331_v45  ;;  %v1340_v54 = vcombine.high %v1315_v15, %v1331_v45  ;;  %v1355_v55 = vcombine.low %v1322_v37, %v1338_v46  ;;  %v1356_v56 = vcombine.high %v1322_v37, %v1338_v46 }
 0x396   : > { %v9328_v63 = vrot.slane %v1816_v47, %v9277_v58  ;;  %v9331_v0 = vrot.slane %v1832_v48, %v9277_v58  ;;  %v1823_v46 = vrot.slane %v1815_v21, %v9277_v58  ;;  %v1839_v24 = vrot.slane %v1831_v22, %v9277_v58 }
 0x397   : > { %v9323_v57 = vpop.permute.xlu1 %2345  ;;  %v9325_v60 = vpop.permute.xlu0 %1203  ;;  %v1347_v1 = vrot.slane %v1339_v49, %v9277_v58  ;;  %v1354_v2 = vrot.slane %v1340_v54, %v9277_v58  ;;  %v1363_v3 = vrot.slane %v1355_v55, %v9277_v58  ;;  %v1370_v6 = vrot.slane %v1356_v56, %v9277_v58 }
 0x398   : > { %2353 = vrot.lane.b32.xlu1 %v9215_v38, %s8852_s5  ;;  %v1850_v16 = vcombine.high %v9328_v63, %v9331_v0  ;;  %v1847_v49 = vcombine.low %v1823_v46, %v1839_v24  ;;  %v1376_v21 = vcombine.high %v9153_v25, %v9225_v39 }
 0x399   : > { %2371 = vrot.lane.b32.xlu0 %v9312_v31, %s8852_s5  ;;  %v1851_v9 = vcombine.low %v1347_v1, %v1354_v2  ;;  %v8050_v10 = vcombine.high %v1347_v1, %v1354_v2  ;;  %v1867_v51 = vcombine.low %v1363_v3, %v1370_v6  ;;  %v8051_v11 = vcombine.high %v1363_v3, %v1370_v6 }
 0x39a   : > { %v1849_v2 = vcombine.low %v9328_v63, %v9331_v0 }
 0x39b   : > { %v9341_v12 = vpop.permute.xlu1 %1181  ;;  %v9343_v13 = vpop.permute.xlu0 %1227  ;;  %v1858_v59 = vrot.slane %v1851_v9, %v9263_v62  ;;  %v1866_v18 = vrot.slane %v8050_v10, %v9263_v62  ;;  %v1874_v19 = vrot.slane %v1867_v51, %v9263_v62  ;;  %v1882_v20 = vrot.slane %v8051_v11, %v9263_v62 }
 0x39c   : > { %2373 = vrot.lane.b32.xlu1 %v9341_v12, %s8852_s5  ;;  %v1391_v11 = vcombine.low %v9227_v40, %v9233_v42 }
 0x39d   : > { %2387 = vrot.lane.b32.xlu0 %v9325_v60, %s8852_s5  ;;  %v1883_v5 = vcombine.low %v1858_v59, %v1866_v18  ;;  %v1899_v14 = vcombine.low %v1874_v19, %v1882_v20  ;;  %v1884_v26 = vcombine.high %v1858_v59, %v1866_v18  ;;  %v1900_v47 = vcombine.high %v1874_v19, %v1882_v20 }
 0x39e   : > { %v1392_v18 = vcombine.high %v9227_v40, %v9233_v42  ;;  %v1375_v19 = vcombine.low %v9153_v25, %v9225_v39  ;;  %v1459_v20 = vcombine.low %v9231_v41, %v9247_v52  ;;  %v1399_v22 = vrot.slane %v1391_v11, %v9263_v62 }
 0x39f   : > { %v9355_v23 = vpop.permute.xlu1 %1205  ;;  %v9357_v15 = vpop.permute.xlu0 %1175  ;;  %v1891_v37 = vrot.slane %v1883_v5, %v9277_v58  ;;  %v1907_v45 = vrot.slane %v1899_v14, %v9277_v58  ;;  %v1898_v54 = vrot.slane %v1884_v26, %v9277_v58  ;;  %v1914_v1 = vrot.slane %v1900_v47, %v9277_v58 }
 0x3a0   : > { %2389 = vrot.lane.b32.xlu1 %v9355_v23, %s8852_s5  ;;  %v1443_v5 = vcombine.low %v9159_v27, %v9239_v43  ;;  %v1406_v14 = vrot.slane %v1392_v18, %v9263_v62  ;;  %v1460_v26 = vcombine.high %v9231_v41, %v9247_v52 }
 0x3a1   : > { %2403 = vrot.lane.b32.xlu0 %v9343_v13, %s8852_s5  ;;  %v1915_v34 = vcombine.low %v1891_v37, %v1907_v45  ;;  %v1917_v3 = vcombine.low %v1898_v54, %v1914_v1  ;;  %v1918_v6 = vcombine.high %v1898_v54, %v1914_v1  ;;  %v1916_v47 = vcombine.high %v1891_v37, %v1907_v45 }
 0x3a2   : > { %v1467_v54 = vrot.slane %v1459_v20, %v9263_v62  ;;  %v1474_v45 = vrot.slane %v1460_v26, %v9263_v62 }
 0x3a3   : > { %v9367_v33 = vpop.permute.xlu1 %1229  ;;  %v9373_v48 = vpop.permute.xlu0 %1199  ;;  %v2327_v56 = vpack.c.bf16 %v1915_v34, %v1847_v49  ;;  %v2331_v10 = vpack.c.bf16 %v1917_v3, %v1849_v2  ;;  %v1848_v34 = vcombine.high %v1823_v46, %v1839_v24  ;;  %v1383_v49 = vrot.slane %v1375_v19, %v9263_v62 }
 0x3a4   : > { %2405 = vrot.lane.b32.xlu1 %v9367_v33, %s8852_s5  ;;  %v1451_v3 = vrot.slane %v1443_v5, %v9263_v62 }
 0x3a5   : > { %2367 = vrot.lane.b32.xlu0 %v9357_v15, %s8852_s5  ;;  %8305 = vmatprep.mubr.msk.bf16.mxu0 %vm4743_vm3, %v2327_v56  ;;  %v1444_v56 = vcombine.high %v9159_v27, %v9239_v43  ;;  %v9426_v1 = vpack.c.bf16 %v1916_v47, %v1848_v34  ;;  %v1407_v2 = vcombine.low %v1383_v49, %v1399_v22 }
 0x3a6   : > { %8321 = vmatprep.mubr.msk.bf16.mxu1 %vm4743_vm3, %v2331_v10  ;;  %v1408_v10 = vcombine.high %v1383_v49, %v1399_v22  ;;  %v1475_v24 = vcombine.low %v1451_v3, %v1467_v54 }
 0x3a7   : > { %v9376_v55 = vpop.permute.xlu1 %1177  ;;  %v9388_v51 = vpop.permute.xlu0 %1223  ;;  %v1415_v11 = vrot.slane %v1407_v2, %v9277_v58 }
 0x3a8   : > { %2369 = vrot.lane.b32.xlu1 %v9376_v55, %s8852_s5  ;;  %11830 = vst [vmem:[#allocation9_spill] sm:$0xff] %v9388_v51  ;;  %v1422_v18 = vrot.slane %v1408_v10, %v9277_v58 }
 0x3a9   : > { %2383 = vrot.lane.b32.xlu0 %v9373_v48, %s8852_s5 }
 0x3aa   : > { %v8052_v26 = vcombine.high %v1415_v11, %v1422_v18 }
 0x3ab   : > { %v9386_v9 = vpop.permute.xlu1 %1201 }
 0x3ac   : > { %2385 = vrot.lane.b32.xlu1 %v9386_v9, %s8852_s5  ;;  %v9460_v63 = vrot.slane %v8052_v26, %v9263_v62 }
 0x3ad   : > { %2399 = vrot.lane.b32.xlu0 %v9388_v51, %s8852_s5 }
 0x3af   : > { %v9397_v59 = vpop.permute.xlu1 %1225 }
 0x3b0   : > { %11831 = vst [vmem:[#allocation10_spill] sm:$0xff] %v9397_v59  ;;  %2401 = vrot.lane.b32.xlu1 %v9397_v59, %s8852_s5  ;;  %s11873_s5 = scalar_lea.vmem %s11782_s12, %s8970_s29  ;;  %s11874_s29 = sld [smem:[#allocation6_spill]] }
 0x3b1   : > { %3547 = vrot.lane.b32.xlu0 %v9153_v25, %s8855_s24  ;;  %v1390_v25 = vrot.slane %v1376_v21, %v9263_v62 }
 0x3b3   : > { %v1423_v46 = vcombine.low %v1390_v25, %v1406_v14  ;;  %v1424_v37 = vcombine.high %v1390_v25, %v1406_v14  ;;  %v1919_v14 = vcombine.low %v1415_v11, %v1422_v18  ;;  %v1595_v11 = vcombine.low %v9376_v55, %v9397_v59 }
 0x3b4   : > { %3549 = vrot.lane.b32.xlu1 %v9159_v27, %s8855_s24  ;;  %v1458_v27 = vrot.slane %v1444_v56, %v9263_v62  ;;  %v1596_v18 = vcombine.high %v9376_v55, %v9397_v59 }
 0x3b5   : > { %3579 = vrot.lane.b32.xlu0 %v9225_v39, %s8855_s24  ;;  %v1476_v39 = vcombine.high %v1451_v3, %v1467_v54  ;;  %v1431_v19 = vrot.slane %v1423_v46, %v9277_v58  ;;  %v1438_v20 = vrot.slane %v1424_v37, %v9277_v58 }
 0x3b6   : > { %v1491_v21 = vcombine.low %v1458_v27, %v1474_v45  ;;  %v1492_v5 = vcombine.high %v1458_v27, %v1474_v45  ;;  %v1663_v27 = vcombine.low %v9312_v31, %v9343_v13 }
 0x3b7   : > { %v1490_v22 = vrot.slane %v1476_v39, %v9277_v58  ;;  %v1935_v34 = vcombine.low %v1431_v19, %v1438_v20  ;;  %v8053_v47 = vcombine.high %v1431_v19, %v1438_v20  ;;  %v1664_v19 = vcombine.high %v9312_v31, %v9343_v13 }
 0x3b8   : > { %3563 = vrot.lane.b32.xlu1 %v9227_v40, %s8855_s24  ;;  %v1483_v40 = vrot.slane %v1475_v24, %v9277_v58  ;;  %v1506_v49 = vrot.slane %v1492_v5, %v9277_v58  ;;  %v1648_v24 = vcombine.high %v9189_v32, %v9325_v60  ;;  %v1716_v20 = vcombine.high %v9199_v35, %v9355_v23 }
 0x3b9   : > { %3595 = vrot.lane.b32.xlu0 %v9233_v42, %s8855_s24  ;;  %v9448_v42 = vpack.c.bf16 %v1918_v6, %v1850_v16  ;;  %v9463_v0 = vrot.slane %v1935_v34, %v9263_v62  ;;  %v1579_v5 = vcombine.low %v9215_v38, %v9386_v9 }
 0x3ba   : > { %v1987_v54 = vcombine.low %v1483_v40, %v1490_v22  ;;  %v8054_v25 = vcombine.high %v1483_v40, %v1490_v22  ;;  %v1527_v40 = vcombine.low %v9357_v15, %v9388_v51  ;;  %v1528_v22 = vcombine.high %v9357_v15, %v9388_v51 }
 0x3bb   : > { %v1662_v26 = vrot.slane %v1648_v24, %v9263_v62 }
 0x3bc   : > { %3565 = vrot.lane.b32.xlu1 %v9231_v41, %s8855_s24  ;;  %v1499_v41 = vrot.slane %v1491_v21, %v9277_v58  ;;  %v9471_v16 = vrot.slane %v1987_v54, %v9263_v62  ;;  %v1732_v21 = vcombine.high %v9341_v12, %v9367_v33  ;;  %v1603_v54 = vrot.slane %v1595_v11, %v9263_v62 }
 0x3bd   : > { %3543 = vrot.lane.b32.xlu0 %v9165_v28, %s8855_s24  ;;  %v9457_v28 = vrot.slane %v1919_v14, %v9263_v62  ;;  %v1580_v14 = vcombine.high %v9215_v38, %v9386_v9 }
 0x3be   : > { %v2003_v6 = vcombine.low %v1499_v41, %v1506_v49  ;;  %v8055_v56 = vcombine.high %v1499_v41, %v1506_v49  ;;  %v1512_v41 = vcombine.high %v9205_v36, %v9373_v48  ;;  %v1671_v49 = vrot.slane %v1663_v27, %v9263_v62 }
 0x3bf   : > { %v1951_v2 = vcombine.low %v9457_v28, %v9460_v63  ;;  %v1594_v24 = vrot.slane %v1580_v14, %v9263_v62 }
 0x3c0   : > { %3581 = vrot.lane.b32.xlu1 %v9239_v43, %s8855_s24  ;;  %v9466_v43 = vrot.slane %v8053_v47, %v9263_v62  ;;  %v9488_v10 = vrot.slane %v8055_v56, %v9263_v62  ;;  %v1511_v47 = vcombine.low %v9205_v36, %v9373_v48  ;;  %v1526_v11 = vrot.slane %v1512_v41, %v9263_v62 }
 0x3c1   : > { %3559 = vrot.lane.b32.xlu0 %v9241_v44, %s8855_s24  ;;  %v9474_v44 = vrot.slane %v8054_v25, %v9263_v62  ;;  %v1610_v25 = vrot.slane %v1596_v18, %v9263_v62 }
 0x3c2   : > { %v1967_v3 = vcombine.low %v9463_v0, %v9466_v43  ;;  %v1519_v27 = vrot.slane %v1511_v47, %v9263_v62 }
 0x3c3   : > { %v2019_v46 = vcombine.low %v9471_v16, %v9474_v44 }
 0x3c4   : > { %3597 = vrot.lane.b32.xlu1 %v9247_v52, %s8855_s24  ;;  %v9485_v52 = vrot.slane %v2003_v6, %v9263_v62  ;;  %v9502_v37 = vrot.slane %v1967_v3, %v9277_v58  ;;  %v1678_v6 = vrot.slane %v1664_v19, %v9263_v62  ;;  %v1746_v3 = vrot.slane %v1732_v21, %v9263_v62 }
 0x3c5   : > { %3575 = vrot.lane.b32.xlu0 %v9249_v53, %s8855_s24  ;;  %v1647_v53 = vcombine.low %v9189_v32, %v9325_v60 }
 0x3c6   : > { %v2035_v45 = vcombine.low %v9485_v52, %v9488_v10  ;;  %v1696_v47 = vcombine.high %v1662_v26, %v1678_v6 }
 0x3c7   : > { %v1655_v39 = vrot.slane %v1647_v53, %v9263_v62  ;;  %v1587_v53 = vrot.slane %v1579_v5, %v9263_v62 }
 0x3c8   : > { %3545 = vrot.lane.b32.xlu1 %v9175_v30, %s8855_s24  ;;  %v9499_v30 = vrot.slane %v1951_v2, %v9277_v58  ;;  %v1730_v2 = vrot.slane %v1716_v20, %v9263_v62  ;;  %v1628_v20 = vcombine.high %v1594_v24, %v1610_v25 }
 0x3c9   : > { %3591 = vrot.lane.b32.xlu0 %v9261_v50, %s8855_s24  ;;  %v1731_v50 = vcombine.low %v9341_v12, %v9367_v33  ;;  %v1611_v18 = vcombine.low %v1587_v53, %v1603_v54  ;;  %v1612_v19 = vcombine.high %v1587_v53, %v1603_v54  ;;  %v1679_v21 = vcombine.low %v1655_v39, %v1671_v49 }
 0x3ca   : > { %v1764_v5 = vcombine.high %v1730_v2, %v1746_v3  ;;  %v1710_v53 = vrot.slane %v1696_v47, %v9277_v58 }
 0x3cb   : > { %v1739_v34 = vrot.slane %v1731_v50, %v9263_v62 }
 0x3cc   : > { %3561 = vrot.lane.b32.xlu1 %v9259_v61, %s8855_s24  ;;  %v9513_v61 = vrot.slane %v2019_v46, %v9277_v58  ;;  %v1535_v46 = vrot.slane %v1527_v40, %v9263_v62  ;;  %v1680_v40 = vcombine.high %v1655_v39, %v1671_v49  ;;  %v1619_v39 = vrot.slane %v1611_v18, %v9277_v58 }
 0x3cd   : > { %3555 = vrot.lane.b32.xlu0 %v9189_v32, %s8855_s24  ;;  %v1715_v32 = vcombine.low %v9199_v35, %v9355_v23  ;;  %v1626_v49 = vrot.slane %v1612_v19, %v9277_v58 }
 0x3ce   : > { %v1543_v14 = vcombine.low %v1519_v27, %v1535_v46  ;;  %v1544_v51 = vcombine.high %v1519_v27, %v1535_v46 }
 0x3cf   : > { %v1723_v56 = vrot.slane %v1715_v32, %v9263_v62  ;;  %v1627_v32 = vcombine.low %v1594_v24, %v1610_v25  ;;  %v1642_v25 = vrot.slane %v1628_v20, %v9277_v58  ;;  %v8058_v27 = vcombine.high %v1619_v39, %v1626_v49 }
 0x3d0   : > { %3577 = vrot.lane.b32.xlu1 %v9279_v7, %s8855_s24  ;;  %v9552_v7 = vrot.slane %v2035_v45, %v9277_v58 }
 0x3d1   : > { %3587 = vrot.lane.b32.xlu0 %v9325_v60, %s8855_s24  ;;  %v1542_v60 = vrot.slane %v1528_v22, %v9263_v62  ;;  %v1747_v45 = vcombine.low %v1723_v56, %v1739_v34  ;;  %v1748_v50 = vcombine.high %v1723_v56, %v1739_v34  ;;  %v1763_v22 = vcombine.low %v1730_v2, %v1746_v3 }
 0x3d2   : > { %v1695_v34 = vcombine.low %v1662_v26, %v1678_v6  ;;  %v1635_v54 = vrot.slane %v1627_v32, %v9277_v58  ;;  %v1687_v56 = vrot.slane %v1679_v21, %v9277_v58  ;;  %v1778_v6 = vrot.slane %v1764_v5, %v9277_v58 }
 0x3d3   : > { %v1560_v59 = vcombine.high %v1526_v11, %v1542_v60  ;;  %v1755_v41 = vrot.slane %v1747_v45, %v9277_v58  ;;  %v1771_v26 = vrot.slane %v1763_v22, %v9277_v58  ;;  %v1551_v2 = vrot.slane %v1543_v14, %v9277_v58 }
 0x3d4   : > { %3593 = vrot.lane.b32.xlu1 %v9291_v4, %s8855_s24  ;;  %v1559_v4 = vcombine.low %v1526_v11, %v1542_v60  ;;  %v1703_v60 = vrot.slane %v1695_v34, %v9277_v58  ;;  %v2139_v11 = vcombine.low %v1635_v54, %v1642_v25  ;;  %v9606_v34 = vrot.slane %v8058_v27, %v9263_v62 }
 0x3d5   : > { %3603 = vrot.lane.b32.xlu0 %v9343_v13, %s8855_s24  ;;  %v1762_v13 = vrot.slane %v1748_v50, %v9277_v58  ;;  %v1574_v46 = vrot.slane %v1560_v59, %v9277_v58  ;;  %v2123_v50 = vcombine.low %v1619_v39, %v1626_v49  ;;  %v2275_v32 = vcombine.low %v1771_v26, %v1778_v6 }
 0x3d6   : > { %v1567_v3 = vrot.slane %v1559_v4, %v9277_v58  ;;  %v8063_v59 = vcombine.high %v1771_v26, %v1778_v6  ;;  %v2207_v22 = vcombine.low %v1703_v60, %v1710_v53  ;;  %v8061_v5 = vcombine.high %v1703_v60, %v1710_v53 }
 0x3d7   : > { %v2259_v24 = vcombine.low %v1755_v41, %v1762_v13  ;;  %v8062_v45 = vcombine.high %v1755_v41, %v1762_v13  ;;  %v9603_v4 = vrot.slane %v2123_v50, %v9263_v62  ;;  %v9609_v47 = vrot.slane %v2139_v11, %v9263_v62 }
 0x3d8   : > { %3557 = vrot.lane.b32.xlu1 %v9199_v35, %s8855_s24  ;;  %v1694_v35 = vrot.slane %v1680_v40, %v9277_v58  ;;  %v8057_v40 = vcombine.high %v1567_v3, %v1574_v46  ;;  %v9615_v41 = vrot.slane %v2275_v32, %v9263_v62  ;;  %v9618_v13 = vrot.slane %v8063_v59, %v9263_v62 }
 0x3d9   : > { %3551 = vrot.lane.b32.xlu0 %v9205_v36, %s8855_s24  ;;  %v1558_v36 = vrot.slane %v1544_v51, %v9277_v58  ;;  %v8059_v51 = vcombine.high %v1635_v54, %v1642_v25  ;;  %v9595_v14 = vrot.slane %v2259_v24, %v9263_v62  ;;  %v2036_v39 = vcombine.high %v9485_v52, %v9488_v10 }
 0x3da   : > { %v2191_v18 = vcombine.low %v1687_v56, %v1694_v35  ;;  %v8060_v19 = vcombine.high %v1687_v56, %v1694_v35  ;;  %v9636_v56 = vrot.slane %v8057_v40, %v9263_v62  ;;  %v9648_v52 = vrot.slane %v8061_v5, %v9263_v62 }
 0x3db   : > { %v2055_v20 = vcombine.low %v1551_v2, %v1558_v36  ;;  %v8056_v21 = vcombine.high %v1551_v2, %v1558_v36  ;;  %v1952_v10 = vcombine.high %v9457_v28, %v9460_v63  ;;  %v1968_v35 = vcombine.high %v9463_v0, %v9466_v43 }
 0x3dc   : > { %3571 = vrot.lane.b32.xlu1 %v9312_v31, %s8855_s24  ;;  %v2071_v31 = vcombine.low %v1567_v3, %v1574_v46  ;;  %v2155_v26 = vcombine.low %v9603_v4, %v9606_v34  ;;  %v2051_v2 = vcombine.low %v9513_v61, %v9552_v7  ;;  %v2050_v3 = vrot.slane %v2036_v39, %v9277_v58 }
 0x3dd   : > { %3567 = vrot.lane.b32.xlu0 %v9357_v15, %s8855_s24  ;;  %v9598_v15 = vrot.slane %v8062_v45, %v9263_v62  ;;  %v9627_v49 = vrot.slane %v2055_v20, %v9263_v62  ;;  %v9630_v54 = vrot.slane %v8056_v21, %v9263_v62  ;;  %v2307_v43 = vcombine.low %v9615_v41, %v9618_v13 }
 0x3de   : > { %v9633_v25 = vrot.slane %v2071_v31, %v9263_v62  ;;  %v1983_v46 = vcombine.low %v9499_v30, %v9502_v37  ;;  %v1966_v24 = vrot.slane %v1952_v10, %v9277_v58  ;;  %v1982_v45 = vrot.slane %v1968_v35, %v9277_v58 }
 0x3df   : > { %v2087_v28 = vcombine.low %v9627_v49, %v9630_v54  ;;  %v2291_v0 = vcombine.low %v9595_v14, %v9598_v15  ;;  %v2163_v50 = vrot.slane %v2155_v26, %v9277_v58  ;;  %v9692_v59 = vrot.slane %v2307_v43, %v9277_v58 }
 0x3e0   : > { %3573 = vrot.lane.b32.xlu1 %v9341_v12, %s8855_s24  ;;  %v9612_v12 = vrot.slane %v8059_v51, %v9263_v62  ;;  %v2103_v63 = vcombine.low %v9633_v25, %v9636_v56  ;;  %v9682_v11 = vpack.c.bf16 %v2051_v2, %v1983_v46  ;;  %v2052_v21 = vcombine.high %v9513_v61, %v9552_v7 }
 0x3e1   : > { %3583 = vrot.lane.b32.xlu0 %v9373_v48, %s8855_s24  ;;  %v2020_v48 = vcombine.high %v9471_v16, %v9474_v44  ;;  %v9639_v16 = vrot.slane %v2191_v18, %v9263_v62  ;;  %v9642_v44 = vrot.slane %v8060_v19, %v9263_v62  ;;  %v2095_v18 = vrot.slane %v2087_v28, %v9277_v58 }
 0x3e2   : > { %v2171_v6 = vcombine.low %v9609_v47, %v9612_v12  ;;  %v2111_v19 = vrot.slane %v2103_v63, %v9277_v58  ;;  %v9689_v32 = vrot.slane %v2291_v0, %v9277_v58  ;;  %v1985_v5 = vcombine.low %v1966_v24, %v1982_v45 }
 0x3e3   : > { %v2034_v36 = vrot.slane %v2020_v48, %v9277_v58  ;;  %v2223_v60 = vcombine.low %v9639_v16, %v9642_v44  ;;  %v1986_v48 = vcombine.high %v1966_v24, %v1982_v45  ;;  %v1984_v35 = vcombine.high %v9499_v30, %v9502_v37 }
 0x3e4   : > { %3589 = vrot.lane.b32.xlu1 %v9355_v23, %s8855_s24  ;;  %v9645_v23 = vrot.slane %v2207_v22, %v9263_v62  ;;  %v2179_v27 = vrot.slane %v2171_v6, %v9277_v58  ;;  %v2088_v26 = vcombine.high %v9627_v49, %v9630_v54  ;;  %v2104_v61 = vcombine.high %v9633_v25, %v9636_v56 }
 0x3e5   : > { %v2053_v51 = vcombine.low %v2034_v36, %v2050_v3  ;;  %v2054_v20 = vcombine.high %v2034_v36, %v2050_v3  ;;  %v9697_v31 = vrot.slane %v2223_v60, %v9277_v58  ;;  %v2156_v7 = vcombine.high %v9603_v4, %v9606_v34 }
 0x3e6   : > { %v2187_v39 = vcombine.low %v2163_v50, %v2179_v27  ;;  %v2188_v10 = vcombine.high %v2163_v50, %v2179_v27  ;;  %v2119_v6 = vcombine.low %v2095_v18, %v2111_v19  ;;  %v2323_v2 = vcombine.low %v9689_v32, %v9692_v59 }
 0x3e7   : > { %v2120_v36 = vcombine.high %v2095_v18, %v2111_v19  ;;  %v2172_v30 = vcombine.high %v9609_v47, %v9612_v12  ;;  %v9716_v37 = vpack.c.bf16 %v2053_v51, %v1985_v5  ;;  %v9718_v49 = vpack.c.bf16 %v2052_v21, %v1984_v35 }
 0x3e8   : > { %3605 = vrot.lane.b32.xlu1 %v9367_v33, %s8855_s24  ;;  %v2239_v33 = vcombine.low %v9645_v23, %v9648_v52  ;;  %v9720_v54 = vpack.c.bf16 %v2054_v20, %v1986_v48  ;;  %v9726_v56 = vpack.c.bf16 %v2187_v39, %v2119_v6  ;;  %v9731_v47 = vrot.slane %v2088_v26, %v9277_v58 }
 0x3e9   : > { %v9728_v3 = vpack.c.bf16 %v2188_v10, %v2120_v36  ;;  %v9734_v12 = vrot.slane %v2104_v61, %v9277_v58  ;;  %v9737_v63 = vrot.slane %v2156_v7, %v9277_v58  ;;  %v9746_v60 = vrot.slane %v2172_v30, %v9277_v58 }
 0x3ea   : > { %v2364_v53 = vpop.permute.xlu0 %2363  ;;  %v9700_v40 = vrot.slane %v2239_v33, %v9277_v58  ;;  %v2324_v45 = vcombine.high %v9689_v32, %v9692_v59  ;;  %v2224_v50 = vcombine.high %v9639_v16, %v9642_v44  ;;  %v2240_v32 = vcombine.high %v9645_v23, %v9648_v52 }
 0x3ec   : > { %3553 = vrot.lane.b32.xlu1 %v9215_v38, %s8855_s24  ;;  %v2255_v4 = vcombine.low %v9697_v31, %v9700_v40  ;;  %v2256_v0 = vcombine.high %v9697_v31, %v9700_v40 }
 0x3ee   : > { %v2366_v38 = vpop.permute.xlu1 %2365  ;;  %v2380_v22 = vpop.permute.xlu0 %2379  ;;  %v9743_v46 = vpack.c.bf16 %v2323_v2, %v2255_v4 }
 0x3ef   : > { %v2575_v34 = vcombine.low %v9281_v8, %v2380_v22 }
 0x3f0   : > { %3569 = vrot.lane.b32.xlu1 %v9376_v55, %s8855_s24  ;;  %v2576_v55 = vcombine.high %v9281_v8, %v2380_v22 }
 0x3f2   : > { %v2382_v25 = vpop.permute.xlu1 %2381  ;;  %v2396_v28 = vpop.permute.xlu0 %2395  ;;  %v2590_v27 = vrot.slane %v2576_v55, %v9263_v62 }
 0x3f3   : > { %v2591_v43 = vcombine.low %v2364_v53, %v2396_v28  ;;  %v2592_v8 = vcombine.high %v2364_v53, %v2396_v28  ;;  %v2643_v33 = vcombine.low %v9310_v29, %v2382_v25  ;;  %v2644_v24 = vcombine.high %v9310_v29, %v2382_v25 }
 0x3f4   : > { %3585 = vrot.lane.b32.xlu1 %v9386_v9, %s8855_s24  ;;  %v2583_v53 = vrot.slane %v2575_v34, %v9263_v62 }
 0x3f5   : > { %v2599_v9 = vrot.slane %v2591_v43, %v9263_v62  ;;  %v2606_v51 = vrot.slane %v2592_v8, %v9263_v62  ;;  %v2651_v5 = vrot.slane %v2643_v33, %v9263_v62  ;;  %v2658_v48 = vrot.slane %v2644_v24, %v9263_v62 }
 0x3f6   : > { %v2398_v18 = vpop.permute.xlu1 %2397  ;;  %v9758_v21 = vpop.permute.xlu0 %2359 }
 0x3f7   : > { %v2659_v19 = vcombine.low %v2366_v38, %v2398_v18  ;;  %v2660_v20 = vcombine.high %v2366_v38, %v2398_v18  ;;  %v2607_v59 = vcombine.low %v2583_v53, %v2599_v9  ;;  %v2608_v31 = vcombine.high %v2583_v53, %v2599_v9 }
 0x3f8   : > { %v2623_v40 = vcombine.low %v2590_v27, %v2606_v51  ;;  %v2624_v22 = vcombine.high %v2590_v27, %v2606_v51  ;;  %v9778_v9 = vpack.c.bf16 %v2324_v45, %v2256_v0  ;;  %v2292_v51 = vcombine.high %v9595_v14, %v9598_v15 }
 0x3f9   : > { %v2667_v39 = vrot.slane %v2659_v19, %v9263_v62  ;;  %v2674_v38 = vrot.slane %v2660_v20, %v9263_v62  ;;  %v2615_v10 = vrot.slane %v2607_v59, %v9277_v58  ;;  %v2622_v35 = vrot.slane %v2608_v31, %v9277_v58 }
 0x3fa   : > { %v2631_v26 = vrot.slane %v2623_v40, %v9277_v58  ;;  %v2638_v61 = vrot.slane %v2624_v22, %v9277_v58  ;;  %v2362_v7 = vpop.permute.xlu1 %2361  ;;  %v2376_v4 = vpop.permute.xlu0 %2375  ;;  %11832 = vst [vmem:[#allocation11_spill] sm:$0xff] %v9778_v9  ;;  %v2308_v18 = vcombine.high %v9615_v41, %v9618_v13 }
 0x3fb   : > { %v2675_v6 = vcombine.low %v2651_v5, %v2667_v39  ;;  %v2676_v2 = vcombine.high %v2651_v5, %v2667_v39  ;;  %v2691_v36 = vcombine.low %v2658_v48, %v2674_v38  ;;  %v2692_v30 = vcombine.high %v2658_v48, %v2674_v38 }
 0x3fc   : > { %v3119_v34 = vcombine.low %v2615_v10, %v2622_v35  ;;  %v8068_v55 = vcombine.high %v2615_v10, %v2622_v35  ;;  %v3135_v25 = vcombine.low %v2631_v26, %v2638_v61  ;;  %v8069_v28 = vcombine.high %v2631_v26, %v2638_v61 }
 0x3fd   : > { %v2683_v43 = vrot.slane %v2675_v6, %v9277_v58  ;;  %v2690_v8 = vrot.slane %v2676_v2, %v9277_v58  ;;  %v2699_v33 = vrot.slane %v2691_v36, %v9277_v58  ;;  %v2706_v24 = vrot.slane %v2692_v30, %v9277_v58 }
 0x3fe   : > { %v2378_v53 = vpop.permute.xlu1 %2377  ;;  %v2439_v22 = vcombine.low %v9293_v17, %v2376_v4  ;;  %v2440_v5 = vcombine.high %v9293_v17, %v2376_v4  ;;  %v9789_v45 = vrot.slane %v3119_v34, %v9263_v62  ;;  %v9792_v39 = vrot.slane %v8068_v55, %v9263_v62 }
 0x3ff   : > { %v3187_v19 = vcombine.low %v2683_v43, %v2690_v8  ;;  %v8070_v20 = vcombine.high %v2683_v43, %v2690_v8  ;;  %v3203_v59 = vcombine.low %v2699_v33, %v2706_v24  ;;  %v8071_v31 = vcombine.high %v2699_v33, %v2706_v24  ;;  %v2392_v40 = vpop.permute.xlu0 %2391 }
 0x400   : > { %v2507_v48 = vcombine.low %v9323_v57, %v2378_v53  ;;  %v2508_v0 = vcombine.high %v9323_v57, %v2378_v53  ;;  %v9795_v38 = vrot.slane %v3135_v25, %v9263_v62  ;;  %v9798_v10 = vrot.slane %v8069_v28, %v9263_v62 }
 0x401   : > { %v9801_v35 = vrot.slane %v3187_v19, %v9263_v62  ;;  %v9804_v17 = vrot.slane %v8070_v20, %v9263_v62  ;;  %v9807_v57 = vrot.slane %v3203_v59, %v9263_v62  ;;  %v9810_v26 = vrot.slane %v8071_v31, %v9263_v62 }
 0x402   : > { %v2394_v61 = vpop.permute.xlu1 %2393  ;;  %v2455_v6 = vcombine.low %v9758_v21, %v2392_v40  ;;  %v2456_v2 = vcombine.high %v9758_v21, %v2392_v40  ;;  %v2447_v34 = vrot.slane %v2439_v22, %v9263_v62  ;;  %v2454_v55 = vrot.slane %v2440_v5, %v9263_v62 }
 0x403   : > { %v2523_v36 = vcombine.low %v2362_v7, %v2394_v61  ;;  %v2524_v30 = vcombine.high %v2362_v7, %v2394_v61  ;;  %v9814_v4 = vpop.permute.xlu0 %2355  ;;  %v2515_v25 = vrot.slane %v2507_v48, %v9263_v62  ;;  %v2522_v28 = vrot.slane %v2508_v0, %v9263_v62 }
 0x404   : > { %v2463_v43 = vrot.slane %v2455_v6, %v9263_v62  ;;  %v2470_v8 = vrot.slane %v2456_v2, %v9263_v62  ;;  %v3151_v7 = vcombine.low %v9789_v45, %v9792_v39  ;;  %v3167_v53 = vcombine.low %v9795_v38, %v9798_v10 }
 0x405   : > { %v2531_v33 = vrot.slane %v2523_v36, %v9263_v62  ;;  %v2538_v21 = vrot.slane %v2524_v30, %v9263_v62  ;;  %v3219_v19 = vcombine.low %v9801_v35, %v9804_v17  ;;  %v3235_v20 = vcombine.low %v9807_v57, %v9810_v26 }
 0x406   : > { %v9824_v24 = vpop.permute.xlu1 %2357  ;;  %v2471_v59 = vcombine.low %v2447_v34, %v2463_v43  ;;  %v2472_v31 = vcombine.high %v2447_v34, %v2463_v43  ;;  %v2487_v40 = vcombine.low %v2454_v55, %v2470_v8  ;;  %v2488_v22 = vcombine.high %v2454_v55, %v2470_v8 }
 0x407   : > { %v9834_v5 = vpop.permute.xlu0 %2351  ;;  %v2539_v48 = vcombine.low %v2515_v25, %v2531_v33  ;;  %v2540_v0 = vcombine.high %v2515_v25, %v2531_v33  ;;  %v2555_v61 = vcombine.low %v2522_v28, %v2538_v21  ;;  %v2556_v6 = vcombine.high %v2522_v28, %v2538_v21 }
 0x408   : > { %v2479_v2 = vrot.slane %v2471_v59, %v9277_v58  ;;  %v2486_v36 = vrot.slane %v2472_v31, %v9277_v58  ;;  %v2495_v30 = vrot.slane %v2487_v40, %v9277_v58  ;;  %v2502_v27 = vrot.slane %v2488_v22, %v9277_v58 }
 0x409   : > { %v2547_v29 = vrot.slane %v2539_v48, %v9277_v58  ;;  %v2554_v34 = vrot.slane %v2540_v0, %v9277_v58  ;;  %v2563_v55 = vrot.slane %v2555_v61, %v9277_v58  ;;  %v2570_v43 = vrot.slane %v2556_v6, %v9277_v58 }
 0x40a   : > { %v9844_v8 = vpop.permute.xlu1 %2353  ;;  %v9847_v28 = vrot.slane %v3151_v7, %v9277_v58  ;;  %v9850_v33 = vrot.slane %v3167_v53, %v9277_v58  ;;  %v9853_v21 = vrot.slane %v3219_v19, %v9277_v58  ;;  %v9856_v59 = vrot.slane %v3235_v20, %v9277_v58 }
 0x40b   : > { %v2372_v25 = vpop.permute.xlu0 %2371  ;;  %v2983_v31 = vcombine.low %v2479_v2, %v2486_v36  ;;  %v8064_v40 = vcombine.high %v2479_v2, %v2486_v36  ;;  %v9862_v22 = vrot.slane %v2224_v50, %v9277_v58  ;;  %v2999_v48 = vcombine.low %v2495_v30, %v2502_v27 }
 0x40c   : > { %v8065_v53 = vcombine.high %v2495_v30, %v2502_v27  ;;  %v9870_v19 = vrot.slane %v2240_v32, %v9277_v58  ;;  %v9876_v20 = vrot.slane %v2292_v51, %v9277_v58  ;;  %v3051_v16 = vcombine.low %v2547_v29, %v2554_v34 }
 0x40d   : > { %11833 = vst [vmem:[#allocation12_spill] sm:$0xff] %v9862_v22  ;;  %v8066_v44 = vcombine.high %v2547_v29, %v2554_v34  ;;  %v3067_v50 = vcombine.low %v2563_v55, %v2570_v43  ;;  %v8067_v0 = vcombine.high %v2563_v55, %v2570_v43  ;;  %v3183_v27 = vcombine.low %v9847_v28, %v9850_v33 }
 0x40e   : > { %11834 = vst [vmem:[#allocation13_spill] sm:$0xff] %v9870_v19  ;;  %v2374_v61 = vpop.permute.xlu1 %2373  ;;  %v3251_v6 = vcombine.low %v9853_v21, %v9856_v59  ;;  %v3152_v23 = vcombine.high %v9789_v45, %v9792_v39  ;;  %v3168_v52 = vcombine.high %v9795_v38, %v9798_v10  ;;  %v9887_v15 = vrot.slane %v2983_v31, %v9263_v62 }
 0x40f   : > { %v2388_v14 = vpop.permute.xlu0 %2387  ;;  %v9890_v29 = vrot.slane %v8064_v40, %v9263_v62  ;;  %v3220_v32 = vcombine.high %v9801_v35, %v9804_v17  ;;  %v3236_v51 = vcombine.high %v9807_v57, %v9810_v26  ;;  %v9904_v38 = vrot.slane %v2999_v48, %v9263_v62 }
 0x410   : > { %v3528_v2 = vpack.c.bf16 %v3251_v6, %v3183_v27  ;;  %v9897_v36 = vrot.slane %v3152_v23, %v9277_v58  ;;  %v9900_v45 = vrot.slane %v3168_v52, %v9277_v58  ;;  %v2847_v39 = vcombine.low %v9814_v4, %v2388_v14 }
 0x411   : > { %v9907_v10 = vrot.slane %v3220_v32, %v9277_v58  ;;  %v9910_v35 = vrot.slane %v3236_v51, %v9277_v58  ;;  %v2848_v17 = vcombine.high %v9814_v4, %v2388_v14  ;;  %v9914_v26 = vrot.slane %v8065_v53, %v9263_v62 }
 0x412   : > { %v2390_v57 = vpop.permute.xlu1 %2389  ;;  %v9917_v30 = vrot.slane %v3051_v16, %v9263_v62  ;;  %v9920_v34 = vrot.slane %v8066_v44, %v9263_v62  ;;  %8477 = vmatprep.subr.msk.bf16.mxu0 %vm4743_vm3, %v3528_v2  ;;  %v4754_v55 = vsel %vm4743_vm3, %v3528_v2, 0  ;;  %v9925_v31 = vrot.slane %v3067_v50, %v9263_v62 }
 0x413   : > { %v2404_v43 = vpop.permute.xlu0 %2403  ;;  %v3185_v4 = vcombine.low %v9897_v36, %v9900_v45  ;;  %v3253_v40 = vcombine.low %v9907_v10, %v9910_v35  ;;  %8302 = vmatpush3.bf16.xpose.msra.mxu0 %v4754_v55  ;;  %v9932_v53 = vrot.slane %v8067_v0, %v9263_v62  ;;  %v2855_v16 = vrot.slane %v2847_v39, %v9263_v62 }
 0x414   : > { %v2863_v48 = vcombine.low %v2372_v25, %v2404_v43  ;;  %v2864_v44 = vcombine.high %v2372_v25, %v2404_v43  ;;  %v3015_v27 = vcombine.low %v9887_v15, %v9890_v29  ;;  %v2862_v50 = vrot.slane %v2848_v17, %v9263_v62 }
 0x415   : > { %v3532_v6 = vpack.c.bf16 %v3253_v40, %v3185_v4  ;;  %v2915_v23 = vcombine.low %v9824_v24, %v2390_v57  ;;  %v3031_v25 = vcombine.low %v9904_v38, %v9914_v26  ;;  %v2916_v17 = vcombine.high %v9824_v24, %v2390_v57 }
 0x416   : > { %v2871_v52 = vrot.slane %v2863_v48, %v9263_v62  ;;  %v2406_v14 = vpop.permute.xlu1 %2405  ;;  %v2878_v32 = vrot.slane %v2864_v44, %v9263_v62  ;;  %v3083_v24 = vcombine.low %v9917_v30, %v9920_v34 }
 0x417   : > { %v2931_v51 = vcombine.low %v2374_v61, %v2406_v14  ;;  %v2932_v2 = vcombine.high %v2374_v61, %v2406_v14  ;;  %v9941_v0 = vpop.permute.xlu0 %2367  ;;  %8481 = vmatprep.subr.msk.bf16.mxu1 %vm4743_vm3, %v3532_v6  ;;  %v4876_v39 = vsel %vm4743_vm3, %v3532_v6, 0  ;;  %v9953_v61 = vrot.slane %v2308_v18, %v9277_v58 }
 0x418   : > { %v2879_v55 = vcombine.low %v2855_v16, %v2871_v52  ;;  %v2880_v43 = vcombine.high %v2855_v16, %v2871_v52  ;;  %8318 = vmatpush3.bf16.xpose.msra.mxu1 %v4876_v39  ;;  %v2895_v4 = vcombine.low %v2862_v50, %v2878_v32  ;;  %v2896_v40 = vcombine.high %v2862_v50, %v2878_v32 }
 0x419   : > { %v2939_v48 = vrot.slane %v2931_v51, %v9263_v62  ;;  %v2946_v6 = vrot.slane %v2932_v2, %v9263_v62  ;;  %v2923_v16 = vrot.slane %v2915_v23, %v9263_v62  ;;  %v9964_v50 = vrot.slane %v3015_v27, %v9277_v58 }
 0x41a   : > { %v2887_v44 = vrot.slane %v2879_v55, %v9277_v58  ;;  %v2894_v14 = vrot.slane %v2880_v43, %v9277_v58  ;;  %v9960_v57 = vpop.permute.xlu1 %2369  ;;  %v9967_v41 = vrot.slane %v3031_v25, %v9277_v58  ;;  %v2930_v52 = vrot.slane %v2916_v17, %v9263_v62 }
 0x41b   : > { %v9969_v13 = vpop.permute.xlu0 %2383  ;;  %v9975_v32 = vrot.slane %v2895_v4, %v9277_v58  ;;  %v9978_v51 = vrot.slane %v2896_v40, %v9277_v58  ;;  %v3099_v27 = vcombine.low %v9925_v31, %v9932_v53  ;;  %v2947_v23 = vcombine.low %v2923_v16, %v2939_v48 }
 0x41c   : > { %v2948_v2 = vcombine.high %v2923_v16, %v2939_v48  ;;  %v11835_v25 = vcombine.low %v9731_v47, %v9734_v12  ;;  %v11836_v39 = vcombine.low %v9737_v63, %v9746_v60  ;;  %v3391_v43 = vcombine.low %v2887_v44, %v2894_v14 }
 0x41d   : > { %v8076_v4 = vcombine.high %v2887_v44, %v2894_v14  ;;  %v2963_v40 = vcombine.low %v2930_v52, %v2946_v6  ;;  %v9993_v18 = vrot.slane %v3083_v24, %v9277_v58  ;;  %v2964_v9 = vcombine.high %v2930_v52, %v2946_v6 }
 0x41e   : > { %v9988_v55 = vpack.c.bf16 %v11836_v39, %v11835_v25  ;;  %v9995_v7 = vpop.permute.xlu1 %2385  ;;  %v3047_v25 = vcombine.low %v9964_v50, %v9967_v41  ;;  %v3407_v44 = vcombine.low %v9975_v32, %v9978_v51  ;;  %v10008_v24 = vrot.slane %v3099_v27, %v9277_v58 }
 0x41f   : > { %v2400_v39 = vpop.permute.xlu0 %2399  ;;  %v3016_v17 = vcombine.high %v9887_v15, %v9890_v29  ;;  %v10013_v48 = vrot.slane %v2947_v23, %v9277_v58  ;;  %v10016_v6 = vrot.slane %v2948_v2, %v9277_v58  ;;  %v3032_v52 = vcombine.high %v9904_v38, %v9914_v26 }
 0x420   : > { %v3084_v16 = vcombine.high %v9917_v30, %v9920_v34  ;;  %v10023_v14 = vrot.slane %v3391_v43, %v9263_v62  ;;  %v10026_v27 = vrot.slane %v8076_v4, %v9263_v62  ;;  %v10029_v15 = vrot.slane %v2963_v40, %v9277_v58 }
 0x421   : > { %v3115_v29 = vcombine.low %v9993_v18, %v10008_v24  ;;  %v10034_v2 = vrot.slane %v3016_v17, %v9277_v58  ;;  %v10037_v38 = vrot.slane %v3032_v52, %v9277_v58  ;;  %v3100_v30 = vcombine.high %v9925_v31, %v9932_v53 }
 0x422   : > { %v2402_v23 = vpop.permute.xlu1 %2401  ;;  %v10040_v26 = vrot.slane %v3084_v16, %v9277_v58  ;;  %v3184_v4 = vcombine.high %v9847_v28, %v9850_v33  ;;  %v3252_v40 = vcombine.high %v9853_v21, %v9856_v59  ;;  %v2711_v17 = vcombine.low %v9834_v5, %v9969_v13 }
 0x423   : > { %v10044_v34 = vpop.permute.xlu0 %3547  ;;  %v3527_v43 = vpack.c.bf16 %v3115_v29, %v3047_v25  ;;  %v10053_v52 = vrot.slane %v3407_v44, %v9263_v62  ;;  %v10056_v16 = vrot.slane %v2964_v9, %v9277_v58  ;;  %v3459_v31 = vcombine.low %v10013_v48, %v10016_v6 }
 0x424   : > { %v10061_v53 = vrot.slane %v3100_v30, %v9277_v58  ;;  %v8078_v28 = vcombine.high %v10013_v48, %v10016_v6  ;;  %v3530_v21 = vpack.c.bf16 %v3252_v40, %v3184_v4  ;;  %v2712_v59 = vcombine.high %v9834_v5, %v9969_v13 }
 0x425   : > { %8478 = vmatprep.subr.msk.bf16.mxu0 %vm4743_vm3, %v3527_v43  ;;  %v4751_v33 = vsel %vm4743_vm3, %v3527_v43, 0  ;;  %v3049_v9 = vcombine.low %v10034_v2, %v10037_v38  ;;  %v2779_v48 = vcombine.low %v9844_v8, %v9995_v7  ;;  %v2727_v6 = vcombine.low %v9941_v0, %v2400_v39 }
 0x426   : > { %v10069_v25 = vpop.permute.xlu1 %3549  ;;  %v3117_v44 = vcombine.low %v10040_v26, %v10061_v53  ;;  %8304 = vmatpush3.bf16.xpose.msra.mxu0 %v4751_v33  ;;  %v2719_v29 = vrot.slane %v2711_v17, %v9263_v62  ;;  %v2780_v5 = vcombine.high %v9844_v8, %v9995_v7  ;;  %v2728_v13 = vcombine.high %v9941_v0, %v2400_v39 }
 0x427   : > { %8479 = vmatprep.subr.msk.bf16.mxu0 %vm4743_vm3, %v3530_v21  ;;  %v3116_v30 = vcombine.high %v9993_v18, %v10008_v24  ;;  %v2735_v4 = vrot.slane %v2727_v6, %v9263_v62  ;;  %v2795_v40 = vcombine.low %v9960_v57, %v2402_v23  ;;  %v2796_v33 = vcombine.high %v9960_v57, %v2402_v23  ;;  %v10088_v19 = vpop.permute.xlu0 %3579 }
 0x428   : > { %v3531_v43 = vpack.c.bf16 %v3117_v44, %v3049_v9  ;;  %v3475_v17 = vcombine.low %v10029_v15, %v10056_v16  ;;  %v2726_v22 = vrot.slane %v2712_v59, %v9263_v62  ;;  %v2742_v8 = vrot.slane %v2728_v13, %v9263_v62 }
 0x429   : > { %v3048_v7 = vcombine.high %v9964_v50, %v9967_v41  ;;  %v2743_v39 = vcombine.low %v2719_v29, %v2735_v4  ;;  %v2744_v24 = vcombine.high %v2719_v29, %v2735_v4  ;;  %v2803_v57 = vrot.slane %v2795_v40, %v9263_v62 }
 0x42a   : > { %v3564_v0 = vpop.permute.xlu1 %3563  ;;  %8482 = vmatprep.subr.msk.bf16.mxu1 %vm4743_vm3, %v3531_v43  ;;  %v4873_v18 = vsel %vm4743_vm3, %v3531_v43, 0  ;;  %v2787_v23 = vrot.slane %v2779_v48, %v9263_v62  ;;  %v2759_v9 = vcombine.low %v2726_v22, %v2742_v8  ;;  %v2760_v44 = vcombine.high %v2726_v22, %v2742_v8 }
 0x42b   : > { %8320 = vmatpush3.bf16.xpose.msra.mxu1 %v4873_v18  ;;  %v2810_v59 = vrot.slane %v2796_v33, %v9263_v62  ;;  %v8079_v6 = vcombine.high %v10029_v15, %v10056_v16  ;;  %v2794_v50 = vrot.slane %v2780_v5, %v9263_v62  ;;  %v4815_v41 = vsel %vm4743_vm3, %v3530_v21, 0  ;;  %v3596_v5 = vpop.permute.xlu0 %3595 }
 0x42c   : > { %v3529_v13 = vpack.c.bf16 %v3116_v30, %v3048_v7  ;;  %v2751_v43 = vrot.slane %v2743_v39, %v9277_v58  ;;  %v2758_v29 = vrot.slane %v2744_v24, %v9277_v58  ;;  %v2811_v48 = vcombine.low %v2787_v23, %v2803_v57 }
 0x42d   : > { %8306 = vmatmul.mubr.msk.bf16.vlgmr.msra.gmra.mxu0 %vm4743_vm3, %v9682_v11  ;;  %v3775_v22 = vcombine.low %v10044_v34, %v10088_v19  ;;  %v2767_v15 = vrot.slane %v2759_v9, %v9277_v58  ;;  %v2774_v16 = vrot.slane %v2760_v44, %v9277_v58  ;;  %v2812_v21 = vcombine.high %v2787_v23, %v2803_v57 }
 0x42e   : > { %v10111_v4 = vpop.permute.xlu1 %3565  ;;  %8310 = vmatpush3.bf16.xpose.msra.mxu0 %v4815_v41  ;;  %8313 = vmatprep.mubr.msk.bf16.mxu0 %vm4743_vm3, %v9426_v1  ;;  %v11837_v11 = vcombine.high %v9975_v32, %v9978_v51  ;;  %v10124_v40 = vrot.slane %v3459_v31, %v9263_v62  ;;  %v2827_v33 = vcombine.low %v2794_v50, %v2810_v59 }
 0x42f   : > { %8480 = vmatprep.subr.msk.bf16.mxu0 %vm4743_vm3, %v3529_v13  ;;  %v2828_v8 = vcombine.high %v2794_v50, %v2810_v59  ;;  %v10128_v7 = vrot.slane %v8078_v28, %v9263_v62  ;;  %v10131_v1 = vrot.slane %v3475_v17, %v9263_v62  ;;  %v10134_v18 = vrot.slane %v8079_v6, %v9263_v62 }
 0x430   : > { %v10121_v30 = vrot.slane %v11837_v11, %v9263_v62  ;;  %v3776_v32 = vcombine.high %v10044_v34, %v10088_v19  ;;  %v3255_v51 = vcombine.low %v2751_v43, %v2758_v29  ;;  %v8072_v39 = vcombine.high %v2751_v43, %v2758_v29  ;;  %v10161_v43 = vpop.permute.xlu0 %3543 }
 0x431   : > { %v2819_v31 = vrot.slane %v2811_v48, %v9277_v58  ;;  %v3783_v24 = vrot.slane %v3775_v22, %v9263_v62  ;;  %v3271_v23 = vcombine.low %v2767_v15, %v2774_v16  ;;  %v2826_v28 = vrot.slane %v2812_v21, %v9277_v58 }
 0x432   : > { %v10140_v57 = vpop.permute.xlu1 %3581  ;;  %8322 = vmatmul.mubr.msk.bf16.vlgmr.msra.gmra.mxu1 %vm4743_vm3, %v9716_v37  ;;  %v4812_v17 = vsel %vm4743_vm3, %v3529_v13, 0  ;;  %v3791_v9 = vcombine.low %v3564_v0, %v3596_v5  ;;  %v2835_v19 = vrot.slane %v2827_v33, %v9277_v58  ;;  %v2842_v34 = vrot.slane %v2828_v8, %v9277_v58 }
 0x433   : > { %8337 = vmatprep.mubr.msk.bf16.mxu1 %vm4743_vm3, %v9726_v56  ;;  %v3792_v44 = vcombine.high %v3564_v0, %v3596_v5  ;;  %v3423_v59 = vcombine.low %v10023_v14, %v10026_v27  ;;  %v8073_v6 = vcombine.high %v2767_v15, %v2774_v16  ;;  %v11838_v37 = vcombine.high %v9897_v36, %v9900_v45 }
 0x434   : > { %v11839_v50 = vcombine.high %v9907_v10, %v9910_v35  ;;  %v3799_v13 = vrot.slane %v3791_v9, %v9263_v62  ;;  %v3439_v56 = vcombine.low %v10053_v52, %v10121_v30  ;;  %v3491_v48 = vcombine.low %v10124_v40, %v10128_v7 }
 0x435   : > { %v3806_v0 = vrot.slane %v3792_v44, %v9263_v62  ;;  %v10165_v29 = vrot.slane %v3423_v59, %v9277_v58  ;;  %v3507_v36 = vcombine.low %v10131_v1, %v10134_v18  ;;  %v10174_v10 = vrot.slane %v3255_v51, %v9263_v62 }
 0x436   : > { %v3534_v41 = vpack.c.bf16 %v11839_v50, %v11838_v37  ;;  %v10171_v45 = vpop.permute.xlu1 %3597  ;;  %v3323_v35 = vcombine.low %v2819_v31, %v2826_v28  ;;  %v3790_v22 = vrot.slane %v3776_v32, %v9263_v62  ;;  %8312 = vmatpush3.bf16.xpose.msra.mxu0 %v4812_v17  ;;  %v10178_v15 = vrot.slane %v3439_v56, %v9277_v58 }
 0x437   : > { %v8074_v16 = vcombine.high %v2819_v31, %v2826_v28  ;;  %v3339_v21 = vcombine.low %v2835_v19, %v2842_v34  ;;  %v10182_v5 = vrot.slane %v3491_v48, %v9277_v58  ;;  %v10185_v11 = vrot.slane %v3507_v36, %v9277_v58 }
 0x438   : > { %8483 = vmatprep.subr.msk.bf16.mxu0 %vm4743_vm3, %v3534_v41  ;;  %v10188_v33 = vrot.slane %v8072_v39, %v9263_v62  ;;  %v8075_v8 = vcombine.high %v2835_v19, %v2842_v34  ;;  %v3807_v51 = vcombine.low %v3783_v24, %v3799_v13  ;;  %v3808_v32 = vcombine.high %v3783_v24, %v3799_v13  ;;  %v10207_v34 = vpop.permute.xlu0 %3559 }
 0x439   : > { %v3823_v17 = vcombine.low %v3790_v22, %v3806_v0  ;;  %v3455_v9 = vcombine.low %v10165_v29, %v10178_v15  ;;  %v3523_v31 = vcombine.low %v10182_v5, %v10185_v11  ;;  %v3118_v28 = vcombine.high %v10040_v26, %v10061_v53 }
 0x43a   : > { %v10196_v44 = vpop.permute.xlu1 %3545  ;;  %v10199_v59 = vrot.slane %v3271_v23, %v9263_v62  ;;  %v10202_v39 = vrot.slane %v8073_v6, %v9263_v62  ;;  %v10205_v24 = vrot.slane %v3323_v35, %v9263_v62  ;;  %v3824_v19 = vcombine.high %v3790_v22, %v3806_v0 }
 0x43b   : > { %v10210_v37 = vrot.slane %v8074_v16, %v9263_v62  ;;  %v10213_v50 = vrot.slane %v3339_v21, %v9263_v62  ;;  %v3536_v26 = vpack.c.bf16 %v3523_v31, %v3455_v9  ;;  %v3050_v53 = vcombine.high %v10034_v2, %v10037_v38 }
 0x43c   : > { %v10218_v23 = vrot.slane %v8075_v8, %v9263_v62  ;;  %v10221_v6 = vrot.slane %v3807_v51, %v9277_v58  ;;  %v10224_v13 = vrot.slane %v3808_v32, %v9277_v58  ;;  %v4937_v56 = vsel %vm4743_vm3, %v3534_v41, 0  ;;  %v10266_v9 = vpop.permute.xlu0 %3575 }
 0x43d   : > { %v10228_v0 = vrot.slane %v3823_v17, %v9277_v58  ;;  %8485 = vmatprep.subr.msk.bf16.mxu1 %vm4743_vm3, %v3536_v26  ;;  %v4998_v48 = vsel %vm4743_vm3, %v3536_v26, 0  ;;  %8314 = vmatmul.mubr.msk.bf16.vlgmr.msra.gmra.mxu0 %vm4743_vm3, %v9718_v49  ;;  %v3533_v2 = vpack.c.bf16 %v3118_v28, %v3050_v53  ;;  %v3287_v38 = vcombine.low %v10174_v10, %v10188_v33 }
 0x43e   : > { %v10236_v36 = vpop.permute.xlu1 %3561  ;;  %v10239_v35 = vrot.slane %v3824_v19, %v9277_v58  ;;  %8334 = vmatpush3.bf16.xpose.msra.mxu1 %v4998_v48  ;;  %8326 = vmatpush3.bf16.xpose.msra.mxu0 %v4937_v56  ;;  %v3859_v41 = vcombine.low %v10111_v4, %v10171_v45  ;;  %v3303_v22 = vcombine.low %v10199_v59, %v10202_v39 }
 0x43f   : > { %8329 = vmatprep.mubr.msk.bf16.mxu0 %vm4743_vm3, %v9448_v42  ;;  %8484 = vmatprep.subr.msk.bf16.mxu0 %vm4743_vm3, %v3533_v2  ;;  %v2325_v49 = vcombine.low %v9876_v20, %v9953_v61  ;;  %v11840_v16 = vcombine.high %v9731_v47, %v9734_v12  ;;  %v11841_v21 = vcombine.high %v9737_v63, %v9746_v60  ;;  %v4934_v51 = vsel %vm4743_vm3, %v3533_v2, 0 }
 0x440   : > { %v4319_v32 = vcombine.low %v10221_v6, %v10224_v13  ;;  %v3843_v42 = vcombine.low %v10069_v25, %v10140_v57  ;;  %v3860_v17 = vcombine.high %v10111_v4, %v10171_v45  ;;  %v3295_v47 = vrot.slane %v3287_v38, %v9277_v58  ;;  %v3592_v2 = vpop.permute.xlu0 %3591 }
 0x441   : > { %v10256_v8 = vpack.c.bf16 %v11841_v21, %v11840_v16  ;;  %v8084_v12 = vcombine.high %v10221_v6, %v10224_v13  ;;  %v3311_v63 = vrot.slane %v3303_v22, %v9277_v58  ;;  %v3355_v60 = vcombine.low %v10205_v24, %v10210_v37 }
 0x442   : > { %v3371_v31 = vcombine.low %v10213_v50, %v10218_v23  ;;  %v10276_v28 = vpop.permute.xlu1 %3577  ;;  %v4335_v4 = vcombine.low %v10228_v0, %v10239_v35  ;;  %v8085_v45 = vcombine.high %v10228_v0, %v10239_v35  ;;  %v3844_v19 = vcombine.high %v10069_v25, %v10140_v57 }
 0x443   : > { %v3867_v26 = vrot.slane %v3859_v41, %v9263_v62  ;;  %v3363_v53 = vrot.slane %v3355_v60, %v9277_v58  ;;  %v3456_v48 = vcombine.high %v10165_v29, %v10178_v15  ;;  %v3524_v38 = vcombine.high %v10182_v5, %v10185_v11 }
 0x444   : > { %v3379_v56 = vrot.slane %v3371_v31, %v9277_v58  ;;  %v3851_v22 = vrot.slane %v3843_v42, %v9263_v62  ;;  %v3874_v16 = vrot.slane %v3860_v17, %v9263_v62  ;;  %v3319_v21 = vcombine.low %v3295_v47, %v3311_v63 }
 0x445   : > { %v3538_v57 = vpack.c.bf16 %v3524_v38, %v3456_v48  ;;  %v3424_v41 = vcombine.high %v10023_v14, %v10026_v27  ;;  %v3440_v60 = vcombine.high %v10053_v52, %v10121_v30  ;;  %v3858_v29 = vrot.slane %v3844_v19, %v9263_v62 }
 0x446   : > { %v3387_v25 = vcombine.low %v3363_v53, %v3379_v56  ;;  %v10298_v31 = vpop.permute.xlu1 %3593  ;;  %v3875_v15 = vcombine.low %v3851_v22, %v3867_v26  ;;  %8328 = vmatpush3.bf16.xpose.msra.mxu0 %v4934_v51  ;;  %v3492_v5 = vcombine.high %v10124_v40, %v10128_v7  ;;  %v3508_v11 = vcombine.high %v10131_v1, %v10134_v18 }
 0x447   : > { %v3876_v42 = vcombine.high %v3851_v22, %v3867_v26  ;;  %8487 = vmatprep.subr.msk.bf16.mxu0 %vm4743_vm3, %v3538_v57  ;;  %v10307_v14 = vrot.slane %v3424_v41, %v9277_v58  ;;  %v10310_v27 = vrot.slane %v3440_v60, %v9277_v58  ;;  %v3891_v52 = vcombine.low %v3858_v29, %v3874_v16 }
 0x448   : > { %v3535_v17 = vpack.c.bf16 %v3387_v25, %v3319_v21  ;;  %v3892_v30 = vcombine.high %v3858_v29, %v3874_v16  ;;  %v10313_v51 = vrot.slane %v3492_v5, %v9277_v58  ;;  %v10316_v40 = vrot.slane %v3508_v11, %v9277_v58 }
 0x449   : > { %v3639_v7 = vcombine.low %v10161_v43, %v10266_v9  ;;  %v3655_v18 = vcombine.low %v10207_v34, %v3592_v2  ;;  %v3388_v19 = vcombine.high %v3363_v53, %v3379_v56  ;;  %v10324_v26 = vrot.slane %v3875_v15, %v9277_v58 }
 0x44a   : > { %8486 = vmatprep.subr.msk.bf16.mxu1 %vm4743_vm3, %v3535_v17  ;;  %v4995_v1 = vsel %vm4743_vm3, %v3535_v17, 0  ;;  %v3640_v48 = vcombine.high %v10161_v43, %v10266_v9  ;;  %v3457_v38 = vcombine.low %v10307_v14, %v10310_v27  ;;  %v3525_v22 = vcombine.low %v10313_v51, %v10316_v40  ;;  %v10332_v16 = vpop.permute.xlu1 %3557 }
 0x44b   : > { %8336 = vmatpush3.bf16.xpose.msra.mxu1 %v4995_v1  ;;  %v3656_v21 = vcombine.high %v10207_v34, %v3592_v2  ;;  %v3320_v25 = vcombine.high %v3295_v47, %v3311_v63  ;;  %v3288_v53 = vcombine.high %v10174_v10, %v10188_v33  ;;  %v3304_v56 = vcombine.high %v10199_v59, %v10202_v39 }
 0x44c   : > { %v3890_v43 = vrot.slane %v3876_v42, %v9277_v58  ;;  %v10341_v9 = vrot.slane %v3891_v52, %v9277_v58  ;;  %v10344_v41 = vrot.slane %v3892_v30, %v9277_v58  ;;  %v3540_v60 = vpack.c.bf16 %v3525_v22, %v3457_v38 }
 0x44d   : > { %v3663_v29 = vrot.slane %v3655_v18, %v9263_v62  ;;  %8330 = vmatmul.mubr.msk.bf16.vlgmr.msra.gmra.mxu0 %vm4743_vm3, %v9720_v54  ;;  %v5059_v34 = vsel %vm4743_vm3, %v3538_v57, 0  ;;  %v3537_v10 = vpack.c.bf16 %v3388_v19, %v3320_v25  ;;  %v3356_v33 = vcombine.high %v10205_v24, %v10210_v37 }
 0x44e   : > { %8489 = vmatprep.subr.msk.bf16.mxu1 %vm4743_vm3, %v3540_v60  ;;  %8342 = vmatpush3.bf16.xpose.msra.mxu0 %v5059_v34  ;;  %v10354_v59 = vrot.slane %v3288_v53, %v9277_v58  ;;  %v10357_v39 = vrot.slane %v3304_v56, %v9277_v58  ;;  %v3372_v47 = vcombine.high %v10213_v50, %v10218_v23  ;;  %v10379_v23 = vpop.permute.xlu1 %3571  ;;  %v5120_v11 = vsel %vm4743_vm3, %v3540_v60, 0 }
 0x44f   : > { %v3647_v54 = vrot.slane %v3639_v7, %v9263_v62  ;;  %v10363_v63 = vrot.slane %v3640_v48, %v9263_v62  ;;  %v10366_v57 = vrot.slane %v3656_v21, %v9263_v62  ;;  %8345 = vmatprep.mubr.msk.bf16.mxu0 %vm4743_vm3, %v9728_v3  ;;  %8488 = vmatprep.subr.msk.bf16.mxu0 %vm4743_vm3, %v3537_v10 }
 0x450   : > { %v4387_v24 = vcombine.low %v10324_v26, %v3890_v43  ;;  %v8086_v37 = vcombine.high %v10324_v26, %v3890_v43  ;;  %v10374_v15 = vrot.slane %v3356_v33, %v9277_v58  ;;  %v10377_v50 = vrot.slane %v3372_v47, %v9277_v58 }
 0x451   : > { %v4403_v5 = vcombine.low %v10341_v9, %v10344_v41  ;;  %v8087_v3 = vcombine.high %v10341_v9, %v10344_v41  ;;  %v3723_v2 = vcombine.low %v10236_v36, %v10298_v31  ;;  %v3671_v42 = vcombine.low %v3647_v54, %v3663_v29 }
 0x452   : > { %8338 = vmatmul.mubr.msk.bf16.vlgmr.msra.gmra.mxu1 %vm4743_vm3, %v9743_v46  ;;  %v3321_v17 = vcombine.low %v10354_v59, %v10357_v39  ;;  %v3389_v52 = vcombine.low %v10374_v15, %v10377_v50  ;;  %v3672_v30 = vcombine.high %v3647_v54, %v3663_v29  ;;  %v3687_v46 = vcombine.low %v10363_v63, %v10366_v57 }
 0x453   : > { %8350 = vmatpush3.bf16.xpose.msra.mxu1 %v5120_v11  ;;  %8353 = vmatprep.mubr.msk.bf16.mxu1 %vm4743_vm3, %v9988_v55  ;;  %v3707_v7 = vcombine.low %v10196_v44, %v10276_v28  ;;  %v3724_v1 = vcombine.high %v10236_v36, %v10298_v31  ;;  %v3458_v55 = vcombine.high %v10307_v14, %v10310_v27  ;;  %v5056_v31 = vsel %vm4743_vm3, %v3537_v10, 0 }
 0x454   : > { %v3539_v18 = vpack.c.bf16 %v3389_v52, %v3321_v17  ;;  %v3526_v19 = vcombine.high %v10313_v51, %v10316_v40  ;;  %v10410_v26 = vrot.slane %v4319_v32, %v9263_v62  ;;  %v3688_v48 = vcombine.high %v10363_v63, %v10366_v57 }
 0x455   : > { %v3708_v38 = vcombine.high %v10196_v44, %v10276_v28  ;;  %v3731_v36 = vrot.slane %v3723_v2, %v9263_v62  ;;  %v10423_v32 = vrot.slane %v8084_v12, %v9263_v62  ;;  %v10429_v27 = vrot.slane %v4335_v4, %v9263_v62  ;;  %v10431_v44 = vpop.permute.xlu1 %3573  ;;  %v11844_v2 = vld [vmem:[#allocation13_spill] sm:$0xff] }
 0x456   : > { %8490 = vmatprep.subr.msk.bf16.mxu1 %vm4743_vm3, %v3539_v18  ;;  %8344 = vmatpush3.bf16.xpose.msra.mxu0 %v5056_v31  ;;  %v3542_v14 = vpack.c.bf16 %v3526_v19, %v3458_v55  ;;  %v10434_v28 = vrot.slane %v3671_v42, %v9277_v58  ;;  %v10437_v51 = vrot.slane %v3672_v30, %v9277_v58  ;;  %v5117_v56 = vsel %vm4743_vm3, %v3539_v18, 0 }
 0x457   : > { %v3715_v40 = vrot.slane %v3707_v7, %v9263_v62  ;;  %v3738_v6 = vrot.slane %v3724_v1, %v9263_v62  ;;  %v10446_v13 = vrot.slane %v8085_v45, %v9263_v62  ;;  %v4351_v12 = vcombine.low %v10410_v26, %v10423_v32 }
 0x458   : > { %8491 = vmatprep.subr.msk.bf16.mxu0 %vm4743_vm3, %v3542_v14  ;;  %v10451_v4 = vrot.slane %v4387_v24, %v9263_v62  ;;  %v10454_v22 = vrot.slane %v8086_v37, %v9263_v62  ;;  %v10457_v21 = vrot.slane %v3687_v46, %v9277_v58  ;;  %v3722_v25 = vrot.slane %v3708_v38, %v9263_v62  ;;  %v11842_v37 = vld [vmem:[#allocation11_spill] sm:$0xff] }
 0x459   : > { %v3739_v53 = vcombine.low %v3715_v40, %v3731_v36  ;;  %v3740_v0 = vcombine.high %v3715_v40, %v3731_v36  ;;  %v4367_v35 = vcombine.low %v10429_v27, %v10446_v13  ;;  %v10464_v45 = vrot.slane %v4403_v5, %v9263_v62  ;;  %v3590_v54 = vpop.permute.xlu1 %3589 }
 0x45a   : > { %v10467_v43 = vrot.slane %v8087_v3, %v9263_v62  ;;  %v3755_v9 = vcombine.low %v3722_v25, %v3738_v6  ;;  %v3756_v41 = vcombine.high %v3722_v25, %v3738_v6  ;;  %v4359_v60 = vrot.slane %v4351_v12, %v9277_v58 }
 0x45b   : > { %8352 = vmatpush3.bf16.xpose.msra.mxu1 %v5117_v56  ;;  %v4419_v29 = vcombine.low %v10451_v4, %v10454_v22  ;;  %v4375_v34 = vrot.slane %v4367_v35, %v9277_v58  ;;  %v3322_v33 = vcombine.high %v10354_v59, %v10357_v39  ;;  %v3390_v47 = vcombine.high %v10374_v15, %v10377_v50  ;;  %v11843_v50 = vld [vmem:[#allocation12_spill] sm:$0xff] }
 0x45c   : > { %v4435_v10 = vcombine.low %v10464_v45, %v10467_v43  ;;  %v3702_v63 = vrot.slane %v3688_v48, %v9277_v58  ;;  %v3747_v57 = vrot.slane %v3739_v53, %v9277_v58  ;;  %v5181_v5 = vsel %vm4743_vm3, %v3542_v14, 0 }
 0x45d   : > { %v4427_v24 = vrot.slane %v4419_v29, %v9277_v58  ;;  %8346 = vmatmul.mubr.msk.bf16.vlgmr.msra.gmra.mxu0 %vm4743_vm3, %v11842_v37  ;;  %v3754_v3 = vrot.slane %v3740_v0, %v9277_v58  ;;  %v3541_v59 = vpack.c.bf16 %v3390_v47, %v3322_v33  ;;  %v3763_v39 = vrot.slane %v3755_v9, %v9277_v58  ;;  %v3606_v31 = vpop.permute.xlu1 %3605 }
 0x45e   : > { %v4443_v11 = vrot.slane %v4435_v10, %v9277_v58  ;;  %8358 = vmatpush3.bf16.xpose.msra.mxu0 %v5181_v5  ;;  %8361 = vmatprep.mubr.msk.bf16.mxu0 %vm4743_vm3, %v10256_v8  ;;  %v3770_v15 = vrot.slane %v3756_v41, %v9277_v58  ;;  %v11845_v42 = vcombine.low %v11843_v50, %v11844_v2 }
 0x45f   : > { %v2258_v52 = vcombine.high %v11843_v50, %v11844_v2  ;;  %v4383_v30 = vcombine.low %v4359_v60, %v4375_v34  ;;  %8492 = vmatprep.subr.msk.bf16.mxu0 %vm4743_vm3, %v3541_v59  ;;  %v4115_v8 = vcombine.low %v10332_v16, %v3590_v54  ;;  %v4183_v7 = vcombine.low %v10434_v28, %v10437_v51 }
 0x460   : > { %v2340_v17 = vpack.c.bf16 %v2325_v49, %v11845_v42  ;;  %v4451_v46 = vcombine.low %v4427_v24, %v4443_v11  ;;  %v8080_v1 = vcombine.high %v10434_v28, %v10437_v51  ;;  %v4199_v18 = vcombine.low %v10457_v21, %v3702_v63 }
 0x461   : > { %v11846_v49 = vcombine.high %v9876_v20, %v9953_v61  ;;  %v8081_v19 = vcombine.high %v10457_v21, %v3702_v63  ;;  %v4251_v48 = vcombine.low %v3747_v57, %v3754_v3  ;;  %v4116_v36 = vcombine.high %v10332_v16, %v3590_v54 }
 0x462   : > { %8354 = vmatmul.mubr.msk.bf16.vlgmr.msra.gmra.mxu1 %vm4743_vm3, %v2340_v17  ;;  %v4728_v38 = vpack.c.bf16 %v4451_v46, %v4383_v30  ;;  %v8082_v14 = vcombine.high %v3747_v57, %v3754_v3  ;;  %v4267_v40 = vcombine.low %v3763_v39, %v3770_v15  ;;  %v8083_v6 = vcombine.high %v3763_v39, %v3770_v15 }
 0x463   : > { %v2342_v55 = vpack.c.bf16 %v11846_v49, %v2258_v52  ;;  %v4123_v28 = vrot.slane %v4115_v8, %v9263_v62  ;;  %v4130_v51 = vrot.slane %v4116_v36, %v9263_v62  ;;  %v5178_v12 = vsel %vm4743_vm3, %v3541_v59, 0 }
 0x464   : > { %8365 = vmatprep.subr.bf16.mxu1 %v4728_v38  ;;  %v4384_v25 = vcombine.high %v4359_v60, %v4375_v34  ;;  %v4452_v20 = vcombine.high %v4427_v24, %v4443_v11  ;;  %v4131_v61 = vcombine.low %v10431_v44, %v3606_v31  ;;  %v4132_v21 = vcombine.high %v10431_v44, %v3606_v31 }
 0x465   : > { %8366 = vmatpush3.bf16.msra.mxu1 %v4728_v38  ;;  %v10518_v16 = vrot.slane %v4183_v7, %v9263_v62  ;;  %v10521_v53 = vrot.slane %v8080_v1, %v9263_v62  ;;  %v10524_v0 = vrot.slane %v4199_v18, %v9263_v62  ;;  %v10527_v35 = vrot.slane %v8081_v19, %v9263_v62 }
 0x466   : > { %8360 = vmatpush3.bf16.xpose.msra.mxu0 %v5178_v12  ;;  %v4730_v56 = vpack.c.bf16 %v4452_v20, %v4384_v25  ;;  %v10530_v9 = vrot.slane %v4251_v48, %v9263_v62  ;;  %v4139_v41 = vrot.slane %v4131_v61, %v9263_v62  ;;  %v4146_v44 = vrot.slane %v4132_v21, %v9263_v62 }
 0x467   : > { %v4215_v60 = vcombine.low %v10518_v16, %v10521_v53  ;;  %v4266_v29 = vrot.slane %v8082_v14, %v9263_v62  ;;  %v4231_v34 = vcombine.low %v10524_v0, %v10527_v35  ;;  %v4274_v10 = vrot.slane %v4267_v40, %v9263_v62 }
 0x468   : > { %8373 = vmatprep.subr.bf16.mxu0 %v4730_v56  ;;  %v4282_v33 = vrot.slane %v8083_v6, %v9263_v62  ;;  %v4352_v47 = vcombine.high %v10410_v26, %v10423_v32  ;;  %v4147_v54 = vcombine.low %v4123_v28, %v4139_v41  ;;  %v4148_v63 = vcombine.high %v4123_v28, %v4139_v41 }
 0x469   : > { %v4163_v57 = vcombine.low %v4130_v51, %v4146_v44  ;;  %v4164_v24 = vcombine.high %v4130_v51, %v4146_v44  ;;  %v4223_v37 = vrot.slane %v4215_v60, %v9277_v58  ;;  %v4239_v5 = vrot.slane %v4231_v34, %v9277_v58 }
 0x46a   : > { %v4283_v3 = vcombine.low %v10530_v9, %v4266_v29  ;;  %v4299_v11 = vcombine.low %v4274_v10, %v4282_v33  ;;  %v4155_v59 = vrot.slane %v4147_v54, %v9277_v58  ;;  %v4162_v39 = vrot.slane %v4148_v63, %v9277_v58 }
 0x46b   : > { %v4171_v15 = vrot.slane %v4163_v57, %v9277_v58  ;;  %v4178_v50 = vrot.slane %v4164_v24, %v9277_v58  ;;  %v4247_v26 = vcombine.low %v4223_v37, %v4239_v5  ;;  %v4366_v42 = vrot.slane %v4352_v47, %v9277_v58 }
 0x46c   : > { %v4291_v32 = vrot.slane %v4283_v3, %v9277_v58  ;;  %v4307_v2 = vrot.slane %v4299_v11, %v9277_v58  ;;  %v4659_v17 = vcombine.low %v4155_v59, %v4162_v39  ;;  %v8094_v52 = vcombine.high %v4155_v59, %v4162_v39 }
 0x46d   : > { %v4675_v30 = vcombine.low %v4171_v15, %v4178_v50  ;;  %v8095_v46 = vcombine.high %v4171_v15, %v4178_v50  ;;  %8362 = vmatmul.mubr.msk.bf16.vlgmr.msra.gmra.mxu0 %vm4743_vm3, %v2342_v55  ;;  %v4368_v7 = vcombine.high %v10429_v27, %v10446_v13  ;;  %v4420_v1 = vcombine.high %v10451_v4, %v10454_v22 }
 0x46e   : > { %v4315_v8 = vcombine.low %v4291_v32, %v4307_v2  ;;  %v4436_v18 = vcombine.high %v10464_v45, %v10467_v43  ;;  %8374 = vmatpush3.bf16.msra.mxu0 %v4730_v56  ;;  %v4666_v55 = vrot.slane %v4659_v17, %v9263_v62  ;;  %v4248_v36 = vcombine.high %v4223_v37, %v4239_v5 }
 0x46f   : > { %v4382_v19 = vrot.slane %v4368_v7, %v9277_v58  ;;  %v4434_v48 = vrot.slane %v4420_v1, %v9277_v58  ;;  %v4316_v31 = vcombine.high %v4291_v32, %v4307_v2  ;;  %v4674_v27 = vrot.slane %v8094_v52, %v9263_v62 }
 0x470   : > { %v4727_v49 = vpack.c.bf16 %v4315_v8, %v4247_v26  ;;  %v4450_v38 = vrot.slane %v4436_v18, %v9277_v58  ;;  %v4682_v45 = vrot.slane %v4675_v30, %v9263_v62  ;;  %v4216_v40 = vcombine.high %v10518_v16, %v10521_v53 }
 0x471   : > { %v4385_v13 = vcombine.low %v4366_v42, %v4382_v19  ;;  %v4729_v43 = vpack.c.bf16 %v4316_v31, %v4248_v36  ;;  %v4386_v14 = vcombine.high %v4366_v42, %v4382_v19  ;;  %v4690_v6 = vrot.slane %v8095_v46, %v9263_v62 }
 0x472   : > { %8367 = vmatprep.subr.bf16.mxu1 %v4727_v49  ;;  %v4453_v4 = vcombine.low %v4434_v48, %v4450_v38  ;;  %v4454_v22 = vcombine.high %v4434_v48, %v4450_v38  ;;  %v4232_v51 = vcombine.high %v10524_v0, %v10527_v35  ;;  %v4284_v12 = vcombine.high %v10530_v9, %v4266_v29 }
 0x473   : > { %8368 = vmatpush3.bf16.msra.mxu1 %v4727_v49  ;;  %8375 = vmatprep.subr.bf16.mxu0 %v4729_v43  ;;  %v4230_v20 = vrot.slane %v4216_v40, %v9277_v58  ;;  %v4300_v61 = vcombine.high %v4274_v10, %v4282_v33  ;;  %v4691_v56 = vcombine.low %v4666_v55, %v4674_v27 }
 0x474   : > { %v10569_v28 = vpack.c.bf16 %v4453_v4, %v4385_v13  ;;  %v10574_v25 = vpack.c.bf16 %v4454_v22, %v4386_v14  ;;  %8376 = vmatpush3.bf16.msra.mxu0 %v4729_v43  ;;  %v4246_v21 = vrot.slane %v4232_v51, %v9277_v58  ;;  %v4298_v16 = vrot.slane %v4284_v12, %v9277_v58 }
 0x475   : > { %v4314_v53 = vrot.slane %v4300_v61, %v9277_v58  ;;  %v4707_v35 = vcombine.low %v4682_v45, %v4690_v6  ;;  %v4692_v9 = vcombine.high %v4666_v55, %v4674_v27  ;;  %v10583_v44 = vrot.slane %v4691_v56, %v9277_v58 }
 0x476   : > { %11847 = vst [vmem:[#allocation11_spill] sm:$0xff] %v10574_v25  ;;  %8381 = vmatprep.subr.bf16.mxu1 %v10569_v28  ;;  %8389 = vmatprep.subr.bf16.mxu0 %v10574_v25  ;;  %v4249_v0 = vcombine.low %v4230_v20, %v4246_v21  ;;  %v4708_v10 = vcombine.high %v4682_v45, %v4690_v6 }
 0x477   : > { %v4317_v41 = vcombine.low %v4298_v16, %v4314_v53  ;;  %v10586_v60 = vrot.slane %v4707_v35, %v9277_v58  ;;  %v10591_v34 = vrot.slane %v4692_v9, %v9277_v58  ;;  %v4250_v33 = vcombine.high %v4230_v20, %v4246_v21 }
 0x478   : > { %v4318_v54 = vcombine.high %v4298_v16, %v4314_v53  ;;  %v10598_v57 = vrot.slane %v4708_v10, %v9277_v58 }
 0x479   : > { %v10588_v29 = vpack.c.bf16 %v4317_v41, %v4249_v0 }
 0x47a   : > { %v10600_v24 = vpack.c.bf16 %v4318_v54, %v4250_v33 }
 0x47c   : > { %11848 = vst [vmem:[#allocation12_spill] sm:$0xff] %v10600_v24 }
 0x4ed   : > { %v8307_v3 = vpop.f32.mrf.mxu0 }
 0x4ee   : > { %v10606_v11 = vmul.f32 0.35355338, %v8307_v3 }
 0x4ef   : > { %v4790_v59 = vpop.f32.mrf.mxu0 }
 0x4f0   : > { %v5270_v39 = vsel %vm926_vm2, %v10606_v11, -inf  ;;  %v10616_v17 = vmul.f32 0.35355338, %v4790_v59 }
 0x4f1   : > { %5271 = vmax.xlane.f32.xlu0 %v5270_v39  ;;  %v8308_v15 = vpop.f32.mrf.mxu0 }
 0x4f2   : > { %v8323_v50 = vpop.f32.mrf.mxu1  ;;  %v10610_v26 = vmul.f32 0.35355338, %v8308_v15  ;;  %v5264_v18 = vsel %vm926_vm2, %v10616_v17, -inf }
 0x4f3   : > { %v10612_v32 = vmul.f32 0.35355338, %v8323_v50  ;;  %v4793_v46 = vpop.f32.mrf.mxu0 }
 0x4f4   : > { %v4912_v2 = vpop.f32.mrf.mxu1  ;;  %v5273_v42 = vsel %vm926_vm2, %v10610_v26, -inf  ;;  %v10624_v1 = vmul.f32 0.35355338, %v4793_v46 }
 0x4f5   : > { %v5294_v52 = vsel %vm926_vm2, %v10612_v32, -inf  ;;  %5274 = vmax.xlane.f32.xlu1 %v5273_v42  ;;  %v10622_v7 = vmul.f32 0.35355338, %v4912_v2 }
 0x4f6   : > { %v8324_v30 = vpop.f32.mrf.mxu1  ;;  %5295 = vmax.xlane.f32.xlu0 %v5294_v52  ;;  %v5267_v55 = vsel %vm926_vm2, %v10624_v1, -inf }
 0x4f7   : > { %v10620_v8 = vmul.f32 0.35355338, %v8324_v30  ;;  %v5288_v38 = vsel %vm926_vm2, %v10622_v7, -inf }
 0x4f8   : > { %v4915_v19 = vpop.f32.mrf.mxu1 }
 0x4f9   : > { %v5297_v49 = vsel %vm926_vm2, %v10620_v8, -inf  ;;  %v10630_v48 = vmul.f32 0.35355338, %v4915_v19 }
 0x4fa   : > { %5265 = vmax.xlane.f32.xlu0 %v5264_v18  ;;  %5298 = vmax.xlane.f32.xlu1 %v5297_v49 }
 0x4fb   : > { %v5291_v4 = vsel %vm926_vm2, %v10630_v48, -inf }
 0x4fd   : > { %v8315_v36 = vpop.f32.mrf.mxu0 }
 0x4fe   : > { %5289 = vmax.xlane.f32.xlu0 %v5288_v38  ;;  %5268 = vmax.xlane.f32.xlu1 %v5267_v55  ;;  %v10636_v31 = vmul.f32 0.35355338, %v8315_v36 }
 0x4ff   : > { %v4851_v27 = vpop.f32.mrf.mxu0 }
 0x500   : > { %v5282_v13 = vsel %vm926_vm2, %v10636_v31, -inf  ;;  %v10648_v20 = vmul.f32 0.35355338, %v4851_v27 }
 0x501   : > { %v8316_v22 = vpop.f32.mrf.mxu0 }
 0x502   : > { %5292 = vmax.xlane.f32.xlu1 %v5291_v4  ;;  %5283 = vmax.xlane.f32.xlu0 %v5282_v13  ;;  %v10642_v45 = vmul.f32 0.35355338, %v8316_v22  ;;  %v5276_v9 = vsel %vm926_vm2, %v10648_v20, -inf }
 0x503   : > { %v4854_v14 = vpop.f32.mrf.mxu0 }
 0x504   : > { %v5285_v43 = vsel %vm926_vm2, %v10642_v45, -inf  ;;  %v10662_v33 = vmul.f32 0.35355338, %v4854_v14 }
 0x506   : > { %5286 = vmax.xlane.f32.xlu1 %v5285_v43  ;;  %v5279_v2 = vsel %vm926_vm2, %v10662_v33, -inf }
 0x50d   : > { %v8331_v40 = vpop.f32.mrf.mxu0 }
 0x50e   : > { %v10670_v50 = vmul.f32 0.35355338, %v8331_v40 }
 0x50f   : > { %v4973_v21 = vpop.f32.mrf.mxu0 }
 0x510   : > { %v5306_v49 = vsel %vm926_vm2, %v10670_v50, -inf  ;;  %v10682_v36 = vmul.f32 0.35355338, %v4973_v21 }
 0x511   : > { %v8332_v10 = vpop.f32.mrf.mxu0 }
 0x512   : > { %v8339_v6 = vpop.f32.mrf.mxu1  ;;  %v10664_v54 = vmul.f32 0.35355338, %v8332_v10 }
 0x513   : > { %v10646_v51 = vmul.f32 0.35355338, %v8339_v6  ;;  %v4976_v39 = vpop.f32.mrf.mxu0  ;;  %v5300_v6 = vsel %vm926_vm2, %v10682_v36, -inf }
 0x514   : > { %v5034_v12 = vpop.f32.mrf.mxu1  ;;  %v5309_v42 = vsel %vm926_vm2, %v10664_v54, -inf  ;;  %v10684_v27 = vmul.f32 0.35355338, %v4976_v39 }
 0x515   : > { %v5318_v61 = vsel %vm926_vm2, %v10646_v51, -inf  ;;  %v10654_v0 = vmul.f32 0.35355338, %v5034_v12 }
 0x516   : > { %5319 = vmax.xlane.f32.xlu0 %v5318_v61  ;;  %v8340_v16 = vpop.f32.mrf.mxu1  ;;  %v5303_v12 = vsel %vm926_vm2, %v10684_v27, -inf }
 0x517   : > { %v10652_v53 = vmul.f32 0.35355338, %v8340_v16  ;;  %v5312_v3 = vsel %vm926_vm2, %v10654_v0, -inf }
 0x518   : > { %v5037_v56 = vpop.f32.mrf.mxu1 }
 0x519   : > { %v10656_v35 = vmul.f32 0.35355338, %v5037_v56  ;;  %v5321_v41 = vsel %vm926_vm2, %v10652_v53, -inf }
 0x51a   : > { %5277 = vmax.xlane.f32.xlu0 %v5276_v9  ;;  %5322 = vmax.xlane.f32.xlu1 %v5321_v41 }
 0x51b   : > { %v5315_v59 = vsel %vm926_vm2, %v10656_v35, -inf }
 0x51d   : > { %v8347_v15 = vpop.f32.mrf.mxu0 }
 0x51e   : > { %5313 = vmax.xlane.f32.xlu0 %v5312_v3  ;;  %5316 = vmax.xlane.f32.xlu1 %v5315_v59  ;;  %v10698_v21 = vmul.f32 0.35355338, %v8347_v15 }
 0x51f   : > { %v5095_v30 = vpop.f32.mrf.mxu0 }
 0x520   : > { %v10706_v10 = vmul.f32 0.35355338, %v5095_v30  ;;  %v5330_v59 = vsel %vm926_vm2, %v10698_v21, -inf }
 0x521   : > { %v8348_v55 = vpop.f32.mrf.mxu0 }
 0x522   : > { %5280 = vmax.xlane.f32.xlu0 %v5279_v2  ;;  %5310 = vmax.xlane.f32.xlu1 %v5309_v42  ;;  %v8355_v52 = vpop.f32.mrf.mxu1  ;;  %v10700_v16 = vmul.f32 0.35355338, %v8348_v55 }
 0x523   : > { %v10676_v18 = vmul.f32 0.35355338, %v8355_v52  ;;  %v5098_v43 = vpop.f32.mrf.mxu0  ;;  %v5324_v52 = vsel %vm926_vm2, %v10706_v10, -inf }
 0x524   : > { %v5156_v46 = vpop.f32.mrf.mxu1  ;;  %v10708_v3 = vmul.f32 0.35355338, %v5098_v43  ;;  %v5333_v39 = vsel %vm926_vm2, %v10700_v16, -inf  ;;  %v11849_v43 = vld [vmem:[#allocation10_spill] sm:$0xff] }
 0x525   : > { %v5342_v13 = vsel %vm926_vm2, %v10676_v18, -inf  ;;  %v10690_v14 = vmul.f32 0.35355338, %v5156_v46 }
 0x526   : > { %5307 = vmax.xlane.f32.xlu0 %v5306_v49  ;;  %v8356_v19 = vpop.f32.mrf.mxu1  ;;  %v5327_v30 = vsel %vm926_vm2, %v10708_v3, -inf }
 0x527   : > { %v10680_v38 = vmul.f32 0.35355338, %v8356_v19  ;;  %v5336_v56 = vsel %vm926_vm2, %v10690_v14, -inf }
 0x528   : > { %v5159_v22 = vpop.f32.mrf.mxu1 }
 0x529   : > { %v5345_v4 = vsel %vm926_vm2, %v10680_v38, -inf  ;;  %v10692_v40 = vmul.f32 0.35355338, %v5159_v22 }
 0x52a   : > { %5343 = vmax.xlane.f32.xlu0 %v5342_v13  ;;  %5346 = vmax.xlane.f32.xlu1 %v5345_v4 }
 0x52b   : > { %v5339_v9 = vsel %vm926_vm2, %v10692_v40, -inf }
 0x52d   : > { %v8363_v61 = vpop.f32.mrf.mxu0 }
 0x52e   : > { %5301 = vmax.xlane.f32.xlu0 %v5300_v6  ;;  %5304 = vmax.xlane.f32.xlu1 %v5303_v12  ;;  %v10714_v2 = vmul.f32 0.35355338, %v8363_v61  ;;  %v11850_v6 = vld [vmem:[#allocation9_spill] sm:$0xff]  ;;  %v10738_v12 = vpop.permute.xlu0 %3555 }
 0x52f   : > { %v5217_v41 = vpop.f32.mrf.mxu0 }
 0x530   : > { %v10722_v49 = vmul.f32 0.35355338, %v5217_v41  ;;  %v5354_v55 = vsel %vm926_vm2, %v10714_v2, -inf  ;;  %v10746_v41 = vpop.permute.xlu1 %3553 }
 0x531   : > { %v8364_v15 = vpop.f32.mrf.mxu0 }
 0x532   : > { %5337 = vmax.xlane.f32.xlu0 %v5336_v56  ;;  %5340 = vmax.xlane.f32.xlu1 %v5339_v9  ;;  %v10716_v42 = vmul.f32 0.35355338, %v8364_v15  ;;  %v5348_v4 = vsel %vm926_vm2, %v10722_v49, -inf  ;;  %v10740_v61 = vpop.permute.xlu0 %3587 }
 0x533   : > { %v5220_v46 = vpop.f32.mrf.mxu0 }
 0x534   : > { %v10724_v19 = vmul.f32 0.35355338, %v5220_v46  ;;  %v5357_v13 = vsel %vm926_vm2, %v10716_v42, -inf }
 0x536   : > { %5331 = vmax.xlane.f32.xlu0 %v5330_v59  ;;  %5334 = vmax.xlane.f32.xlu1 %v5333_v39  ;;  %v5351_v22 = vsel %vm926_vm2, %v10724_v19, -inf  ;;  %v10742_v56 = vpop.permute.xlu0 %3603  ;;  %v10750_v39 = vpop.permute.xlu1 %3569 }
 0x53a   : > { %5325 = vmax.xlane.f32.xlu0 %v5324_v52  ;;  %5328 = vmax.xlane.f32.xlu1 %v5327_v30  ;;  %v10744_v9 = vpop.permute.xlu0 %3551  ;;  %v10754_v52 = vpop.permute.xlu1 %3585 }
 0x53e   : > { %5355 = vmax.xlane.f32.xlu0 %v5354_v55  ;;  %5358 = vmax.xlane.f32.xlu1 %v5357_v13  ;;  %v10748_v59 = vpop.permute.xlu0 %3567 }
 0x542   : > { %5349 = vmax.xlane.f32.xlu0 %v5348_v4  ;;  %5352 = vmax.xlane.f32.xlu1 %v5351_v22  ;;  %v10752_v15 = vpop.permute.xlu0 %3583 }
 0x553   : > { %3601 = vrot.lane.b32.xlu1 %v11849_v43, %s8855_s24 }
 0x558   : > { %3599 = vrot.lane.b32.xlu0 %v11850_v6, %s8855_s24 }
 0x57a   : > { %v5272_v30 = vpop.xlane.xlu0 %5271 }
 0x57b   : > { %v5362_v46 = vsub.f32 %v10606_v11, %v5272_v30 }
 0x57d   : > { %v5396_v55 = vmul.f32 1.442695, %v5362_v46 }
 0x57e   : > { %v5275_v13 = vpop.xlane.xlu1 %5274 }
 0x57f   : > { %8629 = vpow2.f32 %v5396_v55  ;;  %v5363_v4 = vsub.f32 %v10610_v26, %v5275_v13  ;;  %v5296_v22 = vpop.xlane.xlu0 %5295 }
 0x580   : > { %v5370_v43 = vsub.f32 %v10612_v32, %v5296_v22 }
 0x581   : > { %v5398_v6 = vmul.f32 1.442695, %v5363_v4 }
 0x582   : > { %v5412_v5 = vmul.f32 1.442695, %v5370_v43 }
 0x583   : > { %8631 = vpow2.f32 %v5398_v6  ;;  %v5299_v63 = vpop.xlane.xlu1 %5298  ;;  %v5266_v37 = vpop.xlane.xlu0 %5265 }
 0x584   : > { %8633 = vpow2.f32 %v5412_v5  ;;  %v5371_v47 = vsub.f32 %v10620_v8, %v5299_v63  ;;  %v5360_v24 = vsub.f32 %v10616_v17, %v5266_v37 }
 0x586   : > { %v5414_v25 = vmul.f32 1.442695, %v5371_v47  ;;  %v5392_v11 = vmul.f32 1.442695, %v5360_v24 }
 0x587   : > { %v5269_v30 = vpop.xlane.xlu1 %5268  ;;  %v5290_v46 = vpop.xlane.xlu0 %5289 }
 0x588   : > { %8635 = vpow2.f32 %v5414_v25  ;;  %v5361_v26 = vsub.f32 %v10624_v1, %v5269_v30  ;;  %v5368_v55 = vsub.f32 %v10622_v7, %v5290_v46 }
 0x589   : > { %8637 = vpow2.f32 %v5392_v11 }
 0x58a   : > { %v5394_v32 = vmul.f32 1.442695, %v5361_v26  ;;  %v5408_v13 = vmul.f32 1.442695, %v5368_v55 }
 0x58b   : > { %v5293_v4 = vpop.xlane.xlu1 %5292  ;;  %v5284_v22 = vpop.xlane.xlu0 %5283 }
 0x58c   : > { %v10763_v43 = vpop.eup %8629  ;;  %8639 = vpow2.f32 %v5394_v32  ;;  %v5369_v63 = vsub.f32 %v10630_v48, %v5293_v4  ;;  %v5366_v47 = vsub.f32 %v10636_v31, %v5284_v22 }
 0x58d   : > { %8641 = vpow2.f32 %v5408_v13  ;;  %v5462_v25 = vsel %vm926_vm2, %v10763_v43, 0.0 }
 0x58e   : > { %v5410_v24 = vmul.f32 1.442695, %v5369_v63  ;;  %v5404_v37 = vmul.f32 1.442695, %v5366_v47  ;;  %5463 = vadd.xlane.f32.xlu0 %v5462_v25 }
 0x58f   : > { %v5287_v5 = vpop.xlane.xlu1 %5286 }
 0x590   : > { %v10769_v17 = vpop.eup %8631  ;;  %8643 = vpow2.f32 %v5410_v24  ;;  %v5367_v8 = vsub.f32 %v10642_v45, %v5287_v5 }
 0x591   : > { %v10772_v7 = vpop.eup %8633  ;;  %8645 = vpow2.f32 %v5404_v37  ;;  %v5465_v1 = vsel %vm926_vm2, %v10769_v17, 0.0 }
 0x592   : > { %v5406_v48 = vmul.f32 1.442695, %v5367_v8  ;;  %5466 = vadd.xlane.f32.xlu1 %v5465_v1  ;;  %v5486_v31 = vsel %vm926_vm2, %v10772_v7, 0.0 }
 0x593   : > { %5487 = vadd.xlane.f32.xlu0 %v5486_v31 }
 0x594   : > { %8647 = vpow2.f32 %v5406_v48 }
 0x595   : > { %v10778_v6 = vpop.eup %8635 }
 0x596   : > { %v10780_v11 = vpop.eup %8637  ;;  %v5489_v45 = vsel %vm926_vm2, %v10778_v6, 0.0 }
 0x597   : > { %5490 = vadd.xlane.f32.xlu1 %v5489_v45  ;;  %v5456_v30 = vsel %vm926_vm2, %v10780_v11, 0.0 }
 0x598   : > { %5457 = vadd.xlane.f32.xlu0 %v5456_v30 }
 0x599   : > { %v10786_v46 = vpop.eup %8639 }
 0x59a   : > { %v10788_v26 = vpop.eup %8641  ;;  %v5459_v55 = vsel %vm926_vm2, %v10786_v46, 0.0 }
 0x59b   : > { %5460 = vadd.xlane.f32.xlu1 %v5459_v55  ;;  %v5480_v32 = vsel %vm926_vm2, %v10788_v26, 0.0 }
 0x59c   : > { %5481 = vadd.xlane.f32.xlu0 %v5480_v32 }
 0x59d   : > { %v10794_v13 = vpop.eup %8643 }
 0x59e   : > { %v10796_v4 = vpop.eup %8645  ;;  %v5483_v63 = vsel %vm926_vm2, %v10794_v13, 0.0 }
 0x59f   : > { %v5320_v22 = vpop.xlane.xlu0 %5319  ;;  %5484 = vadd.xlane.f32.xlu1 %v5483_v63  ;;  %v5474_v25 = vsel %vm926_vm2, %v10796_v4, 0.0 }
 0x5a0   : > { %v5378_v47 = vsub.f32 %v10646_v51, %v5320_v22  ;;  %5475 = vadd.xlane.f32.xlu0 %v5474_v25 }
 0x5a1   : > { %v10803_v24 = vpop.eup %8647 }
 0x5a2   : > { %v5428_v37 = vmul.f32 1.442695, %v5378_v47  ;;  %v5477_v1 = vsel %vm926_vm2, %v10803_v24, 0.0 }
 0x5a3   : > { %v5323_v5 = vpop.xlane.xlu1 %5322  ;;  %v5278_v8 = vpop.xlane.xlu0 %5277  ;;  %5478 = vadd.xlane.f32.xlu1 %v5477_v1 }
 0x5a4   : > { %8649 = vpow2.f32 %v5428_v37  ;;  %v5379_v48 = vsub.f32 %v10652_v53, %v5323_v5  ;;  %v5364_v31 = vsub.f32 %v10648_v20, %v5278_v8 }
 0x5a6   : > { %v5430_v51 = vmul.f32 1.442695, %v5379_v48  ;;  %v5400_v45 = vmul.f32 1.442695, %v5364_v31 }
 0x5a7   : > { %v5317_v30 = vpop.xlane.xlu1 %5316  ;;  %v5314_v55 = vpop.xlane.xlu0 %5313 }
 0x5a8   : > { %8651 = vpow2.f32 %v5430_v51  ;;  %v5376_v32 = vsub.f32 %v10654_v0, %v5314_v55  ;;  %v5377_v63 = vsub.f32 %v10656_v35, %v5317_v30 }
 0x5a9   : > { %8653 = vpow2.f32 %v5400_v45 }
 0x5aa   : > { %v5424_v22 = vmul.f32 1.442695, %v5376_v32  ;;  %v5426_v5 = vmul.f32 1.442695, %v5377_v63 }
 0x5ab   : > { %v5281_v47 = vpop.xlane.xlu0 %5280  ;;  %v5311_v25 = vpop.xlane.xlu1 %5310 }
 0x5ac   : > { %v5365_v37 = vsub.f32 %v10662_v33, %v5281_v47  ;;  %8655 = vpow2.f32 %v5424_v22  ;;  %v5375_v20 = vsub.f32 %v10664_v54, %v5311_v25 }
 0x5ae   : > { %v5402_v53 = vmul.f32 1.442695, %v5365_v37  ;;  %v5422_v35 = vmul.f32 1.442695, %v5375_v20 }
 0x5af   : > { %v5308_v8 = vpop.xlane.xlu0 %5307 }
 0x5b0   : > { %v5374_v1 = vsub.f32 %v10670_v50, %v5308_v8  ;;  %8657 = vpow2.f32 %v5402_v53 }
 0x5b1   : > { %v10814_v48 = vpop.eup %8649  ;;  %8659 = vpow2.f32 %v5426_v5 }
 0x5b2   : > { %v5420_v0 = vmul.f32 1.442695, %v5374_v1  ;;  %v5510_v31 = vsel %vm926_vm2, %v10814_v48, 0.0 }
 0x5b3   : > { %v10818_v51 = vpop.xlane.xlu1 %5346  ;;  %5511 = vadd.xlane.f32.xlu0 %v5510_v31  ;;  %v5344_v33 = vpop.xlane.xlu0 %5343 }
 0x5b4   : > { %8661 = vpow2.f32 %v5420_v0 }
 0x5b5   : > { %v10820_v45 = vpop.eup %8651  ;;  %8663 = vpow2.f32 %v5422_v35 }
 0x5b6   : > { %v10822_v54 = vpop.eup %8653  ;;  %v5513_v50 = vsel %vm926_vm2, %v10820_v45, 0.0 }
 0x5b7   : > { %v5305_v30 = vpop.xlane.xlu1 %5304  ;;  %5514 = vadd.xlane.f32.xlu1 %v5513_v50  ;;  %v5468_v55 = vsel %vm926_vm2, %v10822_v54, 0.0  ;;  %v5302_v32 = vpop.xlane.xlu0 %5301 }
 0x5b8   : > { %5469 = vadd.xlane.f32.xlu0 %v5468_v55  ;;  %v5372_v22 = vsub.f32 %v10682_v36, %v5302_v32  ;;  %v5373_v25 = vsub.f32 %v10684_v27, %v5305_v30 }
 0x5b9   : > { %v10829_v63 = vpop.eup %8655 }
 0x5ba   : > { %v5416_v47 = vmul.f32 1.442695, %v5372_v22  ;;  %v5504_v53 = vsel %vm926_vm2, %v10829_v63, 0.0  ;;  %v5418_v0 = vmul.f32 1.442695, %v5373_v25 }
 0x5bb   : > { %v5341_v37 = vpop.xlane.xlu1 %5340  ;;  %v5338_v5 = vpop.xlane.xlu0 %5337 }
 0x5bc   : > { %5505 = vadd.xlane.f32.xlu0 %v5504_v53  ;;  %v5384_v20 = vsub.f32 %v10690_v14, %v5338_v5  ;;  %8665 = vpow2.f32 %v5416_v47 }
 0x5bd   : > { %v10835_v8 = vpop.eup %8657 }
 0x5be   : > { %v5440_v1 = vmul.f32 1.442695, %v5384_v20  ;;  %v5471_v36 = vsel %vm926_vm2, %v10835_v8, 0.0  ;;  %v10839_v50 = vpop.eup %8659  ;;  %v5386_v20 = vsub.f32 %v10676_v18, %v5344_v33 }
 0x5bf   : > { %v5335_v31 = vpop.xlane.xlu1 %5334  ;;  %v5332_v35 = vpop.xlane.xlu0 %5331  ;;  %5472 = vadd.xlane.f32.xlu1 %v5471_v36  ;;  %v5507_v25 = vsel %vm926_vm2, %v10839_v50, 0.0 }
 0x5c0   : > { %v5383_v27 = vsub.f32 %v10700_v16, %v5335_v31  ;;  %v5382_v30 = vsub.f32 %v10698_v21, %v5332_v35  ;;  %8667 = vpow2.f32 %v5440_v1  ;;  %v5385_v35 = vsub.f32 %v10692_v40, %v5341_v37 }
 0x5c1   : > { %v10843_v55 = vpop.eup %8661  ;;  %8669 = vpow2.f32 %v5418_v0 }
 0x5c2   : > { %v5438_v14 = vmul.f32 1.442695, %v5383_v27  ;;  %v5498_v32 = vsel %vm926_vm2, %v10843_v55, 0.0  ;;  %v5436_v22 = vmul.f32 1.442695, %v5382_v30  ;;  %v10849_v5 = vpop.eup %8663 }
 0x5c3   : > { %v5329_v47 = vpop.xlane.xlu1 %5328  ;;  %5499 = vadd.xlane.f32.xlu0 %v5498_v32  ;;  %v5326_v53 = vpop.xlane.xlu0 %5325  ;;  %5508 = vadd.xlane.f32.xlu1 %v5507_v25  ;;  %v5501_v31 = vsel %vm926_vm2, %v10849_v5, 0.0  ;;  %v5442_v33 = vmul.f32 1.442695, %v5385_v35 }
 0x5c4   : > { %8671 = vpow2.f32 %v5438_v14  ;;  %v5381_v21 = vsub.f32 %v10708_v3, %v5329_v47  ;;  %v5380_v16 = vsub.f32 %v10706_v10, %v5326_v53  ;;  %v5387_v3 = vsub.f32 %v10680_v38, %v10818_v51 }
 0x5c5   : > { %8673 = vpow2.f32 %v5436_v22  ;;  %v5444_v14 = vmul.f32 1.442695, %v5386_v20 }
 0x5c6   : > { %v5434_v1 = vmul.f32 1.442695, %v5381_v21  ;;  %v5432_v27 = vmul.f32 1.442695, %v5380_v16  ;;  %v5446_v37 = vmul.f32 1.442695, %v5387_v3 }
 0x5c7   : > { %v5359_v0 = vpop.xlane.xlu1 %5358  ;;  %v5356_v36 = vpop.xlane.xlu0 %5355  ;;  %5502 = vadd.xlane.f32.xlu1 %v5501_v31 }
 0x5c8   : > { %8675 = vpow2.f32 %v5434_v1  ;;  %v5391_v47 = vsub.f32 %v10716_v42, %v5359_v0  ;;  %v5390_v1 = vsub.f32 %v10714_v2, %v5356_v36 }
 0x5c9   : > { %v10857_v30 = vpop.eup %8665  ;;  %8677 = vpow2.f32 %v5432_v27 }
 0x5ca   : > { %v5492_v18 = vsel %vm926_vm2, %v10857_v30, 0.0  ;;  %8679 = vpow2.f32 %v5444_v14  ;;  %v5454_v16 = vmul.f32 1.442695, %v5391_v47  ;;  %v5452_v35 = vmul.f32 1.442695, %v5390_v1 }
 0x5cb   : > { %v5350_v10 = vpop.xlane.xlu0 %5349  ;;  %5493 = vadd.xlane.f32.xlu0 %v5492_v18  ;;  %v5353_v22 = vpop.xlane.xlu1 %5352  ;;  %8681 = vpow2.f32 %v5442_v33  ;;  %v4063_v1 = vcombine.low %v10379_v23, %v10742_v56 }
 0x5cc   : > { %v5388_v32 = vsub.f32 %v10722_v49, %v5350_v10  ;;  %v5389_v25 = vsub.f32 %v10724_v19, %v5353_v22  ;;  %8683 = vpow2.f32 %v5446_v37 }
 0x5cd   : > { %v10864_v40 = vpop.eup %8667 }
 0x5ce   : > { %v5528_v38 = vsel %vm926_vm2, %v10864_v40, 0.0  ;;  %v10869_v51 = vpop.eup %8669  ;;  %v5448_v53 = vmul.f32 1.442695, %v5388_v32  ;;  %v5450_v0 = vmul.f32 1.442695, %v5389_v25 }
 0x5cf   : > { %5529 = vadd.xlane.f32.xlu0 %v5528_v38  ;;  %v5495_v42 = vsel %vm926_vm2, %v10869_v51, 0.0 }
 0x5d0   : > { %8685 = vpow2.f32 %v5448_v53 }
 0x5d1   : > { %v10872_v21 = vpop.eup %8671  ;;  %8687 = vpow2.f32 %v5454_v16 }
 0x5d2   : > { %v5525_v49 = vsel %vm926_vm2, %v10872_v21, 0.0  ;;  %v10878_v20 = vpop.eup %8673  ;;  %8689 = vpow2.f32 %v5450_v0  ;;  %v3602_v0 = vpop.permute.xlu1 %3601 }
 0x5d3   : > { %5526 = vadd.xlane.f32.xlu1 %v5525_v49  ;;  %5496 = vadd.xlane.f32.xlu0 %v5495_v42  ;;  %v5522_v19 = vsel %vm926_vm2, %v10878_v20, 0.0  ;;  %8691 = vpow2.f32 %v5452_v35  ;;  %v3600_v42 = vpop.permute.xlu0 %3599  ;;  %v4047_v35 = vcombine.low %v10738_v12, %v10740_v61 }
 0x5d5   : > { %v10883_v31 = vpop.eup %8675 }
 0x5d6   : > { %v10885_v27 = vpop.eup %8677  ;;  %v5519_v2 = vsel %vm926_vm2, %v10883_v31, 0.0 }
 0x5d7   : > { %5523 = vadd.xlane.f32.xlu0 %v5522_v19  ;;  %v10887_v3 = vpop.eup %8679  ;;  %v5516_v36 = vsel %vm926_vm2, %v10885_v27, 0.0  ;;  %5520 = vadd.xlane.f32.xlu1 %v5519_v2  ;;  %v4064_v2 = vcombine.high %v10379_v23, %v10742_v56  ;;  %v3928_v23 = vcombine.high %v10748_v59, %v3600_v42 }
 0x5d8   : > { %11851 = vst [vmem:[#allocation13_spill] sm:$0xff] %v10887_v3  ;;  %v10893_v14 = vpop.eup %8681  ;;  %v5534_v33 = vsel %vm926_vm2, %v10887_v3, 0.0 }
 0x5d9   : > { %11852 = vst [vmem:[#allocation10_spill] sm:$0xff] %v10893_v14  ;;  %v10895_v18 = vpop.eup %8683  ;;  %v5531_v10 = vsel %vm926_vm2, %v10893_v14, 0.0 }
 0x5da   : > { %11853 = vst [vmem:[#allocation9_spill] sm:$0xff] %v10895_v18  ;;  %v5537_v37 = vsel %vm926_vm2, %v10895_v18, 0.0 }
 0x5db   : > { %5517 = vadd.xlane.f32.xlu0 %v5516_v36  ;;  %5532 = vadd.xlane.f32.xlu1 %v5531_v10  ;;  %v3995_v36 = vcombine.low %v10750_v39, %v3602_v0  ;;  %v3996_v10 = vcombine.high %v10750_v39, %v3602_v0  ;;  %v4078_v39 = vrot.slane %v4064_v2, %v9263_v62 }
 0x5dc   : > { %v3942_v2 = vrot.slane %v3928_v23, %v9263_v62 }
 0x5dd   : > { %v10901_v32 = vpop.eup %8685  ;;  %v4010_v0 = vrot.slane %v3996_v10, %v9263_v62 }
 0x5de   : > { %11854 = vst [vmem:[#allocation14_spill] sm:$0xff] %v10901_v32  ;;  %v10903_v22 = vpop.eup %8687  ;;  %v5540_v47 = vsel %vm926_vm2, %v10901_v32, 0.0 }
 0x5df   : > { %5535 = vadd.xlane.f32.xlu0 %v5534_v33  ;;  %11855 = vst [vmem:[#allocation15_spill] sm:$0xff] %v10903_v22  ;;  %v10909_v38 = vpop.eup %8689  ;;  %5538 = vadd.xlane.f32.xlu1 %v5537_v37  ;;  %v5549_v25 = vsel %vm926_vm2, %v10903_v22, 0.0  ;;  %v4048_v33 = vcombine.high %v10738_v12, %v10740_v61  ;;  %v4071_v37 = vrot.slane %v4063_v1, %v9263_v62 }
 0x5e0   : > { %11856 = vst [vmem:[#allocation16_spill] sm:$0xff] %v10909_v38  ;;  %v5543_v53 = vsel %vm926_vm2, %v10909_v38, 0.0  ;;  %v10915_v49 = vpop.eup %8691  ;;  %v4055_v22 = vrot.slane %v4047_v35, %v9263_v62  ;;  %v3911_v12 = vcombine.low %v10744_v9, %v10752_v15  ;;  %v3912_v61 = vcombine.high %v10744_v9, %v10752_v15 }
 0x5e1   : > { %11857 = vst [vmem:[#allocation17_spill] sm:$0xff] %v10915_v49  ;;  %v5546_v16 = vsel %vm926_vm2, %v10915_v49, 0.0  ;;  %v4003_v1 = vrot.slane %v3995_v36, %v9263_v62  ;;  %v4062_v49 = vrot.slane %v4048_v33, %v9263_v62 }
 0x5e2   : > { %v3919_v9 = vrot.slane %v3911_v12, %v9263_v62  ;;  %v3926_v15 = vrot.slane %v3912_v61, %v9263_v62 }
 0x5e3   : > { %5541 = vadd.xlane.f32.xlu0 %v5540_v47  ;;  %5550 = vadd.xlane.f32.xlu1 %v5549_v25  ;;  %v3927_v47 = vcombine.low %v10748_v59, %v3600_v42  ;;  %v4095_v32 = vcombine.low %v4062_v49, %v4078_v39  ;;  %v4096_v18 = vcombine.high %v4062_v49, %v4078_v39 }
 0x5e5   : > { %v3935_v59 = vrot.slane %v3927_v47, %v9263_v62  ;;  %v4103_v39 = vrot.slane %v4095_v32, %v9277_v58  ;;  %v4110_v61 = vrot.slane %v4096_v18, %v9277_v58 }
 0x5e7   : > { %5544 = vadd.xlane.f32.xlu0 %v5543_v53  ;;  %v3979_v53 = vcombine.low %v10746_v41, %v10754_v52 }
 0x5e9   : > { %v3987_v42 = vrot.slane %v3979_v53, %v9263_v62  ;;  %v3959_v53 = vcombine.low %v3926_v15, %v3942_v2 }
 0x5eb   : > { %5547 = vadd.xlane.f32.xlu0 %v5546_v16  ;;  %v3980_v16 = vcombine.high %v10746_v41, %v10754_v52  ;;  %v4079_v41 = vcombine.low %v4055_v22, %v4071_v37  ;;  %v4080_v52 = vcombine.high %v4055_v22, %v4071_v37  ;;  %v4011_v10 = vcombine.low %v3987_v42, %v4003_v1 }
 0x5ec   : > { %v4012_v33 = vcombine.high %v3987_v42, %v4003_v1  ;;  %v3943_v22 = vcombine.low %v3919_v9, %v3935_v59  ;;  %v3944_v37 = vcombine.high %v3919_v9, %v3935_v59  ;;  %v8093_v9 = vcombine.high %v4103_v39, %v4110_v61 }
 0x5ed   : > { %v3994_v35 = vrot.slane %v3980_v16, %v9263_v62  ;;  %v3960_v16 = vcombine.high %v3926_v15, %v3942_v2  ;;  %v4087_v14 = vrot.slane %v4079_v41, %v9277_v58  ;;  %v4094_v49 = vrot.slane %v4080_v52, %v9277_v58 }
 0x5ee   : > { %v4026_v1 = vrot.slane %v4012_v33, %v9277_v58  ;;  %v3958_v41 = vrot.slane %v3944_v37, %v9277_v58  ;;  %v3967_v52 = vrot.slane %v3959_v53, %v9277_v58  ;;  %v4607_v2 = vcombine.low %v4103_v39, %v4110_v61 }
 0x5ef   : > { %v4027_v3 = vcombine.low %v3994_v35, %v4010_v0  ;;  %v4028_v47 = vcombine.high %v3994_v35, %v4010_v0  ;;  %v3974_v32 = vrot.slane %v3960_v16, %v9277_v58  ;;  %v4591_v35 = vcombine.low %v4087_v14, %v4094_v49 }
 0x5f0   : > { %v8092_v18 = vcombine.high %v4087_v14, %v4094_v49  ;;  %v4622_v14 = vrot.slane %v8093_v9, %v9263_v62 }
 0x5f1   : > { %v4035_v0 = vrot.slane %v4027_v3, %v9277_v58  ;;  %v4042_v59 = vrot.slane %v4028_v47, %v9277_v58  ;;  %v8089_v37 = vcombine.high %v3967_v52, %v3974_v32  ;;  %v4598_v53 = vrot.slane %v4591_v35, %v9263_v62 }
 0x5f2   : > { %v4606_v16 = vrot.slane %v8092_v18, %v9263_v62 }
 0x5f3   : > { %v8091_v47 = vcombine.high %v4035_v0, %v4042_v59 }
 0x617   : > { %v5464_v19 = vpop.xlane.xlu0 %5463 }
 0x61b   : > { %v5467_v25 = vpop.xlane.xlu1 %5466 }
 0x61c   : > { %v5488_v56 = vpop.xlane.xlu0 %5487  ;;  %8693 = vrcp.f32 %v5467_v25  ;;  %v4019_v25 = vrot.slane %v4011_v10, %v9277_v58 }
 0x61e   : > { %v4523_v15 = vcombine.low %v4019_v25, %v4026_v1  ;;  %v8090_v3 = vcombine.high %v4019_v25, %v4026_v1  ;;  %v10983_v1 = vrot.slane %v8091_v47, %v9263_v62 }
 0x620   : > { %v5491_v38 = vpop.xlane.xlu1 %5490  ;;  %v10968_v39 = vrot.slane %v4523_v15, %v9263_v62 }
 0x621   : > { %v5458_v36 = vpop.xlane.xlu0 %5457 }
 0x622   : > { %8695 = vrcp.f32 %v5458_v36  ;;  %v4539_v36 = vcombine.low %v4035_v0, %v4042_v59  ;;  %v10989_v59 = vrot.slane %v8089_v37, %v9263_v62 }
 0x623   : > { %8697 = vrcp.f32 %v5464_v19  ;;  %v3951_v19 = vrot.slane %v3943_v22, %v9277_v58  ;;  %v4471_v22 = vcombine.low %v3967_v52, %v3974_v32  ;;  %v4623_v32 = vcombine.low %v4598_v53, %v4606_v16 }
 0x624   : > { %v5461_v23 = vpop.xlane.xlu1 %5460  ;;  %v10980_v25 = vrot.slane %v4539_v36, %v9263_v62 }
 0x625   : > { %8699 = vrcp.f32 %v5461_v23  ;;  %v5482_v12 = vpop.xlane.xlu0 %5481  ;;  %v4455_v10 = vcombine.low %v3951_v19, %v3958_v41  ;;  %v8088_v33 = vcombine.high %v3951_v19, %v3958_v41  ;;  %v4614_v23 = vrot.slane %v4607_v2, %v9263_v62 }
 0x626   : > { %8701 = vrcp.f32 %v5482_v12  ;;  %v10986_v0 = vrot.slane %v4471_v22, %v9263_v62 }
 0x627   : > { %v10974_v12 = vrot.slane %v4455_v10, %v9263_v62 }
 0x628   : > { %v5485_v42 = vpop.xlane.xlu1 %5484 }
 0x629   : > { %8703 = vrcp.f32 %v5485_v42  ;;  %v8694_v49 = vpop.eup %8693  ;;  %v4639_v42 = vcombine.low %v4614_v23, %v4622_v14 }
 0x62a   : > { %8705 = vrcp.f32 %v5491_v38  ;;  %v10971_v38 = vrot.slane %v8090_v3, %v9263_v62  ;;  %v5587_v52 = vmul.f32 %v8694_v49, %v10769_v17  ;;  %v4503_v3 = vcombine.low %v10986_v0, %v10989_v59  ;;  %v5476_v49 = vpop.xlane.xlu0 %5475 }
 0x62b   : > { %8707 = vrcp.f32 %v5488_v56  ;;  %v10977_v56 = vrot.slane %v8088_v33, %v9263_v62  ;;  %v4571_v17 = vcombine.low %v10980_v25, %v10983_v1  ;;  %v11007_v47 = vrot.slane %v4639_v42, %v9277_v58 }
 0x62c   : > { %v4555_v36 = vcombine.low %v10968_v39, %v10971_v38 }
 0x62d   : > { %v4487_v2 = vcombine.low %v10974_v12, %v10977_v56 }
 0x62f   : > { %v8696_v61 = vpop.eup %8695 }
 0x630   : > { %v8698_v19 = vpop.eup %8697  ;;  %v5584_v35 = vmul.f32 %v8696_v61, %v10780_v11  ;;  %v11014_v61 = vrot.slane %v4487_v2, %v9277_v58 }
 0x631   : > { %v5586_v15 = vmul.f32 %v8698_v19, %v10763_v43  ;;  %v11017_v19 = vrot.slane %v4503_v3, %v9277_v58 }
 0x632   : > { %v8700_v41 = vpop.eup %8699 }
 0x633   : > { %v5585_v18 = vmul.f32 %v8700_v41, %v10786_v46  ;;  %v8702_v9 = vpop.eup %8701  ;;  %v5617_v11 = vpack.c.bf16 %v5587_v52, %v5586_v15  ;;  %v11004_v46 = vrot.slane %v4623_v32, %v9277_v58  ;;  %v11020_v41 = vrot.slane %v4555_v36, %v9277_v58 }
 0x634   : > { %v5592_v43 = vmul.f32 %v8702_v9, %v10788_v26  ;;  %v11023_v52 = vrot.slane %v4571_v17, %v9277_v58  ;;  %v11858_v9 = vcombine.low %v10583_v44, %v10586_v60 }
 0x635   : > { %v5616_v10 = vpack.c.bf16 %v5585_v18, %v5584_v35  ;;  %v4624_v35 = vcombine.high %v4598_v53, %v4606_v16  ;;  %v4640_v18 = vcombine.high %v4614_v23, %v4622_v14  ;;  %v5479_v23 = vpop.xlane.xlu1 %5478 }
 0x636   : > { %v8704_v33 = vpop.eup %8703  ;;  %v4587_v36 = vcombine.low %v11020_v41, %v11023_v52  ;;  %8709 = vrcp.f32 %v5479_v23 }
 0x637   : > { %v8706_v22 = vpop.eup %8705  ;;  %8369 = vmatprep.mubr.msk.bf16.mxu1 %vm926_vm2, %v5616_v10  ;;  %v5593_v37 = vmul.f32 %v8704_v33, %v10794_v13  ;;  %v4655_v13 = vcombine.low %v11004_v46, %v11007_v47  ;;  %v11041_v53 = vrot.slane %v4624_v35, %v9277_v58  ;;  %v11044_v16 = vrot.slane %v4640_v18, %v9277_v58 }
 0x638   : > { %8370 = vmatmul.mubr.msk.bf16.vlgmr.msra.gmra.mxu1 %vm926_vm2, %v5617_v11  ;;  %v8708_v32 = vpop.eup %8707  ;;  %v5595_v42 = vmul.f32 %v8706_v22, %v10778_v6  ;;  %v4504_v35 = vcombine.high %v10986_v0, %v10989_v59  ;;  %v4572_v18 = vcombine.high %v10980_v25, %v10983_v1 }
 0x639   : > { %8382 = vmatpush3.bf16.msra.mxu1 %v10569_v28  ;;  %v5620_v26 = vpack.c.bf16 %v5593_v37, %v5592_v43  ;;  %v4736_v15 = vpack.c.bf16 %v11858_v9, %v4655_v13  ;;  %v5594_v3 = vmul.f32 %v8708_v32, %v10772_v7  ;;  %v4519_v28 = vcombine.low %v11014_v61, %v11017_v19 }
 0x63a   : > { %8383 = vmatprep.subr.bf16.mxu1 %v10588_v29  ;;  %v4657_v17 = vcombine.low %v11041_v53, %v11044_v16 }
 0x63b   : > { %8385 = vmatprep.mubr.msk.bf16.mxu1 %vm926_vm2, %v5620_v26  ;;  %v5621_v6 = vpack.c.bf16 %v5595_v42, %v5594_v3  ;;  %v4735_v7 = vpack.c.bf16 %v4587_v36, %v4519_v28  ;;  %v4488_v26 = vcombine.high %v10974_v12, %v10977_v56 }
 0x63c   : > { %v5512_v2 = vpop.xlane.xlu0 %5511 }
 0x63d   : > { %8384 = vmatpush3.bf16.msra.mxu1 %v10588_v29  ;;  %v11859_v29 = vcombine.low %v10591_v34, %v10598_v57  ;;  %v11067_v56 = vrot.slane %v4488_v26, %v9277_v58 }
 0x63e   : > { %8397 = vmatprep.subr.bf16.mxu1 %v4736_v15 }
 0x63f   : > { %v11052_v33 = vpack.c.bf16 %v11859_v29, %v4657_v17 }
 0x640   : > { %8386 = vmatmul.mubr.msk.bf16.vlgmr.msra.gmra.mxu1 %vm926_vm2, %v5621_v6  ;;  %v5515_v10 = vpop.xlane.xlu1 %5514 }
 0x641   : > { %8398 = vmatpush3.bf16.msra.mxu1 %v4736_v15  ;;  %v5470_v14 = vpop.xlane.xlu0 %5469 }
 0x642   : > { %8399 = vmatprep.subr.bf16.mxu1 %v4735_v7  ;;  %8711 = vrcp.f32 %v5470_v14 }
 0x643   : > { %8713 = vrcp.f32 %v5476_v49  ;;  %v8710_v32 = vpop.eup %8709  ;;  %v4556_v49 = vcombine.high %v10968_v39, %v10971_v38  ;;  %v11071_v38 = vrot.slane %v4504_v35, %v9277_v58 }
 0x644   : > { %v5591_v15 = vmul.f32 %v8710_v32, %v10803_v24  ;;  %v11077_v24 = vrot.slane %v4572_v18, %v9277_v58 }
 0x645   : > { %8400 = vmatpush3.bf16.msra.mxu1 %v4735_v7  ;;  %v5506_v11 = vpop.xlane.xlu0 %5505  ;;  %v11074_v25 = vrot.slane %v4556_v49, %v9277_v58 }
 0x646   : > { %8413 = vmatprep.subr.bf16.mxu1 %v11052_v33 }
 0x647   : > { %v4589_v29 = vcombine.low %v11074_v25, %v11077_v24 }
 0x648   : > { %v5473_v22 = vpop.xlane.xlu1 %5472 }
 0x649   : > { %8715 = vrcp.f32 %v5473_v22  ;;  %v11861_v22 = vld [vmem:[#allocation12_spill] sm:$0xff] }
 0x64a   : > { %8717 = vrcp.f32 %v5515_v10  ;;  %v4521_v10 = vcombine.low %v11067_v56, %v11071_v38 }
 0x64b   : > { %8719 = vrcp.f32 %v5506_v11 }
 0x64c   : > { %8721 = vrcp.f32 %v5512_v2  ;;  %v5509_v43 = vpop.xlane.xlu1 %5508  ;;  %v5500_v37 = vpop.xlane.xlu0 %5499  ;;  %v4739_v26 = vpack.c.bf16 %v4589_v29, %v4521_v10  ;;  %v11865_v10 = vld [vmem:[#allocation13_spill] sm:$0xff] }
 0x64d   : > { %8723 = vrcp.f32 %v5509_v43 }
 0x64f   : > { %v8712_v13 = vpop.eup %8711 }
 0x650   : > { %v8714_v9 = vpop.eup %8713  ;;  %v5503_v28 = vpop.xlane.xlu1 %5502  ;;  %v5588_v36 = vmul.f32 %v8712_v13, %v10822_v54 }
 0x651   : > { %v5590_v39 = vmul.f32 %v8714_v9, %v10796_v4  ;;  %8725 = vrcp.f32 %v5503_v28 }
 0x654   : > { %v5494_v42 = vpop.xlane.xlu0 %5493 }
 0x655   : > { %8727 = vrcp.f32 %v5494_v42 }
 0x656   : > { %v8716_v2 = vpop.eup %8715  ;;  %8729 = vrcp.f32 %v5500_v37  ;;  %v11862_v37 = vcombine.high %v10583_v44, %v10586_v60 }
 0x657   : > { %v8718_v3 = vpop.eup %8717  ;;  %v5589_v12 = vmul.f32 %v8716_v2, %v10835_v8  ;;  %v5619_v8 = vpack.c.bf16 %v5591_v15, %v5590_v39  ;;  %v4520_v15 = vcombine.high %v11014_v61, %v11017_v19  ;;  %v4658_v61 = vcombine.high %v11041_v53, %v11044_v16 }
 0x658   : > { %v8720_v0 = vpop.eup %8719  ;;  %v5530_v59 = vpop.xlane.xlu0 %5529  ;;  %v5603_v23 = vmul.f32 %v8718_v3, %v10820_v45  ;;  %v11860_v45 = vld [vmem:[#allocation11_spill] sm:$0xff]  ;;  %v4588_v3 = vcombine.high %v11020_v41, %v11023_v52  ;;  %v11863_v52 = vcombine.high %v10591_v34, %v10598_v57  ;;  %v4522_v16 = vcombine.high %v11067_v56, %v11071_v38  ;;  %v11866_v38 = vld [vmem:[#allocation9_spill] sm:$0xff] }
 0x659   : > { %v8722_v1 = vpop.eup %8721  ;;  %v5618_v54 = vpack.c.bf16 %v5589_v12, %v5588_v36  ;;  %v5600_v4 = vmul.f32 %v8720_v0, %v10829_v63  ;;  %v4590_v34 = vcombine.high %v11074_v25, %v11077_v24 }
 0x65a   : > { %v8724_v6 = vpop.eup %8723  ;;  %v5602_v17 = vmul.f32 %v8722_v1, %v10814_v48  ;;  %v4742_v39 = vpack.c.bf16 %v11863_v52, %v4658_v61 }
 0x65b   : > { %8377 = vmatprep.mubr.msk.bf16.mxu0 %vm926_vm2, %v5618_v54  ;;  %v5601_v7 = vmul.f32 %v8724_v6, %v10839_v50  ;;  %v4656_v50 = vcombine.high %v11004_v46, %v11007_v47 }
 0x65c   : > { %8378 = vmatmul.mubr.msk.bf16.vlgmr.msra.gmra.mxu0 %vm926_vm2, %v5619_v8  ;;  %v5497_v14 = vpop.xlane.xlu0 %5496  ;;  %v5625_v63 = vpack.c.bf16 %v5603_v23, %v5602_v17  ;;  %v5527_v43 = vpop.xlane.xlu1 %5526 }
 0x65d   : > { %8390 = vmatpush3.bf16.msra.mxu0 %v11860_v45  ;;  %8731 = vrcp.f32 %v5497_v14  ;;  %v5624_v11 = vpack.c.bf16 %v5601_v7, %v5600_v4  ;;  %v4738_v32 = vpack.c.bf16 %v11862_v37, %v4656_v50  ;;  %v11864_v14 = vld [vmem:[#allocation10_spill] sm:$0xff]  ;;  %v11868_v50 = vld [vmem:[#allocation16_spill] sm:$0xff] }
 0x65e   : > { %8391 = vmatprep.subr.bf16.mxu0 %v11861_v22  ;;  %v8726_v13 = vpop.eup %8725 }
 0x65f   : > { %8401 = vmatprep.mubr.msk.bf16.mxu1 %vm926_vm2, %v5624_v11  ;;  %v5599_v18 = vmul.f32 %v8726_v13, %v10849_v5  ;;  %v4737_v5 = vpack.c.bf16 %v4588_v3, %v4520_v15 }
 0x660   : > { %8402 = vmatmul.mubr.msk.bf16.vlgmr.msra.gmra.mxu1 %vm926_vm2, %v5625_v63  ;;  %v5524_v48 = vpop.xlane.xlu0 %5523  ;;  %v5521_v46 = vpop.xlane.xlu1 %5520 }
 0x661   : > { %8392 = vmatpush3.bf16.msra.mxu0 %v11861_v22  ;;  %8414 = vmatpush3.bf16.msra.mxu1 %v11052_v33  ;;  %8733 = vrcp.f32 %v5524_v48  ;;  %v11867_v22 = vld [vmem:[#allocation14_spill] sm:$0xff] }
 0x662   : > { %8405 = vmatprep.subr.bf16.mxu0 %v4738_v32  ;;  %8415 = vmatprep.subr.bf16.mxu1 %v4739_v26  ;;  %8735 = vrcp.f32 %v5527_v43  ;;  %v8728_v42 = vpop.eup %8727 }
 0x663   : > { %8737 = vrcp.f32 %v5521_v46  ;;  %v8730_v35 = vpop.eup %8729  ;;  %v5596_v33 = vmul.f32 %v8728_v42, %v10857_v30  ;;  %v11870_v46 = vld [vmem:[#allocation15_spill] sm:$0xff] }
 0x664   : > { %v5518_v47 = vpop.xlane.xlu0 %5517  ;;  %v5533_v44 = vpop.xlane.xlu1 %5532  ;;  %v5598_v2 = vmul.f32 %v8730_v35, %v10843_v55 }
 0x665   : > { %8416 = vmatpush3.bf16.msra.mxu1 %v4739_v26  ;;  %8739 = vrcp.f32 %v5518_v47 }
 0x666   : > { %8741 = vrcp.f32 %v5530_v59  ;;  %v5623_v0 = vpack.c.bf16 %v5599_v18, %v5598_v2 }
 0x667   : > { %8743 = vrcp.f32 %v5533_v44 }
 0x668   : > { %v5536_v60 = vpop.xlane.xlu0 %5535  ;;  %v5539_v28 = vpop.xlane.xlu1 %5538 }
 0x669   : > { %8745 = vrcp.f32 %v5536_v60 }
 0x66a   : > { %v8732_v49 = vpop.eup %8731  ;;  %8747 = vrcp.f32 %v5539_v28 }
 0x66b   : > { %v5597_v9 = vmul.f32 %v8732_v49, %v10869_v51 }
 0x66c   : > { %v5542_v36 = vpop.xlane.xlu0 %5541  ;;  %v5551_v51 = vpop.xlane.xlu1 %5550 }
 0x66d   : > { %v5622_v12 = vpack.c.bf16 %v5597_v9, %v5596_v33  ;;  %8749 = vrcp.f32 %v5542_v36 }
 0x66e   : > { %v8734_v30 = vpop.eup %8733 }
 0x66f   : > { %8393 = vmatprep.mubr.msk.bf16.mxu0 %vm926_vm2, %v5622_v12  ;;  %v8736_v59 = vpop.eup %8735  ;;  %v5606_v1 = vmul.f32 %v8734_v30, %v10878_v20 }
 0x670   : > { %8394 = vmatmul.mubr.msk.bf16.vlgmr.msra.gmra.mxu0 %vm926_vm2, %v5623_v0  ;;  %v5545_v55 = vpop.xlane.xlu0 %5544  ;;  %v8738_v19 = vpop.eup %8737  ;;  %v5607_v53 = vmul.f32 %v8736_v59, %v10872_v21  ;;  %v4741_v21 = vpack.c.bf16 %v4590_v34, %v4522_v16 }
 0x671   : > { %8406 = vmatpush3.bf16.msra.mxu0 %v4738_v32  ;;  %8751 = vrcp.f32 %v5545_v55  ;;  %v5605_v23 = vmul.f32 %v8738_v19, %v10883_v31  ;;  %v11869_v32 = vld [vmem:[#allocation17_spill] sm:$0xff] }
 0x672   : > { %8407 = vmatprep.subr.bf16.mxu0 %v4737_v5  ;;  %v8740_v41 = vpop.eup %8739  ;;  %8753 = vrcp.f32 %v5551_v51 }
 0x673   : > { %v8742_v54 = vpop.eup %8741  ;;  %v5604_v8 = vmul.f32 %v8740_v41, %v10885_v27  ;;  %v5627_v27 = vpack.c.bf16 %v5607_v53, %v5606_v1 }
 0x674   : > { %v5548_v6 = vpop.xlane.xlu0 %5547  ;;  %v8744_v57 = vpop.eup %8743  ;;  %v5608_v7 = vmul.f32 %v8742_v54, %v10864_v40 }
 0x675   : > { %8408 = vmatpush3.bf16.msra.mxu0 %v4737_v5  ;;  %8755 = vrcp.f32 %v5548_v6  ;;  %v5626_v4 = vpack.c.bf16 %v5605_v23, %v5604_v8  ;;  %v5609_v17 = vmul.f32 %v8744_v57, %v11864_v14 }
 0x676   : > { %8421 = vmatprep.subr.bf16.mxu0 %v4742_v39  ;;  %v8746_v20 = vpop.eup %8745 }
 0x677   : > { %8409 = vmatprep.mubr.msk.bf16.mxu0 %vm926_vm2, %v5626_v4  ;;  %v5628_v31 = vpack.c.bf16 %v5609_v17, %v5608_v7  ;;  %v5610_v29 = vmul.f32 %v8746_v20, %v11865_v10  ;;  %v8748_v56 = vpop.eup %8747 }
 0x678   : > { %8410 = vmatmul.mubr.msk.bf16.vlgmr.msra.gmra.mxu0 %vm926_vm2, %v5627_v27  ;;  %v5611_v25 = vmul.f32 %v8748_v56, %v11866_v38 }
 0x679   : > { %8422 = vmatpush3.bf16.msra.mxu0 %v4742_v39  ;;  %8417 = vmatprep.mubr.msk.bf16.mxu1 %vm926_vm2, %v5628_v31 }
 0x67a   : > { %8423 = vmatprep.subr.bf16.mxu0 %v4741_v21  ;;  %v8750_v24 = vpop.eup %8749  ;;  %v5629_v40 = vpack.c.bf16 %v5611_v25, %v5610_v29 }
 0x67b   : > { %v5612_v63 = vmul.f32 %v8750_v24, %v11867_v22 }
 0x67c   : > { %8418 = vmatmul.mubr.msk.bf16.vlgmr.msra.gmra.mxu1 %vm926_vm2, %v5629_v40 }
 0x67d   : > { %8424 = vmatpush3.bf16.msra.mxu0 %v4741_v21 }
 0x67e   : > { %v8752_v45 = vpop.eup %8751 }
 0x67f   : > { %v8754_v11 = vpop.eup %8753  ;;  %v5613_v43 = vmul.f32 %v8752_v45, %v11868_v50 }
 0x680   : > { %v5615_v47 = vmul.f32 %v8754_v11, %v11870_v46 }
 0x681   : > { %v5630_v37 = vpack.c.bf16 %v5613_v43, %v5612_v63 }
 0x682   : > { %v8756_v48 = vpop.eup %8755 }
 0x683   : > { %v5614_v26 = vmul.f32 %v8756_v48, %v11869_v32  ;;  %8425 = vmatprep.mubr.msk.bf16.mxu0 %vm926_vm2, %v5630_v37 }
 0x685   : > { %v5631_v13 = vpack.c.bf16 %v5615_v47, %v5614_v26 }
 0x687   : > { %8426 = vmatmul.mubr.msk.bf16.vlgmr.msra.gmra.mxu0 %vm926_vm2, %v5631_v13 }
 0x6f8   : > { %v8371_v42 = vpop.f32.mrf.mxu1 }
 0x6fa   : > { %v5672_v35 = vpop.f32.mrf.mxu1 }
 0x6fc   : > { %v8372_v44 = vpop.f32.mrf.mxu1 }
 0x6fe   : > { %v5675_v60 = vpop.f32.mrf.mxu1 }
 0x700   : > { %v8387_v49 = vpop.f32.mrf.mxu1 }
 0x701   : > { %v6208_v28 = vcombine.low %v8371_v42, %v8387_v49  ;;  %v6209_v36 = vcombine.high %v8371_v42, %v8387_v49 }
 0x702   : > { %v5782_v33 = vpop.f32.mrf.mxu1 }
 0x703   : > { %v6072_v12 = vcombine.low %v5672_v35, %v5782_v33  ;;  %v6073_v0 = vcombine.high %v5672_v35, %v5782_v33  ;;  %v6216_v52 = vrot.slane %v6208_v28, %v9263_v62  ;;  %v6223_v39 = vrot.slane %v6209_v36, %v9263_v62 }
 0x704   : > { %v8388_v2 = vpop.f32.mrf.mxu1 }
 0x705   : > { %v6276_v30 = vcombine.low %v8372_v44, %v8388_v2  ;;  %v6277_v51 = vcombine.high %v8372_v44, %v8388_v2  ;;  %v6080_v1 = vrot.slane %v6072_v12, %v9263_v62  ;;  %v6087_v54 = vrot.slane %v6073_v0, %v9263_v62 }
 0x706   : > { %v5785_v3 = vpop.f32.mrf.mxu1 }
 0x707   : > { %v6140_v55 = vcombine.low %v5675_v60, %v5785_v3  ;;  %v6141_v59 = vcombine.high %v5675_v60, %v5785_v3  ;;  %v6284_v57 = vrot.slane %v6276_v30, %v9263_v62  ;;  %v11151_v4 = vrot.slane %v6277_v51, %v9263_v62 }
 0x709   : > { %v11154_v20 = vrot.slane %v6140_v55, %v9263_v62  ;;  %v11157_v7 = vrot.slane %v6141_v59, %v9263_v62 }
 0x71c   : > { %v8379_v18 = vpop.f32.mrf.mxu0 }
 0x71e   : > { %v5727_v9 = vpop.f32.mrf.mxu0 }
 0x720   : > { %v11137_v15 = vpop.f32.mrf.mxu0  ;;  %v11145_v6 = vpop.f32.mrf.mxu1 }
 0x722   : > { %v11139_v5 = vpop.f32.mrf.mxu0  ;;  %v11159_v10 = vpop.f32.mrf.mxu1 }
 0x724   : > { %v11169_v47 = vpop.f32.mrf.mxu1 }
 0x726   : > { %v11193_v51 = vpop.f32.mrf.mxu1 }
 0x730   : > { %v8395_v61 = vpop.f32.mrf.mxu0 }
 0x731   : > { %v6224_v19 = vcombine.low %v8379_v18, %v8395_v61  ;;  %v6225_v41 = vcombine.high %v8379_v18, %v8395_v61 }
 0x732   : > { %v5837_v8 = vpop.f32.mrf.mxu0 }
 0x733   : > { %v6232_v23 = vrot.slane %v6224_v19, %v9263_v62  ;;  %v6239_v53 = vrot.slane %v6225_v41, %v9263_v62  ;;  %v6088_v16 = vcombine.low %v5727_v9, %v5837_v8  ;;  %v6089_v34 = vcombine.high %v5727_v9, %v5837_v8 }
 0x734   : > { %v8396_v14 = vpop.f32.mrf.mxu0 }
 0x735   : > { %v6240_v17 = vcombine.low %v6216_v52, %v6232_v23  ;;  %v6241_v27 = vcombine.high %v6216_v52, %v6232_v23  ;;  %v6256_v31 = vcombine.low %v6223_v39, %v6239_v53  ;;  %v6257_v21 = vcombine.high %v6223_v39, %v6239_v53 }
 0x736   : > { %v6096_v29 = vrot.slane %v6088_v16, %v9263_v62  ;;  %v6103_v56 = vrot.slane %v6089_v34, %v9263_v62  ;;  %v6292_v38 = vcombine.low %v11137_v15, %v8396_v14  ;;  %v6293_v25 = vcombine.high %v11137_v15, %v8396_v14  ;;  %v5840_v24 = vpop.f32.mrf.mxu0 }
 0x737   : > { %v6248_v40 = vrot.slane %v6240_v17, %v9277_v58  ;;  %v6255_v45 = vrot.slane %v6241_v27, %v9277_v58  ;;  %v6264_v11 = vrot.slane %v6256_v31, %v9277_v58  ;;  %v6271_v22 = vrot.slane %v6257_v21, %v9277_v58 }
 0x738   : > { %v6104_v63 = vcombine.low %v6080_v1, %v6096_v29  ;;  %v6105_v50 = vcombine.high %v6080_v1, %v6096_v29  ;;  %v6120_v43 = vcombine.low %v6087_v54, %v6103_v56  ;;  %v6121_v48 = vcombine.high %v6087_v54, %v6103_v56  ;;  %v11175_v60 = vpop.f32.mrf.mxu0 }
 0x739   : > { %v6752_v37 = vcombine.low %v6248_v40, %v6255_v45  ;;  %v8132_v32 = vcombine.high %v6248_v40, %v6255_v45  ;;  %v6768_v26 = vcombine.low %v6264_v11, %v6271_v22  ;;  %v8133_v46 = vcombine.high %v6264_v11, %v6271_v22 }
 0x73a   : > { %v6112_v13 = vrot.slane %v6104_v63, %v9277_v58  ;;  %v6119_v42 = vrot.slane %v6105_v50, %v9277_v58  ;;  %v6128_v35 = vrot.slane %v6120_v43, %v9277_v58  ;;  %v6135_v44 = vrot.slane %v6121_v48, %v9277_v58  ;;  %v11207_v41 = vpop.f32.mrf.mxu0 }
 0x73b   : > { %v11178_v49 = vrot.slane %v6752_v37, %v9263_v62  ;;  %v11181_v18 = vrot.slane %v8132_v32, %v9263_v62  ;;  %v11184_v33 = vrot.slane %v6768_v26, %v9263_v62  ;;  %v11187_v9 = vrot.slane %v8133_v46, %v9263_v62 }
 0x73c   : > { %v6616_v2 = vcombine.low %v6112_v13, %v6119_v42  ;;  %v8128_v15 = vcombine.high %v6112_v13, %v6119_v42  ;;  %v6632_v3 = vcombine.low %v6128_v35, %v6135_v44  ;;  %v8129_v28 = vcombine.high %v6128_v35, %v6135_v44  ;;  %v8419_v23 = vpop.f32.mrf.mxu1  ;;  %v11225_v29 = vpop.f32.mrf.mxu0 }
 0x73d   : > { %v6300_v36 = vrot.slane %v6292_v38, %v9263_v62  ;;  %v6307_v12 = vrot.slane %v6293_v25, %v9263_v62  ;;  %v6156_v0 = vcombine.low %v11139_v5, %v5840_v24  ;;  %v6157_v30 = vcombine.high %v11139_v5, %v5840_v24 }
 0x73e   : > { %v11196_v55 = vrot.slane %v6616_v2, %v9263_v62  ;;  %v11199_v59 = vrot.slane %v8128_v15, %v9263_v62  ;;  %v11202_v61 = vrot.slane %v6632_v3, %v9263_v62  ;;  %v11205_v19 = vrot.slane %v8129_v28, %v9263_v62  ;;  %v6002_v56 = vpop.f32.mrf.mxu1  ;;  %v11243_v13 = vpop.f32.mrf.mxu0 }
 0x73f   : > { %v6308_v52 = vcombine.low %v6284_v57, %v6300_v36  ;;  %v6309_v39 = vcombine.high %v6284_v57, %v6300_v36  ;;  %v6324_v5 = vcombine.low %v11151_v4, %v6307_v12  ;;  %v6325_v1 = vcombine.high %v11151_v4, %v6307_v12 }
 0x740   : > { %v6164_v54 = vrot.slane %v6156_v0, %v9263_v62  ;;  %v6171_v8 = vrot.slane %v6157_v30, %v9263_v62  ;;  %v6784_v53 = vcombine.low %v11178_v49, %v11181_v18  ;;  %v6800_v16 = vcombine.low %v11184_v33, %v11187_v9 }
 0x741   : > { %v6316_v34 = vrot.slane %v6308_v52, %v9277_v58  ;;  %v6323_v14 = vrot.slane %v6309_v39, %v9277_v58  ;;  %v6332_v57 = vrot.slane %v6324_v5, %v9277_v58  ;;  %v6339_v17 = vrot.slane %v6325_v1, %v9277_v58 }
 0x742   : > { %v6172_v4 = vcombine.low %v11154_v20, %v6164_v54  ;;  %v6173_v27 = vcombine.high %v11154_v20, %v6164_v54  ;;  %v6188_v31 = vcombine.low %v11157_v7, %v6171_v8  ;;  %v6189_v21 = vcombine.high %v11157_v7, %v6171_v8  ;;  %v8420_v20 = vpop.f32.mrf.mxu1 }
 0x743   : > { %v6820_v38 = vcombine.low %v6316_v34, %v6323_v14  ;;  %v8134_v25 = vcombine.high %v6316_v34, %v6323_v14  ;;  %v6836_v24 = vcombine.low %v6332_v57, %v6339_v17  ;;  %v8135_v40 = vcombine.high %v6332_v57, %v6339_v17 }
 0x744   : > { %v6180_v45 = vrot.slane %v6172_v4, %v9277_v58  ;;  %v6187_v11 = vrot.slane %v6173_v27, %v9277_v58  ;;  %v6196_v22 = vrot.slane %v6188_v31, %v9277_v58  ;;  %v6203_v63 = vrot.slane %v6189_v21, %v9277_v58  ;;  %v6005_v15 = vpop.f32.mrf.mxu1 }
 0x745   : > { %v11232_v50 = vrot.slane %v6820_v38, %v9263_v62  ;;  %v11235_v7 = vrot.slane %v8134_v25, %v9263_v62  ;;  %v11238_v43 = vrot.slane %v6836_v24, %v9263_v62  ;;  %v11241_v48 = vrot.slane %v8135_v40, %v9263_v62 }
 0x746   : > { %v6684_v37 = vcombine.low %v6180_v45, %v6187_v11  ;;  %v8130_v32 = vcombine.high %v6180_v45, %v6187_v11  ;;  %v6700_v26 = vcombine.low %v6196_v22, %v6203_v63  ;;  %v8131_v46 = vcombine.high %v6196_v22, %v6203_v63 }
 0x747   : > { %v6480_v42 = vcombine.low %v11145_v6, %v8419_v23  ;;  %v6481_v35 = vcombine.high %v11145_v6, %v8419_v23  ;;  %v6344_v44 = vcombine.low %v11159_v10, %v6002_v56  ;;  %v6345_v2 = vcombine.high %v11159_v10, %v6002_v56  ;;  %v8427_v0 = vpop.f32.mrf.mxu0 }
 0x748   : > { %v11250_v3 = vrot.slane %v6684_v37, %v9263_v62  ;;  %v11253_v28 = vrot.slane %v8130_v32, %v9263_v62  ;;  %v11256_v36 = vrot.slane %v6700_v26, %v9263_v62  ;;  %v11259_v12 = vrot.slane %v8131_v46, %v9263_v62 }
 0x749   : > { %v6488_v6 = vrot.slane %v6480_v42, %v9263_v62  ;;  %v6495_v30 = vrot.slane %v6481_v35, %v9263_v62  ;;  %v6352_v10 = vrot.slane %v6344_v44, %v9263_v62  ;;  %v6359_v52 = vrot.slane %v6345_v2, %v9263_v62  ;;  %v6057_v57 = vpop.f32.mrf.mxu0 }
 0x74a   : > { %v6548_v39 = vcombine.low %v11169_v47, %v8420_v20  ;;  %v6549_v5 = vcombine.high %v11169_v47, %v8420_v20  ;;  %v6412_v1 = vcombine.low %v11193_v51, %v6005_v15  ;;  %v6413_v54 = vcombine.high %v11193_v51, %v6005_v15 }
 0x74b   : > { %v6496_v8 = vcombine.low %v11175_v60, %v8427_v0  ;;  %v6497_v23 = vcombine.high %v11175_v60, %v8427_v0  ;;  %v11272_v34 = vrot.slane %v6784_v53, %v9277_v58  ;;  %v11275_v14 = vrot.slane %v6800_v16, %v9277_v58 }
 0x74c   : > { %v11278_v17 = vrot.slane %v6548_v39, %v9263_v62  ;;  %v11281_v47 = vrot.slane %v6549_v5, %v9263_v62  ;;  %v11284_v4 = vrot.slane %v6412_v1, %v9263_v62  ;;  %v11287_v51 = vrot.slane %v6413_v54, %v9263_v62 }
 0x74d   : > { %v6504_v60 = vrot.slane %v6496_v8, %v9263_v62  ;;  %v6511_v53 = vrot.slane %v6497_v23, %v9263_v62  ;;  %v6817_v16 = vcombine.high %v11272_v34, %v11275_v14  ;;  %v6852_v27 = vcombine.low %v11232_v50, %v11235_v7 }
 0x74e   : > { %v6868_v31 = vcombine.low %v11238_v43, %v11241_v48  ;;  %v6360_v21 = vcombine.low %v11207_v41, %v6057_v57  ;;  %v6361_v56 = vcombine.high %v11207_v41, %v6057_v57  ;;  %v6648_v38 = vcombine.low %v11196_v55, %v11199_v59 }
 0x74f   : > { %v6512_v25 = vcombine.low %v6488_v6, %v6504_v60  ;;  %v6513_v24 = vcombine.high %v6488_v6, %v6504_v60  ;;  %v6528_v40 = vcombine.low %v6495_v30, %v6511_v53  ;;  %v6529_v45 = vcombine.high %v6495_v30, %v6511_v53 }
 0x750   : > { %v11302_v11 = vrot.slane %v6852_v27, %v9277_v58  ;;  %v11305_v22 = vrot.slane %v6868_v31, %v9277_v58  ;;  %v6368_v63 = vrot.slane %v6360_v21, %v9263_v62  ;;  %v6375_v20 = vrot.slane %v6361_v56, %v9263_v62 }
 0x751   : > { %v6520_v37 = vrot.slane %v6512_v25, %v9277_v58  ;;  %v6527_v41 = vrot.slane %v6513_v24, %v9277_v58  ;;  %v6536_v32 = vrot.slane %v6528_v40, %v9277_v58  ;;  %v6543_v26 = vrot.slane %v6529_v45, %v9277_v58 }
 0x752   : > { %v6885_v46 = vcombine.high %v11302_v11, %v11305_v22  ;;  %v6376_v42 = vcombine.low %v6352_v10, %v6368_v63  ;;  %v6377_v35 = vcombine.high %v6352_v10, %v6368_v63  ;;  %v6392_v44 = vcombine.low %v6359_v52, %v6375_v20 }
 0x753   : > { %v7024_v2 = vcombine.low %v6520_v37, %v6527_v41  ;;  %v8140_v15 = vcombine.high %v6520_v37, %v6527_v41  ;;  %v7040_v0 = vcombine.low %v6536_v32, %v6543_v26  ;;  %v8141_v6 = vcombine.high %v6536_v32, %v6543_v26 }
 0x754   : > { %v8539_v30 = vpack.i.bf16 %v6885_v46, %v6817_v16  ;;  %v6384_v39 = vrot.slane %v6376_v42, %v9277_v58  ;;  %v6391_v5 = vrot.slane %v6377_v35, %v9277_v58  ;;  %v6393_v1 = vcombine.high %v6359_v52, %v6375_v20  ;;  %v8428_v16 = vpop.f32.mrf.mxu0 }
 0x755   : > { %v11318_v54 = vrot.slane %v7024_v2, %v9263_v62  ;;  %v11321_v8 = vrot.slane %v8140_v15, %v9263_v62  ;;  %v11324_v23 = vrot.slane %v7040_v0, %v9263_v62  ;;  %v11327_v10 = vrot.slane %v8141_v6, %v9263_v62 }
 0x756   : > { %8540 = vrot.lane.b32.xlu1 %v8539_v30, %s8856_s20  ;;  %v6400_v57 = vrot.slane %v6392_v44, %v9277_v58  ;;  %v6407_v60 = vrot.slane %v6393_v1, %v9277_v58  ;;  %v6888_v52 = vcombine.low %v6384_v39, %v6391_v5  ;;  %v8136_v53 = vcombine.high %v6384_v39, %v6391_v5 }
 0x757   : > { %v11333_v27 = vrot.slane %v6648_v38, %v9277_v58  ;;  %v6664_v31 = vcombine.low %v11202_v61, %v11205_v19  ;;  %v6716_v21 = vcombine.low %v11250_v3, %v11253_v28  ;;  %v6732_v56 = vcombine.low %v11256_v36, %v11259_v12 }
 0x758   : > { %v11342_v25 = vrot.slane %v6888_v52, %v9263_v62  ;;  %v11345_v24 = vrot.slane %v8136_v53, %v9263_v62  ;;  %v6904_v40 = vcombine.low %v6400_v57, %v6407_v60  ;;  %v8137_v45 = vcombine.high %v6400_v57, %v6407_v60 }
 0x759   : > { %v11348_v38 = vrot.slane %v6664_v31, %v9277_v58  ;;  %v11351_v63 = vrot.slane %v6716_v21, %v9277_v58  ;;  %v11354_v20 = vrot.slane %v6732_v56, %v9277_v58  ;;  %v6564_v37 = vcombine.low %v11225_v29, %v8428_v16 }
 0x75a   : > { %v11358_v41 = vrot.slane %v6904_v40, %v9263_v62  ;;  %v11361_v32 = vrot.slane %v8137_v45, %v9263_v62  ;;  %v6565_v26 = vcombine.high %v11225_v29, %v8428_v16  ;;  %v6785_v46 = vcombine.high %v11178_v49, %v11181_v18  ;;  %v6060_v18 = vpop.f32.mrf.mxu0 }
 0x75b   : > { %v6681_v42 = vcombine.high %v11333_v27, %v11348_v38  ;;  %v6749_v35 = vcombine.high %v11351_v63, %v11354_v20  ;;  %v6572_v44 = vrot.slane %v6564_v37, %v9263_v62  ;;  %v6801_v2 = vcombine.high %v11184_v33, %v11187_v9 }
 0x75c   : > { %v6579_v15 = vrot.slane %v6565_v26, %v9263_v62  ;;  %v11375_v0 = vrot.slane %v6785_v46, %v9277_v58  ;;  %v6853_v29 = vcombine.high %v11232_v50, %v11235_v7  ;;  %v6869_v49 = vcombine.high %v11238_v43, %v11241_v48 }
 0x75d   : > { %v8554_v6 = vpack.i.bf16 %v6749_v35, %v6681_v42  ;;  %v6580_v30 = vcombine.low %v11278_v17, %v6572_v44  ;;  %v6581_v39 = vcombine.high %v11278_v17, %v6572_v44  ;;  %v11384_v5 = vrot.slane %v6801_v2, %v9277_v58  ;;  %v8601_v35 = vld [vmem:[%s11871_s27 + $0x8] sm:$0xff]  }
 0x75e   : > { %v6596_v33 = vcombine.low %v11281_v47, %v6579_v15  ;;  %v6597_v9 = vcombine.high %v11281_v47, %v6579_v15  ;;  %v6867_v1 = vrot.slane %v6853_v29, %v9277_v58  ;;  %v6883_v50 = vrot.slane %v6869_v49, %v9277_v58  ;;  %8429 = vmatprep.subr.bf16.mxu1 %v8601_v35 }
 0x75f   : > { %8555 = vrot.lane.b32.xlu0 %v8554_v6, %s8856_s20  ;;  %v6588_v7 = vrot.slane %v6580_v30, %v9277_v58  ;;  %v6595_v43 = vrot.slane %v6581_v39, %v9277_v58  ;;  %v6818_v48 = vcombine.low %v11375_v0, %v11384_v5  ;;  %v6428_v17 = vcombine.low %v11243_v13, %v6060_v18  ;;  %v8602_v39 = vld [vmem:[%s11871_s27] sm:$0xff]  }
 0x760   : > { %v6604_v57 = vrot.slane %v6596_v33, %v9277_v58  ;;  %v6611_v47 = vrot.slane %v6597_v9, %v9277_v58  ;;  %v6886_v60 = vcombine.low %v6867_v1, %v6883_v50  ;;  %v6429_v52 = vcombine.high %v11243_v13, %v6060_v18  ;;  %8430 = vmatpush3.bf16.msra.mxu1 %v8601_v35 }
 0x761   : > { %v7092_v53 = vcombine.low %v6588_v7, %v6595_v43  ;;  %v8142_v16 = vcombine.high %v6588_v7, %v6595_v43  ;;  %v6436_v31 = vrot.slane %v6428_v17, %v9263_v62  ;;  %v6649_v21 = vcombine.high %v11196_v55, %v11199_v59  ;;  %8431 = vmatprep.subr.bf16.mxu1 %v8602_v39 }
 0x762   : > { %v7108_v56 = vcombine.low %v6604_v57, %v6611_v47  ;;  %v8143_v40 = vcombine.high %v6604_v57, %v6611_v47  ;;  %v8544_v45 = vpack.i.bf16 %v6886_v60, %v6818_v48  ;;  %v6443_v37 = vrot.slane %v6429_v52, %v9263_v62 }
 0x763   : > { %v11404_v26 = vrot.slane %v7092_v53, %v9263_v62  ;;  %v11407_v46 = vrot.slane %v8142_v16, %v9263_v62  ;;  %v6444_v13 = vcombine.low %v11284_v4, %v6436_v31  ;;  %v6445_v42 = vcombine.high %v11284_v4, %v6436_v31 }
 0x764   : > { %v11413_v44 = vrot.slane %v7108_v56, %v9263_v62  ;;  %v11416_v55 = vrot.slane %v8143_v40, %v9263_v62  ;;  %8545 = vrot.lane.b32.xlu1 %v8544_v45, %s8857_s1  ;;  %v6460_v59 = vcombine.low %v11287_v51, %v6443_v37  ;;  %v6461_v2 = vcombine.high %v11287_v51, %v6443_v37 }
 0x765   : > { %v6452_v15 = vrot.slane %v6444_v13, %v9277_v58  ;;  %v6459_v29 = vrot.slane %v6445_v42, %v9277_v58  ;;  %v6663_v4 = vrot.slane %v6649_v21, %v9277_v58  ;;  %v6665_v49 = vcombine.high %v11202_v61, %v11205_v19  ;;  %8432 = vmatpush3.bf16.msra.mxu1 %v8602_v39 }
 0x766   : > { %v6468_v18 = vrot.slane %v6460_v59, %v9277_v58  ;;  %v6475_v6 = vrot.slane %v6461_v2, %v9277_v58  ;;  %v6717_v30 = vcombine.high %v11250_v3, %v11253_v28  ;;  %v6733_v51 = vcombine.high %v11256_v36, %v11259_v12 }
 0x767   : > { %v6956_v33 = vcombine.low %v6452_v15, %v6459_v29  ;;  %v8138_v9 = vcombine.high %v6452_v15, %v6459_v29  ;;  %v6679_v7 = vrot.slane %v6665_v49, %v9277_v58  ;;  %v6819_v61 = vcombine.high %v11375_v0, %v11384_v5 }
 0x768   : > { %v6972_v19 = vcombine.low %v6468_v18, %v6475_v6  ;;  %v8139_v43 = vcombine.high %v6468_v18, %v6475_v6  ;;  %v6731_v48 = vrot.slane %v6717_v30, %v9277_v58  ;;  %v6747_v17 = vrot.slane %v6733_v51, %v9277_v58 }
 0x769   : > { %v6963_v3 = vrot.slane %v6956_v33, %v9263_v62  ;;  %v6971_v28 = vrot.slane %v8138_v9, %v9263_v62  ;;  %v6683_v36 = vcombine.high %v6663_v4, %v6679_v7  ;;  %v6887_v12 = vcombine.high %v6867_v1, %v6883_v50 }
 0x76a   : > { %v6979_v57 = vrot.slane %v6972_v19, %v9263_v62  ;;  %v6987_v47 = vrot.slane %v8139_v43, %v9263_v62  ;;  %v6751_v60 = vcombine.high %v6731_v48, %v6747_v17  ;;  %v6682_v52 = vcombine.low %v6663_v4, %v6679_v7 }
 0x76b   : > { %v8549_v0 = vpack.i.bf16 %v6887_v12, %v6819_v61  ;;  %v6750_v5 = vcombine.low %v6731_v48, %v6747_v17  ;;  %v7056_v53 = vcombine.low %v11318_v54, %v11321_v8  ;;  %v7072_v16 = vcombine.low %v11324_v23, %v11327_v10 }
 0x76c   : > { %v8564_v31 = vpack.i.bf16 %v6751_v60, %v6683_v36  ;;  %v7124_v21 = vcombine.low %v11404_v26, %v11407_v46  ;;  %v7140_v1 = vcombine.low %v11413_v44, %v11416_v55  ;;  %v6920_v62 = vcombine.low %v11342_v25, %v11345_v24 }
 0x76d   : > { %8550 = vrot.lane.b32.xlu1 %v8549_v0, %s8858_s23  ;;  %v8559_v50 = vpack.i.bf16 %v6750_v5, %v6682_v52  ;;  %v11454_v56 = vrot.slane %v7056_v53, %v9277_v58  ;;  %v11457_v40 = vrot.slane %v7072_v16, %v9277_v58  ;;  %v6936_v45 = vcombine.low %v11358_v41, %v11361_v32 }
 0x76e   : > { %8565 = vrot.lane.b32.xlu0 %v8564_v31, %s8858_s23  ;;  %v11463_v37 = vrot.slane %v7124_v21, %v9277_v58  ;;  %v11466_v13 = vrot.slane %v7140_v1, %v9277_v58  ;;  %v11469_v42 = vrot.slane %v6920_v62, %v9277_v58  ;;  %v6988_v35 = vcombine.low %v6963_v3, %v6971_v28 }
 0x76f   : > { %v7089_v59 = vcombine.high %v11454_v56, %v11457_v40  ;;  %v11474_v2 = vrot.slane %v6936_v45, %v9277_v58  ;;  %v7004_v15 = vcombine.low %v6979_v57, %v6987_v47  ;;  %v7057_v29 = vcombine.high %v11318_v54, %v11321_v8 }
 0x770   : > { %v7157_v4 = vcombine.high %v11463_v37, %v11466_v13  ;;  %v11481_v49 = vrot.slane %v6988_v35, %v9277_v58  ;;  %v7073_v18 = vcombine.high %v11324_v23, %v11327_v10  ;;  %v7125_v6 = vcombine.high %v11404_v26, %v11407_v46 }
 0x771   : > { %8560 = vrot.lane.b32.xlu1 %v8559_v50, %s8857_s1  ;;  %v6953_v30 = vcombine.high %v11469_v42, %v11474_v2  ;;  %v11491_v51 = vrot.slane %v7004_v15, %v9277_v58  ;;  %v7071_v54 = vrot.slane %v7057_v29, %v9277_v58  ;;  %v7141_v8 = vcombine.high %v11413_v44, %v11416_v55 }
 0x772   : > { %v8569_v39 = vpack.i.bf16 %v7157_v4, %v7089_v59  ;;  %v7087_v33 = vrot.slane %v7073_v18, %v9277_v58  ;;  %v7139_v23 = vrot.slane %v7125_v6, %v9277_v58  ;;  %v6921_v10 = vcombine.high %v11342_v25, %v11345_v24 }
 0x773   : > { %v7021_v26 = vcombine.high %v11481_v49, %v11491_v51  ;;  %v7155_v46 = vrot.slane %v7141_v8, %v9277_v58  ;;  %v6937_v9 = vcombine.high %v11358_v41, %v11361_v32  ;;  %v6989_v7 = vcombine.high %v6963_v3, %v6971_v28 }
 0x774   : > { %v7090_v61 = vcombine.low %v7071_v54, %v7087_v33  ;;  %v6935_v44 = vrot.slane %v6921_v10, %v9277_v58  ;;  %v7005_v55 = vcombine.high %v6979_v57, %v6987_v47  ;;  %v6816_v17 = vcombine.low %v11272_v34, %v11275_v14 }
 0x775   : > { %8570 = vrot.lane.b32.xlu1 %v8569_v39, %s8856_s20  ;;  %v8579_v19 = vpack.i.bf16 %v7021_v26, %v6953_v30  ;;  %v7158_v43 = vcombine.low %v7139_v23, %v7155_v46  ;;  %v6951_v48 = vrot.slane %v6937_v9, %v9277_v58  ;;  %v7003_v25 = vrot.slane %v6989_v7, %v9277_v58 }
 0x776   : > { %v7019_v24 = vrot.slane %v7005_v55, %v9277_v58  ;;  %v6884_v41 = vcombine.low %v11302_v11, %v11305_v22  ;;  %v7159_v3 = vcombine.high %v7139_v23, %v7155_v46  ;;  %v6680_v28 = vcombine.low %v11333_v27, %v11348_v38 }
 0x777   : > { %8580 = vrot.lane.b32.xlu0 %v8579_v19, %s8856_s20  ;;  %v8574_v32 = vpack.i.bf16 %v7158_v43, %v7090_v61  ;;  %v6954_v36 = vcombine.low %v6935_v44, %v6951_v48  ;;  %v6748_v57 = vcombine.low %v11351_v63, %v11354_v20  ;;  %v7091_v58 = vcombine.high %v7071_v54, %v7087_v33 }
 0x778   : > { %v7022_v12 = vcombine.low %v7003_v25, %v7019_v24  ;;  %v7088_v34 = vcombine.low %v11454_v56, %v11457_v40  ;;  %v7156_v14 = vcombine.low %v11463_v37, %v11466_v13  ;;  %v7023_v22 = vcombine.high %v7003_v25, %v7019_v24 }
 0x779   : > { %8575 = vrot.lane.b32.xlu1 %v8574_v32, %s8857_s1  ;;  %v6952_v47 = vcombine.low %v11469_v42, %v11474_v2  ;;  %v7020_v27 = vcombine.low %v11481_v49, %v11491_v51  ;;  %v8594_v38 = vpack.i.bf16 %v7159_v3, %v7091_v58  ;;  %v6955_v63 = vcombine.high %v6935_v44, %v6951_v48  ;;  %v8144_v42 = vld [vmem:[%s11872_s17] ss:$0 sm:$0xff] }
 0x77a   : > { %v8584_v11 = vpack.i.bf16 %v7022_v12, %v6954_v36 }
 0x77b   : > { %v8589_v20 = vpack.i.bf16 %v7023_v22, %v6955_v63 }
 0x77c   : > { %8585 = vrot.lane.b32.xlu0 %v8584_v11, %s8857_s1  ;;  %s11875_s1 = sadd.s32 4294967295, %s11874_s29  }
 0x77d   : > { %8595 = vrot.lane.b32.xlu1 %v8594_v38, %s8858_s23  ;;  %p11742_p6 = scmp.eq.s32.totalorder %s11875_s1, 3 }
 0x780   : > { %8590 = vrot.lane.b32.xlu0 %v8589_v20, %s8858_s23 }
 0x7c8   : > { %v8541_v60 = vpop.permute.xlu1 %8540 }
 0x7c9   : > { %v8543_v0 = vunpack.i.h.bf16 %v8541_v60  ;;  %v8542_v5 = vunpack.i.l.bf16 %v8541_v60 }
 0x7cb   : > { %v7258_v1 = vsel %vm4743_vm3, %v6816_v17, %v8542_v5  ;;  %v7259_v62 = vsel %vm4743_vm3, %v6884_v41, %v8543_v0 }
 0x7d1   : > { %v8556_v53 = vpop.permute.xlu0 %8555 }
 0x7d2   : > { %v8558_v40 = vunpack.i.h.bf16 %v8556_v53  ;;  %v8557_v45 = vunpack.i.l.bf16 %v8556_v53 }
 0x7d4   : > { %v7257_v30 = vsel %vm4743_vm3, %v6748_v57, %v8558_v40  ;;  %v7256_v54 = vsel %vm4743_vm3, %v6680_v28, %v8557_v45 }
 0x7d6   : > { %v8546_v52 = vpop.permute.xlu1 %8545 }
 0x7d7   : > { %v8548_v16 = vunpack.i.h.bf16 %v8546_v52  ;;  %v8547_v31 = vunpack.i.l.bf16 %v8546_v52 }
 0x7d9   : > { %v7267_v37 = vsel %vm7264_vm4, %v7258_v1, %v8547_v31  ;;  %v7268_v13 = vsel %vm7264_vm4, %v7259_v62, %v8548_v16  ;;  %v8789_v31 = vld [vmem:[#allocation2] sm:$0xff]  ;;  %v8790_v62 = vld [vmem:[#allocation2 + $0x10] sm:$0xff] }
 0x7df   : > { %v8551_v21 = vpop.permute.xlu1 %8550 }
 0x7e0   : > { %v8553_v50 = vunpack.i.h.bf16 %v8551_v21  ;;  %v8552_v56 = vunpack.i.l.bf16 %v8551_v21  ;;  %v8566_v35 = vpop.permute.xlu0 %8565 }
 0x7e1   : > { %v8568_v8 = vunpack.i.h.bf16 %v8566_v35  ;;  %v8567_v39 = vunpack.i.l.bf16 %v8566_v35  ;;  %v8792_v35 = vld [vmem:[#allocation2 + $0x18] sm:$0xff] }
 0x7e2   : > { %v7276_v59 = vsel %vm7273_vm5, %v7267_v37, %v8552_v56  ;;  %v7277_v15 = vsel %vm7273_vm5, %v7268_v13, %v8553_v50  ;;  %v8791_v37 = vld [vmem:[#allocation2 + $0x8] sm:$0xff] }
 0x7e3   : > { %v7283_v29 = vpack.c.bf16 %v7277_v15, %v7276_v59  ;;  %v8561_v4 = vpop.permute.xlu1 %8560 }
 0x7e4   : > { %v8563_v18 = vunpack.i.h.bf16 %v8561_v4  ;;  %v8562_v6 = vunpack.i.l.bf16 %v8561_v4 }
 0x7e6   : > { %v7265_v33 = vsel %vm7264_vm4, %v7256_v54, %v8562_v6  ;;  %v7266_v23 = vsel %vm7264_vm4, %v7257_v30, %v8563_v18 }
 0x7e7   : > { %v7274_v10 = vsel %vm7273_vm5, %v7265_v33, %v8567_v39  ;;  %v7275_v26 = vsel %vm7273_vm5, %v7266_v23, %v8568_v8  ;;  %v8571_v46 = vpop.permute.xlu1 %8570  ;;  %v8793_v39 = vld [vmem:[#allocation2 + $0x20] sm:$0xff] }
 0x7e8   : > { %v7282_v9 = vpack.c.bf16 %v7275_v26, %v7274_v10  ;;  %v8573_v61 = vunpack.i.h.bf16 %v8571_v46  ;;  %v8572_v44 = vunpack.i.l.bf16 %v8571_v46  ;;  %v8794_v10 = vld [vmem:[#allocation2 + $0x30] sm:$0xff] }
 0x7e9   : > { %v8581_v7 = vpop.permute.xlu0 %8580 }
 0x7ea   : > { %8433 = vmatprep.mubr.msk.bf16.mxu1 %vm926_vm2, %v7282_v9  ;;  %v8583_v48 = vunpack.i.h.bf16 %v8581_v7  ;;  %v7262_v24 = vsel %vm4743_vm3, %v7088_v34, %v8572_v44  ;;  %v7263_v17 = vsel %vm4743_vm3, %v7156_v14, %v8573_v61  ;;  %v8582_v41 = vunpack.i.l.bf16 %v8581_v7  ;;  %v8795_v61 = vld [vmem:[#allocation2 + $0x28] sm:$0xff] }
 0x7eb   : > { %8434 = vmatmul.mubr.msk.bf16.vlgmr.msra.gmra.mxu1 %vm926_vm2, %v7283_v29  ;;  %v8576_v55 = vpop.permute.xlu1 %8575 }
 0x7ec   : > { %v8578_v19 = vunpack.i.h.bf16 %v8576_v55  ;;  %v8577_v43 = vunpack.i.l.bf16 %v8576_v55  ;;  %v7261_v11 = vsel %vm4743_vm3, %v7020_v27, %v8583_v48  ;;  %v7260_v38 = vsel %vm4743_vm3, %v6952_v47, %v8582_v41  ;;  %v8796_v55 = vld [vmem:[#allocation2 + $0x38] sm:$0xff] }
 0x7ee   : > { %v8586_v25 = vpop.permute.xlu0 %8585  ;;  %v7271_v57 = vsel %vm7264_vm4, %v7262_v24, %v8577_v43  ;;  %v7272_v58 = vsel %vm7264_vm4, %v7263_v17, %v8578_v19 }
 0x7ef   : > { %v8596_v32 = vpop.permute.xlu1 %8595  ;;  %v8588_v3 = vunpack.i.h.bf16 %v8586_v25  ;;  %v8587_v28 = vunpack.i.l.bf16 %v8586_v25 }
 0x7f0   : > { %v8598_v36 = vunpack.i.h.bf16 %v8596_v32  ;;  %v8597_v12 = vunpack.i.l.bf16 %v8596_v32 }
 0x7f1   : > { %v7269_v52 = vsel %vm7264_vm4, %v7260_v38, %v8587_v28  ;;  %v7270_v49 = vsel %vm7264_vm4, %v7261_v11, %v8588_v3 }
 0x7f2   : > { %v7280_v34 = vsel %vm7273_vm5, %v7271_v57, %v8597_v12  ;;  %v7281_v14 = vsel %vm7273_vm5, %v7272_v58, %v8598_v36  ;;  %v8591_v22 = vpop.permute.xlu0 %8590 }
 0x7f3   : > { %v7285_v63 = vpack.c.bf16 %v7281_v14, %v7280_v34  ;;  %v8593_v20 = vunpack.i.h.bf16 %v8591_v22  ;;  %v8592_v60 = vunpack.i.l.bf16 %v8591_v22 }
 0x7f5   : > { %v7278_v51 = vsel %vm7273_vm5, %v7269_v52, %v8592_v60  ;;  %v7279_v27 = vsel %vm7273_vm5, %v7270_v49, %v8593_v20 }
 0x7f6   : > { %v7284_v0 = vpack.c.bf16 %v7279_v27, %v7278_v51 }
 0x7f8   : > { %8437 = vmatprep.mubr.msk.bf16.mxu1 %vm926_vm2, %v7284_v0 }
 0x7f9   : > { %8438 = vmatmul.mubr.msk.bf16.gmra.mxu1 %vm926_vm2, %v7285_v63 }
 0x8ab   : > { %v8435_v5 = vpop.f32.mrf.mxu1 }
 0x8ac   : > { %v7359_v47 = vadd.f32 %v8435_v5, %v8144_v42 }
 0x8ad   : > { %v7350_v2 = vpop.f32.mrf.mxu1 }
 0x8ae   : > { %v7351_v53 = vadd.f32 %v8144_v42, %v7350_v2  ;;  %v11572_v50 = vadd.f32 %v8790_v62, %v7359_v47 }
 0x8af   : > { %v8436_v16 = vpop.f32.mrf.mxu1 }
 0x8b0   : > { %v11570_v21 = vadd.f32 %v8789_v31, %v7351_v53  ;;  %v7362_v56 = vadd.f32 %v8436_v16, %v8144_v42  ;;  %v7395_v29 = vsel %vm926_vm2, %v11572_v50, 0.0 }
 0x8b1   : > { %v7353_v1 = vpop.f32.mrf.mxu1 }
 0x8b2   : > { %v7354_v40 = vadd.f32 %v8144_v42, %v7353_v1  ;;  %v7389_v45 = vsel %vm926_vm2, %v11570_v21, 0.0  ;;  %v11578_v59 = vadd.f32 %v8792_v35, %v7362_v56 }
 0x8b3   : > { %7390 = vadd.xlane.f32.xlu0 %v7389_v45 }
 0x8b4   : > { %v11576_v13 = vadd.f32 %v8791_v37, %v7354_v40  ;;  %v7398_v18 = vsel %vm926_vm2, %v11578_v59, 0.0 }
 0x8b6   : > { %v7392_v15 = vsel %vm926_vm2, %v11576_v13, 0.0 }
 0x8b7   : > { %7393 = vadd.xlane.f32.xlu1 %v7392_v15  ;;  %7396 = vadd.xlane.f32.xlu0 %v7395_v29 }
 0x8b9   : > { %v8439_v4 = vpop.f32.mrf.mxu1 }
 0x8ba   : > { %v7375_v30 = vadd.f32 %v8439_v4, %v8144_v42 }
 0x8bb   : > { %7399 = vadd.xlane.f32.xlu0 %v7398_v18  ;;  %v7366_v6 = vpop.f32.mrf.mxu1  ;;  %v8603_v18 = vld [vmem:[%s9010_s7 + $0x8] sm:$0xff]  }
 0x8bc   : > { %v7367_v54 = vadd.f32 %v8144_v42, %v7366_v6  ;;  %v11588_v26 = vadd.f32 %v8794_v10, %v7375_v30  ;;  %v8604_v6 = vld [vmem:[%s9010_s7] sm:$0xff]   ;;  %8441 = vmatprep.subr.bf16.mxu0 %v8603_v18 }
 0x8bd   : > { %v8440_v8 = vpop.f32.mrf.mxu1  ;;  %8442 = vmatpush3.bf16.msra.mxu0 %v8603_v18 }
 0x8be   : > { %v11586_v33 = vadd.f32 %v8793_v39, %v7367_v54  ;;  %v7378_v46 = vadd.f32 %v8440_v8, %v8144_v42  ;;  %v7407_v48 = vsel %vm926_vm2, %v11588_v26, 0.0  ;;  %8443 = vmatprep.subr.bf16.mxu0 %v8604_v6 }
 0x8bf   : > { %v7369_v23 = vpop.f32.mrf.mxu1 }
 0x8c0   : > { %v7370_v9 = vadd.f32 %v8144_v42, %v7369_v23  ;;  %v7401_v7 = vsel %vm926_vm2, %v11586_v33, 0.0  ;;  %v11594_v19 = vadd.f32 %v8796_v55, %v7378_v46 }
 0x8c1   : > { %7402 = vadd.xlane.f32.xlu0 %v7401_v7  ;;  %8444 = vmatpush3.bf16.msra.mxu0 %v8604_v6 }
 0x8c2   : > { %v11592_v44 = vadd.f32 %v8795_v61, %v7370_v9  ;;  %v7410_v25 = vsel %vm926_vm2, %v11594_v19, 0.0 }
 0x8c4   : > { %v7404_v43 = vsel %vm926_vm2, %v11592_v44, 0.0 }
 0x8c5   : > { %7405 = vadd.xlane.f32.xlu1 %v7404_v43  ;;  %7408 = vadd.xlane.f32.xlu0 %v7407_v48 }
 0x8c9   : > { %7411 = vadd.xlane.f32.xlu1 %v7410_v25 }
 0x93c   : > { %v7391_v24 = vpop.xlane.xlu0 %7390 }
 0x93d   : > { %v7413_v17 = vmul.f32 0.03125, %v7391_v24 }
 0x93f   : > { %v11603_v41 = vsub.f32 %v11570_v21, %v7413_v17 }
 0x940   : > { %v7394_v32 = vpop.xlane.xlu1 %7393  ;;  %v7397_v3 = vpop.xlane.xlu0 %7396 }
 0x941   : > { %v7414_v28 = vmul.f32 0.03125, %v7394_v32  ;;  %v7415_v36 = vmul.f32 0.03125, %v7397_v3  ;;  %v7429_v12 = vmul.f32 %v11603_v41, %v11603_v41 }
 0x943   : > { %v11608_v57 = vsub.f32 %v11576_v13, %v7414_v28  ;;  %v11611_v58 = vsub.f32 %v11572_v50, %v7415_v36  ;;  %v7437_v11 = vsel %vm926_vm2, %v7429_v12, 0.0  ;;  %v8151_v12 = vld [vmem:[%s729_s6] ss:$0 sm:$0xff] }
 0x944   : > { %7438 = vadd.xlane.f32.xlu0 %v7437_v11  ;;  %v7400_v34 = vpop.xlane.xlu0 %7399 }
 0x945   : > { %v7416_v14 = vmul.f32 0.03125, %v7400_v34  ;;  %v7430_v22 = vmul.f32 %v11608_v57, %v11608_v57  ;;  %v7431_v38 = vmul.f32 %v11611_v58, %v11611_v58 }
 0x947   : > { %v11619_v63 = vsub.f32 %v11578_v59, %v7416_v14  ;;  %v7440_v20 = vsel %vm926_vm2, %v7430_v22, 0.0  ;;  %v7443_v60 = vsel %vm926_vm2, %v7431_v38, 0.0 }
 0x948   : > { %7441 = vadd.xlane.f32.xlu1 %v7440_v20  ;;  %7444 = vadd.xlane.f32.xlu0 %v7443_v60 }
 0x949   : > { %v7432_v52 = vmul.f32 %v11619_v63, %v11619_v63 }
 0x94a   : > { %v7403_v49 = vpop.xlane.xlu0 %7402 }
 0x94b   : > { %v7446_v51 = vsel %vm926_vm2, %v7432_v52, 0.0  ;;  %v7417_v27 = vmul.f32 0.03125, %v7403_v49  ;;  %v8152_v49 = vld [vmem:[%s11873_s5] ss:$0 sm:$0xff] }
 0x94c   : > { %7447 = vadd.xlane.f32.xlu1 %v7446_v51 }
 0x94d   : > { %v11627_v0 = vsub.f32 %v11586_v33, %v7417_v27 }
 0x94e   : > { %v7406_v5 = vpop.xlane.xlu1 %7405  ;;  %v7409_v42 = vpop.xlane.xlu0 %7408 }
 0x94f   : > { %v7418_v2 = vmul.f32 0.03125, %v7406_v5  ;;  %v7419_v47 = vmul.f32 0.03125, %v7409_v42  ;;  %v7433_v53 = vmul.f32 %v11627_v0, %v11627_v0 }
 0x951   : > { %v11632_v16 = vsub.f32 %v11592_v44, %v7418_v2  ;;  %v11635_v31 = vsub.f32 %v11588_v26, %v7419_v47  ;;  %v7449_v1 = vsel %vm926_vm2, %v7433_v53, 0.0 }
 0x952   : > { %v7412_v62 = vpop.xlane.xlu1 %7411  ;;  %7450 = vadd.xlane.f32.xlu0 %v7449_v1 }
 0x953   : > { %v7420_v56 = vmul.f32 0.03125, %v7412_v62  ;;  %v7434_v40 = vmul.f32 %v11632_v16, %v11632_v16  ;;  %v7435_v45 = vmul.f32 %v11635_v31, %v11635_v31 }
 0x955   : > { %v11643_v37 = vsub.f32 %v11594_v19, %v7420_v56  ;;  %v7452_v35 = vsel %vm926_vm2, %v7434_v40, 0.0  ;;  %v7455_v15 = vsel %vm926_vm2, %v7435_v45, 0.0 }
 0x956   : > { %7453 = vadd.xlane.f32.xlu1 %v7452_v35  ;;  %7456 = vadd.xlane.f32.xlu0 %v7455_v15 }
 0x957   : > { %v7436_v29 = vmul.f32 %v11643_v37, %v11643_v37 }
 0x959   : > { %v7458_v4 = vsel %vm926_vm2, %v7436_v29, 0.0 }
 0x95a   : > { %7459 = vadd.xlane.f32.xlu1 %v7458_v4 }
 0x9cd   : > { %v7439_v30 = vpop.xlane.xlu0 %7438 }
 0x9ce   : > { %v7461_v54 = vmul.f32 0.03125, %v7439_v30 }
 0x9d0   : > { %v7469_v8 = vadd.f32 1e-05, %v7461_v54 }
 0x9d1   : > { %v7442_v39 = vpop.xlane.xlu1 %7441  ;;  %v7445_v23 = vpop.xlane.xlu0 %7444 }
 0x9d2   : > { %8757 = vrsqrt.f32 %v7469_v8  ;;  %v7462_v10 = vmul.f32 0.03125, %v7442_v39  ;;  %v7463_v46 = vmul.f32 0.03125, %v7445_v23 }
 0x9d4   : > { %v7470_v9 = vadd.f32 1e-05, %v7462_v10  ;;  %v7471_v7 = vadd.f32 1e-05, %v7463_v46 }
 0x9d5   : > { %v7448_v61 = vpop.xlane.xlu1 %7447 }
 0x9d6   : > { %8759 = vrsqrt.f32 %v7470_v9  ;;  %v7464_v55 = vmul.f32 0.03125, %v7448_v61  ;;  %v8607_v61 = vld [vmem:[%s9020_s19 + $0x28] sm:$0xff]  }
 0x9d7   : > { %8761 = vrsqrt.f32 %v7471_v7  ;;  %v8606_v7 = vld [vmem:[%s9020_s19 + $0x30] sm:$0xff]  }
 0x9d8   : > { %v7472_v43 = vadd.f32 1e-05, %v7464_v55  ;;  %v8609_v55 = vld [vmem:[%s9020_s19 + $0x18] sm:$0xff]  }
 0x9da   : > { %8763 = vrsqrt.f32 %v7472_v43  ;;  %v8610_v43 = vld [vmem:[%s9020_s19 + $0x10] sm:$0xff]  }
 0x9db   : > { %v7451_v48 = vpop.xlane.xlu0 %7450 }
 0x9dc   : > { %v7465_v25 = vmul.f32 0.03125, %v7451_v48  ;;  %v8611_v48 = vld [vmem:[%s9020_s19 + $0x8] sm:$0xff]  }
 0x9de   : > { %v7473_v24 = vadd.f32 1e-05, %v7465_v25  ;;  %v8612_v25 = vld [vmem:[%s9020_s19] sm:$0xff]  }
 0x9df   : > { %v8758_v17 = vpop.eup %8757  ;;  %v7454_v32 = vpop.xlane.xlu1 %7453 }
 0x9e0   : > { %v7457_v3 = vpop.xlane.xlu0 %7456  ;;  %8765 = vrsqrt.f32 %v7473_v24  ;;  %v7466_v28 = vmul.f32 0.03125, %v7454_v32  ;;  %v7485_v11 = vmul.f32 %v8758_v17, %v11603_v41  ;;  %v8153_v24 = vld [vmem:[%s740_s9] ss:$0 sm:$0xff] }
 0x9e1   : > { %v7467_v36 = vmul.f32 0.03125, %v7457_v3 }
 0x9e2   : > { %v7474_v34 = vadd.f32 1e-05, %v7466_v28  ;;  %v7499_v20 = vmul.f32 %v8151_v12, %v7485_v11 }
 0x9e3   : > { %v7475_v14 = vadd.f32 1e-05, %v7467_v36  ;;  %v8760_v22 = vpop.eup %8759  ;;  %v7460_v38 = vpop.xlane.xlu1 %7459 }
 0x9e4   : > { %v8762_v60 = vpop.eup %8761  ;;  %8767 = vrsqrt.f32 %v7474_v34  ;;  %v7468_v52 = vmul.f32 0.03125, %v7460_v38  ;;  %v7486_v51 = vmul.f32 %v8760_v22, %v11608_v57  ;;  %v7513_v2 = vadd.f32 %v8152_v49, %v7499_v20 }
 0x9e5   : > { %v7487_v27 = vmul.f32 %v8762_v60, %v11611_v58  ;;  %8769 = vrsqrt.f32 %v7475_v14 }
 0x9e6   : > { %v7476_v5 = vadd.f32 1e-05, %v7468_v52  ;;  %v7500_v41 = vmul.f32 %v8151_v12, %v7486_v51 }
 0x9e7   : > { %v8764_v42 = vpop.eup %8763  ;;  %v7501_v1 = vmul.f32 %v8151_v12, %v7487_v27 }
 0x9e8   : > { %v7488_v47 = vmul.f32 %v8764_v42, %v11619_v63  ;;  %8771 = vrsqrt.f32 %v7476_v5  ;;  %v7514_v53 = vadd.f32 %v8152_v49, %v7500_v41 }
 0x9e9   : > { %v7515_v40 = vadd.f32 %v8152_v49, %v7501_v1 }
 0x9ea   : > { %v7521_v62 = vpack.c.bf16 %v7514_v53, %v7513_v2  ;;  %v7502_v56 = vmul.f32 %v8151_v12, %v7488_v47 }
 0x9ec   : > { %8445 = vmatprep.mubr.msk.bf16.mxu0 %vm926_vm2, %v7521_v62  ;;  %v7516_v45 = vadd.f32 %v8152_v49, %v7502_v56 }
 0x9ed   : > { %v8766_v35 = vpop.eup %8765 }
 0x9ee   : > { %v7522_v57 = vpack.c.bf16 %v7516_v45, %v7515_v40  ;;  %v7489_v58 = vmul.f32 %v8766_v35, %v11627_v0 }
 0x9f0   : > { %8446 = vmatmul.mubr.msk.bf16.vlgmr.msra.gmra.mxu0 %vm926_vm2, %v7522_v57  ;;  %v7503_v63 = vmul.f32 %v8151_v12, %v7489_v58 }
 0x9f1   : > { %v8768_v15 = vpop.eup %8767 }
 0x9f2   : > { %v8770_v29 = vpop.eup %8769  ;;  %v7490_v4 = vmul.f32 %v8768_v15, %v11632_v16  ;;  %v7517_v54 = vadd.f32 %v8152_v49, %v7503_v63 }
 0x9f3   : > { %v7491_v18 = vmul.f32 %v8770_v29, %v11635_v31  ;;  %v8605_v31 = vld [vmem:[%s9020_s19 + $0x38] sm:$0xff]  }
 0x9f4   : > { %v7504_v6 = vmul.f32 %v8151_v12, %v7490_v4  ;;  %8453 = vmatprep.subr.bf16.mxu1 %v8605_v31 }
 0x9f5   : > { %v8772_v30 = vpop.eup %8771  ;;  %v7505_v23 = vmul.f32 %v8151_v12, %v7491_v18  ;;  %8454 = vmatpush3.bf16.msra.mxu1 %v8605_v31 }
 0x9f6   : > { %v7518_v8 = vadd.f32 %v8152_v49, %v7504_v6  ;;  %v7492_v39 = vmul.f32 %v8772_v30, %v11643_v37  ;;  %8455 = vmatprep.subr.bf16.mxu1 %v8606_v7  ;;  %v8608_v37 = vld [vmem:[%s9020_s19 + $0x20] sm:$0xff]  }
 0x9f7   : > { %v7519_v16 = vadd.f32 %v8152_v49, %v7505_v23 }
 0x9f8   : > { %v7523_v0 = vpack.c.bf16 %v7518_v8, %v7517_v54  ;;  %v7506_v10 = vmul.f32 %v8151_v12, %v7492_v39 }
 0x9f9   : > { %8456 = vmatpush3.bf16.msra.mxu1 %v8606_v7 }
 0x9fa   : > { %8449 = vmatprep.mubr.msk.bf16.mxu0 %vm926_vm2, %v7523_v0  ;;  %v7520_v46 = vadd.f32 %v8152_v49, %v7506_v10  ;;  %8457 = vmatprep.subr.bf16.mxu1 %v8607_v61 }
 0x9fc   : > { %v7524_v9 = vpack.c.bf16 %v7520_v46, %v7519_v16 }
 0x9fd   : > { %8458 = vmatpush3.bf16.msra.mxu1 %v8607_v61 }
 0x9fe   : > { %8450 = vmatmul.mubr.msk.bf16.gmra.mxu0 %vm926_vm2, %v7524_v9  ;;  %8459 = vmatprep.subr.bf16.mxu1 %v8608_v37 }
 0xa01   : > { %8460 = vmatpush3.bf16.msra.mxu1 %v8608_v37 }
 0xa02   : > { %8461 = vmatprep.subr.bf16.mxu1 %v8609_v55 }
 0xa05   : > { %8462 = vmatpush3.bf16.msra.mxu1 %v8609_v55 }
 0xa06   : > { %8463 = vmatprep.subr.bf16.mxu1 %v8610_v43 }
 0xa09   : > { %8464 = vmatpush3.bf16.msra.mxu1 %v8610_v43 }
 0xa0a   : > { %8465 = vmatprep.subr.bf16.mxu1 %v8611_v48 }
 0xa0d   : > { %8466 = vmatpush3.bf16.msra.mxu1 %v8611_v48 }
 0xa0e   : > { %8467 = vmatprep.subr.bf16.mxu1 %v8612_v25 }
 0xa11   : > { %8468 = vmatpush3.bf16.msra.mxu1 %v8612_v25 }
 0xab0   : > { %v8447_v17 = vpop.f32.mrf.mxu0 }
 0xab1   : > { %v11687_v32 = vadd.f32 %v8447_v17, %v8153_v24 }
 0xab2   : > { %v7589_v3 = vpop.f32.mrf.mxu0 }
 0xab3   : > { %v7622_v28 = vmul.f32 %v11687_v32, %v11687_v32  ;;  %v11691_v36 = vadd.f32 %v8153_v24, %v7589_v3 }
 0xab4   : > { %v8448_v12 = vpop.f32.mrf.mxu0 }
 0xab5   : > { %v7630_v11 = vmul.f32 %v7622_v28, %v11687_v32  ;;  %v7620_v34 = vmul.f32 %v11691_v36, %v11691_v36  ;;  %v11696_v14 = vadd.f32 %v8448_v12, %v8153_v24 }
 0xab6   : > { %v7592_v22 = vpop.f32.mrf.mxu0 }
 0xab7   : > { %v7638_v38 = vmul.f32 0.044715, %v7630_v11  ;;  %v7628_v20 = vmul.f32 %v7620_v34, %v11691_v36  ;;  %v7623_v60 = vmul.f32 %v11696_v14, %v11696_v14  ;;  %v11701_v52 = vadd.f32 %v8153_v24, %v7592_v22 }
 0xab9   : > { %v7646_v49 = vadd.f32 %v7638_v38, %v11687_v32  ;;  %v7636_v51 = vmul.f32 0.044715, %v7628_v20  ;;  %v7631_v27 = vmul.f32 %v7623_v60, %v11696_v14  ;;  %v7621_v5 = vmul.f32 %v11701_v52, %v11701_v52 }
 0xabb   : > { %v7654_v41 = vmul.f32 0.7978846, %v7646_v49  ;;  %v7644_v42 = vadd.f32 %v7636_v51, %v11691_v36  ;;  %v7639_v2 = vmul.f32 0.044715, %v7631_v27  ;;  %v7629_v47 = vmul.f32 %v7621_v5, %v11701_v52 }
 0xabd   : > { %v7652_v53 = vmul.f32 0.7978846, %v7644_v42  ;;  %v7647_v1 = vadd.f32 %v7639_v2, %v11696_v14  ;;  %v7637_v62 = vmul.f32 0.044715, %v7629_v47  ;;  %8773 = vtanh.f32 %v7654_v41 }
 0xabe   : > { %v8451_v56 = vpop.f32.mrf.mxu0 }
 0xabf   : > { %8775 = vtanh.f32 %v7652_v53  ;;  %v7655_v40 = vmul.f32 0.7978846, %v7647_v1  ;;  %v7645_v45 = vadd.f32 %v7637_v62, %v11701_v52  ;;  %v11711_v35 = vadd.f32 %v8451_v56, %v8153_v24 }
 0xac0   : > { %v7605_v57 = vpop.f32.mrf.mxu0 }
 0xac1   : > { %8777 = vtanh.f32 %v7655_v40  ;;  %v7653_v58 = vmul.f32 0.7978846, %v7645_v45  ;;  %v7626_v15 = vmul.f32 %v11711_v35, %v11711_v35  ;;  %v7606_v29 = vadd.f32 %v8153_v24, %v7605_v57 }
 0xac2   : > { %v8452_v4 = vpop.f32.mrf.mxu0 }
 0xac3   : > { %8779 = vtanh.f32 %v7653_v58  ;;  %v7634_v63 = vmul.f32 %v7626_v15, %v11711_v35  ;;  %v7624_v18 = vmul.f32 %v7606_v29, %v7606_v29  ;;  %v7617_v6 = vadd.f32 %v8452_v4, %v8153_v24 }
 0xac4   : > { %v7608_v30 = vpop.f32.mrf.mxu0 }
 0xac5   : > { %v7642_v54 = vmul.f32 0.044715, %v7634_v63  ;;  %v7632_v8 = vmul.f32 %v7624_v18, %v7606_v29  ;;  %v7627_v39 = vmul.f32 %v7617_v6, %v7617_v6  ;;  %v7609_v23 = vadd.f32 %v8153_v24, %v7608_v30 }
 0xac7   : > { %v7650_v0 = vadd.f32 %v7642_v54, %v11711_v35  ;;  %v7640_v10 = vmul.f32 0.044715, %v7632_v8  ;;  %v7635_v16 = vmul.f32 %v7627_v39, %v7617_v6  ;;  %v7625_v46 = vmul.f32 %v7609_v23, %v7609_v23  ;;  %v8160_v8 = vld [vmem:[%s748_s22] ss:$0 sm:$0xff]  ;;  %s8859_s22 = smov [#allocation2]  }
 0xac8   : > { %s7841_s27 = sshll.u32 %s8859_s22, 4  ;;  %s7842_s27 = int_to_ptr.vmem [resolvable:$true] %s7841_s27 }
 0xac9   : > { %v7658_v9 = vmul.f32 0.7978846, %v7650_v0  ;;  %v7648_v31 = vadd.f32 %v7640_v10, %v7606_v29  ;;  %v7643_v7 = vmul.f32 0.044715, %v7635_v16  ;;  %v7633_v61 = vmul.f32 %v7625_v46, %v7609_v23  ;;  %s8797_s0 = scalar_lea.vmem %s7842_s27, 1024  ;;  %p8804_p10 = scmp.lt.s32.totalorder %s7842_s27, %s7842_s27 }
 0xaca   : > { %v8774_v37 = vpop.eup %8773  ;;  %p8798_p7 = scmp.ne.s32.totalorder %s7842_s27, %s8797_s0  ;;  %p8805_p11 = scmp.lt.s32.totalorder %s8797_s0, %s8797_s0 }
 0xacb   : > { %v7656_v55 = vmul.f32 0.7978846, %v7648_v31  ;;  %v7651_v43 = vadd.f32 %v7643_v7, %v7617_v6  ;;  %8781 = vtanh.f32 %v7658_v9  ;;  %v7641_v25 = vmul.f32 0.044715, %v7633_v61 }
 0xacc   : > { %v8776_v48 = vpop.eup %8775  ;;  %v7670_v24 = vadd.f32 1.0, %v8774_v37  ;;  %p8799_p8 = pnand %p8798_p7, %p11742_p6  ;;  %p8806_p12 = por %p8805_p11, %p8804_p10 }
 0xacd   : > { %8783 = vtanh.f32 %v7656_v55  ;;  %v7659_v17 = vmul.f32 0.7978846, %v7651_v43  ;;  %v7668_v3 = vadd.f32 1.0, %v8776_v48  ;;  %v7649_v12 = vadd.f32 %v7641_v25, %v7609_v23 }
 0xace   : > { %v8778_v28 = vpop.eup %8777  ;;  %v7678_v49 = vmul.f32 0.5, %v7670_v24  ;;  %p8800_p9 = pneg %p8799_p8 }
 0xacf   : > { %v7671_v11 = vadd.f32 1.0, %v8778_v28  ;;  %8785 = vtanh.f32 %v7659_v17  ;;  %v7657_v22 = vmul.f32 0.7978846, %v7649_v12  ;;  %v7676_v60 = vmul.f32 0.5, %v7668_v3 }
 0xad0   : > { %v8780_v34 = vpop.eup %8779  ;;  %v7686_v42 = vmul.f32 %v7678_v49, %v11687_v32  ;;  %p8807_p13 = pnand %p8806_p12, %p8800_p9 }
 0xad1   : > { %v7679_v38 = vmul.f32 0.5, %v7671_v11  ;;  %v7669_v20 = vadd.f32 1.0, %v8780_v34  ;;  %8787 = vtanh.f32 %v7657_v22  ;;  %v7684_v5 = vmul.f32 %v7676_v60, %v11691_v36 }
 0xad3   : > { %v7677_v51 = vmul.f32 0.5, %v7669_v20  ;;  %v7687_v27 = vmul.f32 %v7679_v38, %v11696_v14 }
 0xad5   : > { %v7685_v41 = vmul.f32 %v7677_v51, %v11701_v52  ;;  %v7693_v47 = vpack.c.bf16 %v7687_v27, %v7686_v42 }
 0xad7   : > { %v7692_v2 = vpack.c.bf16 %v7685_v41, %v7684_v5 }
 0xad8   : > { %v8782_v53 = vpop.eup %8781 }
 0xad9   : > { %8469 = vmatprep.mubr.bf16.mxu1 %v7692_v2  ;;  %v7674_v40 = vadd.f32 1.0, %v8782_v53 }
 0xada   : > { %v8784_v1 = vpop.eup %8783  ;;  %8470 = vmatmul.mubr.bf16.vlgmr.msra.gmra.mxu1 %v7693_v47 }
 0xadb   : > { %v7672_v56 = vadd.f32 1.0, %v8784_v1  ;;  %v7682_v36 = vmul.f32 0.5, %v7674_v40 }
 0xadc   : > { %v8786_v62 = vpop.eup %8785 }
 0xadd   : > { %v7675_v45 = vadd.f32 1.0, %v8786_v62  ;;  %v7680_v15 = vmul.f32 0.5, %v7672_v56  ;;  %v7690_v18 = vmul.f32 %v7682_v36, %v11711_v35 }
 0xade   : > { %v8788_v57 = vpop.eup %8787 }
 0xadf   : > { %v7683_v58 = vmul.f32 0.5, %v7675_v45  ;;  %v7673_v14 = vadd.f32 1.0, %v8788_v57  ;;  %v7688_v63 = vmul.f32 %v7680_v15, %v7606_v29 }
 0xae1   : > { %v7681_v4 = vmul.f32 0.5, %v7673_v14  ;;  %v7691_v52 = vmul.f32 %v7683_v58, %v7617_v6 }
 0xae3   : > { %v7689_v32 = vmul.f32 %v7681_v4, %v7609_v23  ;;  %v7695_v54 = vpack.c.bf16 %v7691_v52, %v7690_v18 }
 0xae5   : > { %v7694_v30 = vpack.c.bf16 %v7689_v32, %v7688_v63 }
 0xae7   : > { %8473 = vmatprep.mubr.bf16.mxu1 %v7694_v30 }
 0xae8   : > { %8474 = vmatmul.mubr.bf16.gmra.mxu1 %v7695_v54 }
 0xb9a   : > { %v8471_v39 = vpop.f32.mrf.mxu1 }
 0xb9b   : > { %v7793_v0 = vadd.f32 %v8471_v39, %v8160_v8 }
 0xb9c   : > { %v7784_v10 = vpop.f32.mrf.mxu1 }
 0xb9d   : > { %v7817_v16 = vadd.f32 %v7793_v0, %v11572_v50  ;;  %v7785_v46 = vadd.f32 %v8160_v8, %v7784_v10 }
 0xb9e   : > { %v8472_v6 = vpop.f32.mrf.mxu1 }
 0xb9f   : > { %7825 = vst.msk [vmem:[#allocation2 + $0x10] sm:$0xff] %vm926_vm2, %v7817_v16  ;;  %v7815_v35 = vadd.f32 %v7785_v46, %v11570_v21  ;;  %v7796_v29 = vadd.f32 %v8472_v6, %v8160_v8 }
 0xba0   : > { %v7787_v23 = vpop.f32.mrf.mxu1 }
 0xba1   : > { %7823 = vst.msk [vmem:[#allocation2] sm:$0xff] %vm926_vm2, %v7815_v35  ;;  %v7818_v9 = vadd.f32 %v7796_v29, %v11578_v59  ;;  %v7788_v31 = vadd.f32 %v8160_v8, %v7787_v23 }
 0xba3   : > { %7826 = vst.msk [vmem:[#allocation2 + $0x18] sm:$0xff] %vm926_vm2, %v7818_v9  ;;  %v7816_v7 = vadd.f32 %v7788_v31, %v11576_v13 }
 0xba5   : > { %7824 = vst.msk [vmem:[#allocation2 + $0x8] sm:$0xff] %vm926_vm2, %v7816_v7 }
 0xba8   : > { %v8475_v50 = vpop.f32.mrf.mxu1 }
 0xba9   : > { %v7809_v61 = vadd.f32 %v8475_v50, %v8160_v8 }
 0xbaa   : > { %v7800_v37 = vpop.f32.mrf.mxu1 }
 0xbab   : > { %v7821_v55 = vadd.f32 %v7809_v61, %v11588_v26  ;;  %v7801_v21 = vadd.f32 %v8160_v8, %v7800_v37 }
 0xbac   : > { %v8476_v43 = vpop.f32.mrf.mxu1 }
 0xbad   : > { %7829 = vst.msk [vmem:[#allocation2 + $0x30] sm:$0xff] %vm926_vm2, %v7821_v55  ;;  %v7819_v48 = vadd.f32 %v7801_v21, %v11586_v33  ;;  %v7812_v59 = vadd.f32 %v8476_v43, %v8160_v8 }
 0xbae   : > { %v7803_v25 = vpop.f32.mrf.mxu1 }
 0xbaf   : > { %7827 = vst.msk [vmem:[#allocation2 + $0x20] sm:$0xff] %vm926_vm2, %v7819_v48  ;;  %v7822_v13 = vadd.f32 %v7812_v59, %v11594_v19  ;;  %v7804_v17 = vadd.f32 %v8160_v8, %v7803_v25 }
 0xbb1   : > { %7830 = vst.msk [vmem:[#allocation2 + $0x38] sm:$0xff] %vm926_vm2, %v7822_v13  ;;  %v7820_v26 = vadd.f32 %v7804_v17, %v11592_v44 }
 0xbb3   : > { %7828 = vst.msk [vmem:[#allocation2 + $0x28] sm:$0xff] %vm926_vm2, %v7820_v26 }
 0xbb4   : > { %8810 = shalt.err (!%p8807_p13)
}
 0xbb5   : > { %s8860_s30 = smov 128   ;;  %s11877_s26 = sld [smem:[#allocation24_spill]] }
 0xbbb   : > { %8494 = dma.vmem_to_hbm [thread:$0]  (%p11742_p6), %s7842_s27, 1024, %s11877_s26, [#allocation3], %s8860_s30, %s8860_s30, %s8856_s20  }
 0xbbc   : > { %8834 = dma.done.wait (%p11742_p6), [#allocation3], 1024  }
 0xbbd   : > { %8836 = vsyncadd (%p11742_p6), [#allocation3], 4294966272 }
 0xbbe PF: > { %s11878_s28 = sld [smem:[#allocation6_spill]] }
 0xbbf   : > { %s11879_s24 = sld [smem:[#allocation5_spill]] }
 0xbc0   : > { %s11880_s25 = sld [smem:[#allocation7_spill]] }
 0xbc4   : > { %s28_s26 = sadd.s32 1, %s11878_s28  }
 0xbc5   : > { %p25_p0 = scmp.ge.s32.totalorder %s28_s26, 6  }
 0xbc7   :  { %27 = sbr.rel (!%p25_p0) target bundleno = 10 (0xa), region = 156 }
 0xbcc   :  { %7857 = vsyncpa [#allocation3], 1 }
 0xbcd   :  { %7859 = vsyncpa [#allocation3 + $0x1], 1 }

// kernel: model_forward.2
= control target key start
LH: loop header
LB: loop body
LE: loop exit
PB: predicated region body
PF: predicated region fallthrough
CT: control target
= control target key end

     0   :  { %s9596_s21 = smov 0   ;;  %s9598_s22 = smov 0   ;;  %s12257_s0 = inlined_call_operand.vmem [shape: f32[2,16,192], index: 0, kind: input, shape index: {}]   ;;  %s12258_s1 = inlined_call_operand.vmem [shape: bf16[192,64], index: 1, kind: input, shape index: {}]   ;;  %s12259_s2 = inlined_call_operand.vmem [shape: f32[1,64], index: 2, kind: input, shape index: {}]   ;;  %s12260_s3 = inlined_call_operand.vmem [shape: f32[1,16,64], index: 3, kind: input, shape index: {}]   ;;  %s12261_s4 = inlined_call_operand.vmem [shape: f32[12,1,64], index: 4, kind: input, shape index: {}]   ;;  %s12262_s5 = inlined_call_operand.vmem [shape: f32[12,1,64], index: 5, kind: input, shape index: {}]   ;;  %s12263_s6 = inlined_call_operand.vmem [shape: bf16[12,64,192], index: 6, kind: input, shape index: {}]   ;;  %s12264_s7 = inlined_call_operand.vmem [shape: f32[12,1,192], index: 7, kind: input, shape index: {}]   ;;  %s12265_s8 = inlined_call_operand.vmem [shape: bf16[12,64,64], index: 8, kind: input, shape index: {}]   ;;  %s12266_s9 = inlined_call_operand.vmem [shape: f32[12,1,64], index: 9, kind: input, shape index: {}]   ;;  %s12267_s10 = inlined_call_operand.vmem [shape: f32[12,1,64], index: 10, kind: input, shape index: {}]   ;;  %s12268_s11 = inlined_call_operand.vmem [shape: f32[12,1,64], index: 11, kind: input, shape index: {}]   ;;  %s12269_s12 = inlined_call_operand.vmem [shape: bf16[12,64,256], index: 12, kind: input, shape index: {}]   ;;  %s12270_s13 = inlined_call_operand.vmem [shape: f32[12,1,256], index: 13, kind: input, shape index: {}]   ;;  %s12271_s14 = inlined_call_operand.vmem [shape: bf16[12,256,64], index: 14, kind: input, shape index: {}]   ;;  %s12272_s15 = inlined_call_operand.vmem [shape: f32[12,1,64], index: 15, kind: input, shape index: {}]   ;;  %s12273_s16 = inlined_call_operand.vmem [shape: f32[2,16,64], index: 16, kind: output, shape index: {}]  }
   0x1   :  { %12297 = sst [smem:[#allocation14_spill]] %s12257_s0  ;;  %s9600_s23 = smov 0  }
   0x2   :  { %12298 = sst [smem:[#allocation15_spill]] %s12260_s3 }
   0x3   :  { %12299 = sst [smem:[#allocation16_spill]] %s12261_s4 }
   0x4   :  { %12300 = sst [smem:[#allocation17_spill]] %s12262_s5 }
   0x5   :  { %12301 = sst [smem:[#allocation18_spill]] %s12263_s6 }
   0x6   :  { %12302 = sst [smem:[#allocation19_spill]] %s12264_s7 }
   0x7   :  { %12303 = sst [smem:[#allocation20_spill]] %s12273_s16 }
   0x8 LB: > { %12304 = sst [smem:[#allocation2_spill]] %s9484_s22  ;;  %s35_s24 = sadd.s32 1, %s9484_s22  ;;  %s9488_s23 = sphi %s9600_s23, %s26_s23   ;;  %s9484_s22 = sphi %s9598_s22, %s12368_s22   ;;  %s9480_s21 = sphi %s9596_s21, %s12367_s21  }
   0x9   : > { %12305 = sst [smem:[#allocation3_spill]] %s9488_s23  ;;  %p8562_p0 = scmp.ge.s32.totalorder %s9488_s23, 1 }
   0xa   : > { %p36_p1 = scmp.ge.s32.totalorder %s35_s24, 12  ;;  %p582_p2 = scmp.lt.s32.totalorder %s9488_s23, 13 }
   0xc   : > { %s12370_s24 = smov (%p36_p1, %s35_s24), 0  ;;  %p583_p3 = pnand %p8562_p0, %p582_p2 }
   0xd   : > { %12306 = sst [smem:[#allocation4_spill]] %s12370_s24 }
   0xe   : > { %586 = sbr.rel (%p583_p3) target bundleno = 3029 (0xbd5), region = 84 }
  0x13   : > { %p687_p4 = scmp.lt.s32.totalorder %s9480_s21, 11  ;;  %s12309_s6 = sld [smem:[#allocation18_spill]] }
  0x14   : > { %s12310_s7 = sld [smem:[#allocation19_spill]]  ;;  %p8573_p5 = scmp.ne.s32.totalorder %s9480_s21, 0 }
  0x15   : > { %s9614_s25 = scalar_select %p687_p4, %s9480_s21, 11 }
  0x17   : > { %s8801_s17 = sshll.u32 %s9614_s25, 6  ;;  %s8565_s18 = sshll.u32 %s9614_s25, 1 }
  0x18   : > { %s8802_s23 = sshll.u32 %s9614_s25, 5  ;;  %s715_s24 = scalar_lea.vmem %s12268_s11, %s9614_s25 }
  0x19   : > { %s9629_s26 = scalar_lea.vmem %s12309_s6, %s8801_s17  ;;  %s9644_s30 = scalar_lea.vmem %s12265_s8, %s8802_s23 }
  0x1a   : > { %s9634_s22 = scalar_lea.vmem %s12310_s7, %s8565_s18  ;;  %s9662_s28 = scalar_lea.vmem %s12270_s13, %s8565_s18 }
  0x1b   : > { %12311 = sst [smem:[#allocation5_spill]] %s9634_s22  ;;  %s9657_s22 = scalar_lea.vmem %s12269_s12, %s8801_s17 }
  0x1c   : > { %s8804_s4 = sshll.u32 %s9614_s25, 7  ;;  %744 = sbr.rel (%p8573_p5) target bundleno = 284 (0x11c), region = 88 }
  0x1d   : > { %s9668_s5 = scalar_lea.vmem %s12271_s14, %s8804_s4  ;;  %s12312_s23 = sld [smem:[#allocation14_spill]] (!%p8573_p5) }
  0x1e   : > { %s12314_s4 = sld [smem:[#allocation15_spill]] (!%p8573_p5) }
  0x1f   : > { %s12315_s18 = sld [smem:[#allocation20_spill]] (!%p8573_p5) }
  0x21   : > { %v9176_v0 = vld [vmem:[%s12258_s1 + $0x38] sm:$0xff]   ;;  %v9490_v1 = vmov 0   ;;  %v9177_v2 = vld [vmem:[%s12258_s1 + $0x30] sm:$0xff]   ;;  %v9178_v3 = vld [vmem:[%s12258_s1 + $0x28] sm:$0xff]   ;;  %vm860_vm0 = vcmask 523264  }
  0x22   : > { %867 = vmatprep.subr.bf16.mxu0 %v9490_v1  ;;  %9107 = vmatprep.subr.bf16.mxu1 %v9490_v1  ;;  %v9179_v4 = vld [vmem:[%s12258_s1 + $0x20] sm:$0xff]   ;;  %v9180_v10 = vld [vmem:[%s12258_s1 + $0x18] sm:$0xff]   ;;  %v9181_v12 = vld [vmem:[%s12258_s1 + $0x10] sm:$0xff]  }
  0x23   : > { %868 = vmatpush1.bf16.msra.mxu0 %v9176_v0  ;;  %9119 = vmatpush1.bf16.msra.mxu1 %v9176_v0  ;;  %s12313_s29 = smov %s12312_s23  ;;  %v746_v5 = vld [vmem:[%s12312_s23 + $0x8] sm:$0xff]  ;;  %v9183_v14 = vld [vmem:[%s12258_s1] sm:$0xff]   ;;  %v9184_v15 = vld [vmem:[%s12258_s1 + $0x58] sm:$0xff]  }
  0x24   : > { %869 = vmatprep.subr.bf16.mxu0 %v9490_v1  ;;  %9108 = vmatprep.subr.bf16.mxu1 %v9490_v1  ;;  %v748_v6 = vld [vmem:[%s12313_s29 + $0x18] sm:$0xff]  ;;  %v750_v7 = vld [vmem:[%s12313_s29 + $0x28] sm:$0xff]  ;;  %v9185_v16 = vld [vmem:[%s12258_s1 + $0x50] sm:$0xff]  }
  0x25   : > { %v754_v8 = vpack.c.bf16 %v748_v6, %v746_v5  ;;  %v752_v9 = vld [vmem:[%s12313_s29 + $0x38] sm:$0xff]  ;;  %v9182_v13 = vld [vmem:[%s12258_s1 + $0x8] sm:$0xff]   ;;  %v9187_v18 = vld [vmem:[%s12258_s1 + $0x40] sm:$0xff]  }
  0x26   : > { %v756_v11 = vpack.c.bf16 %v752_v9, %v750_v7  ;;  %v9186_v17 = vld [vmem:[%s12258_s1 + $0x48] sm:$0xff]   ;;  %v745_v19 = vld [vmem:[%s12313_s29] sm:$0xff]  ;;  %v747_v20 = vld [vmem:[%s12313_s29 + $0x10] sm:$0xff] }
  0x27   : > { %870 = vmatpush1.bf16.msra.mxu0 %v9177_v2  ;;  %9120 = vmatpush1.bf16.msra.mxu1 %v9177_v2  ;;  %v749_v21 = vld [vmem:[%s12313_s29 + $0x20] sm:$0xff]  ;;  %v751_v22 = vld [vmem:[%s12313_s29 + $0x30] sm:$0xff]  ;;  %v753_v23 = vpack.c.bf16 %v747_v20, %v745_v19  ;;  %v917_v36 = vld [vmem:[%s12314_s4 + $0x8] sm:$0xff] }
  0x28   : > { %871 = vmatprep.subr.bf16.mxu0 %v9490_v1  ;;  %9109 = vmatprep.subr.bf16.mxu1 %v9490_v1  ;;  %v755_v24 = vpack.c.bf16 %v751_v22, %v749_v21  ;;  %v8574_v25 = vld [vmem:[%s12259_s2] ss:$0 sm:$0xff] }
  0x29   : > { %8587 = vmatprep.mubr.msk.bf16.mxu0 %vm860_vm0, %v754_v8  ;;  %8588 = vmatprep.mubr.msk.bf16.mxu1 %vm860_vm0, %v756_v11  ;;  %v916_v27 = vld [vmem:[%s12314_s4] sm:$0xff] }
  0x2b   : > { %872 = vmatpush1.bf16.msra.mxu0 %v9178_v3  ;;  %9121 = vmatpush1.bf16.msra.mxu1 %v9178_v3 }
  0x2c   : > { %873 = vmatprep.subr.bf16.mxu0 %v9490_v1  ;;  %9110 = vmatprep.subr.bf16.mxu1 %v9490_v1 }
  0x2f   : > { %874 = vmatpush1.bf16.msra.mxu0 %v9179_v4  ;;  %9122 = vmatpush1.bf16.msra.mxu1 %v9179_v4 }
  0x30   : > { %875 = vmatprep.subr.bf16.mxu0 %v9490_v1  ;;  %9111 = vmatprep.subr.bf16.mxu1 %v9490_v1 }
  0x33   : > { %876 = vmatpush1.bf16.msra.mxu0 %v9180_v10  ;;  %9123 = vmatpush1.bf16.msra.mxu1 %v9180_v10 }
  0x34   : > { %877 = vmatprep.subr.bf16.mxu0 %v9490_v1  ;;  %9112 = vmatprep.subr.bf16.mxu1 %v9490_v1 }
  0x37   : > { %878 = vmatpush1.bf16.msra.mxu0 %v9181_v12  ;;  %9124 = vmatpush1.bf16.msra.mxu1 %v9181_v12 }
  0x38   : > { %879 = vmatprep.subr.bf16.mxu0 %v9490_v1  ;;  %9113 = vmatprep.subr.bf16.mxu1 %v9490_v1 }
  0x3b   : > { %880 = vmatpush1.bf16.msra.mxu0 %v9182_v13  ;;  %9125 = vmatpush1.bf16.msra.mxu1 %v9182_v13 }
  0x3c   : > { %881 = vmatprep.subr.bf16.mxu0 %v9490_v1  ;;  %9114 = vmatprep.subr.bf16.mxu1 %v9490_v1 }
  0x3f   : > { %882 = vmatpush1.bf16.msra.mxu0 %v9183_v14  ;;  %9126 = vmatpush1.bf16.msra.mxu1 %v9183_v14 }
  0x40   : > { %891 = vmatprep.subr.bf16.mxu0 %v9490_v1  ;;  %9115 = vmatprep.subr.bf16.mxu1 %v9490_v1 }
  0x43   : > { %892 = vmatpush2.bf16.msra.mxu0 %v9184_v15  ;;  %9127 = vmatpush2.bf16.msra.mxu1 %v9184_v15 }
  0x44   : > { %893 = vmatprep.subr.bf16.mxu0 %v9490_v1  ;;  %9116 = vmatprep.subr.bf16.mxu1 %v9490_v1 }
  0x47   : > { %894 = vmatpush2.bf16.msra.mxu0 %v9185_v16  ;;  %9128 = vmatpush2.bf16.msra.mxu1 %v9185_v16 }
  0x48   : > { %895 = vmatprep.subr.bf16.mxu0 %v9490_v1  ;;  %9117 = vmatprep.subr.bf16.mxu1 %v9490_v1 }
  0x4b   : > { %896 = vmatpush2.bf16.msra.mxu0 %v9186_v17  ;;  %9129 = vmatpush2.bf16.msra.mxu1 %v9186_v17 }
  0x4c   : > { %897 = vmatprep.subr.bf16.mxu0 %v9490_v1  ;;  %9118 = vmatprep.subr.bf16.mxu1 %v9490_v1 }
  0x4f   : > { %898 = vmatpush2.bf16.msra.mxu0 %v9187_v18  ;;  %9130 = vmatpush2.bf16.msra.mxu1 %v9187_v18 }
  0x52   : > { %900 = vmatmul.mubr.bf16.vlgmr.msra.gmra.mxu0 %v753_v23  ;;  %908 = vmatmul.mubr.bf16.vlgmr.msra.gmra.mxu1 %v755_v24 }
 0x112   : > { %v901_v26 = vpop.f32.mrf.mxu0  ;;  %v909_v28 = vpop.f32.mrf.mxu1 }
 0x113   : > { %v902_v29 = vadd.f32 %v8574_v25, %v901_v26  ;;  %v910_v30 = vadd.f32 %v8574_v25, %v909_v28 }
 0x114   : > { %v903_v31 = vpop.f32.mrf.mxu0  ;;  %v911_v32 = vpop.f32.mrf.mxu1 }
 0x115   : > { %v918_v33 = vadd.f32 %v916_v27, %v902_v29  ;;  %v920_v34 = vadd.f32 %v916_v27, %v910_v30 }
 0x116   : > { %v904_v35 = vpop.f32.mrf.mxu0  ;;  %v912_v37 = vpop.f32.mrf.mxu1 }
 0x117   : > { %922 = vst.msk [vmem:[%s12315_s18] sm:$0xff] %vm860_vm0, %v918_v33  ;;  %924 = vst.msk [vmem:[%s12315_s18 + $0x10] sm:$0xff] %vm860_vm0, %v920_v34  ;;  %v905_v38 = vadd.f32 %v8574_v25, %v904_v35  ;;  %v913_v39 = vadd.f32 %v8574_v25, %v912_v37 }
 0x118   : > { %v906_v40 = vpop.f32.mrf.mxu0  ;;  %v914_v41 = vpop.f32.mrf.mxu1 }
 0x119   : > { %v919_v42 = vadd.f32 %v917_v36, %v905_v38  ;;  %v921_v43 = vadd.f32 %v917_v36, %v913_v39 }
 0x11b   : > { %923 = vst.msk [vmem:[%s12315_s18 + $0x8] sm:$0xff] %vm860_vm0, %v919_v42  ;;  %925 = vst.msk [vmem:[%s12315_s18 + $0x18] sm:$0xff] %vm860_vm0, %v921_v43 }
 0x11c PF: > { %s12316_s7 = sld [smem:[#allocation20_spill]]  ;;  %vm994_vm1 = vcmask 523264   ;;  %v9258_v8 = vld [vmem:[%s9629_s26 + $0x34] ss:$8 sps:$4 sm:$0xff]   ;;  %v9260_v9 = vld [vmem:[%s9629_s26 + $0x30] ss:$8 sps:$4 sm:$0xff]  }
 0x11d   : > { %v9261_v10 = vld [vmem:[%s9629_s26 + $0x24] ss:$8 sps:$4 sm:$0xff]   ;;  %1135 = vmatprep.subr.bf16.mxu0 %v9258_v8  ;;  %v9263_v11 = vld [vmem:[%s9629_s26 + $0x20] ss:$8 sps:$4 sm:$0xff]   ;;  %v12282_v12 = vmov 0   ;;  %s12317_s27 = sld [smem:[#allocation16_spill]] }
 0x11e   : > { %1136 = vmatpush1.bf16.msra.mxu0 %v9260_v9  ;;  %1159 = vmatprep.mubr.bf16.mxu0 %v12282_v12  ;;  %v9264_v13 = vld [vmem:[%s9629_s26 + $0x14] ss:$8 sps:$4 sm:$0xff]   ;;  %v9266_v14 = vld [vmem:[%s9629_s26 + $0x10] ss:$8 sps:$4 sm:$0xff]   ;;  %v9267_v15 = vld [vmem:[%s9629_s26 + $0x4] ss:$8 sps:$4 sm:$0xff]  }
 0x11f   : > { %1137 = vmatprep.subr.bf16.mxu0 %v9261_v10  ;;  %v9269_v16 = vld [vmem:[%s9629_s26] ss:$8 sps:$4 sm:$0xff]   ;;  %s12319_s0 = sld [smem:[#allocation17_spill]]  ;;  %s9492_s21 = smov 112   ;;  %vm9501_vm2 = vmmov 0   ;;  %vm4764_vm3 = vcmask 64512  }
 0x120   : > { %s12321_s20 = sld [smem:[#allocation5_spill]]  ;;  %s9493_s19 = smov 120   ;;  %vm5549_vm4 = vcmask 130048   ;;  %vm7830_vm5 = vcmask 195584   ;;  %vm7835_vm6 = vcmask 261120   ;;  %vm7840_vm7 = vcmask 326656  }
 0x121   : > { %s9494_s18 = smov 104   ;;  %s9495_s26 = smov 96   ;;  %vm7845_vm8 = vcmask 392192   ;;  %vm7850_vm9 = vcmask 457728  }
 0x122   : > { %v926_v44 = vld [vmem:[%s12316_s7] sm:$0xff]  ;;  %v928_v45 = vld [vmem:[%s12316_s7 + $0x10] sm:$0xff]  ;;  %v927_v46 = vld [vmem:[%s12316_s7 + $0x8] sm:$0xff]  ;;  %1138 = vmatpush1.bf16.msra.mxu0 %v9263_v11  ;;  %s9496_s6 = smov 88   ;;  %s9499_s16 = smov 64  }
 0x123   : > { %v995_v47 = vsel %vm994_vm1, %v926_v44, 0.0  ;;  %v1001_v48 = vsel %vm994_vm1, %v928_v45, 0.0  ;;  %v929_v49 = vld [vmem:[%s12316_s7 + $0x18] sm:$0xff]  ;;  %v998_v50 = vsel %vm994_vm1, %v927_v46, 0.0  ;;  %1139 = vmatprep.subr.bf16.mxu0 %v9264_v13  ;;  %s12318_s3 = scalar_lea.vmem %s12317_s27, %s9614_s25  ;;  %s9497_s27 = smov 80  }
 0x124   : > { %996 = vadd.xlane.f32.xlu0 %v995_v47  ;;  %1002 = vadd.xlane.f32.xlu1 %v1001_v48  ;;  %v1004_v51 = vsel %vm994_vm1, %v929_v49, 0.0  ;;  %v8589_v31 = vld [vmem:[%s12318_s3] ss:$0 sm:$0xff]  ;;  %s9498_s3 = smov 72   ;;  %s9504_s23 = smov 16  }
 0x125   : > { %s12320_s17 = scalar_lea.vmem %s12319_s0, %s9614_s25  ;;  %s9505_s0 = smov 8  }
 0x126   : > { %1140 = vmatpush1.bf16.msra.mxu0 %v9266_v14  ;;  %v8590_v36 = vld [vmem:[%s12320_s17] ss:$0 sm:$0xff]  ;;  %s9506_s17 = smov 24  }
 0x127   : > { %1141 = vmatprep.subr.bf16.mxu0 %v9267_v15 }
 0x128   : > { %999 = vadd.xlane.f32.xlu0 %v998_v50  ;;  %1005 = vadd.xlane.f32.xlu1 %v1004_v51 }
 0x12a   : > { %1142 = vmatpush1.bf16.msra.mxu0 %v9269_v16  ;;  %v12284_v16 = vmov 0.0  }
 0x12b   : > { %8903 = vmatprep.subr.bf16.mxu0 %v12284_v16  ;;  %8909 = vmatprep.subr.bf16.mxu1 %v12284_v16 }
 0x12c   : > { %8911 = vmatprep.mubr.msk.bf16.mxu1 %vm9501_vm2, %v12284_v16 }
 0x1ad   : > { %v997_v52 = vpop.xlane.xlu0 %996  ;;  %v1003_v53 = vpop.xlane.xlu1 %1002 }
 0x1ae   : > { %v1008_v54 = vmul.f32 0.015625, %v997_v52  ;;  %v1010_v55 = vmul.f32 0.015625, %v1003_v53  ;;  %v9836_v52 = vld [vmem:[%s12321_s20] sm:$0x3]  ;;  %s9507_s20 = smov 32  }
 0x1b0   : > { %v1012_v56 = vsub.f32 %v926_v44, %v1008_v54  ;;  %v9801_v57 = vsub.f32 %v928_v45, %v1010_v55 }
 0x1b1   : > { %v1000_v58 = vpop.xlane.xlu0 %999  ;;  %v1006_v59 = vpop.xlane.xlu1 %1005 }
 0x1b2   : > { %v1009_v60 = vmul.f32 0.015625, %v1000_v58  ;;  %v1011_v61 = vmul.f32 0.015625, %v1006_v59  ;;  %v1016_v62 = vmul.f32 %v1012_v56, %v1012_v56  ;;  %v1018_v63 = vmul.f32 %v9801_v57, %v9801_v57 }
 0x1b4   : > { %v1013_v0 = vsub.f32 %v927_v46, %v1009_v60  ;;  %v1015_v1 = vsub.f32 %v929_v49, %v1011_v61  ;;  %v1020_v2 = vsel %vm994_vm1, %v1016_v62, 0.0  ;;  %v1026_v3 = vsel %vm994_vm1, %v1018_v63, 0.0 }
 0x1b5   : > { %1021 = vadd.xlane.f32.xlu0 %v1020_v2  ;;  %v1071_v49 = vlaneseq }
 0x1b6   : > { %v1017_v4 = vmul.f32 %v1013_v0, %v1013_v0  ;;  %v1019_v5 = vmul.f32 %v1015_v1, %v1015_v1 }
 0x1b7   : > { %v9832_v50 = vshrl.u32 %v1071_v49, 7 }
 0x1b8   : > { %v1023_v6 = vsel %vm994_vm1, %v1017_v4, 0.0  ;;  %v1029_v7 = vsel %vm994_vm1, %v1019_v5, 0.0 }
 0x1b9   : > { %1027 = vadd.xlane.f32.xlu0 %v1026_v3  ;;  %1024 = vadd.xlane.f32.xlu1 %v1023_v6  ;;  %12322 = vst [vmem:[#allocation6_spill] sm:$0xff] %v9832_v50  ;;  %v12281_v51 = vsub.s32 0, %v9832_v50 }
 0x1bb   : > { %v1074_v53 = vrot.slane %v9836_v52, %v12281_v51 }
 0x1bd   : > { %1030 = vadd.xlane.f32.xlu1 %v1029_v7 }
 0x23e   : > { %v1022_v17 = vpop.xlane.xlu0 %1021 }
 0x23f   : > { %v1032_v18 = vmul.f32 0.015625, %v1022_v17 }
 0x241   : > { %v1036_v19 = vadd.f32 1e-05, %v1032_v18 }
 0x242   : > { %v1025_v20 = vpop.xlane.xlu1 %1024  ;;  %v1028_v21 = vpop.xlane.xlu0 %1027 }
 0x243   : > { %9302 = vrsqrt.f32 %v1036_v19  ;;  %v1033_v22 = vmul.f32 0.015625, %v1025_v20  ;;  %v1034_v23 = vmul.f32 0.015625, %v1028_v21 }
 0x245   : > { %v1037_v24 = vadd.f32 1e-05, %v1033_v22  ;;  %v1038_v25 = vadd.f32 1e-05, %v1034_v23 }
 0x246   : > { %v1031_v26 = vpop.xlane.xlu1 %1030 }
 0x247   : > { %9304 = vrsqrt.f32 %v1037_v24  ;;  %v1035_v27 = vmul.f32 0.015625, %v1031_v26 }
 0x248   : > { %9306 = vrsqrt.f32 %v1038_v25  ;;  %v9502_v25 = vmov 1983009808  }
 0x249   : > { %v1039_v28 = vadd.f32 1e-05, %v1035_v27  ;;  %v1271_v26 = vunpack.c.l.s4 %v9502_v25 }
 0x24b   : > { %9308 = vrsqrt.f32 %v1039_v28 }
 0x250   : > { %v9303_v29 = vpop.eup %9302 }
 0x251   : > { %v1044_v30 = vmul.f32 %v9303_v29, %v1012_v56  ;;  %v1272_v29 = vunpack.c.0.s8 %v1271_v26 }
 0x253   : > { %v1054_v34 = vmul.f32 %v8589_v31, %v1044_v30  ;;  %v9503_v30 = vmov 1934713408  }
 0x254   : > { %v9305_v32 = vpop.eup %9304 }
 0x255   : > { %v1045_v33 = vmul.f32 %v9305_v32, %v1013_v0  ;;  %v9307_v35 = vpop.eup %9306  ;;  %v1064_v39 = vadd.f32 %v8590_v36, %v1054_v34 }
 0x256   : > { %v1046_v41 = vmul.f32 %v9307_v35, %v9801_v57  ;;  %v10024_v35 = vsub.s32 %v1272_v29, %v9832_v50 }
 0x257   : > { %v1055_v37 = vmul.f32 %v8589_v31, %v1045_v33 }
 0x258   : > { %v9309_v38 = vpop.eup %9308  ;;  %v1056_v45 = vmul.f32 %v8589_v31, %v1046_v41 }
 0x259   : > { %v1065_v40 = vadd.f32 %v8590_v36, %v1055_v37  ;;  %v1047_v42 = vmul.f32 %v9309_v38, %v1015_v1  ;;  %v12280_v37 = vsub.s32 1, %v9832_v50 }
 0x25a   : > { %v1066_v47 = vadd.f32 %v8590_v36, %v1056_v45 }
 0x25b   : > { %v1068_v43 = vpack.c.bf16 %v1065_v40, %v1064_v39  ;;  %v1057_v44 = vmul.f32 %v8589_v31, %v1047_v42  ;;  %v1335_v31 = vunpack.c.l.s4 %v9503_v30 }
 0x25d   : > { %8599 = vmatmul.mubr.msk.bf16.vlgmr.msra.gmra.mxu0 %vm994_vm1, %v1068_v43  ;;  %v1067_v46 = vadd.f32 %v8590_v36, %v1057_v44  ;;  %v1336_v40 = vunpack.c.0.s8 %v1335_v31 }
 0x25e   : > { %1169 = vmatprep.mubr.bf16.mxu0 %v12282_v12 }
 0x25f   : > { %v1069_v48 = vpack.c.bf16 %v1067_v46, %v1066_v47  ;;  %v10049_v46 = vrot.slane %v9836_v52, %v12280_v37  ;;  %v10055_v49 = vsub.s32 %v1336_v40, %v9832_v50 }
 0x265   : > { %8600 = vmatmul.mubr.msk.bf16.gmra.mxu0 %vm994_vm1, %v1069_v48 }
 0x266   : > { %8905 = vmatprep.mubr.msk.bf16.mxu0 %vm9501_vm2, %v12284_v16 }
 0x31d   : > { %v1161_v54 = vpop.f32.mrf.mxu0 }
 0x31e   : > { %v9841_v55 = vadd.f32 %v1161_v54, %v1074_v53 }
 0x31f   : > { %v9843_v56 = vpop.f32.mrf.mxu0 }
 0x320   : > { %1196 = vrot.lane.b32.xlu1 %v9841_v55, %s9492_s21  ;;  %1184 = vrot.lane.b32.xlu0 %v9841_v55, %s9493_s19 }
 0x321   : > { %v1165_v57 = vpop.f32.mrf.mxu0 }
 0x322   : > { %v9849_v58 = vadd.f32 %v1165_v57, %v1074_v53 }
 0x323   : > { %v9867_v59 = vpop.f32.mrf.mxu0 }
 0x324   : > { %1186 = vrot.lane.b32.xlu1 %v9849_v58, %s9493_s19  ;;  %1208 = vrot.lane.b32.xlu0 %v9841_v55, %s9494_s18 }
 0x325   : > { %v1171_v60 = vpop.f32.mrf.mxu0 }
 0x326   : > { %v9877_v61 = vadd.f32 %v1171_v60, %v1074_v53 }
 0x327   : > { %v9879_v62 = vpop.f32.mrf.mxu0 }
 0x328   : > { %1198 = vrot.lane.b32.xlu1 %v9849_v58, %s9492_s21  ;;  %1220 = vrot.lane.b32.xlu0 %v9841_v55, %s9495_s26 }
 0x329   : > { %v1175_v63 = vpop.f32.mrf.mxu0 }
 0x32a   : > { %v9889_v0 = vadd.f32 %v1175_v63, %v1074_v53 }
 0x32c   : > { %1210 = vrot.lane.b32.xlu1 %v9849_v58, %s9494_s18  ;;  %1232 = vrot.lane.b32.xlu0 %v9841_v55, %s9496_s6 }
 0x330   : > { %1222 = vrot.lane.b32.xlu1 %v9849_v58, %s9495_s26  ;;  %1244 = vrot.lane.b32.xlu0 %v9841_v55, %s9497_s27 }
 0x334   : > { %1234 = vrot.lane.b32.xlu1 %v9849_v58, %s9496_s6  ;;  %1256 = vrot.lane.b32.xlu0 %v9841_v55, %s9498_s3 }
 0x338   : > { %1246 = vrot.lane.b32.xlu1 %v9849_v58, %s9497_s27  ;;  %2372 = vrot.lane.b32.xlu0 %v9841_v55, %s9499_s16 }
 0x33c   : > { %1258 = vrot.lane.b32.xlu1 %v9849_v58, %s9498_s3  ;;  %1188 = vrot.lane.b32.xlu0 %v9877_v61, %s9493_s19 }
 0x340   : > { %2374 = vrot.lane.b32.xlu1 %v9849_v58, %s9499_s16  ;;  %1200 = vrot.lane.b32.xlu0 %v9877_v61, %s9492_s21 }
 0x344   : > { %1190 = vrot.lane.b32.xlu1 %v9889_v0, %s9493_s19  ;;  %1212 = vrot.lane.b32.xlu0 %v9877_v61, %s9494_s18 }
 0x348   : > { %1202 = vrot.lane.b32.xlu1 %v9889_v0, %s9492_s21  ;;  %1224 = vrot.lane.b32.xlu0 %v9877_v61, %s9495_s26 }
 0x34c   : > { %1214 = vrot.lane.b32.xlu1 %v9889_v0, %s9494_s18  ;;  %1236 = vrot.lane.b32.xlu0 %v9877_v61, %s9496_s6 }
 0x350   : > { %1226 = vrot.lane.b32.xlu1 %v9889_v0, %s9495_s26  ;;  %1248 = vrot.lane.b32.xlu0 %v9877_v61, %s9497_s27 }
 0x354   : > { %1238 = vrot.lane.b32.xlu1 %v9889_v0, %s9496_s6  ;;  %1260 = vrot.lane.b32.xlu0 %v9877_v61, %s9498_s3 }
 0x358   : > { %1250 = vrot.lane.b32.xlu1 %v9889_v0, %s9497_s27 }
 0x35c   : > { %1262 = vrot.lane.b32.xlu1 %v9889_v0, %s9498_s3 }
 0x392   : > { %v9915_v1 = vpop.permute.xlu1 %1196  ;;  %v9917_v2 = vpop.permute.xlu0 %1184 }
 0x393   : > { %2380 = vrot.lane.b32.xlu0 %v9917_v2, %s9499_s16  ;;  %v1268_v36 = vcombine.low %v9841_v55, %v9915_v1  ;;  %v1269_v38 = vcombine.high %v9841_v55, %v9915_v1 }
 0x395   : > { %v1276_v44 = vrot.slane %v1268_v36, %v10024_v35  ;;  %v1283_v47 = vrot.slane %v1269_v38, %v10024_v35 }
 0x396   : > { %v9921_v3 = vpop.permute.xlu1 %1186  ;;  %v9923_v4 = vpop.permute.xlu0 %1208 }
 0x397   : > { %2382 = vrot.lane.b32.xlu1 %v9921_v3, %s9499_s16  ;;  %2388 = vrot.lane.b32.xlu0 %v9915_v1, %s9499_s16  ;;  %v1284_v32 = vcombine.low %v9917_v2, %v9923_v4  ;;  %v1285_v34 = vcombine.high %v9917_v2, %v9923_v4 }
 0x399   : > { %v1292_v41 = vrot.slane %v1284_v32, %v10024_v35  ;;  %v1299_v43 = vrot.slane %v1285_v34, %v10024_v35  ;;  %v10089_v32 = vadd.f32 %v9867_v59, %v10049_v46 }
 0x39a   : > { %v9929_v5 = vpop.permute.xlu1 %1198  ;;  %v9931_v6 = vpop.permute.xlu0 %1220 }
 0x39b   : > { %2390 = vrot.lane.b32.xlu1 %v9929_v5, %s9499_s16  ;;  %2396 = vrot.lane.b32.xlu0 %v9923_v4, %s9499_s16  ;;  %v1332_v53 = vcombine.low %v1276_v44, %v1292_v41  ;;  %v1333_v54 = vcombine.high %v1276_v44, %v1292_v41  ;;  %v1404_v55 = vcombine.low %v9849_v58, %v9929_v5 }
 0x39c   : > { %v1348_v60 = vcombine.low %v1283_v47, %v1299_v43  ;;  %v1349_v63 = vcombine.high %v1283_v47, %v1299_v43  ;;  %v1405_v52 = vcombine.high %v9849_v58, %v9929_v5  ;;  %v10073_v4 = vadd.f32 %v9843_v56, %v10049_v46 }
 0x39d   : > { %v1347_v58 = vrot.slane %v1333_v54, %v10055_v49  ;;  %v1412_v5 = vrot.slane %v1404_v55, %v10024_v35 }
 0x39e   : > { %v9937_v7 = vpop.permute.xlu1 %1210  ;;  %v9939_v8 = vpop.permute.xlu0 %1232  ;;  %v1356_v26 = vrot.slane %v1348_v60, %v10055_v49  ;;  %v1363_v29 = vrot.slane %v1349_v63, %v10055_v49  ;;  %v1419_v30 = vrot.slane %v1405_v52, %v10024_v35 }
 0x39f   : > { %2398 = vrot.lane.b32.xlu1 %v9937_v7, %s9499_s16  ;;  %2404 = vrot.lane.b32.xlu0 %v9931_v6, %s9499_s16  ;;  %v1420_v45 = vcombine.low %v9921_v3, %v9937_v7  ;;  %v1421_v48 = vcombine.high %v9921_v3, %v9937_v7  ;;  %v1340_v7 = vrot.slane %v1332_v53, %v10055_v49 }
 0x3a0   : > { %v8605_v43 = vcombine.low %v1356_v26, %v1363_v29  ;;  %v8607_v44 = vcombine.high %v1356_v26, %v1363_v29 }
 0x3a1   : > { %v1428_v2 = vrot.slane %v1420_v45, %v10024_v35  ;;  %v1435_v3 = vrot.slane %v1421_v48, %v10024_v35  ;;  %v8601_v40 = vcombine.low %v1340_v7, %v1347_v58  ;;  %v8603_v41 = vcombine.high %v1340_v7, %v1347_v58 }
 0x3a2   : > { %v9945_v9 = vpop.permute.xlu1 %1222  ;;  %v9947_v10 = vpop.permute.xlu0 %1244 }
 0x3a3   : > { %2406 = vrot.lane.b32.xlu1 %v9945_v9, %s9499_s16  ;;  %2412 = vrot.lane.b32.xlu0 %v9939_v8, %s9499_s16  ;;  %v1468_v31 = vcombine.low %v1412_v5, %v1428_v2  ;;  %v1469_v56 = vcombine.high %v1412_v5, %v1428_v2  ;;  %v1484_v34 = vcombine.low %v1419_v30, %v1435_v3  ;;  %v1177_v2 = vpop.f32.mrf.mxu0 }
 0x3a4   : > { %v1485_v36 = vcombine.high %v1419_v30, %v1435_v3  ;;  %v1300_v45 = vcombine.low %v9931_v6, %v9947_v10  ;;  %v1301_v55 = vcombine.high %v9931_v6, %v9947_v10  ;;  %v10116_v63 = vrot.slane %v8603_v41, %v10024_v35 }
 0x3a5   : > { %v1476_v59 = vrot.slane %v1468_v31, %v10055_v49  ;;  %v1483_v48 = vrot.slane %v1469_v56, %v10055_v49  ;;  %v1492_v53 = vrot.slane %v1484_v34, %v10055_v49  ;;  %v10121_v3 = vrot.slane %v8605_v43, %v10024_v35 }
 0x3a6   : > { %v9953_v11 = vpop.permute.xlu1 %1234  ;;  %v9955_v13 = vpop.permute.xlu0 %1256  ;;  %v1499_v54 = vrot.slane %v1485_v36, %v10055_v49  ;;  %v10124_v6 = vrot.slane %v8607_v44, %v10024_v35  ;;  %v1315_v30 = vrot.slane %v1301_v55, %v10024_v35  ;;  %v10138_v34 = vadd.f32 %v1177_v2, %v10049_v46 }
 0x3a7   : > { %2414 = vrot.lane.b32.xlu1 %v9953_v11, %s9499_s16  ;;  %2420 = vrot.lane.b32.xlu0 %v9947_v10, %s9499_s16  ;;  %v1316_v38 = vcombine.low %v9939_v8, %v9955_v13  ;;  %v1317_v47 = vcombine.high %v9939_v8, %v9955_v13  ;;  %v10110_v8 = vadd.f32 %v9879_v62, %v10049_v46 }
 0x3a8   : > { %v1308_v10 = vrot.slane %v1300_v45, %v10024_v35  ;;  %v8609_v7 = vcombine.low %v1476_v59, %v1483_v48  ;;  %v8611_v58 = vcombine.high %v1476_v59, %v1483_v48  ;;  %v8613_v29 = vcombine.low %v1492_v53, %v1499_v54  ;;  %12324 = vst [vmem:[#allocation8_spill] sm:$0xff] %v10138_v34 }
 0x3a9   : > { %v1324_v60 = vrot.slane %v1316_v38, %v10024_v35  ;;  %12323 = vst [vmem:[#allocation7_spill] sm:$0xff] %v10110_v8  ;;  %v1331_v62 = vrot.slane %v1317_v47, %v10024_v35  ;;  %v8615_v36 = vcombine.high %v1492_v53, %v1499_v54  ;;  %v1908_v45 = vcombine.low %v10121_v3, %v10124_v6 }
 0x3aa   : > { %v9961_v14 = vpop.permute.xlu1 %1246  ;;  %v9963_v15 = vpop.permute.xlu0 %2372  ;;  %v10150_v46 = vrot.slane %v8609_v7, %v10024_v35  ;;  %v10153_v44 = vrot.slane %v8611_v58, %v10024_v35  ;;  %v10162_v47 = vrot.slane %v8613_v29, %v10024_v35 }
 0x3ab   : > { %2422 = vrot.lane.b32.xlu1 %v9961_v14, %s9499_s16  ;;  %2428 = vrot.lane.b32.xlu0 %v9955_v13, %s9499_s16  ;;  %v10113_v13 = vrot.slane %v8601_v40, %v10024_v35  ;;  %v1436_v5 = vcombine.low %v9945_v9, %v9961_v14  ;;  %v1364_v31 = vcombine.low %v1308_v10, %v1324_v60 }
 0x3ac   : > { %v1365_v56 = vcombine.high %v1308_v10, %v1324_v60  ;;  %v1437_v38 = vcombine.high %v9945_v9, %v9961_v14  ;;  %v1380_v41 = vcombine.low %v1315_v30, %v1331_v62  ;;  %v1381_v43 = vcombine.high %v1315_v30, %v1331_v62 }
 0x3ad   : > { %v1444_v9 = vrot.slane %v1436_v5, %v10024_v35  ;;  %v1372_v59 = vrot.slane %v1364_v31, %v10055_v49  ;;  %v10167_v53 = vrot.slane %v8615_v36, %v10024_v35  ;;  %v2012_v7 = vcombine.low %v10150_v46, %v10153_v44 }
 0x3ae   : > { %v9971_v17 = vpop.permute.xlu1 %1258  ;;  %v9973_v18 = vpop.permute.xlu0 %1188  ;;  %v1379_v48 = vrot.slane %v1365_v56, %v10055_v49  ;;  %v1451_v54 = vrot.slane %v1437_v38, %v10024_v35  ;;  %v1388_v2 = vrot.slane %v1380_v41, %v10055_v49  ;;  %v1395_v10 = vrot.slane %v1381_v43, %v10055_v49 }
 0x3af   : > { %2430 = vrot.lane.b32.xlu1 %v9971_v17, %s9499_s16  ;;  %2376 = vrot.lane.b32.xlu0 %v9877_v61, %s9499_s16  ;;  %v1452_v52 = vcombine.low %v9953_v11, %v9971_v17  ;;  %v1453_v26 = vcombine.high %v9953_v11, %v9971_v17  ;;  %v1876_v11 = vcombine.low %v10113_v13, %v10116_v63 }
 0x3b0   : > { %v1877_v17 = vcombine.high %v10113_v13, %v10116_v63  ;;  %v8602_v30 = vcombine.low %v1372_v59, %v1379_v48  ;;  %v8604_v31 = vcombine.high %v1372_v59, %v1379_v48  ;;  %v2044_v36 = vcombine.low %v10162_v47, %v10167_v53 }
 0x3b1   : > { %v1460_v40 = vrot.slane %v1452_v52, %v10024_v35  ;;  %v1467_v14 = vrot.slane %v1453_v26, %v10024_v35  ;;  %v1909_v52 = vcombine.high %v10121_v3, %v10124_v6  ;;  %v10185_v29 = vrot.slane %v1876_v11, %v10055_v49 }
 0x3b2   : > { %v9979_v19 = vpop.permute.xlu1 %2374  ;;  %v9981_v20 = vpop.permute.xlu0 %1200  ;;  %v2013_v11 = vcombine.high %v10150_v46, %v10153_v44  ;;  %v8606_v41 = vcombine.low %v1388_v2, %v1395_v10  ;;  %v8608_v48 = vcombine.high %v1388_v2, %v1395_v10 }
 0x3b3   : > { %2378 = vrot.lane.b32.xlu1 %v9889_v0, %s9499_s16  ;;  %2384 = vrot.lane.b32.xlu0 %v9973_v18, %s9499_s16  ;;  %v1500_v55 = vcombine.low %v1444_v9, %v1460_v40  ;;  %v1501_v60 = vcombine.high %v1444_v9, %v1460_v40  ;;  %v1516_v58 = vcombine.low %v1451_v54, %v1467_v14 }
 0x3b4   : > { %v1517_v5 = vcombine.high %v1451_v54, %v1467_v14  ;;  %v1540_v56 = vcombine.low %v9877_v61, %v9981_v20  ;;  %v10204_v9 = vrot.slane %v2012_v7, %v10055_v49 }
 0x3b5   : > { %v1508_v38 = vrot.slane %v1500_v55, %v10055_v49  ;;  %v1515_v40 = vrot.slane %v1501_v60, %v10055_v49  ;;  %v1524_v14 = vrot.slane %v1516_v58, %v10055_v49  ;;  %v10219_v55 = vrot.slane %v2044_v36, %v10055_v49 }
 0x3b6   : > { %v9991_v21 = vpop.permute.xlu1 %1190  ;;  %v9993_v22 = vpop.permute.xlu0 %1212  ;;  %v1531_v59 = vrot.slane %v1517_v5, %v10055_v49  ;;  %v1548_v54 = vrot.slane %v1540_v56, %v10024_v35  ;;  %v2045_v58 = vcombine.high %v10162_v47, %v10167_v53  ;;  %v10225_v5 = vrot.slane %v8606_v41, %v10024_v35 }
 0x3b7   : > { %2386 = vrot.lane.b32.xlu1 %v9991_v21, %s9499_s16  ;;  %2392 = vrot.lane.b32.xlu0 %v9981_v20, %s9499_s16  ;;  %v1556_v62 = vcombine.low %v9973_v18, %v9993_v22  ;;  %v1557_v26 = vcombine.high %v9973_v18, %v9993_v22  ;;  %v1541_v18 = vcombine.high %v9877_v61, %v9981_v20 }
 0x3b8   : > { %v10212_v20 = vrot.slane %v8602_v30, %v10024_v35  ;;  %v8610_v60 = vcombine.low %v1508_v38, %v1515_v40  ;;  %v8614_v2 = vcombine.low %v1524_v14, %v1531_v59  ;;  %v8616_v10 = vcombine.high %v1524_v14, %v1531_v59 }
 0x3b9   : > { %v1564_v43 = vrot.slane %v1556_v62, %v10024_v35  ;;  %v1571_v61 = vrot.slane %v1557_v26, %v10024_v35  ;;  %v8612_v62 = vcombine.high %v1508_v38, %v1515_v40  ;;  %v1555_v7 = vrot.slane %v1541_v18, %v10024_v35 }
 0x3ba   : > { %v9999_v23 = vpop.permute.xlu1 %1202  ;;  %v10001_v24 = vpop.permute.xlu0 %1224  ;;  %v10232_v36 = vrot.slane %v8608_v48, %v10024_v35  ;;  %v2076_v59 = vcombine.low %v10204_v9, %v10219_v55 }
 0x3bb   : > { %2394 = vrot.lane.b32.xlu1 %v9999_v23, %s9499_s16  ;;  %2400 = vrot.lane.b32.xlu0 %v9993_v22, %s9499_s16  ;;  %v10196_v22 = vrot.slane %v1908_v45, %v10055_v49  ;;  %v10215_v45 = vrot.slane %v8604_v31, %v10024_v35  ;;  %v1604_v26 = vcombine.low %v1548_v54, %v1564_v43 }
 0x3bc   : > { %v1605_v30 = vcombine.high %v1548_v54, %v1564_v43  ;;  %v1620_v31 = vcombine.low %v1555_v7, %v1571_v61  ;;  %v1621_v56 = vcombine.high %v1555_v7, %v1571_v61  ;;  %v10243_v43 = vrot.slane %v8610_v60, %v10024_v35 }
 0x3bd   : > { %v1892_v38 = vcombine.low %v10212_v20, %v10215_v45  ;;  %v1940_v18 = vcombine.low %v10185_v29, %v10196_v22  ;;  %v10246_v14 = vrot.slane %v8612_v62, %v10024_v35  ;;  %v1612_v61 = vrot.slane %v1604_v26, %v10055_v49 }
 0x3be   : > { %v10007_v27 = vpop.permute.xlu1 %1214  ;;  %v10009_v28 = vpop.permute.xlu0 %1236  ;;  %v1619_v48 = vrot.slane %v1605_v30, %v10055_v49  ;;  %v1676_v54 = vcombine.low %v9889_v0, %v9999_v23  ;;  %v10259_v60 = vrot.slane %v8614_v2, %v10024_v35  ;;  %v10262_v62 = vrot.slane %v8616_v10, %v10024_v35 }
 0x3bf   : > { %2402 = vrot.lane.b32.xlu1 %v10007_v27, %s9499_s16  ;;  %2408 = vrot.lane.b32.xlu0 %v10001_v24, %s9499_s16  ;;  %v1692_v40 = vcombine.low %v9991_v21, %v10007_v27  ;;  %v1693_v7 = vcombine.high %v9991_v21, %v10007_v27  ;;  %v1628_v37 = vrot.slane %v1620_v31, %v10055_v49 }
 0x3c0   : > { %v1635_v26 = vrot.slane %v1621_v56, %v10055_v49  ;;  %v1924_v30 = vcombine.low %v10225_v5, %v10232_v36  ;;  %v1677_v27 = vcombine.high %v9889_v0, %v9999_v23  ;;  %v2028_v10 = vcombine.low %v10243_v43, %v10246_v14 }
 0x3c1   : > { %v1700_v2 = vrot.slane %v1692_v40, %v10024_v35  ;;  %v2029_v31 = vcombine.high %v10243_v43, %v10246_v14  ;;  %v10279_v56 = vpack.c.bf16 %v2076_v59, %v1940_v18  ;;  %v1941_v51 = vcombine.high %v10185_v29, %v10196_v22 }
 0x3c2   : > { %v10017_v33 = vpop.permute.xlu1 %1226  ;;  %v10033_v39 = vpop.permute.xlu0 %1248  ;;  %v8617_v12 = vcombine.low %v1612_v61, %v1619_v48  ;;  %v8619_v16 = vcombine.high %v1612_v61, %v1619_v48  ;;  %v1684_v21 = vrot.slane %v1676_v54, %v10024_v35  ;;  %v1707_v41 = vrot.slane %v1693_v7, %v10024_v35 }
 0x3c3   : > { %2410 = vrot.lane.b32.xlu1 %v10017_v33, %s9499_s16  ;;  %2416 = vrot.lane.b32.xlu0 %v10009_v28, %s9499_s16  ;;  %v2060_v0 = vcombine.low %v10259_v60, %v10262_v62  ;;  %v8621_v40 = vcombine.low %v1628_v37, %v1635_v26  ;;  %v8623_v29 = vcombine.high %v1628_v37, %v1635_v26 }
 0x3c4   : > { %v1691_v22 = vrot.slane %v1677_v27, %v10024_v35  ;;  %v1740_v59 = vcombine.low %v1684_v21, %v1700_v2  ;;  %v1741_v61 = vcombine.high %v1684_v21, %v1700_v2  ;;  %v1572_v48 = vcombine.low %v10001_v24, %v10033_v39 }
 0x3c5   : > { %v2077_v7 = vcombine.high %v10204_v9, %v10219_v55  ;;  %v10306_v23 = vrot.slane %v1877_v17, %v10055_v49  ;;  %v10309_v37 = vrot.slane %v8617_v12, %v10024_v35  ;;  %v10312_v26 = vrot.slane %v8619_v16, %v10024_v35 }
 0x3c6   : > { %v10036_v42 = vpop.permute.xlu1 %1238  ;;  %v10063_v1 = vpop.permute.xlu0 %1260  ;;  %v1756_v21 = vcombine.low %v1691_v22, %v1707_v41  ;;  %v1757_v27 = vcombine.high %v1691_v22, %v1707_v41  ;;  %v10325_v63 = vrot.slane %v8623_v29, %v10024_v35  ;;  %v1748_v16 = vrot.slane %v1740_v59, %v10055_v49 }
 0x3c7   : > { %2418 = vrot.lane.b32.xlu1 %v10036_v42, %s9499_s16  ;;  %2424 = vrot.lane.b32.xlu0 %v10033_v39, %s9499_s16  ;;  %v1588_v18 = vcombine.low %v10009_v28, %v10063_v1  ;;  %v1589_v54 = vcombine.high %v10009_v28, %v10063_v1  ;;  %v10317_v28 = vrot.slane %v8621_v40, %v10024_v35 }
 0x3c8   : > { %v1755_v17 = vrot.slane %v1741_v61, %v10055_v49  ;;  %v1580_v55 = vrot.slane %v1572_v48, %v10024_v35  ;;  %v1764_v2 = vrot.slane %v1756_v21, %v10055_v49  ;;  %v1771_v40 = vrot.slane %v1757_v27, %v10055_v49 }
 0x3c9   : > { %v1596_v13 = vrot.slane %v1588_v18, %v10024_v35  ;;  %v1603_v41 = vrot.slane %v1589_v54, %v10024_v35  ;;  %v2148_v59 = vcombine.low %v10309_v37, %v10312_v26  ;;  %v2149_v48 = vcombine.high %v10309_v37, %v10312_v26 }
 0x3ca   : > { %v10059_v57 = vpop.permute.xlu1 %1250  ;;  %v8625_v61 = vcombine.low %v1748_v16, %v1755_v17  ;;  %v8631_v21 = vcombine.high %v1764_v2, %v1771_v40 }
 0x3cb   : > { %2426 = vrot.lane.b32.xlu1 %v10059_v57, %s9499_s16  ;;  %2432 = vrot.lane.b32.xlu0 %v10063_v1, %s9499_s16  ;;  %v1573_v1 = vcombine.high %v10001_v24, %v10033_v39  ;;  %v1708_v24 = vcombine.low %v10017_v33, %v10059_v57  ;;  %v10335_v39 = vpack.c.bf16 %v2077_v7, %v1941_v51 }
 0x3cc   : > { %v1709_v18 = vcombine.high %v10017_v33, %v10059_v57  ;;  %v1636_v51 = vcombine.low %v1580_v55, %v1596_v13  ;;  %v1637_v29 = vcombine.high %v1580_v55, %v1596_v13  ;;  %v8627_v33 = vcombine.high %v1748_v16, %v1755_v17 }
 0x3cd   : > { %v1716_v6 = vrot.slane %v1708_v24, %v10024_v35  ;;  %v8629_v7 = vcombine.low %v1764_v2, %v1771_v40  ;;  %v10365_v17 = vrot.slane %v8625_v61, %v10024_v35  ;;  %v2027_v40 = vrot.slane %v2013_v11, %v10055_v49 }
 0x3ce   : > { %v10078_v25 = vpop.permute.xlu1 %1262  ;;  %v1723_v27 = vrot.slane %v1709_v18, %v10024_v35  ;;  %v1651_v13 = vrot.slane %v1637_v29, %v10055_v49  ;;  %v2059_v18 = vrot.slane %v2045_v58, %v10055_v49  ;;  %v10386_v29 = vrot.slane %v8631_v21, %v10024_v35 }
 0x3cf   : > { %2434 = vrot.lane.b32.xlu1 %v10078_v25, %s9499_s16  ;;  %3576 = vrot.lane.b32.xlu0 %v10073_v4, %s9493_s19  ;;  %v1724_v12 = vcombine.low %v10036_v42, %v10078_v25  ;;  %v1725_v9 = vcombine.high %v10036_v42, %v10078_v25  ;;  %v10347_v42 = vrot.slane %v1909_v52, %v10055_v49 }
 0x3d0   : > { %v1587_v25 = vrot.slane %v1573_v1, %v10024_v35  ;;  %v2180_v52 = vcombine.low %v10317_v28, %v10325_v63  ;;  %v1644_v1 = vrot.slane %v1636_v51, %v10055_v49  ;;  %v10383_v51 = vrot.slane %v8629_v7, %v10024_v35 }
 0x3d1   : > { %v1732_v22 = vrot.slane %v1724_v12, %v10024_v35  ;;  %v1739_v57 = vrot.slane %v1725_v9, %v10024_v35  ;;  %v10368_v9 = vrot.slane %v8627_v33, %v10024_v35  ;;  %v1942_v46 = vcombine.low %v10306_v23, %v10347_v42 }
 0x3d2   : > { %v1652_v54 = vcombine.low %v1587_v25, %v1603_v41  ;;  %v1653_v3 = vcombine.high %v1587_v25, %v1603_v41  ;;  %v2181_v25 = vcombine.high %v10317_v28, %v10325_v63  ;;  %v8618_v44 = vcombine.low %v1644_v1, %v1651_v13 }
 0x3d3   : > { %3578 = vrot.lane.b32.xlu1 %v10089_v32, %s9493_s19  ;;  %3600 = vrot.lane.b32.xlu0 %v10073_v4, %s9494_s18  ;;  %v1772_v12 = vcombine.low %v1716_v6, %v1732_v22  ;;  %v1773_v16 = vcombine.high %v1716_v6, %v1732_v22  ;;  %v1788_v55 = vcombine.low %v1723_v27, %v1739_v57 }
 0x3d4   : > { %v1789_v41 = vcombine.high %v1723_v27, %v1739_v57  ;;  %v1660_v24 = vrot.slane %v1652_v54, %v10055_v49  ;;  %v1667_v2 = vrot.slane %v1653_v3, %v10055_v49  ;;  %v1943_v53 = vcombine.high %v10306_v23, %v10347_v42 }
 0x3d5   : > { %v1780_v11 = vrot.slane %v1772_v12, %v10055_v49  ;;  %v1787_v47 = vrot.slane %v1773_v16, %v10055_v49  ;;  %v2284_v58 = vcombine.low %v10365_v17, %v10368_v9  ;;  %v2285_v22 = vcombine.high %v10365_v17, %v10368_v9 }
 0x3d6   : > { %v1796_v61 = vrot.slane %v1788_v55, %v10055_v49  ;;  %v1803_v33 = vrot.slane %v1789_v41, %v10055_v49  ;;  %v8620_v57 = vcombine.high %v1644_v1, %v1651_v13  ;;  %v8622_v54 = vcombine.low %v1660_v24, %v1667_v2 }
 0x3d7   : > { %3588 = vrot.lane.b32.xlu1 %v10073_v4, %s9492_s21  ;;  %3612 = vrot.lane.b32.xlu0 %v10073_v4, %s9495_s26  ;;  %v8624_v3 = vcombine.high %v1660_v24, %v1667_v2  ;;  %v2078_v6 = vcombine.low %v2027_v40, %v2059_v18  ;;  %v2316_v7 = vcombine.low %v10383_v51, %v10386_v29 }
 0x3d8   : > { %v2317_v23 = vcombine.high %v10383_v51, %v10386_v29  ;;  %v2036_v42 = vrot.slane %v2028_v10, %v10055_v49  ;;  %v2068_v21 = vrot.slane %v2060_v0, %v10055_v49  ;;  %v10417_v27 = vrot.slane %v8618_v44, %v10024_v35 }
 0x3d9   : > { %v8626_v1 = vcombine.low %v1780_v11, %v1787_v47  ;;  %v8628_v13 = vcombine.high %v1780_v11, %v1787_v47  ;;  %v2079_v12 = vcombine.high %v2027_v40, %v2059_v18  ;;  %v8630_v16 = vcombine.low %v1796_v61, %v1803_v33 }
 0x3da   : > { %v8632_v55 = vcombine.high %v1796_v61, %v1803_v33  ;;  %v1900_v24 = vrot.slane %v1892_v38, %v10055_v49  ;;  %v1932_v10 = vrot.slane %v1924_v30, %v10055_v49  ;;  %v10428_v0 = vrot.slane %v8620_v57, %v10024_v35 }
 0x3db   : > { %3590 = vrot.lane.b32.xlu1 %v10089_v32, %s9492_s21  ;;  %3636 = vrot.lane.b32.xlu0 %v10073_v4, %s9497_s27  ;;  %v10431_v2 = vrot.slane %v8622_v54, %v10024_v35  ;;  %v10434_v40 = vrot.slane %v8624_v3, %v10024_v35  ;;  %v10436_v18 = vpack.c.bf16 %v2078_v6, %v1942_v46 }
 0x3dc   : > { %v2080_v38 = vcombine.low %v2036_v42, %v2068_v21  ;;  %v2081_v44 = vcombine.high %v2036_v42, %v2068_v21  ;;  %v12325_v30 = vcombine.high %v10212_v20, %v10215_v45  ;;  %v12326_v47 = vcombine.high %v10225_v5, %v10232_v36 }
 0x3dd   : > { %v10449_v33 = vrot.slane %v8626_v1, %v10024_v35  ;;  %v10452_v46 = vrot.slane %v8628_v13, %v10024_v35  ;;  %v2043_v57 = vrot.slane %v2029_v31, %v10055_v49  ;;  %v12327_v20 = vcombine.high %v10259_v60, %v10262_v62 }
 0x3de   : > { %v1907_v11 = vrot.slane %v12325_v30, %v10055_v49  ;;  %v1939_v61 = vrot.slane %v12326_v47, %v10055_v49  ;;  %v10463_v54 = vrot.slane %v8630_v16, %v10024_v35  ;;  %v10466_v5 = vrot.slane %v8632_v55, %v10024_v35 }
 0x3df   : > { %3602 = vrot.lane.b32.xlu1 %v10089_v32, %s9494_s18  ;;  %3648 = vrot.lane.b32.xlu0 %v10073_v4, %s9498_s3  ;;  %v2075_v45 = vrot.slane %v12327_v20, %v10055_v49  ;;  %v1944_v6 = vcombine.low %v1900_v24, %v1932_v10  ;;  %v1945_v42 = vcombine.high %v1900_v24, %v1932_v10 }
 0x3e0   : > { %v2164_v21 = vcombine.low %v10417_v27, %v10428_v0  ;;  %v2196_v14 = vcombine.low %v10431_v2, %v10434_v40  ;;  %v10474_v60 = vpack.c.bf16 %v2079_v12, %v1943_v53  ;;  %v1946_v13 = vcombine.low %v1907_v11, %v1939_v61 }
 0x3e1   : > { %v10480_v31 = vpack.c.bf16 %v2080_v38, %v1944_v6  ;;  %v10482_v1 = vpack.c.bf16 %v2081_v44, %v1945_v42  ;;  %v2300_v16 = vcombine.low %v10449_v33, %v10452_v46  ;;  %v2082_v24 = vcombine.low %v2043_v57, %v2075_v45 }
 0x3e2   : > { %v1947_v53 = vcombine.high %v1907_v11, %v1939_v61  ;;  %v2083_v20 = vcombine.high %v2043_v57, %v2075_v45  ;;  %v10498_v6 = vrot.slane %v2148_v59, %v10055_v49  ;;  %v10504_v11 = vrot.slane %v2180_v52, %v10055_v49 }
 0x3e3   : > { %3614 = vrot.lane.b32.xlu1 %v10089_v32, %s9495_s26  ;;  %3580 = vrot.lane.b32.xlu0 %v10110_v8, %s9493_s19  ;;  %v10515_v59 = vrot.slane %v2316_v7, %v10055_v49  ;;  %v10521_v52 = vrot.slane %v2149_v48, %v10055_v49  ;;  %v10621_v17 = vrot.slane %v2164_v21, %v10055_v49 }
 0x3e4   : > { %v2212_v28 = vcombine.low %v10498_v6, %v10504_v11 }
 0x3e7   : > { %3624 = vrot.lane.b32.xlu1 %v10073_v4, %s9496_s6  ;;  %3604 = vrot.lane.b32.xlu0 %v10110_v8, %s9494_s18 }
 0x3eb   : > { %3626 = vrot.lane.b32.xlu1 %v10089_v32, %s9496_s6  ;;  %3616 = vrot.lane.b32.xlu0 %v10110_v8, %s9495_s26 }
 0x3ef   : > { %3638 = vrot.lane.b32.xlu1 %v10089_v32, %s9497_s27  ;;  %3640 = vrot.lane.b32.xlu0 %v10110_v8, %s9497_s27 }
 0x3f3   : > { %3650 = vrot.lane.b32.xlu1 %v10089_v32, %s9498_s3 }
 0x3f7   : > { %3582 = vrot.lane.b32.xlu1 %v10138_v34, %s9493_s19  ;;  %s9509_s19 = smov 48  }
 0x3fb   : > { %3592 = vrot.lane.b32.xlu1 %v10110_v8, %s9492_s21 }
 0x3ff   : > { %3594 = vrot.lane.b32.xlu1 %v10138_v34, %s9492_s21  ;;  %s9508_s21 = smov 40  }
 0x403   : > { %3606 = vrot.lane.b32.xlu1 %v10138_v34, %s9494_s18  ;;  %s9510_s18 = smov 56  }
 0x405   : > { %v2381_v41 = vpop.permute.xlu0 %2380 }
 0x407   : > { %3618 = vrot.lane.b32.xlu1 %v10138_v34, %s9495_s26 }
 0x409   : > { %v2383_v36 = vpop.permute.xlu1 %2382  ;;  %v2389_v3 = vpop.permute.xlu0 %2388 }
 0x40a   : > { %v2468_v38 = vcombine.low %v9963_v15, %v2389_v3  ;;  %v2469_v44 = vcombine.high %v9963_v15, %v2389_v3  ;;  %v10510_v15 = vrot.slane %v2284_v58, %v10055_v49  ;;  %v10525_v58 = vpack.c.bf16 %v2082_v24, %v1946_v13 }
 0x40b   : > { %3628 = vrot.lane.b32.xlu1 %v10110_v8, %s9496_s6  ;;  %v10539_v13 = vpack.c.bf16 %v2083_v20, %v1947_v53 }
 0x40c   : > { %v2476_v7 = vrot.slane %v2468_v38, %v10024_v35  ;;  %v2483_v42 = vrot.slane %v2469_v44, %v10024_v35 }
 0x40d   : > { %v2391_v30 = vpop.permute.xlu1 %2390  ;;  %v2397_v47 = vpop.permute.xlu0 %2396 }
 0x40e   : > { %v2484_v61 = vcombine.low %v2381_v41, %v2397_v47  ;;  %v2485_v57 = vcombine.high %v2381_v41, %v2397_v47  ;;  %v2604_v45 = vcombine.low %v9979_v19, %v2391_v30  ;;  %v2605_v3 = vcombine.high %v9979_v19, %v2391_v30 }
 0x40f   : > { %3630 = vrot.lane.b32.xlu1 %v10138_v34, %s9496_s6  ;;  %v10531_v41 = vrot.slane %v2181_v25, %v10055_v49  ;;  %s12360_s6 = scalar_lea.vmem %s12266_s9, %s9614_s25 }
 0x410   : > { %v2492_v37 = vrot.slane %v2484_v61, %v10024_v35  ;;  %v2499_v26 = vrot.slane %v2485_v57, %v10024_v35  ;;  %v2612_v44 = vrot.slane %v2604_v45, %v10024_v35  ;;  %v2619_v30 = vrot.slane %v2605_v3, %v10024_v35 }
 0x411   : > { %v2399_v48 = vpop.permute.xlu1 %2398  ;;  %v10537_v19 = vpop.permute.xlu0 %2404 }
 0x412   : > { %v2620_v47 = vcombine.low %v2383_v36, %v2399_v48  ;;  %v2621_v10 = vcombine.high %v2383_v36, %v2399_v48  ;;  %v2532_v63 = vcombine.low %v2476_v7, %v2492_v37  ;;  %v2533_v25 = vcombine.high %v2476_v7, %v2492_v37 }
 0x413   : > { %v2548_v24 = vcombine.low %v2483_v42, %v2499_v26  ;;  %v2549_v38 = vcombine.high %v2483_v42, %v2499_v26  ;;  %3642 = vrot.lane.b32.xlu1 %v10138_v34, %s9497_s27 }
 0x414   : > { %v2628_v36 = vrot.slane %v2620_v47, %v10024_v35  ;;  %v2635_v61 = vrot.slane %v2621_v10, %v10024_v35  ;;  %v2540_v53 = vrot.slane %v2532_v63, %v10055_v49  ;;  %v2547_v20 = vrot.slane %v2533_v25, %v10055_v49 }
 0x415   : > { %v2556_v57 = vrot.slane %v2548_v24, %v10055_v49  ;;  %v2563_v7 = vrot.slane %v2549_v38, %v10055_v49  ;;  %v10553_v42 = vpop.permute.xlu1 %2406  ;;  %v10555_v55 = vpop.permute.xlu0 %2412 }
 0x416   : > { %v2668_v37 = vcombine.low %v2612_v44, %v2628_v36  ;;  %v2669_v26 = vcombine.high %v2612_v44, %v2628_v36  ;;  %v2684_v48 = vcombine.low %v2619_v30, %v2635_v61  ;;  %v2685_v45 = vcombine.high %v2619_v30, %v2635_v61 }
 0x417   : > { %v8633_v3 = vcombine.low %v2540_v53, %v2547_v20  ;;  %v8635_v47 = vcombine.high %v2540_v53, %v2547_v20  ;;  %v8637_v62 = vcombine.low %v2556_v57, %v2563_v7  ;;  %v8639_v10 = vcombine.high %v2556_v57, %v2563_v7 }
 0x418   : > { %v2676_v63 = vrot.slane %v2668_v37, %v10055_v49  ;;  %v2683_v25 = vrot.slane %v2669_v26, %v10055_v49  ;;  %v2692_v24 = vrot.slane %v2684_v48, %v10055_v49  ;;  %v2699_v38 = vrot.slane %v2685_v45, %v10055_v49 }
 0x419   : > { %v10561_v43 = vpop.permute.xlu1 %2414  ;;  %v10564_v44 = vrot.slane %v8633_v3, %v10024_v35  ;;  %v10567_v30 = vrot.slane %v8635_v47, %v10024_v35  ;;  %v10570_v36 = vrot.slane %v8637_v62, %v10024_v35  ;;  %v10573_v61 = vrot.slane %v8639_v10, %v10024_v35  ;;  %v2421_v37 = vpop.permute.xlu0 %2420 }
 0x41a   : > { %v8641_v53 = vcombine.low %v2676_v63, %v2683_v25  ;;  %v8643_v20 = vcombine.high %v2676_v63, %v2683_v25  ;;  %v8645_v57 = vcombine.low %v2692_v24, %v2699_v38  ;;  %v8647_v7 = vcombine.high %v2692_v24, %v2699_v38 }
 0x41b   : > { %v3076_v26 = vcombine.low %v10564_v44, %v10567_v30  ;;  %v3108_v48 = vcombine.low %v10570_v36, %v10573_v61  ;;  %v2348_v45 = vcombine.low %v10510_v15, %v10515_v59  ;;  %v2213_v62 = vcombine.high %v10498_v6, %v10504_v11 }
 0x41c   : > { %v10584_v3 = vrot.slane %v8641_v53, %v10024_v35  ;;  %v10587_v47 = vrot.slane %v8643_v20, %v10024_v35  ;;  %v10590_v10 = vrot.slane %v8645_v57, %v10024_v35  ;;  %v10593_v63 = vrot.slane %v8647_v7, %v10024_v35 }
 0x41d   : > { %v2423_v25 = vpop.permute.xlu1 %2422  ;;  %v2349_v24 = vcombine.high %v10510_v15, %v10515_v59  ;;  %v10603_v53 = vrot.slane %v2285_v22, %v10055_v49  ;;  %v10609_v20 = vrot.slane %v2317_v23, %v10055_v49  ;;  %v2429_v57 = vpop.permute.xlu0 %2428  ;;  %v3084_v51 = vrot.slane %v3076_v26, %v10055_v49 }
 0x41e   : > { %v3212_v7 = vcombine.low %v10584_v3, %v10587_v47  ;;  %v3244_v15 = vcombine.low %v10590_v10, %v10593_v63  ;;  %v2516_v9 = vcombine.low %v10555_v55, %v2429_v57  ;;  %v3116_v29 = vrot.slane %v3108_v48, %v10055_v49 }
 0x41f   : > { %v10630_v22 = vrot.slane %v2196_v14, %v10055_v49  ;;  %v2500_v23 = vcombine.low %v10537_v19, %v2421_v37  ;;  %v2517_v59 = vcombine.high %v10555_v55, %v2429_v57  ;;  %v10639_v26 = vpack.c.bf16 %v2348_v45, %v2212_v28 }
 0x420   : > { %v3220_v38 = vrot.slane %v3212_v7, %v10055_v49  ;;  %v3252_v21 = vrot.slane %v3244_v15, %v10055_v49  ;;  %v10641_v48 = vpack.c.bf16 %v2349_v24, %v2213_v62  ;;  %v10647_v14 = vrot.slane %v2300_v16, %v10055_v49 }
 0x421   : > { %v2431_v12 = vpop.permute.xlu1 %2430  ;;  %v12329_v55 = vcombine.low %v10463_v54, %v10466_v5  ;;  %v2501_v7 = vcombine.high %v10537_v19, %v2421_v37  ;;  %v2524_v6 = vrot.slane %v2516_v9, %v10024_v35  ;;  %v10657_v11 = vpop.permute.xlu0 %2376  ;;  %v3140_v24 = vcombine.low %v3084_v51, %v3116_v29 }
 0x422   : > { %12328 = vst [vmem:[#allocation9_spill] sm:$0xff] %v10641_v48  ;;  %v3276_v28 = vcombine.low %v3220_v38, %v3252_v21  ;;  %v3277_v45 = vcombine.high %v3220_v38, %v3252_v21  ;;  %v2652_v62 = vcombine.low %v10561_v43, %v2431_v12  ;;  %v3141_v15 = vcombine.high %v3084_v51, %v3116_v29 }
 0x423   : > { %v10653_v57 = vrot.slane %v12329_v55, %v10055_v49  ;;  %v2350_v16 = vcombine.low %v10603_v53, %v10609_v20  ;;  %v2508_v50 = vrot.slane %v2500_v23, %v10024_v35  ;;  %v2636_v55 = vcombine.low %v10553_v42, %v2423_v25 }
 0x424   : > { %v2531_v34 = vrot.slane %v2517_v59, %v10024_v35  ;;  %v2351_v19 = vcombine.high %v10603_v53, %v10609_v20  ;;  %v2653_v37 = vcombine.high %v10561_v43, %v2431_v12  ;;  %v3556_v38 = vpack.c.bf16 %v3276_v28, %v3140_v24 }
 0x425   : > { %v10668_v9 = vpop.permute.xlu1 %2378  ;;  %v3557_v21 = vpack.c.bf16 %v3277_v45, %v3141_v15  ;;  %v2216_v51 = vcombine.low %v10621_v17, %v10630_v22  ;;  %v2515_v29 = vrot.slane %v2501_v7, %v10024_v35  ;;  %v2637_v23 = vcombine.high %v10553_v42, %v2423_v25  ;;  %v10674_v48 = vpop.permute.xlu0 %2384 }
 0x426   : > { %v2564_v8 = vcombine.low %v2508_v50, %v2524_v6  ;;  %v2217_v59 = vcombine.high %v10621_v17, %v10630_v22  ;;  %v2565_v53 = vcombine.high %v2508_v50, %v2524_v6  ;;  %v2660_v43 = vrot.slane %v2652_v62, %v10024_v35 }
 0x427   : > { %v2352_v12 = vcombine.low %v10647_v14, %v10653_v57  ;;  %v2644_v28 = vrot.slane %v2636_v55, %v10024_v35  ;;  %v2580_v7 = vcombine.low %v2515_v29, %v2531_v34  ;;  %v3077_v42 = vcombine.high %v10564_v44, %v10567_v30 }
 0x428   : > { %v3109_v25 = vcombine.high %v10570_v36, %v10573_v61  ;;  %v2581_v45 = vcombine.high %v2515_v29, %v2531_v34  ;;  %v2667_v50 = vrot.slane %v2653_v37, %v10024_v35  ;;  %v4769_v6 = vsel %vm4764_vm3, %v3556_v38, 0 }
 0x429   : > { %v4816_v62 = vsel %vm4764_vm3, %v3557_v21, 0  ;;  %v10691_v24 = vpop.permute.xlu1 %2386  ;;  %v2651_v15 = vrot.slane %v2637_v23, %v10024_v35  ;;  %v2572_v55 = vrot.slane %v2564_v8, %v10055_v49  ;;  %8904 = vmatpush3.bf16.xpose.msra.mxu0 %v4769_v6  ;;  %v10695_v20 = vpop.permute.xlu0 %2392  ;;  %v12330_v44 = vcombine.high %v10417_v27, %v10428_v0 }
 0x42a   : > { %v12331_v30 = vcombine.high %v10431_v2, %v10434_v40  ;;  %v2579_v61 = vrot.slane %v2565_v53, %v10055_v49  ;;  %v2700_v37 = vcombine.low %v2644_v28, %v2660_v43  ;;  %v2701_v38 = vcombine.high %v2644_v28, %v2660_v43  ;;  %8910 = vmatpush3.bf16.xpose.msra.mxu1 %v4816_v62 }
 0x42b   : > { %v10701_v34 = vrot.slane %v12330_v44, %v10055_v49  ;;  %v12332_v8 = vmov 0.0   ;;  %v3091_v21 = vrot.slane %v3077_v42, %v10055_v49  ;;  %v3123_v27 = vrot.slane %v3109_v25, %v10055_v49 }
 0x42c   : > { %v10707_v36 = vrot.slane %v12331_v30, %v10055_v49  ;;  %8921 = vmatprep.subr.bf16.mxu0 %v12332_v8  ;;  %8915 = vmatprep.subr.bf16.mxu1 %v12332_v8  ;;  %v3213_v0 = vcombine.high %v10584_v3, %v10587_v47  ;;  %v3245_v2 = vcombine.high %v10590_v10, %v10593_v63 }
 0x42d   : > { %v2588_v40 = vrot.slane %v2580_v7, %v10055_v49  ;;  %v2595_v29 = vrot.slane %v2581_v45, %v10055_v49  ;;  %v2716_v23 = vcombine.low %v2651_v15, %v2667_v50  ;;  %v2717_v53 = vcombine.high %v2651_v15, %v2667_v50  ;;  %v10720_v43 = vpop.permute.xlu1 %2394  ;;  %v2401_v28 = vpop.permute.xlu0 %2400 }
 0x42e   : > { %v3227_v6 = vrot.slane %v3213_v0, %v10055_v49  ;;  %v3259_v42 = vrot.slane %v3245_v2, %v10055_v49  ;;  %v12333_v25 = vcombine.low %v10521_v52, %v10531_v41  ;;  %v12334_v47 = vcombine.high %v10521_v52, %v10531_v41 }
 0x42f   : > { %v8634_v63 = vcombine.low %v2572_v55, %v2579_v61  ;;  %v8636_v7 = vcombine.high %v2572_v55, %v2579_v61  ;;  %v2708_v45 = vrot.slane %v2700_v37, %v10055_v49  ;;  %v2715_v50 = vrot.slane %v2701_v38, %v10055_v49 }
 0x430   : > { %v10727_v3 = vpack.c.bf16 %v2350_v16, %v12333_v25  ;;  %v10732_v10 = vpack.c.bf16 %v2351_v19, %v12334_v47  ;;  %v3142_v62 = vcombine.low %v3091_v21, %v3123_v27  ;;  %v3278_v15 = vcombine.low %v3227_v6, %v3259_v42  ;;  %8906 = vmatmul.mubr.msk.bf16.vlgmr.msra.gmra.mxu0 %vm4764_vm3, %v10279_v56 }
 0x431   : > { %v3143_v44 = vcombine.high %v3091_v21, %v3123_v27  ;;  %v3279_v30 = vcombine.high %v3227_v6, %v3259_v42  ;;  %v8638_v0 = vcombine.low %v2588_v40, %v2595_v29  ;;  %v8640_v2 = vcombine.high %v2588_v40, %v2595_v29  ;;  %v2403_v52 = vpop.permute.xlu1 %2402  ;;  %8912 = vmatmul.mubr.msk.bf16.vlgmr.msra.gmra.mxu1 %vm4764_vm3, %v10335_v39  ;;  %v10743_v61 = vpop.permute.xlu0 %2408 }
 0x432   : > { %v2724_v16 = vrot.slane %v2716_v23, %v10055_v49  ;;  %v2731_v25 = vrot.slane %v2717_v53, %v10055_v49  ;;  %v2756_v41 = vcombine.low %v10674_v48, %v2401_v28  ;;  %v3558_v19 = vpack.c.bf16 %v3278_v15, %v3142_v62  ;;  %8917 = vmatprep.mubr.msk.bf16.mxu1 %vm9501_vm2, %v12332_v8 }
 0x433   : > { %v3559_v55 = vpack.c.bf16 %v3279_v30, %v3143_v44  ;;  %v12335_v37 = vcombine.high %v10449_v33, %v10452_v46  ;;  %v8642_v21 = vcombine.low %v2708_v45, %v2715_v50  ;;  %v8644_v27 = vcombine.high %v2708_v45, %v2715_v50  ;;  %8923 = vmatprep.mubr.msk.bf16.mxu0 %vm9501_vm2, %v12332_v8 }
 0x434   : > { %v2740_v56 = vcombine.low %v10657_v11, %v10695_v20  ;;  %v2757_v40 = vcombine.high %v10674_v48, %v2401_v28  ;;  %v2741_v39 = vcombine.high %v10657_v11, %v10695_v20  ;;  %v4863_v29 = vsel %vm4764_vm3, %v3558_v19, 0 }
 0x435   : > { %v10749_v38 = vrot.slane %v12335_v37, %v10055_v49  ;;  %v10762_v33 = vrot.slane %v8634_v63, %v10024_v35  ;;  %v10765_v46 = vrot.slane %v8636_v7, %v10024_v35  ;;  %v8646_v23 = vcombine.low %v2724_v16, %v2731_v25  ;;  %8916 = vmatpush3.bf16.xpose.msra.mxu1 %v4863_v29  ;;  %v10768_v53 = vpop.permute.xlu1 %2410  ;;  %v10778_v42 = vpop.permute.xlu0 %2416 }
 0x436   : > { %v4910_v48 = vsel %vm4764_vm3, %v3559_v55, 0  ;;  %v10771_v28 = vrot.slane %v8638_v0, %v10024_v35  ;;  %v10774_v11 = vrot.slane %v8640_v2, %v10024_v35  ;;  %v2764_v20 = vrot.slane %v2756_v41, %v10024_v35  ;;  %8927 = vmatprep.subr.bf16.mxu1 %v12332_v8 }
 0x437   : > { %8922 = vmatpush3.bf16.xpose.msra.mxu0 %v4910_v48  ;;  %v2892_v6 = vcombine.low %v10691_v24, %v2403_v52  ;;  %v10786_v47 = vpack.c.bf16 %v2352_v12, %v2216_v51  ;;  %v12336_v63 = vcombine.high %v10463_v54, %v10466_v5  ;;  %v8648_v45 = vcombine.high %v2724_v16, %v2731_v25 }
 0x438   : > { %v2748_v50 = vrot.slane %v2740_v56, %v10024_v35  ;;  %v2876_v62 = vcombine.low %v10668_v9, %v10720_v43  ;;  %v2771_v15 = vrot.slane %v2757_v40, %v10024_v35  ;;  %v2755_v44 = vrot.slane %v2741_v39, %v10024_v35  ;;  %8933 = vmatprep.subr.bf16.mxu0 %v12332_v8 }
 0x439   : > { %v10792_v7 = vrot.slane %v12336_v63, %v10055_v49  ;;  %v2877_v51 = vcombine.high %v10668_v9, %v10720_v43  ;;  %v2893_v12 = vcombine.high %v10691_v24, %v2403_v52  ;;  %v3092_v54 = vcombine.low %v10762_v33, %v10765_v46  ;;  %v10811_v16 = vpop.permute.xlu1 %2418 }
 0x43a   : > { %v3124_v5 = vcombine.low %v10771_v28, %v10774_v11  ;;  %v3163_v30 = vrot.slane %v8642_v21, %v10024_v35  ;;  %v3179_v0 = vrot.slane %v8644_v27, %v10024_v35  ;;  %v3195_v2 = vrot.slane %v8646_v23, %v10024_v35  ;;  %v10824_v21 = vpop.permute.xlu0 %2424 }
 0x43b   : > { %v2804_v25 = vcombine.low %v2748_v50, %v2764_v20  ;;  %v2805_v9 = vcombine.high %v2748_v50, %v2764_v20  ;;  %v2900_v24 = vrot.slane %v2892_v6, %v10024_v35  ;;  %v12337_v43 = vcombine.high %v10647_v14, %v10653_v57 }
 0x43c   : > { %v2884_v41 = vrot.slane %v2876_v62, %v10024_v35  ;;  %v2820_v19 = vcombine.low %v2755_v44, %v2771_v15  ;;  %v3211_v55 = vrot.slane %v8648_v45, %v10024_v35  ;;  %v3228_v37 = vcombine.low %v3163_v30, %v3179_v0  ;;  %8918 = vmatmul.mubr.msk.bf16.vlgmr.msra.gmra.mxu1 %vm4764_vm3, %v10436_v18 }
 0x43d   : > { %v10820_v52 = vpack.c.bf16 %v12337_v43, %v2217_v59  ;;  %v2891_v27 = vrot.slane %v2877_v51, %v10024_v35  ;;  %v2821_v56 = vcombine.high %v2755_v44, %v2771_v15  ;;  %v2907_v40 = vrot.slane %v2893_v12, %v10024_v35  ;;  %v10835_v59 = vpop.permute.xlu1 %2426  ;;  %8929 = vmatprep.mubr.msk.bf16.mxu1 %vm9501_vm2, %v12332_v8 }
 0x43e   : > { %v3100_v17 = vrot.slane %v3092_v54, %v10055_v49  ;;  %8924 = vmatmul.mubr.msk.bf16.vlgmr.msra.gmra.mxu0 %vm4764_vm3, %v10474_v60  ;;  %v3132_v22 = vrot.slane %v3124_v5, %v10055_v49  ;;  %v3236_v14 = vrot.slane %v3228_v37, %v10055_v49  ;;  %v3260_v57 = vcombine.low %v3195_v2, %v3211_v55  ;;  %v2433_v54 = vpop.permute.xlu0 %2432 }
 0x43f   : > { %v10840_v39 = vrot.slane %v2804_v25, %v10055_v49  ;;  %v10843_v18 = vrot.slane %v2805_v9, %v10055_v49  ;;  %v2940_v29 = vcombine.low %v2884_v41, %v2900_v24  ;;  %8935 = vmatprep.mubr.msk.bf16.mxu0 %vm9501_vm2, %v12332_v8  ;;  %v3229_v60 = vcombine.high %v3163_v30, %v3179_v0 }
 0x440   : > { %v10848_v23 = vrot.slane %v2820_v19, %v10055_v49  ;;  %v3268_v48 = vrot.slane %v3260_v57, %v10055_v49  ;;  %v3093_v20 = vcombine.high %v10762_v33, %v10765_v46  ;;  %v3125_v6 = vcombine.high %v10771_v28, %v10774_v11 }
 0x441   : > { %v10856_v63 = vrot.slane %v2821_v56, %v10055_v49  ;;  %v2941_v45 = vcombine.high %v2884_v41, %v2900_v24  ;;  %v2956_v50 = vcombine.low %v2891_v27, %v2907_v40  ;;  %v2957_v62 = vcombine.high %v2891_v27, %v2907_v40  ;;  %v10858_v5 = vpop.permute.xlu1 %2434 }
 0x442   : > { %v3144_v15 = vcombine.low %v3100_v17, %v3132_v22  ;;  %v3280_v44 = vcombine.low %v3236_v14, %v3268_v48  ;;  %v3145_v51 = vcombine.high %v3100_v17, %v3132_v22  ;;  %v3281_v12 = vcombine.high %v3236_v14, %v3268_v48 }
 0x443   : > { %v8649_v30 = vcombine.low %v10840_v39, %v10843_v18  ;;  %v10863_v33 = vrot.slane %v2940_v29, %v10055_v49  ;;  %v3243_v46 = vrot.slane %v3229_v60, %v10055_v49  ;;  %v3261_v28 = vcombine.high %v3195_v2, %v3211_v55 }
 0x444   : > { %v3560_v11 = vpack.c.bf16 %v3280_v44, %v3144_v15  ;;  %v3561_v0 = vpack.c.bf16 %v3281_v12, %v3145_v51  ;;  %v3107_v25 = vrot.slane %v3093_v20, %v10055_v49  ;;  %v3139_v9 = vrot.slane %v3125_v6, %v10055_v49 }
 0x445   : > { %v10869_v24 = vrot.slane %v2941_v45, %v10055_v49  ;;  %v10872_v43 = vrot.slane %v2956_v50, %v10055_v49  ;;  %v2788_v41 = vcombine.low %v10778_v42, %v2433_v54  ;;  %v3275_v19 = vrot.slane %v3261_v28, %v10055_v49  ;;  %v10881_v56 = vpop.permute.xlu1 %3578 }
 0x446   : > { %v2971_v37 = vrot.slane %v2957_v62, %v10055_v49  ;;  %v4957_v2 = vsel %vm4764_vm3, %v3560_v11, 0  ;;  %v5004_v55 = vsel %vm4764_vm3, %v3561_v0, 0  ;;  %v2772_v27 = vcombine.low %v10743_v61, %v10824_v21 }
 0x447   : > { %8928 = vmatpush3.bf16.xpose.msra.mxu1 %v4957_v2  ;;  %8934 = vmatpush3.bf16.xpose.msra.mxu0 %v5004_v55  ;;  %v2773_v40 = vcombine.high %v10743_v61, %v10824_v21  ;;  %v2789_v17 = vcombine.high %v10778_v42, %v2433_v54  ;;  %v3282_v22 = vcombine.low %v3243_v46, %v3275_v19 }
 0x448   : > { %8939 = vmatprep.subr.bf16.mxu1 %v12332_v8  ;;  %8945 = vmatprep.subr.bf16.mxu0 %v12332_v8  ;;  %v3146_v14 = vcombine.low %v3107_v25, %v3139_v9  ;;  %v3147_v57 = vcombine.high %v3107_v25, %v3139_v9  ;;  %v3283_v29 = vcombine.high %v3243_v46, %v3275_v19  ;;  %v10916_v46 = vpop.permute.xlu0 %3576 }
 0x449   : > { %v8651_v60 = vcombine.high %v10840_v39, %v10843_v18  ;;  %v8653_v48 = vcombine.low %v10848_v23, %v10856_v63  ;;  %v2908_v20 = vcombine.low %v10768_v53, %v10835_v59  ;;  %v2796_v61 = vrot.slane %v2788_v41, %v10024_v35  ;;  %v10899_v50 = vpop.permute.xlu1 %3588 }
 0x44a   : > { %v8655_v42 = vcombine.high %v10848_v23, %v10856_v63  ;;  %v8657_v21 = vcombine.low %v10863_v33, %v10869_v24  ;;  %v3562_v6 = vpack.c.bf16 %v3282_v22, %v3146_v14  ;;  %v3563_v45 = vpack.c.bf16 %v3283_v29, %v3147_v57 }
 0x44b   : > { %v8659_v39 = vcombine.high %v10863_v33, %v10869_v24  ;;  %v8661_v18 = vcombine.low %v10872_v43, %v2971_v37  ;;  %v2780_v62 = vrot.slane %v2772_v27, %v10024_v35  ;;  %v2924_v15 = vcombine.low %v10811_v16, %v10858_v5 }
 0x44c   : > { %v8663_v44 = vcombine.high %v10872_v43, %v2971_v37  ;;  %v2787_v23 = vrot.slane %v2773_v40, %v10024_v35  ;;  %v2803_v63 = vrot.slane %v2789_v17, %v10024_v35  ;;  %v10911_v51 = vrot.slane %v8649_v30, %v10024_v35  ;;  %v3601_v14 = vpop.permute.xlu0 %3600 }
 0x44d   : > { %v2909_v12 = vcombine.high %v10768_v53, %v10835_v59  ;;  %v2916_v54 = vrot.slane %v2908_v20, %v10024_v35  ;;  %v2836_v33 = vcombine.low %v2780_v62, %v2796_v61  ;;  %v10919_v28 = vrot.slane %v8651_v60, %v10024_v35  ;;  %v10930_v59 = vpop.permute.xlu1 %3590 }
 0x44e   : > { %v2837_v11 = vcombine.high %v2780_v62, %v2796_v61  ;;  %8930 = vmatmul.mubr.msk.bf16.vlgmr.msra.gmra.mxu1 %vm4764_vm3, %v10480_v31  ;;  %8936 = vmatmul.mubr.msk.bf16.vlgmr.msra.gmra.mxu0 %vm4764_vm3, %v10482_v1  ;;  %v5051_v30 = vsel %vm4764_vm3, %v3562_v6, 0  ;;  %v5098_v0 = vsel %vm4764_vm3, %v3563_v45, 0  ;;  %v10928_v53 = vrot.slane %v8653_v48, %v10024_v35 }
 0x44f   : > { %8940 = vmatpush3.bf16.xpose.msra.mxu1 %v5051_v30  ;;  %8946 = vmatpush3.bf16.xpose.msra.mxu0 %v5098_v0  ;;  %v2925_v25 = vcombine.high %v10811_v16, %v10858_v5  ;;  %v2932_v9 = vrot.slane %v2924_v15, %v10024_v35  ;;  %v10936_v31 = vrot.slane %v8655_v42, %v10024_v35 }
 0x450   : > { %v2852_v1 = vcombine.low %v2787_v23, %v2803_v63  ;;  %v2853_v24 = vcombine.high %v2787_v23, %v2803_v63  ;;  %8941 = vmatprep.mubr.msk.bf16.mxu1 %vm9501_vm2, %v12332_v8  ;;  %8947 = vmatprep.mubr.msk.bf16.mxu0 %vm9501_vm2, %v12332_v8  ;;  %v3348_v43 = vcombine.low %v10911_v51, %v10919_v28 }
 0x451   : > { %8951 = vmatprep.subr.bf16.mxu1 %v12332_v8  ;;  %8957 = vmatprep.subr.bf16.mxu0 %v12332_v8  ;;  %v3380_v16 = vcombine.low %v10928_v53, %v10936_v31  ;;  %v10949_v5 = vrot.slane %v8657_v21, %v10024_v35  ;;  %v10952_v41 = vrot.slane %v8659_v39, %v10024_v35  ;;  %v10961_v55 = vpop.permute.xlu1 %3602 }
 0x452   : > { %v2923_v19 = vrot.slane %v2909_v12, %v10024_v35  ;;  %v10956_v37 = vrot.slane %v8661_v18, %v10024_v35  ;;  %v10959_v2 = vrot.slane %v8663_v44, %v10024_v35  ;;  %v2218_v27 = vcombine.low %v10701_v34, %v10707_v36 }
 0x453   : > { %v2939_v40 = vrot.slane %v2925_v25, %v10024_v35  ;;  %v2972_v17 = vcombine.low %v2916_v54, %v2932_v9  ;;  %v2973_v22 = vcombine.high %v2916_v54, %v2932_v9  ;;  %v3484_v57 = vcombine.low %v10949_v5, %v10952_v41 }
 0x454   : > { %v10969_v29 = vrot.slane %v2836_v33, %v10055_v49  ;;  %v3356_v60 = vrot.slane %v3348_v43, %v10055_v49  ;;  %v3388_v48 = vrot.slane %v3380_v16, %v10055_v49  ;;  %v3516_v20 = vcombine.low %v10956_v37, %v10959_v2 }
 0x455   : > { %v10976_v61 = vrot.slane %v2837_v11, %v10055_v49  ;;  %v10979_v42 = vrot.slane %v2852_v1, %v10055_v49  ;;  %v10982_v21 = vrot.slane %v2853_v24, %v10055_v49  ;;  %v3492_v6 = vrot.slane %v3484_v57, %v10055_v49  ;;  %v10992_v62 = vpop.permute.xlu1 %3614 }
 0x456   : > { %v3676_v45 = vcombine.low %v10916_v46, %v3601_v14  ;;  %v3677_v39 = vcombine.high %v10916_v46, %v3601_v14  ;;  %8942 = vmatmul.mubr.msk.bf16.vlgmr.msra.gmra.mxu1 %vm4764_vm3, %v10525_v58  ;;  %8948 = vmatmul.mubr.msk.bf16.vlgmr.msra.gmra.mxu0 %vm4764_vm3, %v10539_v13  ;;  %v3524_v18 = vrot.slane %v3516_v20, %v10055_v49 }
 0x457   : > { %v10995_v15 = vrot.slane %v2972_v17, %v10055_v49  ;;  %v10998_v44 = vrot.slane %v2973_v22, %v10055_v49  ;;  %v2988_v23 = vcombine.low %v2923_v19, %v2939_v40  ;;  %v2989_v63 = vcombine.high %v2923_v19, %v2939_v40  ;;  %8953 = vmatprep.mubr.msk.bf16.mxu1 %vm9501_vm2, %v12332_v8 }
 0x458   : > { %v3412_v12 = vcombine.low %v3356_v60, %v3388_v48  ;;  %v3548_v58 = vcombine.low %v3492_v6, %v3524_v18  ;;  %v3413_v54 = vcombine.high %v3356_v60, %v3388_v48  ;;  %v3549_v33 = vcombine.high %v3492_v6, %v3524_v18  ;;  %8959 = vmatprep.mubr.msk.bf16.mxu0 %vm9501_vm2, %v12332_v8 }
 0x459   : > { %v8650_v13 = vcombine.low %v10969_v29, %v10976_v61  ;;  %v8652_v46 = vcombine.high %v10969_v29, %v10976_v61  ;;  %v8654_v11 = vcombine.low %v10979_v42, %v10982_v21  ;;  %v3660_v30 = vcombine.low %v10073_v4, %v10899_v50  ;;  %v11017_v24 = vpop.permute.xlu1 %3624  ;;  %v11036_v29 = vpop.permute.xlu0 %3612 }
 0x45a   : > { %v8656_v0 = vcombine.high %v10979_v42, %v10982_v21  ;;  %v11015_v25 = vrot.slane %v3676_v45, %v10024_v35  ;;  %v3564_v9 = vpack.c.bf16 %v3548_v58, %v3412_v12  ;;  %v3565_v1 = vpack.c.bf16 %v3549_v33, %v3413_v54 }
 0x45b   : > { %v11020_v43 = vrot.slane %v2988_v23, %v10055_v49  ;;  %v11023_v16 = vrot.slane %v2989_v63, %v10055_v49  ;;  %v11026_v19 = vrot.slane %v3677_v39, %v10024_v35  ;;  %v3349_v40 = vcombine.high %v10911_v51, %v10919_v28 }
 0x45c   : > { %v8658_v17 = vcombine.low %v10995_v15, %v10998_v44  ;;  %v8660_v22 = vcombine.high %v10995_v15, %v10998_v44  ;;  %v5145_v14 = vsel %vm4764_vm3, %v3564_v9, 0  ;;  %v5192_v57 = vsel %vm4764_vm3, %v3565_v1, 0 }
 0x45d   : > { %8952 = vmatpush3.bf16.xpose.msra.mxu1 %v5145_v14  ;;  %8958 = vmatpush3.bf16.xpose.msra.mxu0 %v5192_v57  ;;  %v3661_v60 = vcombine.high %v10073_v4, %v10899_v50  ;;  %v3668_v48 = vrot.slane %v3660_v30, %v10024_v35  ;;  %v3363_v51 = vrot.slane %v3349_v40, %v10055_v49  ;;  %v11050_v42 = vpop.permute.xlu1 %3626  ;;  %v11070_v18 = vpop.permute.xlu0 %3636 }
 0x45e   : > { %8963 = vmatprep.subr.bf16.mxu1 %v12332_v8  ;;  %8969 = vmatprep.subr.bf16.mxu0 %v12332_v8  ;;  %v3381_v28 = vcombine.high %v10928_v53, %v10936_v31  ;;  %v3485_v20 = vcombine.high %v10949_v5, %v10952_v41  ;;  %v3517_v61 = vcombine.high %v10956_v37, %v10959_v2 }
 0x45f   : > { %v8662_v4 = vcombine.low %v11020_v43, %v11023_v16  ;;  %v8664_v50 = vcombine.high %v11020_v43, %v11023_v16  ;;  %v3796_v21 = vcombine.low %v10089_v32, %v10930_v59  ;;  %v3797_v53 = vcombine.high %v10089_v32, %v10930_v59 }
 0x460   : > { %v3395_v31 = vrot.slane %v3381_v28, %v10055_v49  ;;  %v3499_v5 = vrot.slane %v3485_v20, %v10055_v49  ;;  %v3531_v41 = vrot.slane %v3517_v61, %v10055_v49  ;;  %v3812_v37 = vcombine.low %v10881_v56, %v10961_v55 }
 0x461   : > { %v3675_v2 = vrot.slane %v3661_v60, %v10024_v35  ;;  %v3724_v6 = vcombine.low %v3668_v48, %v11015_v25  ;;  %v3725_v45 = vcombine.high %v3668_v48, %v11015_v25  ;;  %v3813_v39 = vcombine.high %v10881_v56, %v10961_v55  ;;  %v11072_v23 = vpop.permute.xlu1 %3638  ;;  %v12338_v56 = vld [vmem:[#allocation9_spill] sm:$0xff]  ;;  %v11111_v57 = vpop.permute.xlu0 %3648 }
 0x462   : > { %v3414_v32 = vcombine.low %v3363_v51, %v3395_v31  ;;  %v3550_v59 = vcombine.low %v3499_v5, %v3531_v41  ;;  %v3415_v15 = vcombine.high %v3363_v51, %v3395_v31  ;;  %v3551_v44 = vcombine.high %v3499_v5, %v3531_v41 }
 0x463   : > { %v11075_v63 = vrot.slane %v8650_v13, %v10024_v35  ;;  %v11078_v12 = vrot.slane %v8652_v46, %v10024_v35  ;;  %v11081_v58 = vrot.slane %v8654_v11, %v10024_v35  ;;  %v11084_v54 = vrot.slane %v8656_v0, %v10024_v35 }
 0x464   : > { %8954 = vmatmul.mubr.msk.bf16.vlgmr.msra.gmra.mxu1 %vm4764_vm3, %v10639_v26  ;;  %8960 = vmatmul.mubr.msk.bf16.vlgmr.msra.gmra.mxu0 %vm4764_vm3, %v12338_v56  ;;  %v3566_v55 = vpack.c.bf16 %v3550_v59, %v3414_v32  ;;  %v3567_v33 = vpack.c.bf16 %v3551_v44, %v3415_v15  ;;  %v3820_v13 = vrot.slane %v3812_v37, %v10024_v35 }
 0x465   : > { %v3740_v30 = vcombine.low %v3675_v2, %v11026_v19  ;;  %v3741_v46 = vcombine.high %v3675_v2, %v11026_v19  ;;  %v3804_v11 = vrot.slane %v3796_v21, %v10024_v35  ;;  %v3827_v25 = vrot.slane %v3813_v39, %v10024_v35  ;;  %8965 = vmatprep.mubr.msk.bf16.mxu1 %vm9501_vm2, %v12332_v8  ;;  %v11116_v60 = vpop.permute.xlu1 %3650  ;;  %v11136_v56 = vpop.permute.xlu0 %3580 }
 0x466   : > { %v3811_v26 = vrot.slane %v3797_v53, %v10024_v35  ;;  %v5239_v0 = vsel %vm4764_vm3, %v3566_v55, 0  ;;  %v5286_v9 = vsel %vm4764_vm3, %v3567_v33, 0  ;;  %8971 = vmatprep.mubr.msk.bf16.mxu0 %vm9501_vm2, %v12332_v8  ;;  %v11103_v1 = vrot.slane %v8658_v17, %v10024_v35 }
 0x467   : > { %v3732_v43 = vrot.slane %v3724_v6, %v10055_v49  ;;  %8964 = vmatpush3.bf16.xpose.msra.mxu1 %v5239_v0  ;;  %8970 = vmatpush3.bf16.xpose.msra.mxu0 %v5286_v9  ;;  %v3364_v16 = vcombine.low %v11075_v63, %v11078_v12  ;;  %v3396_v19 = vcombine.low %v11081_v58, %v11084_v54 }
 0x468   : > { %v3739_v40 = vrot.slane %v3725_v45, %v10055_v49  ;;  %v3860_v14 = vcombine.low %v3804_v11, %v3820_v13  ;;  %8975 = vmatprep.subr.bf16.mxu1 %v12332_v8  ;;  %8981 = vmatprep.subr.bf16.mxu0 %v12332_v8  ;;  %v3451_v17 = vrot.slane %v8660_v22, %v10024_v35 }
 0x469   : > { %v3861_v48 = vcombine.high %v3804_v11, %v3820_v13  ;;  %v3876_v51 = vcombine.low %v3811_v26, %v3827_v25  ;;  %v3877_v28 = vcombine.high %v3811_v26, %v3827_v25  ;;  %v3467_v20 = vrot.slane %v8662_v4, %v10024_v35  ;;  %v11143_v33 = vpop.permute.xlu1 %3582 }
 0x46a   : > { %v3748_v61 = vrot.slane %v3740_v30, %v10055_v49  ;;  %v3755_v21 = vrot.slane %v3741_v46, %v10055_v49  ;;  %v3483_v53 = vrot.slane %v8664_v50, %v10024_v35  ;;  %v3500_v31 = vcombine.low %v11103_v1, %v3451_v17 }
 0x46b   : > { %v3372_v5 = vrot.slane %v3364_v16, %v10055_v49  ;;  %v3404_v41 = vrot.slane %v3396_v19, %v10055_v49  ;;  %v2354_v22 = vcombine.low %v10749_v38, %v10792_v7  ;;  %v2219_v37 = vcombine.high %v10701_v34, %v10707_v36 }
 0x46c   : > { %v8665_v2 = vcombine.low %v3732_v43, %v3739_v40  ;;  %v3508_v4 = vrot.slane %v3500_v31, %v10055_v49  ;;  %v3532_v6 = vcombine.low %v3467_v20, %v3483_v53  ;;  %v2355_v45 = vcombine.high %v10749_v38, %v10792_v7 }
 0x46d   : > { %v3868_v50 = vrot.slane %v3860_v14, %v10055_v49  ;;  %v3875_v39 = vrot.slane %v3861_v48, %v10055_v49  ;;  %v3884_v32 = vrot.slane %v3876_v51, %v10055_v49  ;;  %v3891_v59 = vrot.slane %v3877_v28, %v10055_v49  ;;  %v11170_v51 = vpop.permute.xlu0 %3604 }
 0x46e   : > { %v8667_v15 = vcombine.high %v3732_v43, %v3739_v40  ;;  %v8669_v44 = vcombine.low %v3748_v61, %v3755_v21  ;;  %8966 = vmatmul.mubr.msk.bf16.vlgmr.msra.gmra.mxu1 %vm4764_vm3, %v10727_v3  ;;  %8972 = vmatmul.mubr.msk.bf16.vlgmr.msra.gmra.mxu0 %vm4764_vm3, %v10732_v10  ;;  %v3540_v55 = vrot.slane %v3532_v6, %v10055_v49 }
 0x46f   : > { %v8671_v13 = vcombine.high %v3748_v61, %v3755_v21  ;;  %v3416_v30 = vcombine.low %v3372_v5, %v3404_v41  ;;  %8977 = vmatprep.mubr.msk.bf16.mxu1 %vm9501_vm2, %v12332_v8  ;;  %v3365_v46 = vcombine.high %v11075_v63, %v11078_v12  ;;  %v3397_v11 = vcombine.high %v11081_v58, %v11084_v54  ;;  %v11173_v21 = vpop.permute.xlu1 %3592 }
 0x470   : > { %v3552_v25 = vcombine.low %v3508_v4, %v3540_v55  ;;  %v3417_v3 = vcombine.high %v3372_v5, %v3404_v41  ;;  %v3553_v26 = vcombine.high %v3508_v4, %v3540_v55  ;;  %8983 = vmatprep.mubr.msk.bf16.mxu0 %vm9501_vm2, %v12332_v8  ;;  %v3501_v10 = vcombine.high %v11103_v1, %v3451_v17 }
 0x471   : > { %v11155_v0 = vrot.slane %v8665_v2, %v10024_v35  ;;  %v8673_v9 = vcombine.low %v3868_v50, %v3875_v39  ;;  %v8675_v43 = vcombine.high %v3868_v50, %v3875_v39  ;;  %v8677_v16 = vcombine.low %v3884_v32, %v3891_v59 }
 0x472   : > { %v11158_v19 = vrot.slane %v8667_v15, %v10024_v35  ;;  %v8679_v63 = vcombine.high %v3884_v32, %v3891_v59  ;;  %v3568_v12 = vpack.c.bf16 %v3552_v25, %v3416_v30  ;;  %v3569_v58 = vpack.c.bf16 %v3553_v26, %v3417_v3 }
 0x473   : > { %v11161_v54 = vrot.slane %v8669_v44, %v10024_v35  ;;  %v11164_v40 = vrot.slane %v8671_v13, %v10024_v35  ;;  %v3379_v1 = vrot.slane %v3365_v46, %v10055_v49  ;;  %v3411_v14 = vrot.slane %v3397_v11, %v10055_v49  ;;  %v11208_v3 = vpop.permute.xlu1 %3594 }
 0x474   : > { %v5333_v17 = vsel %vm4764_vm3, %v3568_v12, 0  ;;  %v5380_v48 = vsel %vm4764_vm3, %v3569_v58, 0  ;;  %v3515_v28 = vrot.slane %v3501_v10, %v10055_v49  ;;  %v3533_v61 = vcombine.high %v3467_v20, %v3483_v53 }
 0x475   : > { %v11176_v31 = vrot.slane %v8673_v9, %v10024_v35  ;;  %v11179_v5 = vrot.slane %v8675_v43, %v10024_v35  ;;  %v11182_v41 = vrot.slane %v8677_v16, %v10024_v35  ;;  %8976 = vmatpush3.bf16.xpose.msra.mxu1 %v5333_v17  ;;  %8982 = vmatpush3.bf16.xpose.msra.mxu0 %v5380_v48 }
 0x476   : > { %v11185_v2 = vrot.slane %v8679_v63, %v10024_v35  ;;  %8987 = vmatprep.subr.bf16.mxu1 %v12332_v8  ;;  %8993 = vmatprep.subr.bf16.mxu0 %v12332_v8  ;;  %v3547_v20 = vrot.slane %v3533_v61, %v10055_v49  ;;  %v3828_v53 = vcombine.low %v10992_v62, %v11072_v23 }
 0x477   : > { %v3948_v4 = vcombine.low %v11136_v56, %v11170_v51  ;;  %v3418_v6 = vcombine.low %v3379_v1, %v3411_v14  ;;  %v3829_v50 = vcombine.high %v10992_v62, %v11072_v23  ;;  %v3844_v39 = vcombine.low %v11050_v42, %v11116_v60 }
 0x478   : > { %v3554_v32 = vcombine.low %v3515_v28, %v3547_v20  ;;  %v3419_v59 = vcombine.high %v3379_v1, %v3411_v14  ;;  %v3555_v15 = vcombine.high %v3515_v28, %v3547_v20  ;;  %v3845_v44 = vcombine.high %v11050_v42, %v11116_v60 }
 0x479   : > { %v3949_v55 = vcombine.high %v11136_v56, %v11170_v51  ;;  %v3836_v13 = vrot.slane %v3828_v53, %v10024_v35  ;;  %v3843_v30 = vrot.slane %v3829_v50, %v10024_v35  ;;  %v3852_v46 = vrot.slane %v3844_v39, %v10024_v35  ;;  %v3607_v53 = vpop.permute.xlu1 %3606  ;;  %v12339_v50 = vld [vmem:[#allocation7_spill] sm:$0xff] }
 0x47a   : > { %v3570_v11 = vpack.c.bf16 %v3554_v32, %v3418_v6  ;;  %v3571_v62 = vpack.c.bf16 %v3555_v15, %v3419_v59  ;;  %v3859_v23 = vrot.slane %v3845_v44, %v10024_v35  ;;  %v4268_v25 = vcombine.low %v11155_v0, %v11158_v19 }
 0x47b   : > { %v3892_v26 = vcombine.low %v3836_v13, %v3852_v46  ;;  %v3893_v42 = vcombine.high %v3836_v13, %v3852_v46  ;;  %v4300_v60 = vcombine.low %v11161_v54, %v11164_v40  ;;  %v4404_v56 = vcombine.low %v11176_v31, %v11179_v5 }
 0x47c   : > { %8978 = vmatmul.mubr.msk.bf16.vlgmr.msra.gmra.mxu1 %vm4764_vm3, %v10786_v47  ;;  %8984 = vmatmul.mubr.msk.bf16.vlgmr.msra.gmra.mxu0 %vm4764_vm3, %v10820_v52  ;;  %v5427_v10 = vsel %vm4764_vm3, %v3570_v11, 0  ;;  %v5474_v9 = vsel %vm4764_vm3, %v3571_v62, 0  ;;  %v3908_v43 = vcombine.low %v3843_v30, %v3859_v23  ;;  %v3909_v16 = vcombine.high %v3843_v30, %v3859_v23 }
 0x47d   : > { %8988 = vmatpush3.bf16.xpose.msra.mxu1 %v5427_v10  ;;  %8994 = vmatpush3.bf16.xpose.msra.mxu0 %v5474_v9  ;;  %v3900_v63 = vrot.slane %v3892_v26, %v10055_v49  ;;  %v3907_v12 = vrot.slane %v3893_v42, %v10055_v49  ;;  %v4276_v58 = vrot.slane %v4268_v25, %v10055_v49 }
 0x47e   : > { %v11224_v1 = vrot.slane %v3908_v43, %v10055_v49  ;;  %v11227_v47 = vrot.slane %v3909_v16, %v10055_v49  ;;  %8989 = vmatprep.mubr.msk.bf16.mxu1 %vm9501_vm2, %v12332_v8  ;;  %8995 = vmatprep.mubr.msk.bf16.mxu0 %vm9501_vm2, %v12332_v8  ;;  %v4308_v52 = vrot.slane %v4300_v60, %v10055_v49 }
 0x47f   : > { %v8674_v14 = vcombine.low %v3900_v63, %v3907_v12  ;;  %v8676_v17 = vcombine.high %v3900_v63, %v3907_v12  ;;  %v2370_v48 = vpack.c.bf16 %v2354_v22, %v2218_v27  ;;  %8999 = vmatprep.subr.bf16.mxu1 %v12332_v8  ;;  %9005 = vmatprep.subr.bf16.mxu0 %v12332_v8 }
 0x480   : > { %v8678_v51 = vcombine.low %v11224_v1, %v11227_v47  ;;  %v8680_v28 = vcombine.high %v11224_v1, %v11227_v47  ;;  %v4412_v61 = vrot.slane %v4404_v56, %v10055_v49  ;;  %v4436_v20 = vcombine.low %v11182_v41, %v11185_v2 }
 0x481   : > { %v3956_v6 = vrot.slane %v3948_v4, %v10024_v35  ;;  %v3963_v27 = vrot.slane %v3949_v55, %v10024_v35  ;;  %v2371_v22 = vpack.c.bf16 %v2355_v45, %v2219_v37  ;;  %v3932_v39 = vcombine.low %v12339_v50, %v11173_v21  ;;  %v12340_v55 = vld [vmem:[#allocation8_spill] sm:$0xff] }
 0x482   : > { %v4332_v32 = vcombine.low %v4276_v58, %v4308_v52  ;;  %v4444_v59 = vrot.slane %v4436_v20, %v10055_v49  ;;  %v4333_v15 = vcombine.high %v4276_v58, %v4308_v52  ;;  %v3933_v44 = vcombine.high %v12339_v50, %v11173_v21 }
 0x483   : > { %v3940_v4 = vrot.slane %v3932_v39, %v10024_v35  ;;  %v4068_v13 = vcombine.low %v12340_v55, %v11208_v3  ;;  %v4069_v34 = vcombine.high %v12340_v55, %v11208_v3  ;;  %v4084_v36 = vcombine.low %v11143_v33, %v3607_v53 }
 0x484   : > { %8990 = vmatmul.mubr.msk.bf16.vlgmr.msra.gmra.mxu1 %vm4764_vm3, %v2370_v48  ;;  %8996 = vmatmul.mubr.msk.bf16.vlgmr.msra.gmra.mxu0 %vm4764_vm3, %v2371_v22  ;;  %v4468_v38 = vcombine.low %v4412_v61, %v4444_v59  ;;  %v4469_v7 = vcombine.high %v4412_v61, %v4444_v59  ;;  %v3947_v37 = vrot.slane %v3933_v44, %v10024_v35 }
 0x485   : > { %v3996_v45 = vcombine.low %v3940_v4, %v3956_v6  ;;  %v3997_v21 = vcombine.high %v3940_v4, %v3956_v6  ;;  %9001 = vmatprep.mubr.msk.bf16.mxu1 %vm9501_vm2, %v12332_v8  ;;  %9007 = vmatprep.mubr.msk.bf16.mxu0 %vm9501_vm2, %v12332_v8  ;;  %v4076_v23 = vrot.slane %v4068_v13, %v10024_v35 }
 0x486   : > { %v4748_v30 = vpack.c.bf16 %v4468_v38, %v4332_v32  ;;  %v4749_v46 = vpack.c.bf16 %v4469_v7, %v4333_v15  ;;  %v4012_v11 = vcombine.low %v3947_v37, %v3963_v27  ;;  %v4013_v62 = vcombine.high %v3947_v37, %v3963_v27 }
 0x487   : > { %v4085_v25 = vcombine.high %v11143_v33, %v3607_v53  ;;  %v4092_v3 = vrot.slane %v4084_v36, %v10024_v35  ;;  %v4004_v26 = vrot.slane %v3996_v45, %v10055_v49  ;;  %v4011_v42 = vrot.slane %v3997_v21, %v10055_v49 }
 0x488   : > { %9000 = vmatpush3.bf16.msra.mxu1 %v4748_v30  ;;  %9006 = vmatpush3.bf16.msra.mxu0 %v4749_v46  ;;  %v4083_v60 = vrot.slane %v4069_v34, %v10024_v35  ;;  %v4020_v56 = vrot.slane %v4012_v11, %v10055_v49  ;;  %v4027_v10 = vrot.slane %v4013_v62, %v10055_v49 }
 0x489   : > { %v4099_v9 = vrot.slane %v4085_v25, %v10024_v35  ;;  %v4132_v43 = vcombine.low %v4076_v23, %v4092_v3  ;;  %9011 = vmatprep.subr.bf16.mxu1 %v12332_v8  ;;  %v4133_v33 = vcombine.high %v4076_v23, %v4092_v3  ;;  %9017 = vmatprep.subr.bf16.mxu0 %v12332_v8 }
 0x48a   : > { %v4355_v16 = vrot.slane %v8674_v14, %v10024_v35  ;;  %v4371_v63 = vrot.slane %v8676_v17, %v10024_v35  ;;  %v8681_v52 = vcombine.low %v4004_v26, %v4011_v42  ;;  %v8683_v48 = vcombine.high %v4004_v26, %v4011_v42 }
 0x48b   : > { %v4140_v12 = vrot.slane %v4132_v43, %v10055_v49  ;;  %v4148_v58 = vcombine.low %v4083_v60, %v4099_v9  ;;  %v4147_v61 = vrot.slane %v4133_v33, %v10055_v49  ;;  %v4149_v20 = vcombine.high %v4083_v60, %v4099_v9 }
 0x48c   : > { %v8685_v53 = vcombine.low %v4020_v56, %v4027_v10  ;;  %v8687_v6 = vcombine.high %v4020_v56, %v4027_v10  ;;  %v4269_v22 = vcombine.high %v11155_v0, %v11158_v19  ;;  %v4301_v17 = vcombine.high %v11161_v54, %v11164_v40 }
 0x48d   : > { %v4156_v27 = vrot.slane %v4148_v58, %v10055_v49  ;;  %v4163_v39 = vrot.slane %v4149_v20, %v10055_v49  ;;  %v8689_v14 = vcombine.low %v4140_v12, %v4147_v61  ;;  %v8691_v32 = vcombine.high %v4140_v12, %v4147_v61 }
 0x48e   : > { %v4283_v59 = vrot.slane %v4269_v22, %v10055_v49  ;;  %v4405_v15 = vcombine.high %v11176_v31, %v11179_v5  ;;  %v4437_v44 = vcombine.high %v11182_v41, %v11185_v2  ;;  %v4387_v0 = vrot.slane %v8678_v51, %v10024_v35 }
 0x48f   : > { %v4403_v19 = vrot.slane %v8680_v28, %v10024_v35  ;;  %v8693_v4 = vcombine.low %v4156_v27, %v4163_v39  ;;  %v8695_v54 = vcombine.high %v4156_v27, %v4163_v39  ;;  %v4484_v40 = vrot.slane %v8681_v52, %v10024_v35 }
 0x490   : > { %v4315_v13 = vrot.slane %v4301_v17, %v10055_v49  ;;  %v4419_v31 = vrot.slane %v4405_v15, %v10055_v49  ;;  %v4451_v5 = vrot.slane %v4437_v44, %v10055_v49  ;;  %v4500_v41 = vrot.slane %v8683_v48, %v10024_v35 }
 0x491   : > { %v4516_v2 = vrot.slane %v8685_v53, %v10024_v35  ;;  %v4532_v51 = vrot.slane %v8687_v6, %v10024_v35  ;;  %v4420_v34 = vcombine.low %v4355_v16, %v4371_v63  ;;  %v4620_v38 = vrot.slane %v8689_v14, %v10024_v35 }
 0x492   : > { %v4334_v36 = vcombine.low %v4283_v59, %v4315_v13  ;;  %v4470_v1 = vcombine.low %v4419_v31, %v4451_v5  ;;  %v4335_v47 = vcombine.high %v4283_v59, %v4315_v13  ;;  %v4471_v28 = vcombine.high %v4419_v31, %v4451_v5 }
 0x493   : > { %v4636_v7 = vrot.slane %v8691_v32, %v10024_v35  ;;  %v11319_v37 = vrot.slane %v4420_v34, %v10055_v49  ;;  %v4452_v45 = vcombine.low %v4387_v0, %v4403_v19  ;;  %v4421_v46 = vcombine.high %v4355_v16, %v4371_v63 }
 0x494   : > { %v11321_v21 = vpack.c.bf16 %v4470_v1, %v4334_v36  ;;  %v11323_v30 = vpack.c.bf16 %v4471_v28, %v4335_v47  ;;  %v4652_v11 = vrot.slane %v8693_v4, %v10024_v35  ;;  %v4668_v23 = vrot.slane %v8695_v54, %v10024_v35 }
 0x495   : > { %v11327_v62 = vrot.slane %v4452_v45, %v10055_v49  ;;  %v11331_v25 = vrot.slane %v4421_v46, %v10055_v49  ;;  %v4453_v3 = vcombine.high %v4387_v0, %v4403_v19  ;;  %v4540_v26 = vcombine.low %v4484_v40, %v4500_v41 }
 0x496   : > { %v4572_v56 = vcombine.low %v4516_v2, %v4532_v51  ;;  %v4676_v10 = vcombine.low %v4620_v38, %v4636_v7  ;;  %v4708_v58 = vcombine.low %v4652_v11, %v4668_v23  ;;  %v4541_v52 = vcombine.high %v4484_v40, %v4500_v41 }
 0x497   : > { %v11338_v9 = vrot.slane %v4453_v3, %v10055_v49  ;;  %v4548_v43 = vrot.slane %v4540_v26, %v10055_v49  ;;  %v4573_v48 = vcombine.high %v4516_v2, %v4532_v51  ;;  %v4677_v61 = vcombine.high %v4620_v38, %v4636_v7 }
 0x498   : > { %v4580_v33 = vrot.slane %v4572_v56, %v10055_v49  ;;  %v4684_v16 = vrot.slane %v4676_v10, %v10055_v49  ;;  %v4716_v20 = vrot.slane %v4708_v58, %v10055_v49  ;;  %v4555_v53 = vrot.slane %v4541_v52, %v10055_v49 }
 0x499   : > { %v4587_v6 = vrot.slane %v4573_v48, %v10055_v49  ;;  %v4691_v27 = vrot.slane %v4677_v61, %v10055_v49  ;;  %v4709_v22 = vcombine.high %v4652_v11, %v4668_v23 }
 0x49a   : > { %v4604_v39 = vcombine.low %v4548_v43, %v4580_v33  ;;  %v4740_v14 = vcombine.low %v4684_v16, %v4716_v20  ;;  %v4605_v32 = vcombine.high %v4548_v43, %v4580_v33  ;;  %v4741_v17 = vcombine.high %v4684_v16, %v4716_v20 }
 0x49b   : > { %v4723_v59 = vrot.slane %v4709_v22, %v10055_v49  ;;  %v4606_v0 = vcombine.low %v4555_v53, %v4587_v6  ;;  %v4607_v4 = vcombine.high %v4555_v53, %v4587_v6 }
 0x49c   : > { %v11352_v15 = vpack.c.bf16 %v4740_v14, %v4604_v39  ;;  %v11354_v44 = vpack.c.bf16 %v4741_v17, %v4605_v32 }
 0x49d   : > { %v4742_v19 = vcombine.low %v4691_v27, %v4723_v59  ;;  %v4743_v54 = vcombine.high %v4691_v27, %v4723_v59 }
 0x49f   : > { %v11356_v40 = vpack.c.bf16 %v4742_v19, %v4606_v0  ;;  %v11358_v13 = vpack.c.bf16 %v4743_v54, %v4607_v4 }
 0x4a1   : > { %12341 = vst [vmem:[#allocation9_spill] sm:$0xff] %v11356_v40  ;;  %12342 = vst [vmem:[#allocation7_spill] sm:$0xff] %v11358_v13 }
 0x4f0   : > { %v4805_v31 = vpop.f32.mrf.mxu0 }
 0x4f1   : > { %v11360_v5 = vmul.f32 0.35355338, %v4805_v31  ;;  %v4852_v41 = vpop.f32.mrf.mxu1 }
 0x4f2   : > { %v8907_v2 = vpop.f32.mrf.mxu0  ;;  %v11362_v51 = vmul.f32 0.35355338, %v4852_v41 }
 0x4f3   : > { %v8913_v34 = vpop.f32.mrf.mxu1  ;;  %v5550_v36 = vsel %vm5549_vm4, %v11360_v5, -inf }
 0x4f4   : > { %5551 = vmax.xlane.f32.xlu0 %v5550_v36  ;;  %v4808_v1 = vpop.f32.mrf.mxu0  ;;  %v5556_v46 = vsel %vm5549_vm4, %v11362_v51, -inf }
 0x4f5   : > { %v4855_v47 = vpop.f32.mrf.mxu1  ;;  %v11366_v28 = vmul.f32 0.35355338, %v4808_v1 }
 0x4f6   : > { %v8908_v38 = vpop.f32.mrf.mxu0  ;;  %v11368_v7 = vmul.f32 0.35355338, %v4855_v47 }
 0x4f7   : > { %v8914_v45 = vpop.f32.mrf.mxu1  ;;  %v5553_v11 = vsel %vm5549_vm4, %v11366_v28, -inf }
 0x4f8   : > { %5557 = vmax.xlane.f32.xlu0 %v5556_v46  ;;  %5554 = vmax.xlane.f32.xlu1 %v5553_v11  ;;  %v5559_v3 = vsel %vm5549_vm4, %v11368_v7, -inf }
 0x4fc   : > { %v4899_v23 = vpop.f32.mrf.mxu1  ;;  %5560 = vmax.xlane.f32.xlu0 %v5559_v3 }
 0x4fd   : > { %v11376_v26 = vmul.f32 0.35355338, %v4899_v23 }
 0x4fe   : > { %v4946_v56 = vpop.f32.mrf.mxu0  ;;  %v8919_v10 = vpop.f32.mrf.mxu1 }
 0x4ff   : > { %v11378_v33 = vmul.f32 0.35355338, %v4946_v56  ;;  %v5562_v58 = vsel %vm5549_vm4, %v11376_v26, -inf }
 0x500   : > { %v8925_v43 = vpop.f32.mrf.mxu0  ;;  %v4902_v16 = vpop.f32.mrf.mxu1  ;;  %5563 = vmax.xlane.f32.xlu0 %v5562_v58 }
 0x501   : > { %v11382_v52 = vmul.f32 0.35355338, %v4902_v16  ;;  %v5568_v27 = vsel %vm5549_vm4, %v11378_v33, -inf }
 0x502   : > { %v4949_v48 = vpop.f32.mrf.mxu0  ;;  %v8920_v61 = vpop.f32.mrf.mxu1 }
 0x503   : > { %v11384_v20 = vmul.f32 0.35355338, %v4949_v48  ;;  %v5565_v6 = vsel %vm5549_vm4, %v11382_v52, -inf }
 0x504   : > { %v8926_v53 = vpop.f32.mrf.mxu0  ;;  %5566 = vmax.xlane.f32.xlu1 %v5565_v6  ;;  %5569 = vmax.xlane.f32.xlu0 %v5568_v27 }
 0x505   : > { %v5571_v22 = vsel %vm5549_vm4, %v11384_v20, -inf }
 0x508   : > { %5572 = vmax.xlane.f32.xlu1 %v5571_v22 }
 0x50e   : > { %v4993_v39 = vpop.f32.mrf.mxu1  ;;  %v5040_v14 = vpop.f32.mrf.mxu0 }
 0x50f   : > { %v11392_v32 = vmul.f32 0.35355338, %v4993_v39  ;;  %v11394_v0 = vmul.f32 0.35355338, %v5040_v14 }
 0x510   : > { %v8931_v17 = vpop.f32.mrf.mxu1  ;;  %v8937_v59 = vpop.f32.mrf.mxu0 }
 0x511   : > { %v5574_v19 = vsel %vm5549_vm4, %v11392_v32, -inf  ;;  %v5580_v1 = vsel %vm5549_vm4, %v11394_v0, -inf }
 0x512   : > { %v4996_v4 = vpop.f32.mrf.mxu1  ;;  %v5043_v54 = vpop.f32.mrf.mxu0  ;;  %5575 = vmax.xlane.f32.xlu0 %v5574_v19 }
 0x513   : > { %v11398_v31 = vmul.f32 0.35355338, %v4996_v4  ;;  %v11400_v34 = vmul.f32 0.35355338, %v5043_v54 }
 0x514   : > { %v8932_v41 = vpop.f32.mrf.mxu1  ;;  %v8938_v2 = vpop.f32.mrf.mxu0 }
 0x515   : > { %v5577_v36 = vsel %vm5549_vm4, %v11398_v31, -inf  ;;  %v5583_v3 = vsel %vm5549_vm4, %v11400_v34, -inf }
 0x516   : > { %v5134_v47 = vpop.f32.mrf.mxu0  ;;  %5578 = vmax.xlane.f32.xlu1 %v5577_v36  ;;  %v5087_v38 = vpop.f32.mrf.mxu1  ;;  %5581 = vmax.xlane.f32.xlu0 %v5580_v1 }
 0x517   : > { %v11406_v45 = vmul.f32 0.35355338, %v5087_v38  ;;  %v11408_v23 = vmul.f32 0.35355338, %v5134_v47 }
 0x518   : > { %v8943_v46 = vpop.f32.mrf.mxu1  ;;  %v8949_v11 = vpop.f32.mrf.mxu0 }
 0x519   : > { %v5586_v56 = vsel %vm5549_vm4, %v11406_v45, -inf  ;;  %v5592_v6 = vsel %vm5549_vm4, %v11408_v23, -inf }
 0x51a   : > { %v5137_v10 = vpop.f32.mrf.mxu0  ;;  %5584 = vmax.xlane.f32.xlu1 %v5583_v3  ;;  %v5090_v43 = vpop.f32.mrf.mxu1  ;;  %5587 = vmax.xlane.f32.xlu0 %v5586_v56 }
 0x51b   : > { %v11414_v16 = vmul.f32 0.35355338, %v5090_v43  ;;  %v11416_v61 = vmul.f32 0.35355338, %v5137_v10 }
 0x51c   : > { %v8944_v58 = vpop.f32.mrf.mxu1  ;;  %v8950_v48 = vpop.f32.mrf.mxu0 }
 0x51d   : > { %v5589_v53 = vsel %vm5549_vm4, %v11414_v16, -inf  ;;  %v5595_v27 = vsel %vm5549_vm4, %v11416_v61, -inf }
 0x51e   : > { %5590 = vmax.xlane.f32.xlu1 %v5589_v53  ;;  %5593 = vmax.xlane.f32.xlu0 %v5592_v6 }
 0x522   : > { %5596 = vmax.xlane.f32.xlu1 %v5595_v27 }
 0x524   : > { %v5181_v22 = vpop.f32.mrf.mxu1  ;;  %v5228_v39 = vpop.f32.mrf.mxu0 }
 0x525   : > { %v11424_v14 = vmul.f32 0.35355338, %v5181_v22  ;;  %v11426_v19 = vmul.f32 0.35355338, %v5228_v39 }
 0x526   : > { %v8955_v17 = vpop.f32.mrf.mxu1  ;;  %v8961_v59 = vpop.f32.mrf.mxu0 }
 0x527   : > { %v5598_v4 = vsel %vm5549_vm4, %v11424_v14, -inf  ;;  %v5604_v46 = vsel %vm5549_vm4, %v11426_v19, -inf }
 0x528   : > { %v5184_v54 = vpop.f32.mrf.mxu1  ;;  %v5231_v41 = vpop.f32.mrf.mxu0  ;;  %5599 = vmax.xlane.f32.xlu0 %v5598_v4 }
 0x529   : > { %v11430_v2 = vmul.f32 0.35355338, %v5184_v54  ;;  %v11432_v47 = vmul.f32 0.35355338, %v5231_v41 }
 0x52a   : > { %v8956_v36 = vpop.f32.mrf.mxu1  ;;  %v8962_v1 = vpop.f32.mrf.mxu0 }
 0x52b   : > { %v5601_v38 = vsel %vm5549_vm4, %v11430_v2, -inf  ;;  %v5607_v10 = vsel %vm5549_vm4, %v11432_v47, -inf }
 0x52c   : > { %5602 = vmax.xlane.f32.xlu1 %v5601_v38  ;;  %5605 = vmax.xlane.f32.xlu0 %v5604_v46 }
 0x52e   : > { %v5322_v11 = vpop.f32.mrf.mxu0  ;;  %v5275_v3 = vpop.f32.mrf.mxu1 }
 0x52f   : > { %v11438_v56 = vmul.f32 0.35355338, %v5275_v3  ;;  %v11442_v48 = vmul.f32 0.35355338, %v5322_v11 }
 0x530   : > { %v8967_v43 = vpop.f32.mrf.mxu1  ;;  %v8973_v58 = vpop.f32.mrf.mxu0  ;;  %5608 = vmax.xlane.f32.xlu1 %v5607_v10 }
 0x531   : > { %v5610_v53 = vsel %vm5549_vm4, %v11438_v56, -inf  ;;  %v5616_v54 = vsel %vm5549_vm4, %v11442_v48, -inf }
 0x532   : > { %v5325_v6 = vpop.f32.mrf.mxu0  ;;  %v5278_v27 = vpop.f32.mrf.mxu1  ;;  %5611 = vmax.xlane.f32.xlu0 %v5610_v53 }
 0x533   : > { %v11446_v22 = vmul.f32 0.35355338, %v5278_v27  ;;  %v11448_v59 = vmul.f32 0.35355338, %v5325_v6 }
 0x534   : > { %v8968_v39 = vpop.f32.mrf.mxu1  ;;  %v8974_v17 = vpop.f32.mrf.mxu0 }
 0x535   : > { %v5613_v4 = vsel %vm5549_vm4, %v11446_v22, -inf  ;;  %v5619_v41 = vsel %vm5549_vm4, %v11448_v59, -inf }
 0x536   : > { %5614 = vmax.xlane.f32.xlu1 %v5613_v4  ;;  %5617 = vmax.xlane.f32.xlu0 %v5616_v54 }
 0x53a   : > { %5620 = vmax.xlane.f32.xlu1 %v5619_v41 }
 0x53c   : > { %v5369_v36 = vpop.f32.mrf.mxu1  ;;  %v5416_v1 = vpop.f32.mrf.mxu0 }
 0x53d   : > { %v11456_v38 = vmul.f32 0.35355338, %v5369_v36  ;;  %v11458_v3 = vmul.f32 0.35355338, %v5416_v1 }
 0x53e   : > { %v8979_v46 = vpop.f32.mrf.mxu1  ;;  %v8985_v11 = vpop.f32.mrf.mxu0 }
 0x53f   : > { %v5622_v10 = vsel %vm5549_vm4, %v11456_v38, -inf  ;;  %v5628_v4 = vsel %vm5549_vm4, %v11458_v3, -inf }
 0x540   : > { %v5372_v43 = vpop.f32.mrf.mxu1  ;;  %v5419_v58 = vpop.f32.mrf.mxu0  ;;  %5623 = vmax.xlane.f32.xlu0 %v5622_v10 }
 0x541   : > { %v11462_v53 = vmul.f32 0.35355338, %v5372_v43  ;;  %v11464_v39 = vmul.f32 0.35355338, %v5419_v58 }
 0x542   : > { %v8980_v6 = vpop.f32.mrf.mxu1  ;;  %v8986_v27 = vpop.f32.mrf.mxu0 }
 0x543   : > { %v5625_v17 = vsel %vm5549_vm4, %v11462_v53, -inf  ;;  %v5631_v10 = vsel %vm5549_vm4, %v11464_v39, -inf }
 0x544   : > { %v5510_v54 = vpop.f32.mrf.mxu0  ;;  %5626 = vmax.xlane.f32.xlu1 %v5625_v17  ;;  %v5463_v41 = vpop.f32.mrf.mxu1  ;;  %5629 = vmax.xlane.f32.xlu0 %v5628_v4 }
 0x545   : > { %v11470_v36 = vmul.f32 0.35355338, %v5463_v41  ;;  %v11472_v11 = vmul.f32 0.35355338, %v5510_v54 }
 0x546   : > { %v8991_v1 = vpop.f32.mrf.mxu1  ;;  %v8997_v46 = vpop.f32.mrf.mxu0 }
 0x547   : > { %v5634_v43 = vsel %vm5549_vm4, %v11470_v36, -inf  ;;  %v5640_v1 = vsel %vm5549_vm4, %v11472_v11, -inf }
 0x548   : > { %v5513_v58 = vpop.f32.mrf.mxu0  ;;  %5632 = vmax.xlane.f32.xlu1 %v5631_v10  ;;  %v5466_v6 = vpop.f32.mrf.mxu1  ;;  %5635 = vmax.xlane.f32.xlu0 %v5634_v43 }
 0x549   : > { %v11478_v27 = vmul.f32 0.35355338, %v5466_v6  ;;  %v11480_v41 = vmul.f32 0.35355338, %v5513_v58  ;;  %v11490_v10 = vpop.permute.xlu1 %3618  ;;  %v11494_v58 = vpop.permute.xlu0 %3616 }
 0x54a   : > { %v8992_v17 = vpop.f32.mrf.mxu1  ;;  %v8998_v4 = vpop.f32.mrf.mxu0  ;;  %12343 = vst [vmem:[#allocation8_spill] sm:$0xff] %v11490_v10  ;;  %12344 = vst [vmem:[#allocation10_spill] sm:$0xff] %v11494_v58 }
 0x54b   : > { %v5637_v54 = vsel %vm5549_vm4, %v11478_v27, -inf  ;;  %v5643_v46 = vsel %vm5549_vm4, %v11480_v41, -inf }
 0x54c   : > { %5638 = vmax.xlane.f32.xlu1 %v5637_v54  ;;  %5641 = vmax.xlane.f32.xlu0 %v5640_v1 }
 0x54d   : > { %v11492_v43 = vpop.permute.xlu1 %3628  ;;  %v11498_v17 = vpop.permute.xlu0 %3640 }
 0x550   : > { %5644 = vmax.xlane.f32.xlu1 %v5643_v46 }
 0x551   : > { %v11496_v6 = vpop.permute.xlu1 %3630 }
 0x552   : > { %12345 = vst [vmem:[#allocation11_spill] sm:$0xff] %v11496_v6 }
 0x555   : > { %v11500_v4 = vpop.permute.xlu1 %3642 }
 0x556   : > { %12346 = vst [vmem:[#allocation12_spill] sm:$0xff] %v11500_v4 }
 0x562   : > { %3652 = vrot.lane.b32.xlu0 %v12339_v50, %s9498_s3 }
 0x57d   : > { %v5552_v54 = vpop.xlane.xlu0 %5551 }
 0x57e   : > { %v5646_v1 = vsub.f32 %v11360_v5, %v5552_v54 }
 0x580   : > { %v5678_v12 = vmul.f32 1.442695, %v5646_v1 }
 0x581   : > { %v5555_v46 = vpop.xlane.xlu1 %5554  ;;  %v5558_v63 = vpop.xlane.xlu0 %5557 }
 0x582   : > { %9310 = vpow2.f32 %v5678_v12  ;;  %v5647_v50 = vsub.f32 %v11366_v28, %v5555_v46  ;;  %v5648_v60 = vsub.f32 %v11362_v51, %v5558_v63 }
 0x584   : > { %v5680_v42 = vmul.f32 1.442695, %v5647_v50  ;;  %v5682_v10 = vmul.f32 1.442695, %v5648_v60 }
 0x585   : > { %v5561_v13 = vpop.xlane.xlu0 %5560 }
 0x586   : > { %9312 = vpow2.f32 %v5680_v42  ;;  %v5649_v6 = vsub.f32 %v11368_v7, %v5561_v13 }
 0x587   : > { %9314 = vpow2.f32 %v5682_v10 }
 0x588   : > { %v5684_v40 = vmul.f32 1.442695, %v5649_v6 }
 0x589   : > { %v5564_v4 = vpop.xlane.xlu0 %5563 }
 0x58a   : > { %9316 = vpow2.f32 %v5684_v40  ;;  %v5650_v5 = vsub.f32 %v11376_v26, %v5564_v4 }
 0x58c   : > { %v5686_v1 = vmul.f32 1.442695, %v5650_v5 }
 0x58d   : > { %v5567_v54 = vpop.xlane.xlu1 %5566  ;;  %v5570_v58 = vpop.xlane.xlu0 %5569 }
 0x58e   : > { %v5651_v12 = vsub.f32 %v11382_v52, %v5567_v54  ;;  %9318 = vpow2.f32 %v5686_v1  ;;  %v5652_v63 = vsub.f32 %v11378_v33, %v5570_v58 }
 0x58f   : > { %v11509_v51 = vpop.eup %9310 }
 0x590   : > { %v5688_v60 = vmul.f32 1.442695, %v5651_v12  ;;  %v5690_v28 = vmul.f32 1.442695, %v5652_v63  ;;  %v5742_v13 = vsel %vm5549_vm4, %v11509_v51, 0.0 }
 0x591   : > { %v5573_v42 = vpop.xlane.xlu1 %5572  ;;  %5743 = vadd.xlane.f32.xlu0 %v5742_v13 }
 0x592   : > { %9320 = vpow2.f32 %v5688_v60  ;;  %v5653_v40 = vsub.f32 %v11384_v20, %v5573_v42 }
 0x593   : > { %9322 = vpow2.f32 %v5690_v28  ;;  %v11514_v7 = vpop.eup %9312 }
 0x594   : > { %v5692_v26 = vmul.f32 1.442695, %v5653_v40  ;;  %v11516_v52 = vpop.eup %9314  ;;  %v5745_v33 = vsel %vm5549_vm4, %v11514_v7, 0.0 }
 0x595   : > { %5746 = vadd.xlane.f32.xlu1 %v5745_v33  ;;  %v5748_v10 = vsel %vm5549_vm4, %v11516_v52, 0.0 }
 0x596   : > { %9324 = vpow2.f32 %v5692_v26  ;;  %5749 = vadd.xlane.f32.xlu0 %v5748_v10 }
 0x597   : > { %v11522_v58 = vpop.eup %9316 }
 0x598   : > { %v5751_v20 = vsel %vm5549_vm4, %v11522_v58, 0.0 }
 0x599   : > { %5752 = vadd.xlane.f32.xlu1 %v5751_v20 }
 0x59b   : > { %v5576_v6 = vpop.xlane.xlu0 %5575  ;;  %v11527_v46 = vpop.eup %9318 }
 0x59c   : > { %v5654_v4 = vsub.f32 %v11392_v32, %v5576_v6  ;;  %v5754_v5 = vsel %vm5549_vm4, %v11527_v46, 0.0 }
 0x59d   : > { %5755 = vadd.xlane.f32.xlu0 %v5754_v5 }
 0x59e   : > { %v5694_v50 = vmul.f32 1.442695, %v5654_v4 }
 0x59f   : > { %v5579_v54 = vpop.xlane.xlu1 %5578  ;;  %v5582_v1 = vpop.xlane.xlu0 %5581 }
 0x5a0   : > { %v11531_v12 = vpop.eup %9320  ;;  %v5655_v63 = vsub.f32 %v11398_v31, %v5579_v54  ;;  %9326 = vpow2.f32 %v5694_v50  ;;  %v5656_v60 = vsub.f32 %v11394_v0, %v5582_v1 }
 0x5a1   : > { %v11535_v42 = vpop.eup %9322  ;;  %v5757_v32 = vsel %vm5549_vm4, %v11531_v12, 0.0 }
 0x5a2   : > { %v5696_v28 = vmul.f32 1.442695, %v5655_v63  ;;  %v5698_v13 = vmul.f32 1.442695, %v5656_v60  ;;  %5758 = vadd.xlane.f32.xlu1 %v5757_v32  ;;  %v5760_v40 = vsel %vm5549_vm4, %v11535_v42, 0.0 }
 0x5a3   : > { %v5585_v26 = vpop.xlane.xlu1 %5584  ;;  %v5588_v33 = vpop.xlane.xlu0 %5587  ;;  %5761 = vadd.xlane.f32.xlu0 %v5760_v40 }
 0x5a4   : > { %v11541_v10 = vpop.eup %9324  ;;  %9328 = vpow2.f32 %v5696_v28  ;;  %v5657_v31 = vsub.f32 %v11400_v34, %v5585_v26  ;;  %v5658_v0 = vsub.f32 %v11406_v45, %v5588_v33 }
 0x5a5   : > { %9330 = vpow2.f32 %v5698_v13  ;;  %v5763_v4 = vsel %vm5549_vm4, %v11541_v10, 0.0 }
 0x5a6   : > { %v5700_v20 = vmul.f32 1.442695, %v5657_v31  ;;  %v5702_v6 = vmul.f32 1.442695, %v5658_v0 }
 0x5a7   : > { %v5591_v50 = vpop.xlane.xlu1 %5590  ;;  %v5594_v5 = vpop.xlane.xlu0 %5593  ;;  %5764 = vadd.xlane.f32.xlu0 %v5763_v4 }
 0x5a8   : > { %9332 = vpow2.f32 %v5700_v20  ;;  %v5659_v54 = vsub.f32 %v11414_v16, %v5591_v50  ;;  %v5660_v1 = vsub.f32 %v11408_v23, %v5594_v5 }
 0x5a9   : > { %9334 = vpow2.f32 %v5702_v6 }
 0x5aa   : > { %v5704_v63 = vmul.f32 1.442695, %v5659_v54  ;;  %v5706_v60 = vmul.f32 1.442695, %v5660_v1 }
 0x5ab   : > { %v5597_v34 = vpop.xlane.xlu1 %5596 }
 0x5ac   : > { %9336 = vpow2.f32 %v5704_v63  ;;  %v5661_v45 = vsub.f32 %v11416_v61, %v5597_v34 }
 0x5ad   : > { %v11550_v32 = vpop.eup %9326  ;;  %9338 = vpow2.f32 %v5706_v60 }
 0x5ae   : > { %v5708_v28 = vmul.f32 1.442695, %v5661_v45  ;;  %v5766_v13 = vsel %vm5549_vm4, %v11550_v32, 0.0 }
 0x5af   : > { %5767 = vadd.xlane.f32.xlu0 %v5766_v13 }
 0x5b0   : > { %9340 = vpow2.f32 %v5708_v28 }
 0x5b1   : > { %v11554_v40 = vpop.eup %9328  ;;  %v5600_v16 = vpop.xlane.xlu0 %5599 }
 0x5b2   : > { %v11556_v23 = vpop.eup %9330  ;;  %v5662_v26 = vsub.f32 %v11424_v14, %v5600_v16  ;;  %v5769_v33 = vsel %vm5549_vm4, %v11554_v40, 0.0 }
 0x5b3   : > { %5770 = vadd.xlane.f32.xlu1 %v5769_v33  ;;  %v5772_v61 = vsel %vm5549_vm4, %v11556_v23, 0.0 }
 0x5b4   : > { %v5710_v31 = vmul.f32 1.442695, %v5662_v26  ;;  %5773 = vadd.xlane.f32.xlu0 %v5772_v61 }
 0x5b5   : > { %v11563_v0 = vpop.eup %9332  ;;  %v5603_v20 = vpop.xlane.xlu1 %5602 }
 0x5b6   : > { %v5606_v6 = vpop.xlane.xlu0 %5605  ;;  %v11565_v4 = vpop.eup %9334  ;;  %v5663_v50 = vsub.f32 %v11430_v2, %v5603_v20  ;;  %9342 = vpow2.f32 %v5710_v31  ;;  %v5775_v5 = vsel %vm5549_vm4, %v11563_v0, 0.0 }
 0x5b7   : > { %v5664_v14 = vsub.f32 %v11426_v19, %v5606_v6  ;;  %5776 = vadd.xlane.f32.xlu1 %v5775_v5  ;;  %v5778_v54 = vsel %vm5549_vm4, %v11565_v4, 0.0 }
 0x5b8   : > { %v5712_v1 = vmul.f32 1.442695, %v5663_v50  ;;  %5779 = vadd.xlane.f32.xlu0 %v5778_v54 }
 0x5b9   : > { %v5714_v63 = vmul.f32 1.442695, %v5664_v14  ;;  %v11573_v60 = vpop.eup %9336  ;;  %v5609_v34 = vpop.xlane.xlu1 %5608 }
 0x5ba   : > { %v11575_v45 = vpop.eup %9338  ;;  %9344 = vpow2.f32 %v5712_v1  ;;  %v5665_v2 = vsub.f32 %v11432_v47, %v5609_v34  ;;  %v5781_v19 = vsel %vm5549_vm4, %v11573_v60, 0.0 }
 0x5bb   : > { %9346 = vpow2.f32 %v5714_v63  ;;  %v5612_v28 = vpop.xlane.xlu0 %5611  ;;  %5782 = vadd.xlane.f32.xlu1 %v5781_v19  ;;  %v5784_v13 = vsel %vm5549_vm4, %v11575_v45, 0.0 }
 0x5bc   : > { %v5716_v16 = vmul.f32 1.442695, %v5665_v2  ;;  %v5666_v26 = vsub.f32 %v11438_v56, %v5612_v28  ;;  %5785 = vadd.xlane.f32.xlu0 %v5784_v13 }
 0x5bd   : > { %v11583_v33 = vpop.eup %9340 }
 0x5be   : > { %9348 = vpow2.f32 %v5716_v16  ;;  %v5718_v61 = vmul.f32 1.442695, %v5666_v26  ;;  %v5787_v47 = vsel %vm5549_vm4, %v11583_v33, 0.0 }
 0x5bf   : > { %v5615_v31 = vpop.xlane.xlu1 %5614  ;;  %v5618_v20 = vpop.xlane.xlu0 %5617 }
 0x5c0   : > { %v5667_v6 = vsub.f32 %v11446_v22, %v5615_v31  ;;  %9350 = vpow2.f32 %v5718_v61  ;;  %v5668_v50 = vsub.f32 %v11442_v48, %v5618_v20  ;;  %5788 = vadd.xlane.f32.xlu0 %v5787_v47 }
 0x5c2   : > { %v5720_v14 = vmul.f32 1.442695, %v5667_v6  ;;  %v5722_v5 = vmul.f32 1.442695, %v5668_v50 }
 0x5c3   : > { %v11589_v54 = vpop.eup %9342  ;;  %v5621_v56 = vpop.xlane.xlu1 %5620 }
 0x5c4   : > { %9352 = vpow2.f32 %v5720_v14  ;;  %v5669_v1 = vsub.f32 %v11448_v59, %v5621_v56  ;;  %v5790_v63 = vsel %vm5549_vm4, %v11589_v54, 0.0 }
 0x5c5   : > { %9354 = vpow2.f32 %v5722_v5  ;;  %5791 = vadd.xlane.f32.xlu0 %v5790_v63 }
 0x5c6   : > { %v5724_v34 = vmul.f32 1.442695, %v5669_v1 }
 0x5c7   : > { %v11594_v2 = vpop.eup %9344 }
 0x5c8   : > { %v11596_v22 = vpop.eup %9346  ;;  %9356 = vpow2.f32 %v5724_v34  ;;  %v5793_v48 = vsel %vm5549_vm4, %v11594_v2, 0.0 }
 0x5c9   : > { %v5624_v19 = vpop.xlane.xlu0 %5623  ;;  %5794 = vadd.xlane.f32.xlu1 %v5793_v48  ;;  %v5796_v28 = vsel %vm5549_vm4, %v11596_v22, 0.0 }
 0x5ca   : > { %v5670_v59 = vsub.f32 %v11456_v38, %v5624_v19  ;;  %5797 = vadd.xlane.f32.xlu0 %v5796_v28 }
 0x5cb   : > { %v11603_v13 = vpop.eup %9348 }
 0x5cc   : > { %v5726_v16 = vmul.f32 1.442695, %v5670_v59  ;;  %v5799_v26 = vsel %vm5549_vm4, %v11603_v13, 0.0 }
 0x5cd   : > { %v11607_v61 = vpop.eup %9350  ;;  %v5627_v31 = vpop.xlane.xlu1 %5626  ;;  %5800 = vadd.xlane.f32.xlu1 %v5799_v26 }
 0x5ce   : > { %v5630_v20 = vpop.xlane.xlu0 %5629  ;;  %v5671_v47 = vsub.f32 %v11462_v53, %v5627_v31  ;;  %9358 = vpow2.f32 %v5726_v16  ;;  %v5802_v38 = vsel %vm5549_vm4, %v11607_v61, 0.0 }
 0x5cf   : > { %v5672_v6 = vsub.f32 %v11458_v3, %v5630_v20  ;;  %5803 = vadd.xlane.f32.xlu0 %v5802_v38 }
 0x5d0   : > { %v5728_v50 = vmul.f32 1.442695, %v5671_v47 }
 0x5d1   : > { %v5730_v14 = vmul.f32 1.442695, %v5672_v6  ;;  %v11613_v5 = vpop.eup %9352  ;;  %v5633_v56 = vpop.xlane.xlu1 %5632 }
 0x5d2   : > { %v5636_v1 = vpop.xlane.xlu0 %5635  ;;  %v11615_v63 = vpop.eup %9354  ;;  %9360 = vpow2.f32 %v5728_v50  ;;  %v5673_v34 = vsub.f32 %v11464_v39, %v5633_v56  ;;  %v5805_v3 = vsel %vm5549_vm4, %v11613_v5, 0.0 }
 0x5d3   : > { %v5674_v53 = vsub.f32 %v11470_v36, %v5636_v1  ;;  %9362 = vpow2.f32 %v5730_v14  ;;  %5806 = vadd.xlane.f32.xlu1 %v5805_v3  ;;  %v5808_v48 = vsel %vm5549_vm4, %v11615_v63, 0.0 }
 0x5d4   : > { %v5732_v19 = vmul.f32 1.442695, %v5673_v34  ;;  %5809 = vadd.xlane.f32.xlu0 %v5808_v48 }
 0x5d5   : > { %v5734_v28 = vmul.f32 1.442695, %v5674_v53  ;;  %v11623_v59 = vpop.eup %9356  ;;  %v5639_v16 = vpop.xlane.xlu1 %5638 }
 0x5d6   : > { %v5642_v26 = vpop.xlane.xlu0 %5641  ;;  %9364 = vpow2.f32 %v5732_v19  ;;  %v5811_v36 = vsel %vm5549_vm4, %v11623_v59, 0.0 }
 0x5d7   : > { %v5676_v39 = vsub.f32 %v11472_v11, %v5642_v26  ;;  %9366 = vpow2.f32 %v5734_v28 }
 0x5d8   : > { %5812 = vadd.xlane.f32.xlu0 %v5811_v36 }
 0x5d9   : > { %v5738_v31 = vmul.f32 1.442695, %v5676_v39  ;;  %v5645_v20 = vpop.xlane.xlu1 %5644  ;;  %v5675_v39 = vsub.f32 %v11478_v27, %v5639_v16  ;;  %v3693_v27 = vcombine.high %v11036_v29, %v11070_v18 }
 0x5da   : > { %v5677_v47 = vsub.f32 %v11480_v41, %v5645_v20  ;;  %v11662_v20 = vpop.permute.xlu0 %3652 }
 0x5db   : > { %v11629_v6 = vpop.eup %9358  ;;  %9368 = vpow2.f32 %v5738_v31  ;;  %v5736_v36 = vmul.f32 1.442695, %v5675_v39 }
 0x5dc   : > { %v5740_v38 = vmul.f32 1.442695, %v5677_v47  ;;  %v5814_v50 = vsel %vm5549_vm4, %v11629_v6, 0.0 }
 0x5dd   : > { %5815 = vadd.xlane.f32.xlu0 %v5814_v50  ;;  %v3709_v50 = vcombine.high %v11017_v24, %v11111_v57 }
 0x5de   : > { %9370 = vpow2.f32 %v5740_v38  ;;  %v3708_v38 = vcombine.low %v11017_v24, %v11111_v57 }
 0x5df   : > { %v11633_v14 = vpop.eup %9360  ;;  %9372 = vpow2.f32 %v5736_v36 }
 0x5e0   : > { %v11635_v11 = vpop.eup %9362  ;;  %v5817_v56 = vsel %vm5549_vm4, %v11633_v14, 0.0 }
 0x5e1   : > { %5818 = vadd.xlane.f32.xlu1 %v5817_v56  ;;  %v5820_v41 = vsel %vm5549_vm4, %v11635_v11, 0.0  ;;  %v3716_v56 = vrot.slane %v3708_v38, %v10024_v35 }
 0x5e2   : > { %5821 = vadd.xlane.f32.xlu0 %v5820_v41  ;;  %v3723_v41 = vrot.slane %v3709_v50, %v10024_v35 }
 0x5e3   : > { %v11641_v1 = vpop.eup %9364 }
 0x5e4   : > { %v11643_v34 = vpop.eup %9366  ;;  %v5823_v53 = vsel %vm5549_vm4, %v11641_v1, 0.0 }
 0x5e5   : > { %5824 = vadd.xlane.f32.xlu1 %v5823_v53  ;;  %v5826_v3 = vsel %vm5549_vm4, %v11643_v34, 0.0 }
 0x5e6   : > { %5827 = vadd.xlane.f32.xlu0 %v5826_v3  ;;  %v3707_v3 = vrot.slane %v3693_v27, %v10024_v35 }
 0x5e8   : > { %v11649_v48 = vpop.eup %9368  ;;  %v3772_v39 = vcombine.low %v3707_v3, %v3723_v41  ;;  %v3773_v36 = vcombine.high %v3707_v3, %v3723_v41 }
 0x5e9   : > { %v5832_v19 = vsel %vm5549_vm4, %v11649_v48, 0.0 }
 0x5ea   : > { %5833 = vadd.xlane.f32.xlu0 %v5832_v19  ;;  %v3780_v38 = vrot.slane %v3772_v39, %v10055_v49  ;;  %v3787_v50 = vrot.slane %v3773_v36, %v10055_v49 }
 0x5eb   : > { %v11653_v28 = vpop.eup %9370 }
 0x5ec   : > { %v5835_v26 = vsel %vm5549_vm4, %v11653_v28, 0.0  ;;  %v11660_v31 = vpop.eup %9372 }
 0x5ed   : > { %12347 = vst [vmem:[#allocation13_spill] sm:$0xff] %v11660_v31  ;;  %v5829_v47 = vsel %vm5549_vm4, %v11660_v31, 0.0  ;;  %v8672_v31 = vcombine.high %v3780_v38, %v3787_v50 }
 0x5ee   : > { %5836 = vadd.xlane.f32.xlu0 %v5835_v26 }
 0x5ef   : > { %v11692_v39 = vrot.slane %v8672_v31, %v10024_v35 }
 0x5f6   : > { %3654 = vrot.lane.b32.xlu1 %v12340_v55, %s9498_s3  ;;  %v3692_v55 = vcombine.low %v11036_v29, %v11070_v18 }
 0x5f8   : > { %v3700_v53 = vrot.slane %v3692_v55, %v10024_v35 }
 0x5fa   : > { %v3756_v57 = vcombine.low %v3700_v53, %v3716_v56  ;;  %v3757_v26 = vcombine.high %v3700_v53, %v3716_v56 }
 0x5fc   : > { %v3764_v29 = vrot.slane %v3756_v57, %v10055_v49  ;;  %v3771_v18 = vrot.slane %v3757_v26, %v10055_v49 }
 0x5fe   : > { %v8666_v27 = vcombine.low %v3764_v29, %v3771_v18 }
 0x61a   : > { %5830 = vadd.xlane.f32.xlu1 %v5829_v47  ;;  %v5744_v16 = vpop.xlane.xlu0 %5743 }
 0x61b   : > { %9374 = vrcp.f32 %v5744_v16  ;;  %v8668_v16 = vcombine.high %v3764_v29, %v3771_v18 }
 0x61d   : > { %v11686_v57 = vrot.slane %v8668_v16, %v10024_v35 }
 0x61e   : > { %v5747_v19 = vpop.xlane.xlu1 %5746 }
 0x61f   : > { %9376 = vrcp.f32 %v5747_v19  ;;  %v5750_v24 = vpop.xlane.xlu0 %5749  ;;  %v8670_v19 = vcombine.low %v3780_v38, %v3787_v50 }
 0x620   : > { %9378 = vrcp.f32 %v5750_v24  ;;  %v11683_v24 = vrot.slane %v8666_v27, %v10024_v35 }
 0x621   : > { %v11689_v26 = vrot.slane %v8670_v19, %v10024_v35 }
 0x622   : > { %v5753_v47 = vpop.xlane.xlu1 %5752  ;;  %v4284_v31 = vcombine.low %v11683_v24, %v11686_v57 }
 0x623   : > { %9380 = vrcp.f32 %v5753_v47  ;;  %v4316_v16 = vcombine.low %v11689_v26, %v11692_v39 }
 0x626   : > { %v5756_v55 = vpop.xlane.xlu0 %5755 }
 0x627   : > { %9382 = vrcp.f32 %v5756_v55 }
 0x628   : > { %v9375_v53 = vpop.eup %9374 }
 0x629   : > { %v5870_v36 = vmul.f32 %v9375_v53, %v11509_v51 }
 0x62b   : > { %v5759_v56 = vpop.xlane.xlu1 %5758 }
 0x62c   : > { %9384 = vrcp.f32 %v5759_v56  ;;  %v5762_v41 = vpop.xlane.xlu0 %5761  ;;  %v9377_v3 = vpop.eup %9376 }
 0x62d   : > { %9386 = vrcp.f32 %v5762_v41  ;;  %v5871_v47 = vmul.f32 %v9377_v3, %v11514_v7  ;;  %v9379_v29 = vpop.eup %9378 }
 0x62e   : > { %v5872_v55 = vmul.f32 %v9379_v29, %v11516_v52  ;;  %v4292_v52 = vrot.slane %v4284_v31, %v10055_v49 }
 0x62f   : > { %v5902_v38 = vpack.c.bf16 %v5871_v47, %v5870_v36 }
 0x630   : > { %v5765_v18 = vpop.xlane.xlu0 %5764  ;;  %v9381_v50 = vpop.eup %9380 }
 0x631   : > { %9388 = vrcp.f32 %v5765_v18  ;;  %9002 = vmatmul.mubr.msk.bf16.vlgmr.msra.gmra.mxu1 %vm5549_vm4, %v5902_v38  ;;  %v5873_v27 = vmul.f32 %v9381_v50, %v11522_v58  ;;  %v4324_v58 = vrot.slane %v4316_v16, %v10055_v49  ;;  %v12349_v16 = vcombine.high %v11319_v37, %v11327_v62 }
 0x632   : > { %9012 = vmatpush3.bf16.msra.mxu1 %v11321_v21  ;;  %9013 = vmatprep.mubr.msk.bf16.mxu1 %vm9501_vm2, %v12332_v8 }
 0x633   : > { %v5903_v51 = vpack.c.bf16 %v5873_v27, %v5872_v55  ;;  %9023 = vmatprep.subr.bf16.mxu1 %v12332_v8  ;;  %v4336_v41 = vcombine.low %v4292_v52, %v4324_v58  ;;  %v4337_v55 = vcombine.high %v4292_v52, %v4324_v58 }
 0x634   : > { %v9383_v7 = vpop.eup %9382 }
 0x635   : > { %9008 = vmatmul.mubr.msk.bf16.vlgmr.msra.gmra.mxu0 %vm5549_vm4, %v5903_v51  ;;  %v5874_v56 = vmul.f32 %v9383_v7, %v11527_v46  ;;  %v4753_v51 = vpack.c.bf16 %v12349_v16, %v4337_v55  ;;  %v4317_v7 = vcombine.high %v11689_v26, %v11692_v39 }
 0x636   : > { %9018 = vmatpush3.bf16.msra.mxu0 %v11323_v30  ;;  %9019 = vmatprep.mubr.msk.bf16.mxu0 %vm9501_vm2, %v12332_v8  ;;  %v12348_v30 = vcombine.low %v11319_v37, %v11327_v62 }
 0x637   : > { %9029 = vmatprep.subr.bf16.mxu0 %v12332_v8  ;;  %v4331_v62 = vrot.slane %v4317_v7, %v10055_v49  ;;  %v3980_v7 = vcombine.low %v11492_v43, %v11662_v20 }
 0x638   : > { %v5768_v19 = vpop.xlane.xlu0 %5767  ;;  %v4752_v18 = vpack.c.bf16 %v12348_v30, %v4336_v41 }
 0x639   : > { %v9385_v21 = vpop.eup %9384  ;;  %9390 = vrcp.f32 %v5768_v19 }
 0x63a   : > { %v5875_v53 = vmul.f32 %v9385_v21, %v11531_v12  ;;  %v9387_v3 = vpop.eup %9386 }
 0x63b   : > { %v5876_v38 = vmul.f32 %v9387_v3, %v11535_v42  ;;  %v12350_v3 = vcombine.low %v11331_v25, %v11338_v9 }
 0x63c   : > { %v5771_v36 = vpop.xlane.xlu1 %5770  ;;  %v5904_v47 = vpack.c.bf16 %v5875_v53, %v5874_v56 }
 0x63d   : > { %9392 = vrcp.f32 %v5771_v36  ;;  %v5774_v29 = vpop.xlane.xlu0 %5773 }
 0x63e   : > { %v9389_v46 = vpop.eup %9388  ;;  %9394 = vrcp.f32 %v5774_v29  ;;  %9014 = vmatmul.mubr.msk.bf16.vlgmr.msra.gmra.mxu1 %vm5549_vm4, %v5904_v47 }
 0x63f   : > { %9024 = vmatpush3.bf16.msra.mxu1 %v4752_v18  ;;  %v5877_v50 = vmul.f32 %v9389_v46, %v11541_v10  ;;  %9025 = vmatprep.mubr.msk.bf16.mxu1 %vm9501_vm2, %v12332_v8  ;;  %v4285_v10 = vcombine.high %v11683_v24, %v11686_v57 }
 0x640   : > { %v5777_v12 = vpop.xlane.xlu1 %5776  ;;  %9035 = vmatprep.subr.bf16.mxu1 %v12332_v8 }
 0x641   : > { %9396 = vrcp.f32 %v5777_v12  ;;  %v5780_v27 = vpop.xlane.xlu0 %5779  ;;  %v5905_v31 = vpack.c.bf16 %v5877_v50, %v5876_v38  ;;  %v4299_v37 = vrot.slane %v4285_v10, %v10055_v49  ;;  %v12351_v38 = vcombine.high %v11331_v25, %v11338_v9 }
 0x642   : > { %9398 = vrcp.f32 %v5780_v27 }
 0x643   : > { %9020 = vmatmul.mubr.msk.bf16.vlgmr.msra.gmra.mxu0 %vm5549_vm4, %v5905_v31  ;;  %v4338_v39 = vcombine.low %v4299_v37, %v4331_v62  ;;  %v4339_v30 = vcombine.high %v4299_v37, %v4331_v62  ;;  %v3981_v37 = vcombine.high %v11492_v43, %v11662_v20  ;;  %v12353_v20 = vld [vmem:[#allocation9_spill] sm:$0xff] }
 0x644   : > { %v5783_v42 = vpop.xlane.xlu1 %5782  ;;  %9030 = vmatpush3.bf16.msra.mxu0 %v4753_v51  ;;  %9031 = vmatprep.mubr.msk.bf16.mxu0 %vm9501_vm2, %v12332_v8 }
 0x645   : > { %9400 = vrcp.f32 %v5783_v42  ;;  %v5786_v52 = vpop.xlane.xlu0 %5785  ;;  %9041 = vmatprep.subr.bf16.mxu0 %v12332_v8  ;;  %v4754_v36 = vpack.c.bf16 %v12350_v3, %v4338_v39  ;;  %v4755_v50 = vpack.c.bf16 %v12351_v38, %v4339_v30  ;;  %v3995_v43 = vrot.slane %v3981_v37, %v10024_v35 }
 0x646   : > { %v9391_v58 = vpop.eup %9390  ;;  %9402 = vrcp.f32 %v5786_v52 }
 0x647   : > { %v5878_v56 = vmul.f32 %v9391_v58, %v11550_v32 }
 0x649   : > { %v5789_v19 = vpop.xlane.xlu0 %5788 }
 0x64a   : > { %v9393_v24 = vpop.eup %9392  ;;  %9404 = vrcp.f32 %v5789_v19 }
 0x64b   : > { %v9395_v57 = vpop.eup %9394  ;;  %v5879_v26 = vmul.f32 %v9393_v24, %v11554_v40 }
 0x64c   : > { %v5880_v53 = vmul.f32 %v9395_v57, %v11556_v23  ;;  %v3988_v57 = vrot.slane %v3980_v7, %v10024_v35 }
 0x64d   : > { %v5906_v21 = vpack.c.bf16 %v5879_v26, %v5878_v56 }
 0x64e   : > { %v9397_v41 = vpop.eup %9396  ;;  %v5792_v47 = vpop.xlane.xlu0 %5791 }
 0x64f   : > { %v9399_v29 = vpop.eup %9398  ;;  %9026 = vmatmul.mubr.msk.bf16.vlgmr.msra.gmra.mxu1 %vm5549_vm4, %v5906_v21  ;;  %9406 = vrcp.f32 %v5792_v47  ;;  %v5881_v32 = vmul.f32 %v9397_v41, %v11563_v0 }
 0x650   : > { %9036 = vmatpush3.bf16.msra.mxu1 %v4754_v36  ;;  %9037 = vmatprep.mubr.msk.bf16.mxu1 %vm9501_vm2, %v12332_v8  ;;  %v5882_v23 = vmul.f32 %v9399_v29, %v11565_v4 }
 0x651   : > { %v5907_v40 = vpack.c.bf16 %v5881_v32, %v5880_v53  ;;  %9047 = vmatprep.subr.bf16.mxu1 %v12332_v8  ;;  %v12354_v32 = vld [vmem:[#allocation7_spill] sm:$0xff] }
 0x652   : > { %v9401_v18 = vpop.eup %9400  ;;  %v5795_v46 = vpop.xlane.xlu1 %5794 }
 0x653   : > { %9408 = vrcp.f32 %v5795_v46  ;;  %9032 = vmatmul.mubr.msk.bf16.vlgmr.msra.gmra.mxu0 %vm5549_vm4, %v5907_v40  ;;  %v5798_v0 = vpop.xlane.xlu0 %5797  ;;  %v5883_v12 = vmul.f32 %v9401_v18, %v11573_v60  ;;  %v9403_v55 = vpop.eup %9402 }
 0x654   : > { %9042 = vmatpush3.bf16.msra.mxu0 %v4755_v50  ;;  %9410 = vrcp.f32 %v5798_v0  ;;  %9043 = vmatprep.mubr.msk.bf16.mxu0 %vm9501_vm2, %v12332_v8  ;;  %v5884_v9 = vmul.f32 %v9403_v55, %v11575_v45 }
 0x655   : > { %v5908_v27 = vpack.c.bf16 %v5883_v12, %v5882_v23  ;;  %9053 = vmatprep.subr.bf16.mxu0 %v12332_v8 }
 0x656   : > { %v5801_v4 = vpop.xlane.xlu1 %5800 }
 0x657   : > { %v9405_v31 = vpop.eup %9404  ;;  %9412 = vrcp.f32 %v5801_v4  ;;  %9038 = vmatmul.mubr.msk.bf16.vlgmr.msra.gmra.mxu1 %vm5549_vm4, %v5908_v27  ;;  %v12355_v27 = vld [vmem:[#allocation12_spill] sm:$0xff] }
 0x658   : > { %9048 = vmatpush3.bf16.msra.mxu1 %v11352_v15  ;;  %v5804_v25 = vpop.xlane.xlu0 %5803  ;;  %v5885_v60 = vmul.f32 %v9405_v31, %v11583_v33  ;;  %9049 = vmatprep.mubr.msk.bf16.mxu1 %vm9501_vm2, %v12332_v8 }
 0x659   : > { %9414 = vrcp.f32 %v5804_v25  ;;  %9059 = vmatprep.subr.bf16.mxu1 %v12332_v8 }
 0x65a   : > { %v5909_v16 = vpack.c.bf16 %v5885_v60, %v5884_v9 }
 0x65c   : > { %v9407_v51 = vpop.eup %9406  ;;  %v5807_v42 = vpop.xlane.xlu1 %5806  ;;  %9044 = vmatmul.mubr.msk.bf16.vlgmr.msra.gmra.mxu0 %vm5549_vm4, %v5909_v16 }
 0x65d   : > { %9416 = vrcp.f32 %v5807_v42  ;;  %v5810_v10 = vpop.xlane.xlu0 %5809  ;;  %9054 = vmatpush3.bf16.msra.mxu0 %v11354_v44  ;;  %9055 = vmatprep.mubr.msk.bf16.mxu0 %vm9501_vm2, %v12332_v8  ;;  %v5886_v15 = vmul.f32 %v9407_v51, %v11589_v54  ;;  %v12352_v44 = vld [vmem:[#allocation10_spill] sm:$0xff] }
 0x65e   : > { %9065 = vmatprep.subr.bf16.mxu0 %v12332_v8  ;;  %9418 = vrcp.f32 %v5810_v10  ;;  %v3964_v62 = vcombine.low %v12352_v44, %v11498_v17  ;;  %v3965_v24 = vcombine.high %v12352_v44, %v11498_v17 }
 0x660   : > { %v9409_v45 = vpop.eup %9408  ;;  %v3979_v17 = vrot.slane %v3965_v24, %v10024_v35 }
 0x661   : > { %v9411_v33 = vpop.eup %9410  ;;  %v5813_v52 = vpop.xlane.xlu0 %5812  ;;  %v5887_v58 = vmul.f32 %v9409_v45, %v11594_v2  ;;  %v12357_v45 = vld [vmem:[#allocation11_spill] sm:$0xff] }
 0x662   : > { %9420 = vrcp.f32 %v5813_v52  ;;  %v5888_v56 = vmul.f32 %v9411_v33, %v11596_v22  ;;  %v3972_v22 = vrot.slane %v3964_v62, %v10024_v35  ;;  %v4044_v36 = vcombine.low %v3979_v17, %v3995_v43 }
 0x663   : > { %v5910_v19 = vpack.c.bf16 %v5887_v58, %v5886_v15  ;;  %v4045_v47 = vcombine.high %v3979_v17, %v3995_v43 }
 0x664   : > { %v9413_v54 = vpop.eup %9412  ;;  %v4028_v53 = vcombine.low %v3972_v22, %v3988_v57  ;;  %v4029_v41 = vcombine.high %v3972_v22, %v3988_v57  ;;  %v4052_v38 = vrot.slane %v4044_v36, %v10055_v49 }
 0x665   : > { %9050 = vmatmul.mubr.msk.bf16.vlgmr.msra.gmra.mxu1 %vm5549_vm4, %v5910_v19  ;;  %v5889_v2 = vmul.f32 %v9413_v54, %v11603_v13  ;;  %v4059_v50 = vrot.slane %v4045_v47, %v10055_v49 }
 0x666   : > { %v9415_v26 = vpop.eup %9414  ;;  %9060 = vmatpush3.bf16.msra.mxu1 %v12353_v20  ;;  %v5816_v39 = vpop.xlane.xlu0 %5815  ;;  %9061 = vmatprep.mubr.msk.bf16.mxu1 %vm9501_vm2, %v12332_v8  ;;  %v4036_v18 = vrot.slane %v4028_v53, %v10055_v49  ;;  %v4043_v46 = vrot.slane %v4029_v41, %v10055_v49 }
 0x667   : > { %v5911_v21 = vpack.c.bf16 %v5889_v2, %v5888_v56  ;;  %9071 = vmatprep.subr.bf16.mxu1 %v12332_v8  ;;  %v5890_v13 = vmul.f32 %v9415_v26, %v11607_v61  ;;  %9422 = vrcp.f32 %v5816_v39  ;;  %v8686_v51 = vcombine.low %v4052_v38, %v4059_v50 }
 0x668   : > { %v8682_v60 = vcombine.low %v4036_v18, %v4043_v46  ;;  %v8684_v16 = vcombine.high %v4036_v18, %v4043_v46  ;;  %v8688_v42 = vcombine.high %v4052_v38, %v4059_v50 }
 0x669   : > { %9056 = vmatmul.mubr.msk.bf16.vlgmr.msra.gmra.mxu0 %vm5549_vm4, %v5911_v21  ;;  %v4523_v19 = vrot.slane %v8686_v51, %v10024_v35 }
 0x66a   : > { %v9417_v3 = vpop.eup %9416  ;;  %v5819_v29 = vpop.xlane.xlu1 %5818  ;;  %9066 = vmatpush3.bf16.msra.mxu0 %v12354_v32  ;;  %9067 = vmatprep.mubr.msk.bf16.mxu0 %vm9501_vm2, %v12332_v8  ;;  %v4491_v44 = vrot.slane %v8682_v60, %v10024_v35  ;;  %v4507_v62 = vrot.slane %v8684_v16, %v10024_v35  ;;  %v4539_v56 = vrot.slane %v8688_v42, %v10024_v35 }
 0x66b   : > { %v5822_v30 = vpop.xlane.xlu0 %5821  ;;  %v5891_v40 = vmul.f32 %v9417_v3, %v11613_v5  ;;  %9077 = vmatprep.subr.bf16.mxu0 %v12332_v8  ;;  %v9419_v23 = vpop.eup %9418  ;;  %v12356_v5 = vld [vmem:[#allocation8_spill] sm:$0xff] }
 0x66c   : > { %v4100_v4 = vcombine.low %v12356_v5, %v12355_v27  ;;  %v5892_v31 = vmul.f32 %v9419_v23, %v11615_v63  ;;  %v4101_v9 = vcombine.high %v12356_v5, %v12355_v27  ;;  %9424 = vrcp.f32 %v5822_v30 }
 0x66d   : > { %v5912_v61 = vpack.c.bf16 %v5891_v40, %v5890_v13  ;;  %9426 = vrcp.f32 %v5819_v29  ;;  %v4556_v21 = vcombine.low %v4491_v44, %v4507_v62  ;;  %v4588_v17 = vcombine.low %v4523_v19, %v4539_v56 }
 0x66e   : > { %v5825_v0 = vpop.xlane.xlu1 %5824  ;;  %v4108_v7 = vrot.slane %v4100_v4, %v10024_v35  ;;  %v4115_v52 = vrot.slane %v4101_v9, %v10024_v35  ;;  %v4557_v18 = vcombine.high %v4491_v44, %v4507_v62  ;;  %v4589_v46 = vcombine.high %v4523_v19, %v4539_v56 }
 0x66f   : > { %v9421_v12 = vpop.eup %9420  ;;  %9062 = vmatmul.mubr.msk.bf16.vlgmr.msra.gmra.mxu1 %vm5549_vm4, %v5912_v61  ;;  %v11803_v55 = vpop.xlane.xlu0 %5827  ;;  %9428 = vrcp.f32 %v5825_v0  ;;  %v4564_v40 = vrot.slane %v4556_v21, %v10055_v49  ;;  %v4596_v23 = vrot.slane %v4588_v17, %v10055_v49 }
 0x670   : > { %v5893_v25 = vmul.f32 %v9421_v12, %v11623_v59  ;;  %9073 = vmatprep.mubr.msk.bf16.mxu1 %vm9501_vm2, %v12332_v8  ;;  %v4571_v16 = vrot.slane %v4557_v18, %v10055_v49  ;;  %v4603_v51 = vrot.slane %v4589_v46, %v10055_v49 }
 0x672   : > { %v3655_v10 = vpop.permute.xlu1 %3654  ;;  %v5913_v15 = vpack.c.bf16 %v5893_v25, %v5892_v31  ;;  %v4610_v19 = vcombine.low %v4571_v16, %v4603_v51  ;;  %v4611_v56 = vcombine.high %v4571_v16, %v4603_v51 }
 0x673   : > { %v4116_v33 = vcombine.low %v12357_v45, %v3655_v10  ;;  %v4117_v63 = vcombine.high %v12357_v45, %v3655_v10  ;;  %v5834_v59 = vpop.xlane.xlu0 %5833  ;;  %v4608_v10 = vcombine.low %v4564_v40, %v4596_v23  ;;  %v4609_v45 = vcombine.high %v4564_v40, %v4596_v23 }
 0x674   : > { %9068 = vmatmul.mubr.msk.bf16.vlgmr.msra.gmra.mxu0 %vm5549_vm4, %v5913_v15  ;;  %v9423_v30 = vpop.eup %9422 }
 0x675   : > { %v4124_v58 = vrot.slane %v4116_v33, %v10024_v35  ;;  %v4131_v37 = vrot.slane %v4117_v63, %v10024_v35  ;;  %9079 = vmatprep.mubr.msk.bf16.mxu0 %vm9501_vm2, %v12332_v8  ;;  %v5894_v60 = vmul.f32 %v9423_v30, %v11629_v6 }
 0x677   : > { %v4164_v54 = vcombine.low %v4108_v7, %v4124_v58  ;;  %v4165_v24 = vcombine.high %v4108_v7, %v4124_v58  ;;  %v4180_v57 = vcombine.low %v4115_v52, %v4131_v37  ;;  %v4181_v2 = vcombine.high %v4115_v52, %v4131_v37  ;;  %v5837_v26 = vpop.xlane.xlu0 %5836 }
 0x678   : > { %9430 = vrcp.f32 %v5837_v26 }
 0x679   : > { %v4172_v43 = vrot.slane %v4164_v54, %v10055_v49  ;;  %v4179_v20 = vrot.slane %v4165_v24, %v10055_v49  ;;  %v4188_v39 = vrot.slane %v4180_v57, %v10055_v49  ;;  %v4195_v22 = vrot.slane %v4181_v2, %v10055_v49  ;;  %v9425_v61 = vpop.eup %9424 }
 0x67a   : > { %9432 = vrcp.f32 %v5834_v59  ;;  %v9427_v27 = vpop.eup %9426  ;;  %v5896_v42 = vmul.f32 %v9425_v61, %v11635_v11  ;;  %v12358_v2 = vmov 0  }
 0x67b   : > { %v8690_v53 = vcombine.low %v4172_v43, %v4179_v20  ;;  %v8692_v41 = vcombine.high %v4172_v43, %v4179_v20  ;;  %v8694_v13 = vcombine.low %v4188_v39, %v4195_v22  ;;  %v8696_v3 = vcombine.high %v4188_v39, %v4195_v22  ;;  %v12359_v39 = vld [vmem:[#allocation13_spill] sm:$0xff] }
 0x67c   : > { %v9429_v5 = vpop.eup %9428  ;;  %v5895_v63 = vmul.f32 %v9427_v27, %v11633_v14  ;;  %9434 = vrcp.f32 %v11803_v55 }
 0x67d   : > { %v4627_v36 = vrot.slane %v8690_v53, %v10024_v35  ;;  %v4643_v47 = vrot.slane %v8692_v41, %v10024_v35  ;;  %v4659_v29 = vrot.slane %v8694_v13, %v10024_v35  ;;  %v4675_v32 = vrot.slane %v8696_v3, %v10024_v35 }
 0x67e   : > { %v5897_v59 = vmul.f32 %v9429_v5, %v11641_v1  ;;  %v5914_v44 = vpack.c.bf16 %v5895_v63, %v5894_v60 }
 0x67f   : > { %v4692_v38 = vcombine.low %v4627_v36, %v4643_v47  ;;  %v4724_v50 = vcombine.low %v4659_v29, %v4675_v32  ;;  %v4693_v0 = vcombine.high %v4627_v36, %v4643_v47  ;;  %v4725_v12 = vcombine.high %v4659_v29, %v4675_v32 }
 0x680   : > { %v5915_v6 = vpack.c.bf16 %v5897_v59, %v5896_v42 }
 0x681   : > { %v4700_v4 = vrot.slane %v4692_v38, %v10055_v49  ;;  %v4732_v31 = vrot.slane %v4724_v50, %v10055_v49  ;;  %v4707_v25 = vrot.slane %v4693_v0, %v10055_v49  ;;  %v4739_v9 = vrot.slane %v4725_v12, %v10055_v49 }
 0x683   : > { %v4744_v15 = vcombine.low %v4700_v4, %v4732_v31  ;;  %v4745_v33 = vcombine.high %v4700_v4, %v4732_v31  ;;  %v4746_v58 = vcombine.low %v4707_v25, %v4739_v9  ;;  %v4747_v37 = vcombine.high %v4707_v25, %v4739_v9 }
 0x685   : > { %v4760_v7 = vpack.c.bf16 %v4744_v15, %v4608_v10  ;;  %v4761_v52 = vpack.c.bf16 %v4745_v33, %v4609_v45  ;;  %v9431_v62 = vpop.eup %9430  ;;  %v4762_v54 = vpack.c.bf16 %v4746_v58, %v4610_v19  ;;  %v4763_v14 = vpack.c.bf16 %v4747_v37, %v4611_v56 }
 0x686   : > { %v5901_v1 = vmul.f32 %v9431_v62, %v11653_v28 }
 0x687   : > { %9072 = vmatpush3.bf16.msra.mxu1 %v4760_v7  ;;  %9078 = vmatpush3.bf16.msra.mxu0 %v4761_v52  ;;  %v9433_v11 = vpop.eup %9432 }
 0x688   : > { %9083 = vmatprep.subr.bf16.mxu1 %v12332_v8  ;;  %9089 = vmatprep.subr.bf16.mxu0 %v12332_v8  ;;  %v5900_v24 = vmul.f32 %v9433_v11, %v11649_v48 }
 0x689   : > { %v9435_v28 = vpop.eup %9434 }
 0x68a   : > { %9074 = vmatmul.mubr.msk.bf16.vlgmr.msra.gmra.mxu1 %vm5549_vm4, %v5914_v44  ;;  %9080 = vmatmul.mubr.msk.bf16.vlgmr.msra.gmra.mxu0 %vm5549_vm4, %v5915_v6  ;;  %v5917_v57 = vpack.c.bf16 %v5901_v1, %v5900_v24  ;;  %v5898_v20 = vmul.f32 %v9435_v28, %v11643_v34 }
 0x68b   : > { %9084 = vmatpush3.bf16.msra.mxu1 %v4762_v54  ;;  %9090 = vmatpush3.bf16.msra.mxu0 %v4763_v14 }
 0x68c   : > { %9091 = vmatprep.mubr.msk.bf16.mxu0 %vm9501_vm2, %v12332_v8  ;;  %9085 = vmatprep.mubr.msk.bf16.mxu1 %vm9501_vm2, %v12332_v8 }
 0x692   : > { %9092 = vmatmul.mubr.msk.bf16.vlgmr.msra.gmra.mxu0 %vm5549_vm4, %v5917_v57 }
 0x693   : > { %8109 = vmatprep.mubr.bf16.mxu0 %v12358_v2 }
 0x6a3   : > { %v5831_v26 = vpop.xlane.xlu1 %5830 }
 0x6a4   : > { %9436 = vrcp.f32 %v5831_v26 }
 0x6b1   : > { %v9437_v43 = vpop.eup %9436 }
 0x6b2   : > { %v5899_v22 = vmul.f32 %v9437_v43, %v12359_v39 }
 0x6b4   : > { %v5916_v21 = vpack.c.bf16 %v5899_v22, %v5898_v20 }
 0x6b6   : > { %9086 = vmatmul.mubr.msk.bf16.vlgmr.msra.gmra.mxu1 %vm5549_vm4, %v5916_v21 }
 0x6f1   : > { %v5955_v48 = vpop.f32.mrf.mxu1 }
 0x6f3   : > { %v9003_v8 = vpop.f32.mrf.mxu1 }
 0x6f5   : > { %v5958_v17 = vpop.f32.mrf.mxu1  ;;  %v5999_v53 = vpop.f32.mrf.mxu0 }
 0x6f7   : > { %v9004_v41 = vpop.f32.mrf.mxu1  ;;  %v9009_v13 = vpop.f32.mrf.mxu0 }
 0x6f9   : > { %v6002_v3 = vpop.f32.mrf.mxu0 }
 0x6fb   : > { %v9010_v36 = vpop.f32.mrf.mxu0 }
 0x6fe   : > { %v6043_v55 = vpop.f32.mrf.mxu1 }
 0x6ff   : > { %v6622_v29 = vcombine.low %v5955_v48, %v6043_v55  ;;  %v6623_v32 = vcombine.high %v5955_v48, %v6043_v55 }
 0x700   : > { %v9015_v47 = vpop.f32.mrf.mxu1 }
 0x701   : > { %v6630_v61 = vrot.slane %v6622_v29, %v10024_v35  ;;  %v6637_v38 = vrot.slane %v6623_v32, %v10024_v35 }
 0x702   : > { %v6046_v30 = vpop.f32.mrf.mxu1 }
 0x703   : > { %v6087_v40 = vpop.f32.mrf.mxu0  ;;  %v6758_v12 = vcombine.low %v5958_v17, %v6046_v30  ;;  %v6759_v27 = vcombine.high %v5958_v17, %v6046_v30 }
 0x704   : > { %v9016_v34 = vpop.f32.mrf.mxu1  ;;  %v6638_v23 = vcombine.low %v5999_v53, %v6087_v40  ;;  %v6639_v18 = vcombine.high %v5999_v53, %v6087_v40 }
 0x705   : > { %v9021_v46 = vpop.f32.mrf.mxu0  ;;  %v6766_v33 = vrot.slane %v6758_v12, %v10024_v35  ;;  %v6773_v63 = vrot.slane %v6759_v27, %v10024_v35 }
 0x706   : > { %v6646_v50 = vrot.slane %v6638_v23, %v10024_v35  ;;  %v6653_v0 = vrot.slane %v6639_v18, %v10024_v35 }
 0x707   : > { %v6090_v5 = vpop.f32.mrf.mxu0 }
 0x708   : > { %v6686_v4 = vcombine.low %v6630_v61, %v6646_v50  ;;  %v6687_v31 = vcombine.high %v6630_v61, %v6646_v50  ;;  %v6702_v25 = vcombine.low %v6637_v38, %v6653_v0  ;;  %v6703_v9 = vcombine.high %v6637_v38, %v6653_v0 }
 0x709   : > { %v6774_v60 = vcombine.low %v6002_v3, %v6090_v5  ;;  %v6775_v16 = vcombine.high %v6002_v3, %v6090_v5  ;;  %v9022_v51 = vpop.f32.mrf.mxu0 }
 0x70a   : > { %v6694_v42 = vrot.slane %v6686_v4, %v10055_v49  ;;  %v6701_v10 = vrot.slane %v6687_v31, %v10055_v49  ;;  %v6710_v15 = vrot.slane %v6702_v25, %v10055_v49  ;;  %v6717_v45 = vrot.slane %v6703_v9, %v10055_v49 }
 0x70b   : > { %v6782_v59 = vrot.slane %v6774_v60, %v10024_v35  ;;  %v6789_v7 = vrot.slane %v6775_v16, %v10024_v35 }
 0x70c   : > { %v8729_v52 = vcombine.low %v6694_v42, %v6701_v10  ;;  %v8731_v58 = vcombine.high %v6694_v42, %v6701_v10  ;;  %v8733_v37 = vcombine.low %v6710_v15, %v6717_v45  ;;  %v8735_v44 = vcombine.high %v6710_v15, %v6717_v45 }
 0x70d   : > { %v6822_v6 = vcombine.low %v6766_v33, %v6782_v59  ;;  %v6823_v62 = vcombine.high %v6766_v33, %v6782_v59  ;;  %v6838_v19 = vcombine.low %v6773_v63, %v6789_v7  ;;  %v6839_v56 = vcombine.high %v6773_v63, %v6789_v7 }
 0x70e   : > { %v7174_v11 = vrot.slane %v8729_v52, %v10024_v35  ;;  %v7190_v54 = vrot.slane %v8731_v58, %v10024_v35  ;;  %v7206_v14 = vrot.slane %v8733_v37, %v10024_v35  ;;  %v7222_v1 = vrot.slane %v8735_v44, %v10024_v35 }
 0x70f   : > { %v6830_v24 = vrot.slane %v6822_v6, %v10055_v49  ;;  %v6837_v57 = vrot.slane %v6823_v62, %v10055_v49  ;;  %v6846_v26 = vrot.slane %v6838_v19, %v10055_v49  ;;  %v6853_v28 = vrot.slane %v6839_v56, %v10055_v49  ;;  %v6131_v43 = vpop.f32.mrf.mxu1 }
 0x710   : > { %v7231_v20 = vcombine.high %v7174_v11, %v7190_v54  ;;  %v7263_v39 = vcombine.high %v7206_v14, %v7222_v1  ;;  %v7230_v22 = vcombine.low %v7174_v11, %v7190_v54  ;;  %v7262_v21 = vcombine.low %v7206_v14, %v7222_v1 }
 0x711   : > { %v8737_v48 = vcombine.low %v6830_v24, %v6837_v57  ;;  %v8739_v8 = vcombine.high %v6830_v24, %v6837_v57  ;;  %v8741_v17 = vcombine.low %v6846_v26, %v6853_v28  ;;  %v8743_v53 = vcombine.high %v6846_v26, %v6853_v28  ;;  %v9027_v41 = vpop.f32.mrf.mxu1 }
 0x712   : > { %v11883_v13 = vrot.slane %v7230_v22, %v10055_v49  ;;  %v11886_v3 = vrot.slane %v7262_v21, %v10055_v49  ;;  %v7245_v40 = vrot.slane %v7231_v20, %v10055_v49  ;;  %v7277_v34 = vrot.slane %v7263_v39, %v10055_v49 }
 0x713   : > { %v7310_v36 = vrot.slane %v8737_v48, %v10024_v35  ;;  %v7326_v55 = vrot.slane %v8739_v8, %v10024_v35  ;;  %v7342_v47 = vrot.slane %v8741_v17, %v10024_v35  ;;  %v7358_v29 = vrot.slane %v8743_v53, %v10024_v35  ;;  %v11892_v32 = vpop.f32.mrf.mxu1  ;;  %v6175_v30 = vpop.f32.mrf.mxu0 }
 0x714   : > { %v7294_v23 = vcombine.low %v11883_v13, %v11886_v3  ;;  %v7296_v9 = vcombine.low %v7245_v40, %v7277_v34  ;;  %v7295_v42 = vcombine.high %v11883_v13, %v11886_v3  ;;  %v7297_v62 = vcombine.high %v7245_v40, %v7277_v34 }
 0x715   : > { %v9028_v18 = vpop.f32.mrf.mxu1  ;;  %v9033_v46 = vpop.f32.mrf.mxu0  ;;  %v7367_v61 = vcombine.high %v7310_v36, %v7326_v55  ;;  %v7399_v38 = vcombine.high %v7342_v47, %v7358_v29  ;;  %v7366_v50 = vcombine.low %v7310_v36, %v7326_v55  ;;  %v7398_v0 = vcombine.low %v7342_v47, %v7358_v29 }
 0x717   : > { %v6178_v12 = vpop.f32.mrf.mxu0  ;;  %v6219_v27 = vpop.f32.mrf.mxu1  ;;  %v7381_v5 = vrot.slane %v7367_v61, %v10055_v49  ;;  %v7413_v4 = vrot.slane %v7399_v38, %v10055_v49  ;;  %v11901_v31 = vrot.slane %v7366_v50, %v10055_v49  ;;  %v11904_v25 = vrot.slane %v7398_v0, %v10055_v49 }
 0x718   : > { %v6654_v45 = vcombine.low %v6131_v43, %v6219_v27  ;;  %v6655_v33 = vcombine.high %v6131_v43, %v6219_v27 }
 0x719   : > { %v9034_v60 = vpop.f32.mrf.mxu0  ;;  %v9039_v16 = vpop.f32.mrf.mxu1  ;;  %v7432_v51 = vcombine.low %v7381_v5, %v7413_v4  ;;  %v7431_v10 = vcombine.high %v11901_v31, %v11904_v25  ;;  %v7430_v15 = vcombine.low %v11901_v31, %v11904_v25  ;;  %v7433_v52 = vcombine.high %v7381_v5, %v7413_v4 }
 0x71a   : > { %v6662_v19 = vrot.slane %v6654_v45, %v10024_v35  ;;  %v6669_v11 = vrot.slane %v6655_v33, %v10024_v35 }
 0x71b   : > { %v6222_v63 = vpop.f32.mrf.mxu1  ;;  %v9193_v59 = vpack.i.bf16 %v7432_v51, %v7296_v9  ;;  %v9188_v7 = vpack.i.bf16 %v7431_v10, %v7295_v42  ;;  %v9198_v1 = vpack.i.bf16 %v7433_v52, %v7297_v62 }
 0x71c   : > { %v6263_v58 = vpop.f32.mrf.mxu0  ;;  %v6790_v24 = vcombine.low %v11892_v32, %v6222_v63  ;;  %v6791_v57 = vcombine.high %v11892_v32, %v6222_v63 }
 0x71d   : > { %v9040_v37 = vpop.f32.mrf.mxu1  ;;  %v6670_v44 = vcombine.low %v6175_v30, %v6263_v58  ;;  %v6671_v6 = vcombine.high %v6175_v30, %v6263_v58  ;;  %9194 = vrot.lane.b32.xlu1 %v9193_v59, %s9504_s23  ;;  %9189 = vrot.lane.b32.xlu0 %v9188_v7, %s9505_s0 }
 0x71e   : > { %v9045_v56 = vpop.f32.mrf.mxu0  ;;  %v6798_v36 = vrot.slane %v6790_v24, %v10024_v35  ;;  %v6805_v55 = vrot.slane %v6791_v57, %v10024_v35 }
 0x71f   : > { %v6678_v54 = vrot.slane %v6670_v44, %v10024_v35  ;;  %v6685_v14 = vrot.slane %v6671_v6, %v10024_v35 }
 0x720   : > { %v6266_v26 = vpop.f32.mrf.mxu0 }
 0x721   : > { %v6718_v28 = vcombine.low %v6662_v19, %v6678_v54  ;;  %v6719_v43 = vcombine.high %v6662_v19, %v6678_v54  ;;  %v6734_v20 = vcombine.low %v6669_v11, %v6685_v14  ;;  %v6735_v39 = vcombine.high %v6669_v11, %v6685_v14  ;;  %9199 = vrot.lane.b32.xlu0 %v9198_v1, %s9506_s17 }
 0x722   : > { %v6806_v22 = vcombine.low %v6178_v12, %v6266_v26  ;;  %v6807_v21 = vcombine.high %v6178_v12, %v6266_v26  ;;  %v9046_v48 = vpop.f32.mrf.mxu0 }
 0x723   : > { %v6726_v8 = vrot.slane %v6718_v28, %v10055_v49  ;;  %v6733_v17 = vrot.slane %v6719_v43, %v10055_v49  ;;  %v6742_v53 = vrot.slane %v6734_v20, %v10055_v49  ;;  %v6749_v41 = vrot.slane %v6735_v39, %v10055_v49 }
 0x724   : > { %v6814_v47 = vrot.slane %v6806_v22, %v10024_v35  ;;  %v6821_v29 = vrot.slane %v6807_v21, %v10024_v35 }
 0x725   : > { %v8730_v32 = vcombine.low %v6726_v8, %v6733_v17  ;;  %v8732_v30 = vcombine.high %v6726_v8, %v6733_v17  ;;  %v8734_v40 = vcombine.low %v6742_v53, %v6749_v41  ;;  %v8736_v34 = vcombine.high %v6742_v53, %v6749_v41  ;;  %v11929_v18 = vpop.f32.mrf.mxu1 }
 0x726   : > { %v6854_v46 = vcombine.low %v6798_v36, %v6814_v47  ;;  %v6855_v61 = vcombine.high %v6798_v36, %v6814_v47  ;;  %v6870_v38 = vcombine.low %v6805_v55, %v6821_v29  ;;  %v6871_v50 = vcombine.high %v6805_v55, %v6821_v29 }
 0x727   : > { %v7181_v0 = vrot.slane %v8730_v32, %v10024_v35  ;;  %v7197_v12 = vrot.slane %v8732_v30, %v10024_v35  ;;  %v7213_v27 = vrot.slane %v8734_v40, %v10024_v35  ;;  %v7229_v5 = vrot.slane %v8736_v34, %v10024_v35  ;;  %v9051_v4 = vpop.f32.mrf.mxu1 }
 0x728   : > { %v6862_v9 = vrot.slane %v6854_v46, %v10055_v49  ;;  %v6869_v60 = vrot.slane %v6855_v61, %v10055_v49  ;;  %v6878_v16 = vrot.slane %v6870_v38, %v10055_v49  ;;  %v6885_v51 = vrot.slane %v6871_v50, %v10055_v49 }
 0x729   : > { %v11939_v42 = vpop.f32.mrf.mxu1  ;;  %v6351_v10 = vpop.f32.mrf.mxu0  ;;  %v7246_v45 = vcombine.low %v7181_v0, %v7197_v12  ;;  %v7278_v33 = vcombine.low %v7213_v27, %v7229_v5  ;;  %v7247_v14 = vcombine.high %v7181_v0, %v7197_v12  ;;  %v7279_v1 = vcombine.high %v7213_v27, %v7229_v5 }
 0x72a   : > { %v8738_v63 = vcombine.low %v6862_v9, %v6869_v60  ;;  %v8740_v59 = vcombine.high %v6862_v9, %v6869_v60  ;;  %v8742_v7 = vcombine.low %v6878_v16, %v6885_v51  ;;  %v8744_v52 = vcombine.high %v6878_v16, %v6885_v51 }
 0x72b   : > { %v9052_v58 = vpop.f32.mrf.mxu1  ;;  %v9057_v37 = vpop.f32.mrf.mxu0  ;;  %v7254_v11 = vrot.slane %v7246_v45, %v10055_v49  ;;  %v7286_v54 = vrot.slane %v7278_v33, %v10055_v49  ;;  %v7261_v48 = vrot.slane %v7247_v14, %v10055_v49  ;;  %v7293_v8 = vrot.slane %v7279_v1, %v10055_v49 }
 0x72c   : > { %v7317_v44 = vrot.slane %v8738_v63, %v10024_v35  ;;  %v7333_v6 = vrot.slane %v8740_v59, %v10024_v35  ;;  %v7349_v62 = vrot.slane %v8742_v7, %v10024_v35  ;;  %v7365_v19 = vrot.slane %v8744_v52, %v10024_v35 }
 0x72d   : > { %v11945_v56 = vpop.f32.mrf.mxu0  ;;  %v7298_v17 = vcombine.low %v7254_v11, %v7286_v54  ;;  %v7299_v50 = vcombine.high %v7254_v11, %v7286_v54  ;;  %v7300_v0 = vcombine.low %v7261_v48, %v7293_v8  ;;  %v7301_v45 = vcombine.high %v7261_v48, %v7293_v8 }
 0x72e   : > { %v7382_v24 = vcombine.low %v7317_v44, %v7333_v6  ;;  %v7414_v57 = vcombine.low %v7349_v62, %v7365_v19  ;;  %v7383_v26 = vcombine.high %v7317_v44, %v7333_v6  ;;  %v7415_v28 = vcombine.high %v7349_v62, %v7365_v19 }
 0x72f   : > { %v6395_v43 = vpop.f32.mrf.mxu1  ;;  %v9058_v20 = vpop.f32.mrf.mxu0 }
 0x730   : > { %v7390_v39 = vrot.slane %v7382_v24, %v10055_v49  ;;  %v7422_v22 = vrot.slane %v7414_v57, %v10055_v49  ;;  %v7397_v41 = vrot.slane %v7383_v26, %v10055_v49  ;;  %v7429_v36 = vrot.slane %v7415_v28, %v10055_v49 }
 0x731   : > { %v9063_v21 = vpop.f32.mrf.mxu1  ;;  %v6894_v55 = vcombine.low %v11929_v18, %v6395_v43  ;;  %v6895_v47 = vcombine.high %v11929_v18, %v6395_v43 }
 0x732   : > { %v7434_v53 = vcombine.low %v7390_v39, %v7422_v22  ;;  %v7435_v40 = vcombine.high %v7390_v39, %v7422_v22  ;;  %v7436_v12 = vcombine.low %v7397_v41, %v7429_v36  ;;  %v7437_v27 = vcombine.high %v7397_v41, %v7429_v36 }
 0x733   : > { %v6398_v29 = vpop.f32.mrf.mxu1  ;;  %v6902_v5 = vrot.slane %v6894_v55, %v10024_v35  ;;  %v6909_v4 = vrot.slane %v6895_v47, %v10024_v35 }
 0x734   : > { %v6439_v32 = vpop.f32.mrf.mxu0  ;;  %v9203_v30 = vpack.i.bf16 %v7434_v53, %v7298_v17  ;;  %v7030_v60 = vcombine.low %v11939_v42, %v6398_v29  ;;  %v7031_v16 = vcombine.high %v11939_v42, %v6398_v29  ;;  %v9213_v44 = vpack.i.bf16 %v7436_v12, %v7300_v0 }
 0x735   : > { %v9064_v34 = vpop.f32.mrf.mxu1  ;;  %v6910_v46 = vcombine.low %v6351_v10, %v6439_v32  ;;  %v6911_v61 = vcombine.high %v6351_v10, %v6439_v32  ;;  %v9208_v10 = vpack.i.bf16 %v7435_v40, %v7299_v50  ;;  %v9218_v6 = vpack.i.bf16 %v7437_v27, %v7301_v45 }
 0x736   : > { %v9069_v38 = vpop.f32.mrf.mxu0  ;;  %9204 = vrot.lane.b32.xlu0 %v9203_v30, %s9507_s20  ;;  %v7038_v54 = vrot.slane %v7030_v60, %v10024_v35  ;;  %v7045_v14 = vrot.slane %v7031_v16, %v10024_v35 }
 0x737   : > { %v6918_v18 = vrot.slane %v6910_v46, %v10024_v35  ;;  %v6925_v9 = vrot.slane %v6911_v61, %v10024_v35 }
 0x738   : > { %v6442_v51 = vpop.f32.mrf.mxu0 }
 0x739   : > { %v6958_v33 = vcombine.low %v6902_v5, %v6918_v18  ;;  %v6959_v63 = vcombine.high %v6902_v5, %v6918_v18  ;;  %v6974_v59 = vcombine.low %v6909_v4, %v6925_v9  ;;  %v6975_v7 = vcombine.high %v6909_v4, %v6925_v9 }
 0x73a   : > { %v7046_v52 = vcombine.low %v11945_v56, %v6442_v51  ;;  %v7047_v58 = vcombine.high %v11945_v56, %v6442_v51  ;;  %v9070_v37 = vpop.f32.mrf.mxu0  ;;  %9209 = vrot.lane.b32.xlu0 %v9208_v10, %s9508_s21 }
 0x73b   : > { %v6966_v62 = vrot.slane %v6958_v33, %v10055_v49  ;;  %v6973_v42 = vrot.slane %v6959_v63, %v10055_v49  ;;  %v6982_v19 = vrot.slane %v6974_v59, %v10055_v49  ;;  %v6989_v11 = vrot.slane %v6975_v7, %v10055_v49 }
 0x73c   : > { %v7054_v56 = vrot.slane %v7046_v52, %v10024_v35  ;;  %v7061_v1 = vrot.slane %v7047_v58, %v10024_v35 }
 0x73d   : > { %v8745_v24 = vcombine.low %v6966_v62, %v6973_v42  ;;  %v8747_v57 = vcombine.high %v6966_v62, %v6973_v42  ;;  %v8749_v26 = vcombine.low %v6982_v19, %v6989_v11  ;;  %v8751_v28 = vcombine.high %v6982_v19, %v6989_v11 }
 0x73e   : > { %v7094_v43 = vcombine.low %v7038_v54, %v7054_v56  ;;  %v7095_v20 = vcombine.high %v7038_v54, %v7054_v56  ;;  %v7110_v39 = vcombine.low %v7045_v14, %v7061_v1  ;;  %v7111_v22 = vcombine.high %v7045_v14, %v7061_v1  ;;  %9214 = vrot.lane.b32.xlu0 %v9213_v44, %s9509_s19 }
 0x73f   : > { %v7446_v21 = vrot.slane %v8745_v24, %v10024_v35  ;;  %v7462_v48 = vrot.slane %v8747_v57, %v10024_v35  ;;  %v7478_v8 = vrot.slane %v8749_v26, %v10024_v35  ;;  %v7494_v17 = vrot.slane %v8751_v28, %v10024_v35 }
 0x740   : > { %v7102_v53 = vrot.slane %v7094_v43, %v10055_v49  ;;  %v7109_v41 = vrot.slane %v7095_v20, %v10055_v49  ;;  %v7118_v36 = vrot.slane %v7110_v39, %v10055_v49  ;;  %v7125_v55 = vrot.slane %v7111_v22, %v10055_v49 }
 0x741   : > { %v7502_v47 = vcombine.low %v7446_v21, %v7462_v48  ;;  %v7534_v29 = vcombine.low %v7478_v8, %v7494_v17  ;;  %v7503_v27 = vcombine.high %v7446_v21, %v7462_v48  ;;  %v7535_v5 = vcombine.high %v7478_v8, %v7494_v17 }
 0x742   : > { %v8753_v32 = vcombine.low %v7102_v53, %v7109_v41  ;;  %v8755_v30 = vcombine.high %v7102_v53, %v7109_v41  ;;  %v8757_v40 = vcombine.low %v7118_v36, %v7125_v55  ;;  %v8759_v34 = vcombine.high %v7118_v36, %v7125_v55  ;;  %9219 = vrot.lane.b32.xlu0 %v9218_v6, %s9510_s18 }
 0x743   : > { %v11986_v46 = vrot.slane %v7502_v47, %v10055_v49  ;;  %v11989_v61 = vrot.slane %v7534_v29, %v10055_v49  ;;  %v7517_v63 = vrot.slane %v7503_v27, %v10055_v49  ;;  %v7549_v37 = vrot.slane %v7535_v5, %v10055_v49 }
 0x744   : > { %v7582_v38 = vrot.slane %v8753_v32, %v10024_v35  ;;  %v7598_v50 = vrot.slane %v8755_v30, %v10024_v35  ;;  %v7614_v0 = vrot.slane %v8757_v40, %v10024_v35  ;;  %v7630_v12 = vrot.slane %v8759_v34, %v10024_v35 }
 0x745   : > { %v7566_v4 = vcombine.low %v11986_v46, %v11989_v61  ;;  %v7567_v52 = vcombine.high %v11986_v46, %v11989_v61  ;;  %v7568_v14 = vcombine.low %v7517_v63, %v7549_v37  ;;  %v7569_v28 = vcombine.high %v7517_v63, %v7549_v37 }
 0x746   : > { %v7638_v18 = vcombine.low %v7582_v38, %v7598_v50  ;;  %v7670_v9 = vcombine.low %v7614_v0, %v7630_v12  ;;  %v7639_v60 = vcombine.high %v7582_v38, %v7598_v50  ;;  %v7671_v16 = vcombine.high %v7614_v0, %v7630_v12 }
 0x748   : > { %v11998_v51 = vrot.slane %v7638_v18, %v10055_v49  ;;  %v12001_v10 = vrot.slane %v7670_v9, %v10055_v49  ;;  %v7653_v45 = vrot.slane %v7639_v60, %v10055_v49  ;;  %v7685_v33 = vrot.slane %v7671_v16, %v10055_v49 }
 0x74a   : > { %v6483_v59 = vpop.f32.mrf.mxu1  ;;  %v6527_v7 = vpop.f32.mrf.mxu0  ;;  %v7703_v58 = vcombine.high %v11998_v51, %v12001_v10  ;;  %v7702_v44 = vcombine.low %v11998_v51, %v12001_v10  ;;  %v7704_v19 = vcombine.low %v7653_v45, %v7685_v33  ;;  %v7705_v57 = vcombine.high %v7653_v45, %v7685_v33 }
 0x74c   : > { %v9075_v6 = vpop.f32.mrf.mxu1  ;;  %v9081_v62 = vpop.f32.mrf.mxu0  ;;  %v9223_v42 = vpack.i.bf16 %v7703_v58, %v7567_v52  ;;  %v9228_v24 = vpack.i.bf16 %v7704_v19, %v7568_v14  ;;  %v9233_v20 = vpack.i.bf16 %v7705_v57, %v7569_v28 }
 0x74e   : > { %v6486_v11 = vpop.f32.mrf.mxu1  ;;  %v6530_v54 = vpop.f32.mrf.mxu0  ;;  %9224 = vrot.lane.b32.xlu1 %v9223_v42, %s9505_s0 }
 0x750   : > { %v9076_v56 = vpop.f32.mrf.mxu1  ;;  %v9082_v1 = vpop.f32.mrf.mxu0 }
 0x752   : > { %v6615_v26 = vpop.f32.mrf.mxu0  ;;  %9229 = vrot.lane.b32.xlu1 %v9228_v24, %s9504_s23 }
 0x753   : > { %v6942_v21 = vcombine.low %v6527_v7, %v6615_v26  ;;  %v6943_v48 = vcombine.high %v6527_v7, %v6615_v26 }
 0x754   : > { %v9093_v43 = vpop.f32.mrf.mxu0 }
 0x755   : > { %v6950_v36 = vrot.slane %v6942_v21, %v10024_v35  ;;  %v6957_v55 = vrot.slane %v6943_v48, %v10024_v35  ;;  %v9270_v48 = vld [vmem:[%s9644_s30 + $0x18] sm:$0xff]  }
 0x756   : > { %v6618_v39 = vpop.f32.mrf.mxu0  ;;  %9234 = vrot.lane.b32.xlu1 %v9233_v20, %s9506_s17  ;;  %9095 = vmatprep.subr.bf16.mxu1 %v9270_v48 }
 0x757   : > { %v7078_v32 = vcombine.low %v6530_v54, %v6618_v39  ;;  %v7079_v30 = vcombine.high %v6530_v54, %v6618_v39  ;;  %9096 = vmatpush3.bf16.msra.mxu1 %v9270_v48 }
 0x758   : > { %v9094_v22 = vpop.f32.mrf.mxu0 }
 0x759   : > { %v7086_v45 = vrot.slane %v7078_v32, %v10024_v35  ;;  %v7093_v33 = vrot.slane %v7079_v30, %v10024_v35  ;;  %v9271_v32 = vld [vmem:[%s9644_s30 + $0x10] sm:$0xff]  }
 0x75a   : > { %9097 = vmatprep.subr.bf16.mxu1 %v9271_v32 }
 0x75b   : > { %9098 = vmatpush3.bf16.msra.mxu1 %v9271_v32 }
 0x776   : > { %v6571_v8 = vpop.f32.mrf.mxu1 }
 0x777   : > { %v6926_v17 = vcombine.low %v6483_v59, %v6571_v8  ;;  %v6927_v53 = vcombine.high %v6483_v59, %v6571_v8 }
 0x778   : > { %v9087_v41 = vpop.f32.mrf.mxu1 }
 0x779   : > { %v6934_v47 = vrot.slane %v6926_v17, %v10024_v35  ;;  %v6941_v29 = vrot.slane %v6927_v53, %v10024_v35 }
 0x77a   : > { %v6574_v40 = vpop.f32.mrf.mxu1 }
 0x77b   : > { %v6990_v34 = vcombine.low %v6934_v47, %v6950_v36  ;;  %v6991_v38 = vcombine.high %v6934_v47, %v6950_v36  ;;  %v7006_v50 = vcombine.low %v6941_v29, %v6957_v55  ;;  %v7007_v0 = vcombine.high %v6941_v29, %v6957_v55 }
 0x77c   : > { %v7062_v12 = vcombine.low %v6486_v11, %v6574_v40  ;;  %v7063_v27 = vcombine.high %v6486_v11, %v6574_v40  ;;  %v9088_v5 = vpop.f32.mrf.mxu1 }
 0x77d   : > { %v6998_v18 = vrot.slane %v6990_v34, %v10055_v49  ;;  %v7005_v9 = vrot.slane %v6991_v38, %v10055_v49  ;;  %v7014_v60 = vrot.slane %v7006_v50, %v10055_v49  ;;  %v7021_v16 = vrot.slane %v7007_v0, %v10055_v49 }
 0x77e   : > { %v7070_v63 = vrot.slane %v7062_v12, %v10024_v35  ;;  %v7077_v59 = vrot.slane %v7063_v27, %v10024_v35  ;;  %v9272_v27 = vld [vmem:[%s9644_s30 + $0x8] sm:$0xff]  }
 0x77f   : > { %v8746_v7 = vcombine.low %v6998_v18, %v7005_v9  ;;  %v8748_v52 = vcombine.high %v6998_v18, %v7005_v9  ;;  %v8750_v58 = vcombine.low %v7014_v60, %v7021_v16  ;;  %v8752_v37 = vcombine.high %v7014_v60, %v7021_v16  ;;  %9099 = vmatprep.subr.bf16.mxu1 %v9272_v27 }
 0x780   : > { %v7126_v6 = vcombine.low %v7070_v63, %v7086_v45  ;;  %v7127_v62 = vcombine.high %v7070_v63, %v7086_v45  ;;  %v7142_v42 = vcombine.low %v7077_v59, %v7093_v33  ;;  %v7143_v19 = vcombine.high %v7077_v59, %v7093_v33  ;;  %9100 = vmatpush3.bf16.msra.mxu1 %v9272_v27 }
 0x781   : > { %v7453_v11 = vrot.slane %v8746_v7, %v10024_v35  ;;  %v7469_v54 = vrot.slane %v8748_v52, %v10024_v35  ;;  %v7485_v14 = vrot.slane %v8750_v58, %v10024_v35  ;;  %v7501_v56 = vrot.slane %v8752_v37, %v10024_v35  ;;  %v9273_v7 = vld [vmem:[%s9644_s30] sm:$0xff]  }
 0x782   : > { %v7134_v1 = vrot.slane %v7126_v6, %v10055_v49  ;;  %v7141_v24 = vrot.slane %v7127_v62, %v10055_v49  ;;  %v7150_v57 = vrot.slane %v7142_v42, %v10055_v49  ;;  %v7157_v26 = vrot.slane %v7143_v19, %v10055_v49  ;;  %9101 = vmatprep.subr.bf16.mxu1 %v9273_v7 }
 0x783   : > { %v7518_v28 = vcombine.low %v7453_v11, %v7469_v54  ;;  %v7550_v43 = vcombine.low %v7485_v14, %v7501_v56  ;;  %v7551_v12 = vcombine.high %v7485_v14, %v7501_v56 }
 0x784   : > { %v8754_v20 = vcombine.low %v7134_v1, %v7141_v24  ;;  %v8756_v39 = vcombine.high %v7134_v1, %v7141_v24  ;;  %v8758_v22 = vcombine.low %v7150_v57, %v7157_v26  ;;  %v8760_v21 = vcombine.high %v7150_v57, %v7157_v26  ;;  %9102 = vmatpush3.bf16.msra.mxu1 %v9273_v7 }
 0x785   : > { %v7526_v36 = vrot.slane %v7518_v28, %v10055_v49  ;;  %v7558_v55 = vrot.slane %v7550_v43, %v10055_v49  ;;  %v7565_v33 = vrot.slane %v7551_v12, %v10055_v49 }
 0x786   : > { %v7589_v8 = vrot.slane %v8754_v20, %v10024_v35  ;;  %v7605_v17 = vrot.slane %v8756_v39, %v10024_v35  ;;  %v7621_v53 = vrot.slane %v8758_v22, %v10024_v35  ;;  %v7637_v41 = vrot.slane %v8760_v21, %v10024_v35 }
 0x787   : > { %v7570_v50 = vcombine.low %v7526_v36, %v7558_v55  ;;  %v7519_v35 = vcombine.high %v7453_v11, %v7469_v54  ;;  %v7571_v16 = vcombine.high %v7526_v36, %v7558_v55 }
 0x788   : > { %v7654_v47 = vcombine.low %v7589_v8, %v7605_v17  ;;  %v7686_v29 = vcombine.low %v7621_v53, %v7637_v41  ;;  %v7655_v34 = vcombine.high %v7589_v8, %v7605_v17  ;;  %v7687_v38 = vcombine.high %v7621_v53, %v7637_v41 }
 0x789   : > { %v7533_v45 = vrot.slane %v7519_v35, %v10055_v49 }
 0x78a   : > { %v7662_v30 = vrot.slane %v7654_v47, %v10055_v49  ;;  %v7694_v40 = vrot.slane %v7686_v29, %v10055_v49  ;;  %v7669_v9 = vrot.slane %v7655_v34, %v10055_v49  ;;  %v7701_v60 = vrot.slane %v7687_v38, %v10055_v49 }
 0x78b   : > { %v7572_v52 = vcombine.low %v7533_v45, %v7565_v33  ;;  %v7573_v6 = vcombine.high %v7533_v45, %v7565_v33 }
 0x78c   : > { %v7706_v0 = vcombine.low %v7662_v30, %v7694_v40  ;;  %v7707_v18 = vcombine.high %v7662_v30, %v7694_v40  ;;  %v7708_v59 = vcombine.low %v7669_v9, %v7701_v60  ;;  %v7709_v37 = vcombine.high %v7669_v9, %v7701_v60 }
 0x78e   : > { %v9238_v5 = vpack.i.bf16 %v7706_v0, %v7570_v50  ;;  %v9243_v63 = vpack.i.bf16 %v7707_v18, %v7571_v16  ;;  %v9248_v58 = vpack.i.bf16 %v7708_v59, %v7572_v52  ;;  %v9253_v62 = vpack.i.bf16 %v7709_v37, %v7573_v6 }
 0x78f   : > { %v9190_v42 = vpop.permute.xlu0 %9189  ;;  %v9195_v11 = vpop.permute.xlu1 %9194 }
 0x790   : > { %9239 = vrot.lane.b32.xlu1 %v9238_v5, %s9507_s20  ;;  %v9192_v54 = vunpack.i.h.bf16 %v9190_v42  ;;  %v9191_v14 = vunpack.i.l.bf16 %v9190_v42  ;;  %v9197_v1 = vunpack.i.h.bf16 %v9195_v11  ;;  %v9196_v24 = vunpack.i.l.bf16 %v9195_v11 }
 0x792   : > { %v7823_v57 = vsel %vm4764_vm3, %v7430_v15, %v9192_v54  ;;  %v7822_v26 = vsel %vm4764_vm3, %v7294_v23, %v9191_v14 }
 0x793   : > { %v9200_v19 = vpop.permute.xlu0 %9199  ;;  %v7826_v8 = vsel %vm5549_vm4, %v7822_v26, %v9196_v24  ;;  %v7827_v31 = vsel %vm5549_vm4, %v7823_v57, %v9197_v1  ;;  %v8761_v26 = vld [vmem:[%s12360_s6] ss:$0 sm:$0xff] }
 0x794   : > { %9244 = vrot.lane.b32.xlu1 %v9243_v63, %s9508_s21  ;;  %v9202_v28 = vunpack.i.h.bf16 %v9200_v19  ;;  %v9201_v43 = vunpack.i.l.bf16 %v9200_v19 }
 0x796   : > { %v7831_v13 = vsel %vm7830_vm5, %v7826_v8, %v9201_v43  ;;  %v7832_v3 = vsel %vm7830_vm5, %v7827_v31, %v9202_v28  ;;  %v9463_v8 = vld [vmem:[%s12316_s7 + $0x10] sm:$0xff] }
 0x798   : > { %9249 = vrot.lane.b32.xlu1 %v9248_v58, %s9509_s19 }
 0x79c   : > { %9254 = vrot.lane.b32.xlu1 %v9253_v62, %s9510_s18  ;;  %s12361_s18 = scalar_lea.vmem %s12267_s10, %s9614_s25 }
 0x7a8   : > { %v9205_v49 = vpop.permute.xlu0 %9204 }
 0x7a9   : > { %v9207_v20 = vunpack.i.h.bf16 %v9205_v49  ;;  %v9206_v39 = vunpack.i.l.bf16 %v9205_v49 }
 0x7ab   : > { %v7836_v23 = vsel %vm7835_vm6, %v7831_v13, %v9206_v39  ;;  %v7837_v17 = vsel %vm7835_vm6, %v7832_v3, %v9207_v20  ;;  %v9464_v3 = vld [vmem:[%s12316_s7 + $0x8] sm:$0xff] }
 0x7ac   : > { %v9210_v56 = vpop.permute.xlu0 %9209 }
 0x7ad   : > { %v9212_v21 = vunpack.i.h.bf16 %v9210_v56  ;;  %v9211_v48 = vunpack.i.l.bf16 %v9210_v56 }
 0x7af   : > { %v7841_v41 = vsel %vm7840_vm7, %v7836_v23, %v9211_v48  ;;  %v7842_v36 = vsel %vm7840_vm7, %v7837_v17, %v9212_v21  ;;  %v9465_v17 = vld [vmem:[%s12316_s7 + $0x18] sm:$0xff] }
 0x7b0   : > { %v9215_v22 = vpop.permute.xlu0 %9214 }
 0x7b1   : > { %v9217_v25 = vunpack.i.h.bf16 %v9215_v22  ;;  %v9216_v15 = vunpack.i.l.bf16 %v9215_v22  ;;  %v9462_v22 = vld [vmem:[%s12316_s7] sm:$0xff] }
 0x7b3   : > { %v7846_v29 = vsel %vm7845_vm8, %v7841_v41, %v9216_v15  ;;  %v7847_v32 = vsel %vm7845_vm8, %v7842_v36, %v9217_v25 }
 0x7b4   : > { %v9220_v53 = vpop.permute.xlu0 %9219 }
 0x7b5   : > { %v9222_v55 = vunpack.i.h.bf16 %v9220_v53  ;;  %v9221_v47 = vunpack.i.l.bf16 %v9220_v53 }
 0x7b7   : > { %v7851_v30 = vsel %vm7850_vm9, %v7846_v29, %v9221_v47  ;;  %v7852_v40 = vsel %vm7850_vm9, %v7847_v32, %v9222_v55 }
 0x7b8   : > { %v7855_v34 = vpack.c.bf16 %v7852_v40, %v7851_v30 }
 0x7ba   : > { %9103 = vmatprep.mubr.msk.bf16.mxu1 %vm994_vm1, %v7855_v34 }
 0x7c0   : > { %v9225_v38 = vpop.permute.xlu1 %9224 }
 0x7c1   : > { %v9227_v0 = vunpack.i.h.bf16 %v9225_v38  ;;  %v9226_v35 = vunpack.i.l.bf16 %v9225_v38 }
 0x7c3   : > { %v7824_v18 = vsel %vm4764_vm3, %v7566_v4, %v9226_v35  ;;  %v7825_v9 = vsel %vm4764_vm3, %v7702_v44, %v9227_v0 }
 0x7c4   : > { %v9230_v50 = vpop.permute.xlu1 %9229 }
 0x7c5   : > { %v9232_v12 = vunpack.i.h.bf16 %v9230_v50  ;;  %v9231_v27 = vunpack.i.l.bf16 %v9230_v50 }
 0x7c7   : > { %v7828_v45 = vsel %vm5549_vm4, %v7824_v18, %v9231_v27  ;;  %v7829_v33 = vsel %vm5549_vm4, %v7825_v9, %v9232_v12 }
 0x7c8   : > { %v9235_v5 = vpop.permute.xlu1 %9234 }
 0x7c9   : > { %v9237_v60 = vunpack.i.h.bf16 %v9235_v5  ;;  %v9236_v16 = vunpack.i.l.bf16 %v9235_v5 }
 0x7cb   : > { %v7833_v63 = vsel %vm7830_vm5, %v7828_v45, %v9236_v16  ;;  %v7834_v59 = vsel %vm7830_vm5, %v7829_v33, %v9237_v60 }
 0x802   : > { %v9240_v7 = vpop.permute.xlu1 %9239 }
 0x803   : > { %v9242_v46 = vunpack.i.h.bf16 %v9240_v7  ;;  %v9241_v61 = vunpack.i.l.bf16 %v9240_v7  ;;  %v9276_v7 = vld [vmem:[%s9657_s22 + $0x34] ss:$8 sps:$4 sm:$0xff]  }
 0x804   : > { %8085 = vmatprep.subr.bf16.mxu0 %v9276_v7 }
 0x805   : > { %v7839_v44 = vsel %vm7835_vm6, %v7834_v59, %v9242_v46  ;;  %v7838_v6 = vsel %vm7835_vm6, %v7833_v63, %v9241_v61  ;;  %v9274_v59 = vld [vmem:[%s9657_s22 + $0x30] ss:$8 sps:$4 sm:$0xff]   ;;  %v9277_v46 = vld [vmem:[%s9657_s22 + $0x20] ss:$8 sps:$4 sm:$0xff]   ;;  %v9282_v61 = vld [vmem:[%s9657_s22 + $0x14] ss:$8 sps:$4 sm:$0xff]  }
 0x806   : > { %v9245_v52 = vpop.permute.xlu1 %9244  ;;  %8086 = vmatpush1.bf16.msra.mxu0 %v9274_v59 }
 0x807   : > { %v9247_v58 = vunpack.i.h.bf16 %v9245_v52  ;;  %v9246_v37 = vunpack.i.l.bf16 %v9245_v52  ;;  %v9279_v52 = vld [vmem:[%s9657_s22 + $0x24] ss:$8 sps:$4 sm:$0xff]  }
 0x808   : > { %8087 = vmatprep.subr.bf16.mxu0 %v9279_v52 }
 0x809   : > { %v7843_v42 = vsel %vm7840_vm7, %v7838_v6, %v9246_v37  ;;  %v7844_v19 = vsel %vm7840_vm7, %v7839_v44, %v9247_v58  ;;  %v9285_v58 = vld [vmem:[%s9657_s22 + $0x4] ss:$8 sps:$4 sm:$0xff]   ;;  %v9283_v37 = vld [vmem:[%s9657_s22] ss:$8 sps:$4 sm:$0xff]  }
 0x80a   : > { %v9250_v4 = vpop.permute.xlu1 %9249  ;;  %8088 = vmatpush1.bf16.msra.mxu0 %v9277_v46 }
 0x80b   : > { %v9252_v51 = vunpack.i.h.bf16 %v9250_v4  ;;  %v9251_v10 = vunpack.i.l.bf16 %v9250_v4  ;;  %v9280_v4 = vld [vmem:[%s9657_s22 + $0x10] ss:$8 sps:$4 sm:$0xff]   ;;  %8089 = vmatprep.subr.bf16.mxu0 %v9282_v61 }
 0x80d   : > { %v7848_v54 = vsel %vm7845_vm8, %v7843_v42, %v9251_v10  ;;  %v7849_v14 = vsel %vm7845_vm8, %v7844_v19, %v9252_v51 }
 0x80e   : > { %v9255_v62 = vpop.permute.xlu1 %9254  ;;  %8090 = vmatpush1.bf16.msra.mxu0 %v9280_v4 }
 0x80f   : > { %v9257_v49 = vunpack.i.h.bf16 %v9255_v62  ;;  %v9256_v11 = vunpack.i.l.bf16 %v9255_v62  ;;  %8091 = vmatprep.subr.bf16.mxu0 %v9285_v58 }
 0x811   : > { %v7853_v56 = vsel %vm7850_vm9, %v7848_v54, %v9256_v11  ;;  %v7854_v1 = vsel %vm7850_vm9, %v7849_v14, %v9257_v49 }
 0x812   : > { %v7856_v24 = vpack.c.bf16 %v7854_v1, %v7853_v56  ;;  %8092 = vmatpush1.bf16.msra.mxu0 %v9283_v37 }
 0x814   : > { %9104 = vmatmul.mubr.msk.bf16.vlgmr.msra.gmra.mxu1 %vm994_vm1, %v7856_v24 }
 0x8d4   : > { %v9105_v57 = vpop.f32.mrf.mxu1 }
 0x8d5   : > { %v7936_v43 = vadd.f32 %v9105_v57, %v8761_v26  ;;  %v8768_v57 = vld [vmem:[%s12361_s18] ss:$0 sm:$0xff] }
 0x8d6   : > { %v7927_v28 = vpop.f32.mrf.mxu1 }
 0x8d7   : > { %v7928_v20 = vadd.f32 %v8761_v26, %v7927_v28  ;;  %v12111_v31 = vadd.f32 %v9463_v8, %v7936_v43 }
 0x8d8   : > { %v9106_v39 = vpop.f32.mrf.mxu1 }
 0x8d9   : > { %v12106_v21 = vadd.f32 %v9462_v22, %v7928_v20  ;;  %v7939_v25 = vadd.f32 %v9106_v39, %v8761_v26  ;;  %v7952_v36 = vsel %vm994_vm1, %v12111_v31, 0.0  ;;  %v8769_v39 = vld [vmem:[%s715_s24] ss:$0 sm:$0xff] }
 0x8da   : > { %v7930_v48 = vpop.f32.mrf.mxu1 }
 0x8db   : > { %v7931_v15 = vadd.f32 %v8761_v26, %v7930_v48  ;;  %v7946_v13 = vsel %vm994_vm1, %v12106_v21, 0.0  ;;  %v12123_v53 = vadd.f32 %v9465_v17, %v7939_v25 }
 0x8dc   : > { %7947 = vadd.xlane.f32.xlu0 %v7946_v13 }
 0x8dd   : > { %v12118_v23 = vadd.f32 %v9464_v3, %v7931_v15  ;;  %v7955_v55 = vsel %vm994_vm1, %v12123_v53, 0.0 }
 0x8df   : > { %v7949_v41 = vsel %vm994_vm1, %v12118_v23, 0.0 }
 0x8e0   : > { %7950 = vadd.xlane.f32.xlu1 %v7949_v41  ;;  %7953 = vadd.xlane.f32.xlu0 %v7952_v36 }
 0x8e4   : > { %7956 = vadd.xlane.f32.xlu0 %v7955_v55 }
 0x965   : > { %v7948_v47 = vpop.xlane.xlu0 %7947 }
 0x966   : > { %v7958_v29 = vmul.f32 0.015625, %v7948_v47 }
 0x968   : > { %v7962_v32 = vsub.f32 %v12106_v21, %v7958_v29  ;;  %v9286_v29 = vld [vmem:[%s9668_s5 + $0x78] sm:$0xff]  }
 0x969   : > { %v7951_v30 = vpop.xlane.xlu1 %7950  ;;  %v7954_v40 = vpop.xlane.xlu0 %7953  ;;  %8875 = vmatprep.subr.bf16.mxu1 %v9286_v29 }
 0x96a   : > { %v7959_v34 = vmul.f32 0.015625, %v7951_v30  ;;  %v7960_v38 = vmul.f32 0.015625, %v7954_v40  ;;  %v7966_v50 = vmul.f32 %v7962_v32, %v7962_v32  ;;  %v9288_v30 = vld [vmem:[%s9668_s5 + $0x70] sm:$0xff]  }
 0x96b   : > { %v9289_v40 = vld [vmem:[%s9668_s5 + $0x30] sm:$0xff]  }
 0x96c   : > { %v7963_v0 = vsub.f32 %v12118_v23, %v7959_v34  ;;  %v7964_v35 = vsub.f32 %v12111_v31, %v7960_v38  ;;  %v7970_v12 = vsel %vm994_vm1, %v7966_v50, 0.0  ;;  %v9290_v34 = vld [vmem:[%s9668_s5 + $0x68] sm:$0xff]   ;;  %v9292_v38 = vld [vmem:[%s9668_s5 + $0x60] sm:$0xff]  }
 0x96d   : > { %7971 = vadd.xlane.f32.xlu0 %v7970_v12  ;;  %v7957_v27 = vpop.xlane.xlu0 %7956  ;;  %v9293_v50 = vld [vmem:[%s9668_s5 + $0x20] sm:$0xff]   ;;  %v9296_v12 = vld [vmem:[%s9668_s5 + $0x50] sm:$0xff]  }
 0x96e   : > { %v7961_v5 = vmul.f32 0.015625, %v7957_v27  ;;  %v7967_v18 = vmul.f32 %v7963_v0, %v7963_v0  ;;  %v7968_v9 = vmul.f32 %v7964_v35, %v7964_v35  ;;  %v9297_v27 = vld [vmem:[%s9668_s5 + $0x10] sm:$0xff]  }
 0x970   : > { %v7965_v60 = vsub.f32 %v12123_v53, %v7961_v5  ;;  %v7973_v16 = vsel %vm994_vm1, %v7967_v18, 0.0  ;;  %v7976_v45 = vsel %vm994_vm1, %v7968_v9, 0.0  ;;  %v9298_v5 = vld [vmem:[%s9668_s5 + $0x48] sm:$0xff]   ;;  %v9300_v9 = vld [vmem:[%s9668_s5 + $0x40] sm:$0xff]  }
 0x971   : > { %7974 = vadd.xlane.f32.xlu1 %v7973_v16  ;;  %7977 = vadd.xlane.f32.xlu0 %v7976_v45  ;;  %v9299_v18 = vld [vmem:[%s9668_s5 + $0x8] sm:$0xff]   ;;  %v960_v16 = vld [vmem:[%s9662_s28] sm:$0x3] }
 0x972   : > { %v7969_v33 = vmul.f32 %v7965_v60, %v7965_v60  ;;  %v12362_v45 = vld [vmem:[#allocation6_spill] sm:$0xff] }
 0x973   : > { %v12364_v59 = vsub.s32 1, %v12362_v45 }
 0x974   : > { %v7979_v63 = vsel %vm994_vm1, %v7969_v33, 0.0  ;;  %v12363_v33 = vsub.s32 0, %v12362_v45 }
 0x975   : > { %7980 = vadd.xlane.f32.xlu1 %v7979_v63  ;;  %v8028_v7 = vrot.slane %v960_v16, %v12364_v59 }
 0x976   : > { %v8024_v63 = vrot.slane %v960_v16, %v12363_v33 }
 0x9f6   : > { %v7972_v51 = vpop.xlane.xlu0 %7971 }
 0x9f7   : > { %v7982_v10 = vmul.f32 0.015625, %v7972_v51 }
 0x9f9   : > { %v7986_v44 = vadd.f32 1e-05, %v7982_v10 }
 0x9fa   : > { %v7975_v6 = vpop.xlane.xlu1 %7974  ;;  %v7978_v62 = vpop.xlane.xlu0 %7977 }
 0x9fb   : > { %9438 = vrsqrt.f32 %v7986_v44  ;;  %v7983_v42 = vmul.f32 0.015625, %v7975_v6  ;;  %v7984_v19 = vmul.f32 0.015625, %v7978_v62 }
 0x9fd   : > { %v7987_v49 = vadd.f32 1e-05, %v7983_v42  ;;  %v7988_v11 = vadd.f32 1e-05, %v7984_v19 }
 0x9fe   : > { %v7981_v54 = vpop.xlane.xlu1 %7980 }
 0x9ff   : > { %9440 = vrsqrt.f32 %v7987_v49  ;;  %v7985_v14 = vmul.f32 0.015625, %v7981_v54 }
 0xa00   : > { %9442 = vrsqrt.f32 %v7988_v11 }
 0xa01   : > { %v7989_v56 = vadd.f32 1e-05, %v7985_v14 }
 0xa03   : > { %9444 = vrsqrt.f32 %v7989_v56 }
 0xa08   : > { %v9439_v1 = vpop.eup %9438 }
 0xa09   : > { %v7994_v24 = vmul.f32 %v9439_v1, %v7962_v32  ;;  %v9287_v32 = vld [vmem:[%s9668_s5 + $0x38] sm:$0xff]  }
 0xa0a   : > { %8876 = vmatpush3.bf16.msra.mxu1 %v9287_v32 }
 0xa0b   : > { %v8004_v43 = vmul.f32 %v8768_v57, %v7994_v24  ;;  %8877 = vmatprep.subr.bf16.mxu1 %v9288_v30 }
 0xa0c   : > { %v9441_v26 = vpop.eup %9440 }
 0xa0d   : > { %v7995_v28 = vmul.f32 %v9441_v26, %v7963_v0  ;;  %v9443_v20 = vpop.eup %9442  ;;  %v8014_v8 = vadd.f32 %v8769_v39, %v8004_v43  ;;  %v9294_v0 = vld [vmem:[%s9668_s5 + $0x58] sm:$0xff]  }
 0xa0e   : > { %v7996_v15 = vmul.f32 %v9443_v20, %v7964_v35  ;;  %8878 = vmatpush3.bf16.msra.mxu1 %v9289_v40  ;;  %v9295_v35 = vld [vmem:[%s9668_s5 + $0x18] sm:$0xff]  }
 0xa0f   : > { %v8005_v22 = vmul.f32 %v8768_v57, %v7995_v28  ;;  %8879 = vmatprep.subr.bf16.mxu1 %v9290_v34 }
 0xa10   : > { %v9445_v48 = vpop.eup %9444  ;;  %v8006_v41 = vmul.f32 %v8768_v57, %v7996_v15 }
 0xa11   : > { %v8015_v25 = vadd.f32 %v8769_v39, %v8005_v22  ;;  %v7997_v13 = vmul.f32 %v9445_v48, %v7965_v60  ;;  %v9301_v60 = vld [vmem:[%s9668_s5] sm:$0xff]  }
 0xa12   : > { %v8016_v55 = vadd.f32 %v8769_v39, %v8006_v41 }
 0xa13   : > { %v8018_v3 = vpack.c.bf16 %v8015_v25, %v8014_v8  ;;  %v8007_v17 = vmul.f32 %v8768_v57, %v7997_v13 }
 0xa15   : > { %8778 = vmatmul.mubr.msk.bf16.vlgmr.msra.gmra.mxu0 %vm994_vm1, %v8018_v3  ;;  %v8017_v36 = vadd.f32 %v8769_v39, %v8007_v17 }
 0xa16   : > { %8119 = vmatprep.mubr.bf16.mxu0 %v12358_v2  ;;  %v9291_v2 = vld [vmem:[%s9668_s5 + $0x28] sm:$0xff]   ;;  %s12365_s5 = scalar_lea.vmem %s12272_s15, %s9614_s25 }
 0xa17   : > { %v8019_v47 = vpack.c.bf16 %v8017_v36, %v8016_v55  ;;  %8880 = vmatpush3.bf16.msra.mxu1 %v9291_v2 }
 0xa18   : > { %8881 = vmatprep.subr.bf16.mxu1 %v9292_v38 }
 0xa1b   : > { %8882 = vmatpush3.bf16.msra.mxu1 %v9293_v50 }
 0xa1c   : > { %8883 = vmatprep.subr.bf16.mxu1 %v9294_v0 }
 0xa1d   : > { %8779 = vmatmul.mubr.msk.bf16.gmra.mxu0 %vm994_vm1, %v8019_v47 }
 0xa1f   : > { %8884 = vmatpush3.bf16.msra.mxu1 %v9295_v35 }
 0xa20   : > { %8885 = vmatprep.subr.bf16.mxu1 %v9296_v12 }
 0xa23   : > { %8886 = vmatpush3.bf16.msra.mxu1 %v9297_v27 }
 0xa24   : > { %8887 = vmatprep.subr.bf16.mxu1 %v9298_v5 }
 0xa27   : > { %8888 = vmatpush3.bf16.msra.mxu1 %v9299_v18 }
 0xa28   : > { %8889 = vmatprep.subr.bf16.mxu1 %v9300_v9 }
 0xa2b   : > { %8890 = vmatpush3.bf16.msra.mxu1 %v9301_v60 }
 0xad5   : > { %v8111_v52 = vpop.f32.mrf.mxu0 }
 0xad6   : > { %v12181_v46 = vadd.f32 %v8111_v52, %v8024_v63 }
 0xad7   : > { %v8113_v61 = vpop.f32.mrf.mxu0 }
 0xad8   : > { %v8130_v4 = vmul.f32 %v12181_v46, %v12181_v46  ;;  %v12185_v58 = vadd.f32 %v8113_v61, %v8028_v7 }
 0xad9   : > { %v8115_v37 = vpop.f32.mrf.mxu0 }
 0xada   : > { %v8138_v51 = vmul.f32 %v8130_v4, %v12181_v46  ;;  %v8131_v10 = vmul.f32 %v12185_v58, %v12185_v58  ;;  %v12190_v44 = vadd.f32 %v8115_v37, %v8024_v63 }
 0xadb   : > { %v8117_v6 = vpop.f32.mrf.mxu0 }
 0xadc   : > { %v8146_v62 = vmul.f32 0.044715, %v8138_v51  ;;  %v8139_v42 = vmul.f32 %v8131_v10, %v12185_v58  ;;  %v8132_v19 = vmul.f32 %v12190_v44, %v12190_v44  ;;  %v12195_v49 = vadd.f32 %v8117_v6, %v8028_v7 }
 0xadd   : > { %v8121_v11 = vpop.f32.mrf.mxu0 }
 0xade   : > { %v8154_v54 = vadd.f32 %v8146_v62, %v12181_v46  ;;  %v8147_v14 = vmul.f32 0.044715, %v8139_v42  ;;  %v8140_v56 = vmul.f32 %v8132_v19, %v12190_v44  ;;  %v8133_v1 = vmul.f32 %v12195_v49, %v12195_v49 }
 0xadf   : > { %v12201_v24 = vadd.f32 %v8121_v11, %v8024_v63  ;;  %v8123_v57 = vpop.f32.mrf.mxu0 }
 0xae0   : > { %v8162_v26 = vmul.f32 0.7978846, %v8154_v54  ;;  %v8155_v28 = vadd.f32 %v8147_v14, %v12185_v58  ;;  %v8148_v43 = vmul.f32 0.044715, %v8140_v56  ;;  %v8141_v20 = vmul.f32 %v8133_v1, %v12195_v49 }
 0xae1   : > { %v8134_v39 = vmul.f32 %v12201_v24, %v12201_v24  ;;  %v12207_v22 = vadd.f32 %v8123_v57, %v8028_v7  ;;  %v8125_v48 = vpop.f32.mrf.mxu0 }
 0xae2   : > { %v8163_v8 = vmul.f32 0.7978846, %v8155_v28  ;;  %v8156_v25 = vadd.f32 %v8148_v43, %v12190_v44  ;;  %v8149_v15 = vmul.f32 0.044715, %v8141_v20  ;;  %9446 = vtanh.f32 %v8162_v26 }
 0xae3   : > { %v8142_v13 = vmul.f32 %v8134_v39, %v12201_v24  ;;  %v8135_v3 = vmul.f32 %v12207_v22, %v12207_v22  ;;  %v8126_v17 = vadd.f32 %v8125_v48, %v8024_v63  ;;  %v8127_v41 = vpop.f32.mrf.mxu0 }
 0xae4   : > { %9448 = vtanh.f32 %v8163_v8  ;;  %v8164_v36 = vmul.f32 0.7978846, %v8156_v25  ;;  %v8157_v55 = vadd.f32 %v8149_v15, %v12195_v49  ;;  %v8128_v47 = vadd.f32 %v8127_v41, %v8028_v7 }
 0xae5   : > { %v8150_v29 = vmul.f32 0.044715, %v8142_v13  ;;  %v8143_v32 = vmul.f32 %v8135_v3, %v12207_v22  ;;  %v8136_v30 = vmul.f32 %v8126_v17, %v8126_v17 }
 0xae6   : > { %9450 = vtanh.f32 %v8164_v36  ;;  %v8165_v40 = vmul.f32 0.7978846, %v8157_v55  ;;  %v8137_v34 = vmul.f32 %v8128_v47, %v8128_v47  ;;  %v8780_v55 = vld [vmem:[%s12365_s5] ss:$0 sm:$0xff] }
 0xae7   : > { %v8158_v2 = vadd.f32 %v8150_v29, %v12201_v24  ;;  %v8151_v38 = vmul.f32 0.044715, %v8143_v32  ;;  %v8144_v50 = vmul.f32 %v8136_v30, %v8126_v17 }
 0xae8   : > { %9452 = vtanh.f32 %v8165_v40  ;;  %v8145_v0 = vmul.f32 %v8137_v34, %v8128_v47 }
 0xae9   : > { %v8166_v35 = vmul.f32 0.7978846, %v8158_v2  ;;  %v8159_v12 = vadd.f32 %v8151_v38, %v12207_v22  ;;  %v8152_v27 = vmul.f32 0.044715, %v8144_v50 }
 0xaea   : > { %v8153_v5 = vmul.f32 0.044715, %v8145_v0 }
 0xaeb   : > { %9454 = vtanh.f32 %v8166_v35  ;;  %v8167_v18 = vmul.f32 0.7978846, %v8159_v12  ;;  %v8160_v9 = vadd.f32 %v8152_v27, %v8126_v17 }
 0xaec   : > { %v8161_v60 = vadd.f32 %v8153_v5, %v8128_v47 }
 0xaed   : > { %9456 = vtanh.f32 %v8167_v18  ;;  %v8168_v16 = vmul.f32 0.7978846, %v8160_v9 }
 0xaee   : > { %v8169_v45 = vmul.f32 0.7978846, %v8161_v60 }
 0xaef   : > { %9458 = vtanh.f32 %v8168_v16  ;;  %v9447_v33 = vpop.eup %9446 }
 0xaf0   : > { %9460 = vtanh.f32 %v8169_v45  ;;  %v8178_v52 = vadd.f32 1.0, %v9447_v33 }
 0xaf1   : > { %v9449_v63 = vpop.eup %9448 }
 0xaf2   : > { %v8179_v59 = vadd.f32 1.0, %v9449_v63  ;;  %v8186_v6 = vmul.f32 0.5, %v8178_v52 }
 0xaf3   : > { %v9451_v7 = vpop.eup %9450 }
 0xaf4   : > { %v8180_v61 = vadd.f32 1.0, %v9451_v7  ;;  %v8187_v10 = vmul.f32 0.5, %v8179_v59  ;;  %v8194_v56 = vmul.f32 %v8186_v6, %v12181_v46 }
 0xaf5   : > { %v9453_v4 = vpop.eup %9452 }
 0xaf6   : > { %v8188_v37 = vmul.f32 0.5, %v8180_v61  ;;  %v8181_v51 = vadd.f32 1.0, %v9453_v4  ;;  %v8195_v54 = vmul.f32 %v8187_v10, %v12185_v58 }
 0xaf8   : > { %v9455_v62 = vpop.eup %9454  ;;  %v8189_v42 = vmul.f32 0.5, %v8181_v51  ;;  %v8196_v19 = vmul.f32 %v8188_v37, %v12190_v44 }
 0xaf9   : > { %v8182_v57 = vadd.f32 1.0, %v9455_v62 }
 0xafa   : > { %v9457_v11 = vpop.eup %9456  ;;  %v8197_v14 = vmul.f32 %v8189_v42, %v12195_v49  ;;  %v8202_v20 = vpack.c.bf16 %v8196_v19, %v8194_v56 }
 0xafb   : > { %v8183_v1 = vadd.f32 1.0, %v9457_v11  ;;  %v8190_v44 = vmul.f32 0.5, %v8182_v57 }
 0xafc   : > { %v9459_v26 = vpop.eup %9458  ;;  %v8203_v28 = vpack.c.bf16 %v8197_v14, %v8195_v54 }
 0xafd   : > { %v9461_v43 = vpop.eup %9460  ;;  %v8184_v39 = vadd.f32 1.0, %v9459_v26  ;;  %v8191_v8 = vmul.f32 0.5, %v8183_v1  ;;  %v8198_v46 = vmul.f32 %v8190_v44, %v12201_v24 }
 0xafe   : > { %8340 = vmatprep.mubr.bf16.mxu1 %v8203_v28  ;;  %v8185_v48 = vadd.f32 1.0, %v9461_v43 }
 0xaff   : > { %8341 = vmatmul.mubr.bf16.vlgmr.msra.gmra.mxu1 %v8202_v20  ;;  %v8192_v25 = vmul.f32 0.5, %v8184_v39  ;;  %v8199_v49 = vmul.f32 %v8191_v8, %v12207_v22 }
 0xb00   : > { %v8193_v15 = vmul.f32 0.5, %v8185_v48 }
 0xb01   : > { %v8200_v58 = vmul.f32 %v8192_v25, %v8126_v17 }
 0xb02   : > { %v8201_v13 = vmul.f32 %v8193_v15, %v8128_v47 }
 0xb03   : > { %v8204_v41 = vpack.c.bf16 %v8200_v58, %v8198_v46 }
 0xb04   : > { %v8205_v3 = vpack.c.bf16 %v8201_v13, %v8199_v49 }
 0xb06   : > { %8348 = vmatprep.mubr.bf16.mxu1 %v8205_v3 }
 0xb07   : > { %8349 = vmatmul.mubr.bf16.gmra.mxu1 %v8204_v41 }
 0xbbf   : > { %v8891_v36 = vpop.f32.mrf.mxu1 }
 0xbc1   : > { %v8892_v29 = vpop.f32.mrf.mxu1 }
 0xbc2   : > { %v8893_v32 = vadd.f32 %v8892_v29, %v8891_v36 }
 0xbc3   : > { %v8894_v30 = vpop.f32.mrf.mxu1 }
 0xbc4   : > { %v8343_v40 = vadd.f32 %v8893_v32, %v8780_v55 }
 0xbc5   : > { %v8895_v17 = vpop.f32.mrf.mxu1 }
 0xbc6   : > { %v8357_v22 = vadd.f32 %v8343_v40, %v12106_v21  ;;  %v8896_v47 = vadd.f32 %v8895_v17, %v8894_v30 }
 0xbc7   : > { %v8897_v34 = vpop.f32.mrf.mxu1 }
 0xbc8   : > { %8361 = vst.msk [vmem:[%s12316_s7] sm:$0xff] %vm994_vm1, %v8357_v22  ;;  %v8346_v24 = vadd.f32 %v8896_v47, %v8780_v55 }
 0xbc9   : > { %v8898_v2 = vpop.f32.mrf.mxu1 }
 0xbca   : > { %v8358_v38 = vadd.f32 %v8346_v24, %v12118_v23  ;;  %v8899_v50 = vadd.f32 %v8898_v2, %v8897_v34 }
 0xbcb   : > { %v8900_v0 = vpop.f32.mrf.mxu1 }
 0xbcc   : > { %8362 = vst.msk [vmem:[%s12316_s7 + $0x8] sm:$0xff] %vm994_vm1, %v8358_v38  ;;  %v8351_v35 = vadd.f32 %v8899_v50, %v8780_v55 }
 0xbcd   : > { %v8901_v21 = vpop.f32.mrf.mxu1 }
 0xbce   : > { %v8359_v12 = vadd.f32 %v8351_v35, %v12111_v31  ;;  %v8902_v27 = vadd.f32 %v8901_v21, %v8900_v0 }
 0xbd0   : > { %8363 = vst.msk [vmem:[%s12316_s7 + $0x10] sm:$0xff] %vm994_vm1, %v8359_v12  ;;  %v8354_v5 = vadd.f32 %v8902_v27, %v8780_v55 }
 0xbd2   : > { %v8360_v23 = vadd.f32 %v8354_v5, %v12123_v53 }
 0xbd4   : > { %8364 = vst.msk [vmem:[%s12316_s7 + $0x18] sm:$0xff] %vm994_vm1, %v8360_v23 }
 0xbd5 PF: > { %s12366_s20 = sld [smem:[#allocation3_spill]] }
 0xbd6   : > { %s12367_s21 = sld [smem:[#allocation2_spill]] }
 0xbd7   : > { %s12368_s22 = sld [smem:[#allocation4_spill]] }
 0xbdb   : > { %s26_s23 = sadd.s32 1, %s12366_s20  }
 0xbdc   : > { %p23_p6 = scmp.ge.s32.totalorder %s26_s23, 14  }
 0xbde   :  { %25 = sbr.rel (!%p23_p6) target bundleno = 8 (0x8), region = 154 }

</bundles_post_ra>
